<compile_context>
chip_gen: v5e
topology: v5e:2x2
jax: 0.10.0
libtpu: 0.0.40
codegen_flags: <defaults>
</compile_context>

<pallas_src>
from functools import partial

import jax
import jax.numpy as jnp
import numpy as np
from jax import lax
from jax.experimental import pallas as pl
from jax.experimental.pallas import tpu as pltpu

LANES = 128


def _round_up(x, m):
    return (x + m - 1) // m * m


def _convt_where_kernel(xh_ref, w_ref, o_ref, *, T):
    # xh_ref: (WPP*T, RED) bf16 — height-im2col'd activations, (width, row) flattened
    # w_ref : (K, RED, CP) bf16 — flipped/packed weight, reduction index = kh*CIN + ci
    # o_ref : (OW*T, CP)   f32  — one output row tile, (width, row) flattened
    K, RED, CP = w_ref.shape
    M = o_ref.shape[0]                               # = OW * T
    acc = jnp.zeros((M, CP), jnp.float32)            # register-resident accumulator
    for kw in range(K):                              # fully unrolled: 13 MXU matmuls
        a = xh_ref[kw * T:kw * T + M, :]             # static, 8-sublane-aligned window
        acc = acc + jnp.dot(a, w_ref[kw], preferred_element_type=jnp.float32)
    # z4 = where(z1 > 0, z1, 399 * z1), fused before the single lane-dense store.
    o_ref[...] = jnp.where(acc > 0.0, acc, acc * 399.0).astype(o_ref.dtype)


def make_conv_transpose_where(w_pt, T=8):
    """w_pt: (CIN, COUT, K, K) torch ConvTranspose2d weight.  Returns fwd(x_nchw)."""
    CIN, COUT, K, K2 = w_pt.shape
    assert K2 == K
    RED = _round_up(K * CIN, LANES)                  # packed reduction dim (455 -> 512)
    CP = _round_up(COUT, LANES)                      # lane-dense output channels

    # ---- one-time weight packing ("module init", hoisted out of the hot path) ----
    # out[n,co,oh,ow] = sum_{kh,kw,ci} xp[n, oh+kh, ow+kw, ci] * w_pt[ci,co,K-1-kh,K-1-kw]
    wf = jnp.flip(w_pt, axis=(2, 3))                 # wf[ci,co,kh,kw] = w_pt[ci,co,K-1-kh,K-1-kw]
    w2 = jnp.transpose(wf, (3, 2, 0, 1))             # (kw, kh, ci, co)
    w2 = w2.reshape(K, K * CIN, COUT)                # reduction index = kh*CIN + ci
    w2 = jnp.pad(w2, ((0, 0), (0, RED - K * CIN), (0, CP - COUT)))
    w2 = jax.device_put(w2.astype(jnp.bfloat16))     # (K, RED, CP), ~1.7 MiB bf16

    @jax.jit
    def fwd(x_nchw):
        N, CIN2, H, W = x_nchw.shape
        assert CIN2 == CIN
        OH, OW = H + K - 1, W + K - 1
        OHP = _round_up(OH, T)                       # pad output rows to a tile multiple
        ntiles = OHP // T
        WPP = W + 2 * (K - 1)                        # = OW + K - 1 padded input width

        # ---- activation layout glue (XLA side): height-im2col + (w,row) flatten ----
        xw = jnp.transpose(x_nchw, (0, 3, 2, 1))     # (N, W, H, CIN), width-major
        xw = jnp.pad(xw, ((0, 0),
                          (K - 1, K - 1),
                          (K - 1, K - 1 + OHP - OH),
                          (0, 0)))                   # (N, WPP, OHP + K - 1, CIN)
        xh = jnp.concatenate([xw[:, :, kh:kh + OHP, :] for kh in range(K)],
                             axis=-1)                # (N, WPP, OHP, K*CIN)
        xh = xh.reshape(N, WPP, ntiles, T, K * CIN)
        xh = jnp.transpose(xh, (0, 2, 1, 3, 4))      # (N, ntiles, WPP, T, K*CIN)
        xh = xh.reshape(N, ntiles, WPP * T, K * CIN)
        xh = jnp.pad(xh, ((0, 0), (0, 0), (0, 0), (0, RED - K * CIN)))
        xh = xh.astype(jnp.bfloat16)

        flops = 2.0 * N * OH * OW * CIN * COUT * K * K          # real work (~unpadded)
        bytes_accessed = xh.size * 2 + w2.size * 2 + N * ntiles * OW * T * CP * 4

        out = pl.pallas_call(
            partial(_convt_where_kernel, T=T),
            out_shape=jax.ShapeDtypeStruct((N, ntiles, OW * T, CP), jnp.float32),
            grid_spec=pltpu.PrefetchScalarGridSpec(
                num_scalar_prefetch=0,
                grid=(N, ntiles),
                in_specs=[
                    pl.BlockSpec((None, None, WPP * T, RED),
                                 lambda n, t: (n, t, 0, 0)),
                    pl.BlockSpec((K, RED, CP), lambda n, t: (0, 0, 0)),
                ],
                out_specs=pl.BlockSpec((None, None, OW * T, CP),
                                       lambda n, t: (n, t, 0, 0)),
            ),
            compiler_params=pltpu.CompilerParams(
                dimension_semantics=("parallel", "parallel")),
            cost_estimate=pl.CostEstimate(
                flops=int(flops), transcendentals=0,
                bytes_accessed=int(bytes_accessed)),
        )(xh, w2)

        # un-flatten (width, row), drop channel / row padding, back to NCHW
        out = out.reshape(N, ntiles, OW, T, CP)[:, :, :, :, :COUT]
        out = jnp.transpose(out, (0, 4, 1, 3, 2))    # (N, COUT, ntiles, T, OW)
        out = out.reshape(N, COUT, OHP, OW)[:, :, :OH, :]
        return out.astype(x_nchw.dtype)

    return fwd


if __name__ == "__main__":
    key = jax.random.PRNGKey(0)
    kx, kw_ = jax.random.split(key)

    # Small shapes consistent with the module: channels fixed at 35 by the module,
    # kernel 13; batch / spatial kept small.
    N, CIN, COUT, K, H, W = 2, 35, 35, 13, 16, 16
    x = jax.random.normal(kx, (N, CIN, H, W), dtype=jnp.float32)
    bound = 1.0 / (CIN * K * K) ** 0.5
    w_pt = jax.random.uniform(kw_, (CIN, COUT, K, K), jnp.float32, -bound, bound)

    fwd = make_conv_transpose_where(w_pt)
    out = jax.block_until_ready(fwd(x))
    assert out.shape == (N, COUT, H + K - 1, W + K - 1), out.shape

    # Independent reference: scatter-form definition of the transposed conv.
    # The kernel feeds the MXU bf16 operands with f32 accumulation, so round the
    # reference operands identically; accumulation itself stays f32.
    x_r = x.astype(jnp.bfloat16).astype(jnp.float32)
    w_r = w_pt.astype(jnp.bfloat16).astype(jnp.float32)
    ref = jnp.zeros((N, COUT, H + K - 1, W + K - 1), jnp.float32)
    for kh in range(K):
        for kw in range(K):
            contrib = jnp.einsum("ncij,cd->ndij", x_r, w_r[:, :, kh, kw],
                                 precision=lax.Precision.HIGHEST)
            ref = ref.at[:, :, kh:kh + H, kw:kw + W].add(contrib)
    ref = jnp.where(ref > 0, ref, ref * 399.0)

    np.testing.assert_allclose(np.asarray(out), np.asarray(ref), rtol=2e-2, atol=1e-1)
    print("KERNEL_OK")
</pallas_src>

<mosaic_0001>
module attributes {stable_mosaic.version = 11 : i64} {
  func.func @_convt_where_kernel(%arg0: i32, %arg1: i32, %arg2: memref<1x1x320x512xbf16, #tpu.memory_space<vmem>>, %arg3: memref<13x512x128xbf16, #tpu.memory_space<vmem>>, %arg4: memref<1x1x224x128xf32, #tpu.memory_space<vmem>>) attributes {dimension_semantics = [#tpu.dimension_semantics<parallel>, #tpu.dimension_semantics<parallel>], iteration_bounds = array<i64: 2, 4>, scalar_prefetch = 0 : i64, scratch_operands = 0 : i64, tpu.core_type = #tpu.core_type<tc>, window_params = [{transform_indices = @transform_0, window_bounds = array<i64: 1, 1, 320, 512>}, {pipeline_mode = #tpu.pipeline_mode<synchronous>, transform_indices = @transform_1, window_bounds = array<i64: 13, 512, 128>}, {transform_indices = @transform_2, window_bounds = array<i64: 1, 1, 224, 128>}]} {
    %cst = arith.constant 0.000000e+00 : f32
    %0 = vector.broadcast %cst : f32 to vector<224x128xf32>
    %c0 = arith.constant 0 : index
    %c0_0 = arith.constant 0 : index
    %c0_1 = arith.constant 0 : index
    %c0_2 = arith.constant 0 : index
    %1 = vector.load %arg2[%c0, %c0_0, %c0_1, %c0_2] : memref<1x1x320x512xbf16, #tpu.memory_space<vmem>>, vector<1x1x224x512xbf16>
    %2 = vector.shape_cast %1 : vector<1x1x224x512xbf16> to vector<224x512xbf16>
    %c0_3 = arith.constant 0 : index
    %c0_4 = arith.constant 0 : index
    %c0_5 = arith.constant 0 : index
    %3 = vector.load %arg3[%c0_3, %c0_4, %c0_5] : memref<13x512x128xbf16, #tpu.memory_space<vmem>>, vector<1x512x128xbf16>
    %4 = vector.shape_cast %3 : vector<1x512x128xbf16> to vector<512x128xbf16>
    %cst_6 = arith.constant dense<0.000000e+00> : vector<224x128xf32>
    %5 = tpu.matmul %2, %4, %cst_6 {dimension_numbers = #tpu.dot_dimension_numbers<[1], [0], [0], [1], [0, 0, 1, 1], [], []>} : vector<224x512xbf16>, vector<512x128xbf16>, vector<224x128xf32> -> vector<224x128xf32>
    %6 = arith.addf %0, %5 : vector<224x128xf32>
    %c0_7 = arith.constant 0 : index
    %c0_8 = arith.constant 0 : index
    %c8 = arith.constant 8 : index
    %c0_9 = arith.constant 0 : index
    %7 = vector.load %arg2[%c0_7, %c0_8, %c8, %c0_9] : memref<1x1x320x512xbf16, #tpu.memory_space<vmem>>, vector<1x1x224x512xbf16>
    %8 = vector.shape_cast %7 : vector<1x1x224x512xbf16> to vector<224x512xbf16>
    %c1 = arith.constant 1 : index
    %c0_10 = arith.constant 0 : index
    %c0_11 = arith.constant 0 : index
    %9 = vector.load %arg3[%c1, %c0_10, %c0_11] : memref<13x512x128xbf16, #tpu.memory_space<vmem>>, vector<1x512x128xbf16>
    %10 = vector.shape_cast %9 : vector<1x512x128xbf16> to vector<512x128xbf16>
    %cst_12 = arith.constant dense<0.000000e+00> : vector<224x128xf32>
    %11 = tpu.matmul %8, %10, %cst_12 {dimension_numbers = #tpu.dot_dimension_numbers<[1], [0], [0], [1], [0, 0, 1, 1], [], []>} : vector<224x512xbf16>, vector<512x128xbf16>, vector<224x128xf32> -> vector<224x128xf32>
    %12 = arith.addf %6, %11 : vector<224x128xf32>
    %c0_13 = arith.constant 0 : index
    %c0_14 = arith.constant 0 : index
    %c16 = arith.constant 16 : index
    %c0_15 = arith.constant 0 : index
    %13 = vector.load %arg2[%c0_13, %c0_14, %c16, %c0_15] : memref<1x1x320x512xbf16, #tpu.memory_space<vmem>>, vector<1x1x224x512xbf16>
    %14 = vector.shape_cast %13 : vector<1x1x224x512xbf16> to vector<224x512xbf16>
    %c2 = arith.constant 2 : index
    %c0_16 = arith.constant 0 : index
    %c0_17 = arith.constant 0 : index
    %15 = vector.load %arg3[%c2, %c0_16, %c0_17] : memref<13x512x128xbf16, #tpu.memory_space<vmem>>, vector<1x512x128xbf16>
    %16 = vector.shape_cast %15 : vector<1x512x128xbf16> to vector<512x128xbf16>
    %cst_18 = arith.constant dense<0.000000e+00> : vector<224x128xf32>
    %17 = tpu.matmul %14, %16, %cst_18 {dimension_numbers = #tpu.dot_dimension_numbers<[1], [0], [0], [1], [0, 0, 1, 1], [], []>} : vector<224x512xbf16>, vector<512x128xbf16>, vector<224x128xf32> -> vector<224x128xf32>
    %18 = arith.addf %12, %17 : vector<224x128xf32>
    %c0_19 = arith.constant 0 : index
    %c0_20 = arith.constant 0 : index
    %c24 = arith.constant 24 : index
    %c0_21 = arith.constant 0 : index
    %19 = vector.load %arg2[%c0_19, %c0_20, %c24, %c0_21] : memref<1x1x320x512xbf16, #tpu.memory_space<vmem>>, vector<1x1x224x512xbf16>
    %20 = vector.shape_cast %19 : vector<1x1x224x512xbf16> to vector<224x512xbf16>
    %c3 = arith.constant 3 : index
    %c0_22 = arith.constant 0 : index
    %c0_23 = arith.constant 0 : index
    %21 = vector.load %arg3[%c3, %c0_22, %c0_23] : memref<13x512x128xbf16, #tpu.memory_space<vmem>>, vector<1x512x128xbf16>
    %22 = vector.shape_cast %21 : vector<1x512x128xbf16> to vector<512x128xbf16>
    %cst_24 = arith.constant dense<0.000000e+00> : vector<224x128xf32>
    %23 = tpu.matmul %20, %22, %cst_24 {dimension_numbers = #tpu.dot_dimension_numbers<[1], [0], [0], [1], [0, 0, 1, 1], [], []>} : vector<224x512xbf16>, vector<512x128xbf16>, vector<224x128xf32> -> vector<224x128xf32>
    %24 = arith.addf %18, %23 : vector<224x128xf32>
    %c0_25 = arith.constant 0 : index
    %c0_26 = arith.constant 0 : index
    %c32 = arith.constant 32 : index
    %c0_27 = arith.constant 0 : index
    %25 = vector.load %arg2[%c0_25, %c0_26, %c32, %c0_27] : memref<1x1x320x512xbf16, #tpu.memory_space<vmem>>, vector<1x1x224x512xbf16>
    %26 = vector.shape_cast %25 : vector<1x1x224x512xbf16> to vector<224x512xbf16>
    %c4 = arith.constant 4 : index
    %c0_28 = arith.constant 0 : index
    %c0_29 = arith.constant 0 : index
    %27 = vector.load %arg3[%c4, %c0_28, %c0_29] : memref<13x512x128xbf16, #tpu.memory_space<vmem>>, vector<1x512x128xbf16>
    %28 = vector.shape_cast %27 : vector<1x512x128xbf16> to vector<512x128xbf16>
    %cst_30 = arith.constant dense<0.000000e+00> : vector<224x128xf32>
    %29 = tpu.matmul %26, %28, %cst_30 {dimension_numbers = #tpu.dot_dimension_numbers<[1], [0], [0], [1], [0, 0, 1, 1], [], []>} : vector<224x512xbf16>, vector<512x128xbf16>, vector<224x128xf32> -> vector<224x128xf32>
    %30 = arith.addf %24, %29 : vector<224x128xf32>
    %c0_31 = arith.constant 0 : index
    %c0_32 = arith.constant 0 : index
    %c40 = arith.constant 40 : index
    %c0_33 = arith.constant 0 : index
    %31 = vector.load %arg2[%c0_31, %c0_32, %c40, %c0_33] : memref<1x1x320x512xbf16, #tpu.memory_space<vmem>>, vector<1x1x224x512xbf16>
    %32 = vector.shape_cast %31 : vector<1x1x224x512xbf16> to vector<224x512xbf16>
    %c5 = arith.constant 5 : index
    %c0_34 = arith.constant 0 : index
    %c0_35 = arith.constant 0 : index
    %33 = vector.load %arg3[%c5, %c0_34, %c0_35] : memref<13x512x128xbf16, #tpu.memory_space<vmem>>, vector<1x512x128xbf16>
    %34 = vector.shape_cast %33 : vector<1x512x128xbf16> to vector<512x128xbf16>
    %cst_36 = arith.constant dense<0.000000e+00> : vector<224x128xf32>
    %35 = tpu.matmul %32, %34, %cst_36 {dimension_numbers = #tpu.dot_dimension_numbers<[1], [0], [0], [1], [0, 0, 1, 1], [], []>} : vector<224x512xbf16>, vector<512x128xbf16>, vector<224x128xf32> -> vector<224x128xf32>
    %36 = arith.addf %30, %35 : vector<224x128xf32>
    %c0_37 = arith.constant 0 : index
    %c0_38 = arith.constant 0 : index
    %c48 = arith.constant 48 : index
    %c0_39 = arith.constant 0 : index
    %37 = vector.load %arg2[%c0_37, %c0_38, %c48, %c0_39] : memref<1x1x320x512xbf16, #tpu.memory_space<vmem>>, vector<1x1x224x512xbf16>
    %38 = vector.shape_cast %37 : vector<1x1x224x512xbf16> to vector<224x512xbf16>
    %c6 = arith.constant 6 : index
    %c0_40 = arith.constant 0 : index
    %c0_41 = arith.constant 0 : index
    %39 = vector.load %arg3[%c6, %c0_40, %c0_41] : memref<13x512x128xbf16, #tpu.memory_space<vmem>>, vector<1x512x128xbf16>
    %40 = vector.shape_cast %39 : vector<1x512x128xbf16> to vector<512x128xbf16>
    %cst_42 = arith.constant dense<0.000000e+00> : vector<224x128xf32>
    %41 = tpu.matmul %38, %40, %cst_42 {dimension_numbers = #tpu.dot_dimension_numbers<[1], [0], [0], [1], [0, 0, 1, 1], [], []>} : vector<224x512xbf16>, vector<512x128xbf16>, vector<224x128xf32> -> vector<224x128xf32>
    %42 = arith.addf %36, %41 : vector<224x128xf32>
    %c0_43 = arith.constant 0 : index
    %c0_44 = arith.constant 0 : index
    %c56 = arith.constant 56 : index
    %c0_45 = arith.constant 0 : index
    %43 = vector.load %arg2[%c0_43, %c0_44, %c56, %c0_45] : memref<1x1x320x512xbf16, #tpu.memory_space<vmem>>, vector<1x1x224x512xbf16>
    %44 = vector.shape_cast %43 : vector<1x1x224x512xbf16> to vector<224x512xbf16>
    %c7 = arith.constant 7 : index
    %c0_46 = arith.constant 0 : index
    %c0_47 = arith.constant 0 : index
    %45 = vector.load %arg3[%c7, %c0_46, %c0_47] : memref<13x512x128xbf16, #tpu.memory_space<vmem>>, vector<1x512x128xbf16>
    %46 = vector.shape_cast %45 : vector<1x512x128xbf16> to vector<512x128xbf16>
    %cst_48 = arith.constant dense<0.000000e+00> : vector<224x128xf32>
    %47 = tpu.matmul %44, %46, %cst_48 {dimension_numbers = #tpu.dot_dimension_numbers<[1], [0], [0], [1], [0, 0, 1, 1], [], []>} : vector<224x512xbf16>, vector<512x128xbf16>, vector<224x128xf32> -> vector<224x128xf32>
    %48 = arith.addf %42, %47 : vector<224x128xf32>
    %c0_49 = arith.constant 0 : index
    %c0_50 = arith.constant 0 : index
    %c64 = arith.constant 64 : index
    %c0_51 = arith.constant 0 : index
    %49 = vector.load %arg2[%c0_49, %c0_50, %c64, %c0_51] : memref<1x1x320x512xbf16, #tpu.memory_space<vmem>>, vector<1x1x224x512xbf16>
    %50 = vector.shape_cast %49 : vector<1x1x224x512xbf16> to vector<224x512xbf16>
    %c8_52 = arith.constant 8 : index
    %c0_53 = arith.constant 0 : index
    %c0_54 = arith.constant 0 : index
    %51 = vector.load %arg3[%c8_52, %c0_53, %c0_54] : memref<13x512x128xbf16, #tpu.memory_space<vmem>>, vector<1x512x128xbf16>
    %52 = vector.shape_cast %51 : vector<1x512x128xbf16> to vector<512x128xbf16>
    %cst_55 = arith.constant dense<0.000000e+00> : vector<224x128xf32>
    %53 = tpu.matmul %50, %52, %cst_55 {dimension_numbers = #tpu.dot_dimension_numbers<[1], [0], [0], [1], [0, 0, 1, 1], [], []>} : vector<224x512xbf16>, vector<512x128xbf16>, vector<224x128xf32> -> vector<224x128xf32>
    %54 = arith.addf %48, %53 : vector<224x128xf32>
    %c0_56 = arith.constant 0 : index
    %c0_57 = arith.constant 0 : index
    %c72 = arith.constant 72 : index
    %c0_58 = arith.constant 0 : index
    %55 = vector.load %arg2[%c0_56, %c0_57, %c72, %c0_58] : memref<1x1x320x512xbf16, #tpu.memory_space<vmem>>, vector<1x1x224x512xbf16>
    %56 = vector.shape_cast %55 : vector<1x1x224x512xbf16> to vector<224x512xbf16>
    %c9 = arith.constant 9 : index
    %c0_59 = arith.constant 0 : index
    %c0_60 = arith.constant 0 : index
    %57 = vector.load %arg3[%c9, %c0_59, %c0_60] : memref<13x512x128xbf16, #tpu.memory_space<vmem>>, vector<1x512x128xbf16>
    %58 = vector.shape_cast %57 : vector<1x512x128xbf16> to vector<512x128xbf16>
    %cst_61 = arith.constant dense<0.000000e+00> : vector<224x128xf32>
    %59 = tpu.matmul %56, %58, %cst_61 {dimension_numbers = #tpu.dot_dimension_numbers<[1], [0], [0], [1], [0, 0, 1, 1], [], []>} : vector<224x512xbf16>, vector<512x128xbf16>, vector<224x128xf32> -> vector<224x128xf32>
    %60 = arith.addf %54, %59 : vector<224x128xf32>
    %c0_62 = arith.constant 0 : index
    %c0_63 = arith.constant 0 : index
    %c80 = arith.constant 80 : index
    %c0_64 = arith.constant 0 : index
    %61 = vector.load %arg2[%c0_62, %c0_63, %c80, %c0_64] : memref<1x1x320x512xbf16, #tpu.memory_space<vmem>>, vector<1x1x224x512xbf16>
    %62 = vector.shape_cast %61 : vector<1x1x224x512xbf16> to vector<224x512xbf16>
    %c10 = arith.constant 10 : index
    %c0_65 = arith.constant 0 : index
    %c0_66 = arith.constant 0 : index
    %63 = vector.load %arg3[%c10, %c0_65, %c0_66] : memref<13x512x128xbf16, #tpu.memory_space<vmem>>, vector<1x512x128xbf16>
    %64 = vector.shape_cast %63 : vector<1x512x128xbf16> to vector<512x128xbf16>
    %cst_67 = arith.constant dense<0.000000e+00> : vector<224x128xf32>
    %65 = tpu.matmul %62, %64, %cst_67 {dimension_numbers = #tpu.dot_dimension_numbers<[1], [0], [0], [1], [0, 0, 1, 1], [], []>} : vector<224x512xbf16>, vector<512x128xbf16>, vector<224x128xf32> -> vector<224x128xf32>
    %66 = arith.addf %60, %65 : vector<224x128xf32>
    %c0_68 = arith.constant 0 : index
    %c0_69 = arith.constant 0 : index
    %c88 = arith.constant 88 : index
    %c0_70 = arith.constant 0 : index
    %67 = vector.load %arg2[%c0_68, %c0_69, %c88, %c0_70] : memref<1x1x320x512xbf16, #tpu.memory_space<vmem>>, vector<1x1x224x512xbf16>
    %68 = vector.shape_cast %67 : vector<1x1x224x512xbf16> to vector<224x512xbf16>
    %c11 = arith.constant 11 : index
    %c0_71 = arith.constant 0 : index
    %c0_72 = arith.constant 0 : index
    %69 = vector.load %arg3[%c11, %c0_71, %c0_72] : memref<13x512x128xbf16, #tpu.memory_space<vmem>>, vector<1x512x128xbf16>
    %70 = vector.shape_cast %69 : vector<1x512x128xbf16> to vector<512x128xbf16>
    %cst_73 = arith.constant dense<0.000000e+00> : vector<224x128xf32>
    %71 = tpu.matmul %68, %70, %cst_73 {dimension_numbers = #tpu.dot_dimension_numbers<[1], [0], [0], [1], [0, 0, 1, 1], [], []>} : vector<224x512xbf16>, vector<512x128xbf16>, vector<224x128xf32> -> vector<224x128xf32>
    %72 = arith.addf %66, %71 : vector<224x128xf32>
    %c0_74 = arith.constant 0 : index
    %c0_75 = arith.constant 0 : index
    %c96 = arith.constant 96 : index
    %c0_76 = arith.constant 0 : index
    %73 = vector.load %arg2[%c0_74, %c0_75, %c96, %c0_76] : memref<1x1x320x512xbf16, #tpu.memory_space<vmem>>, vector<1x1x224x512xbf16>
    %74 = vector.shape_cast %73 : vector<1x1x224x512xbf16> to vector<224x512xbf16>
    %c12 = arith.constant 12 : index
    %c0_77 = arith.constant 0 : index
    %c0_78 = arith.constant 0 : index
    %75 = vector.load %arg3[%c12, %c0_77, %c0_78] : memref<13x512x128xbf16, #tpu.memory_space<vmem>>, vector<1x512x128xbf16>
    %76 = vector.shape_cast %75 : vector<1x512x128xbf16> to vector<512x128xbf16>
    %cst_79 = arith.constant dense<0.000000e+00> : vector<224x128xf32>
    %77 = tpu.matmul %74, %76, %cst_79 {dimension_numbers = #tpu.dot_dimension_numbers<[1], [0], [0], [1], [0, 0, 1, 1], [], []>} : vector<224x512xbf16>, vector<512x128xbf16>, vector<224x128xf32> -> vector<224x128xf32>
    %78 = arith.addf %72, %77 : vector<224x128xf32>
    %cst_80 = arith.constant 0.000000e+00 : f32
    %79 = vector.broadcast %cst_80 : f32 to vector<224x128xf32>
    %80 = arith.cmpf ogt, %78, %79 : vector<224x128xf32>
    %cst_81 = arith.constant 3.990000e+02 : f32
    %81 = vector.broadcast %cst_81 : f32 to vector<224x128xf32>
    %82 = arith.mulf %78, %81 : vector<224x128xf32>
    %83 = arith.select %80, %78, %82 : vector<224x128xi1>, vector<224x128xf32>
    %c0_82 = arith.constant 0 : index
    %c0_83 = arith.constant 0 : index
    %c0_84 = arith.constant 0 : index
    %c0_85 = arith.constant 0 : index
    %84 = vector.load %arg4[%c0_82, %c0_83, %c0_84, %c0_85] : memref<1x1x224x128xf32, #tpu.memory_space<vmem>>, vector<1x1x224x128xf32>
    %85 = vector.shape_cast %84 : vector<1x1x224x128xf32> to vector<224x128xf32>
    %86 = vector.shape_cast %83 : vector<224x128xf32> to vector<1x1x224x128xf32>
    tpu.vector_store %arg4[%c0_82, %c0_83, %c0_84, %c0_85], %86 {strides = array<i32>} : memref<1x1x224x128xf32, #tpu.memory_space<vmem>>, vector<1x1x224x128xf32>,
    return
  }
  func.func @transform_0(%arg0: i32, %arg1: i32) -> (i32, i32, i32, i32) {
    %c0_i32 = arith.constant 0 : i32
    %c0_i32_0 = arith.constant 0 : i32
    %c0_i32_1 = arith.constant 0 : i32
    return %arg0, %arg1, %c0_i32, %c0_i32_0 : i32, i32, i32, i32
  }
  func.func @transform_1(%arg0: i32, %arg1: i32) -> (i32, i32, i32) {
    %c0_i32 = arith.constant 0 : i32
    %c0_i32_0 = arith.constant 0 : i32
    %c0_i32_1 = arith.constant 0 : i32
    %c0_i32_2 = arith.constant 0 : i32
    return %c0_i32, %c0_i32_0, %c0_i32_1 : i32, i32, i32
  }
  func.func @transform_2(%arg0: i32, %arg1: i32) -> (i32, i32, i32, i32) {
    %c0_i32 = arith.constant 0 : i32
    %c0_i32_0 = arith.constant 0 : i32
    %c0_i32_1 = arith.constant 0 : i32
    return %arg0, %arg1, %c0_i32, %c0_i32_0 : i32, i32, i32, i32
  }
}

</mosaic_0001>

<bundles_post_ra>
// kernel: fwd.1
= control target key start
LH: loop header
LB: loop body
LE: loop exit
PB: predicated region body
PF: predicated region fallthrough
CT: control target
= control target key end

     0   :  { %s18331_s9 = smov 0   ;;  %s18333_s10 = smov 0   ;;  %s22620_s0 = inlined_call_operand.vmem [shape: bf16[2,4,320,512], index: 0, kind: input, shape index: {}]   ;;  %s22621_s1 = inlined_call_operand.vmem [shape: bf16[13,512,128], index: 1, kind: input, shape index: {}]   ;;  %s22622_s2 = inlined_call_operand.vmem [shape: f32[2,4,224,128], index: 2, kind: output, shape index: {}]  }
   0x1   :  { %s18335_s11 = smov 0   ;;  %s18337_s12 = smov 0  }
   0x2   :  { %s18339_s13 = smov 0  }
   0x3 LB: > { %s21_s14 = sadd.s32 1, %s18306_s11  ;;  %s24_s15 = sadd.s32 1, %s18310_s12  ;;  %s18314_s13 = sphi %s18339_s13, %s12_s13   ;;  %s18310_s12 = sphi %s18337_s12, %s22916_s12   ;;  %s18306_s11 = sphi %s18335_s11, %s22915_s11   ;;  %s18302_s10 = sphi %s18333_s10, %s22914_s10   ;;  %s18298_s9 = sphi %s18331_s9, %s22913_s9  }
   0x4   : > { %p22_p0 = scmp.ge.s32.totalorder %s21_s14, 4  ;;  %p12299_p1 = scmp.ge.s32.totalorder %s18314_s13, 1 }
   0x5   : > { %p132_p2 = scmp.lt.s32.totalorder %s18314_s13, 9 }
   0x6   : > { %s22918_s14 = smov (%p22_p0, %s21_s14), 0  ;;  %s22920_s15 = smov (!%p22_p0, %s24_s15), %s18310_s12 }
   0x7   : > { %p133_p3 = pnand %p12299_p1, %p132_p2  ;;  %p26_p4 = scmp.ge.s32.totalorder %s22920_s15, 2 }
   0x9   : > { %s22922_s15 = smov (%p26_p4, %s22920_s15), 0  ;;  %136 = sbr.rel (%p133_p3) target bundleno = 3094 (0xc16), region = 28 }
   0xe   : > { %v17239_v0 = vld [vmem:[%s22621_s1 + $0x138] sm:$0xff]  ;;  %p162_p5 = scmp.lt.s32.totalorder %s18302_s10, 1  ;;  %p164_p6 = scmp.lt.s32.totalorder %s18298_s9, 3  ;;  %v17238_v4 = vld [vmem:[%s22621_s1 + $0x130] sm:$0xff]  ;;  %v17237_v8 = vld [vmem:[%s22621_s1 + $0x128] sm:$0xff] }
   0xf   : > { %v17247_v1 = vld [vmem:[%s22621_s1 + $0x178] sm:$0xff]  ;;  %839 = vmatpush.bf16.msra.mxu0 %v17239_v0  ;;  %v17246_v5 = vld [vmem:[%s22621_s1 + $0x170] sm:$0xff]  ;;  %v17245_v9 = vld [vmem:[%s22621_s1 + $0x168] sm:$0xff] }
  0x10   : > { %v17255_v2 = vld [vmem:[%s22621_s1 + $0x1b8] sm:$0xff]  ;;  %918 = vmatpush.bf16.msra.mxu1 %v17247_v1  ;;  %v17254_v6 = vld [vmem:[%s22621_s1 + $0x1b0] sm:$0xff]  ;;  %s22924_s10 = smov (!%p162_p5, %s18302_s10), 1  ;;  %s22926_s9 = smov (!%p164_p6, %s18298_s9), 3  ;;  %v17253_v10 = vld [vmem:[%s22621_s1 + $0x1a8] sm:$0xff] }
  0x11   : > { %v17263_v3 = vld [vmem:[%s22621_s1 + $0x1f8] sm:$0xff]  ;;  %997 = vmatpush.bf16.msra.mxu2 %v17255_v2  ;;  %v17262_v7 = vld [vmem:[%s22621_s1 + $0x1f0] sm:$0xff]  ;;  %v17261_v11 = vld [vmem:[%s22621_s1 + $0x1e8] sm:$0xff]  ;;  %s18233_s19 = smul.u32 640, %s22924_s10 }
  0x12   : > { %1076 = vmatpush.bf16.msra.mxu3 %v17263_v3  ;;  %s18232_s20 = smul.u32 160, %s22926_s9  ;;  %v17236_v12 = vld [vmem:[%s22621_s1 + $0x120] sm:$0xff]  ;;  %v17235_v16 = vld [vmem:[%s22621_s1 + $0x118] sm:$0xff]  ;;  %v17234_v20 = vld [vmem:[%s22621_s1 + $0x110] sm:$0xff] }
  0x13   : > { %840 = vmatpush.bf16.msra.mxu0 %v17238_v4  ;;  %v17244_v13 = vld [vmem:[%s22621_s1 + $0x160] sm:$0xff]  ;;  %v17243_v17 = vld [vmem:[%s22621_s1 + $0x158] sm:$0xff]  ;;  %v17242_v21 = vld [vmem:[%s22621_s1 + $0x150] sm:$0xff]  ;;  %s18234_s5 = smul.u32 28, %s22926_s9 }
  0x14   : > { %919 = vmatpush.bf16.msra.mxu1 %v17246_v5  ;;  %v17252_v14 = vld [vmem:[%s22621_s1 + $0x1a0] sm:$0xff]  ;;  %s168_s29 = sadd.s32 %s18233_s19, %s18232_s20  ;;  %v17251_v18 = vld [vmem:[%s22621_s1 + $0x198] sm:$0xff]  ;;  %v17250_v22 = vld [vmem:[%s22621_s1 + $0x190] sm:$0xff]  ;;  %s18235_s6 = smul.u32 112, %s22924_s10 }
  0x15   : > { %998 = vmatpush.bf16.msra.mxu2 %v17254_v6  ;;  %v17260_v15 = vld [vmem:[%s22621_s1 + $0x1e0] sm:$0xff]  ;;  %v17259_v19 = vld [vmem:[%s22621_s1 + $0x1d8] sm:$0xff]  ;;  %s12300_s17 = sshll.u32 %s168_s29, 2  ;;  %v17258_v23 = vld [vmem:[%s22621_s1 + $0x1d0] sm:$0xff] }
  0x16   : > { %1077 = vmatpush.bf16.msra.mxu3 %v17262_v7  ;;  %s18446_s28 = scalar_lea.vmem %s22620_s0, %s12300_s17  ;;  %v17233_v24 = vld [vmem:[%s22621_s1 + $0x108] sm:$0xff]  ;;  %v17232_v36 = vld [vmem:[%s22621_s1 + $0x100] sm:$0xff]  ;;  %v17223_v44 = vld [vmem:[%s22621_s1 + $0xb8] sm:$0xff]  ;;  %s177_s7 = sadd.s32 %s18235_s6, %s18234_s5 }
  0x17   : > { %841 = vmatpush.bf16.msra.mxu0 %v17237_v8  ;;  %v17241_v25 = vld [vmem:[%s22621_s1 + $0x148] sm:$0xff]  ;;  %v18458_v27 = vld [vmem:[%s18446_s28 + $0x10] sm:$0xff]  ;;  %v18461_v28 = vld [vmem:[%s18446_s28 + $0x20] sm:$0xff]  ;;  %s12301_s9 = sshll.u32 %s177_s7, 3 }
  0x18   : > { %920 = vmatpush.bf16.msra.mxu1 %v17245_v9  ;;  %v17249_v26 = vld [vmem:[%s22621_s1 + $0x188] sm:$0xff]  ;;  %v18467_v30 = vld [vmem:[%s18446_s28 + $0x18] sm:$0xff]  ;;  %v22702_v32 = vunpack.c.l.b16 %v18458_v27  ;;  %v22698_v33 = vunpack.c.l.b16 %v18461_v28  ;;  %v22701_v34 = vunpack.c.h.b16 %v18458_v27  ;;  %v22688_v35 = vunpack.c.h.b16 %v18461_v28  ;;  %v17240_v37 = vld [vmem:[%s22621_s1 + $0x140] sm:$0xff]  ;;  %s22516_s16 = scalar_lea.vmem %s22622_s2, %s12301_s9 }
  0x19   : > { %999 = vmatpush.bf16.msra.mxu2 %v17253_v10  ;;  %v17257_v29 = vld [vmem:[%s22621_s1 + $0x1c8] sm:$0xff]  ;;  %v22700_v38 = vunpack.c.l.b16 %v18467_v30  ;;  %v22699_v40 = vunpack.c.h.b16 %v18467_v30  ;;  %v17248_v42 = vld [vmem:[%s22621_s1 + $0x180] sm:$0xff]  ;;  %v17231_v45 = vld [vmem:[%s22621_s1 + $0xf8] sm:$0xff] }
  0x1a   : > { %1078 = vmatpush.bf16.msra.mxu3 %v17261_v11  ;;  %v18470_v31 = vld [vmem:[%s18446_s28 + $0x28] sm:$0xff]  ;;  %v17256_v43 = vld [vmem:[%s22621_s1 + $0x1c0] sm:$0xff]  ;;  %v535_v46 = vpack.c.b16 %v22698_v33, %v22702_v32  ;;  %v536_v47 = vpack.c.b16 %v22688_v35, %v22701_v34  ;;  %v17207_v50 = vld [vmem:[%s22621_s1 + $0x38] sm:$0xff] }
  0x1b   : > { %842 = vmatpush.bf16.msra.mxu0 %v17236_v12  ;;  %v22686_v39 = vunpack.c.l.b16 %v18470_v31  ;;  %v22680_v41 = vunpack.c.h.b16 %v18470_v31  ;;  %v17215_v51 = vld [vmem:[%s22621_s1 + $0x78] sm:$0xff]  ;;  %v17222_v52 = vld [vmem:[%s22621_s1 + $0xb0] sm:$0xff]  ;;  %v18536_v57 = vld [vmem:[%s18446_s28 + $0x40] sm:$0xff] }
  0x1c   : > { %921 = vmatpush.bf16.msra.mxu1 %v17244_v13  ;;  %v17230_v53 = vld [vmem:[%s22621_s1 + $0xf0] sm:$0xff]  ;;  %v18539_v58 = vld [vmem:[%s18446_s28 + $0x38] sm:$0xff]  ;;  %v18542_v59 = vld [vmem:[%s18446_s28 + $0x48] sm:$0xff]  ;;  %v22678_v61 = vunpack.c.l.b16 %v18536_v57  ;;  %v22676_v63 = vunpack.c.h.b16 %v18536_v57 }
  0x1d   : > { %1000 = vmatpush.bf16.msra.mxu2 %v17252_v14  ;;  %v537_v48 = vpack.c.b16 %v22686_v39, %v22700_v38  ;;  %v538_v49 = vpack.c.b16 %v22680_v41, %v22699_v40  ;;  %v17206_v54 = vld [vmem:[%s22621_s1 + $0x30] sm:$0xff]  ;;  %v22683_v0 = vunpack.c.l.b16 %v18539_v58  ;;  %v22670_v1 = vunpack.c.l.b16 %v18542_v59  ;;  %v17221_v8 = vld [vmem:[%s22621_s1 + $0xa8] sm:$0xff]  ;;  %v18584_v13 = vld [vmem:[%s18446_s28 + $0x60] sm:$0xff] }
  0x1e   : > { %1079 = vmatpush.bf16.msra.mxu3 %v17260_v15  ;;  %v17214_v55 = vld [vmem:[%s22621_s1 + $0x70] sm:$0xff]  ;;  %v22679_v2 = vunpack.c.h.b16 %v18539_v58  ;;  %v22668_v3 = vunpack.c.h.b16 %v18542_v59  ;;  %v17229_v9 = vld [vmem:[%s22621_s1 + $0xe8] sm:$0xff]  ;;  %v18587_v14 = vld [vmem:[%s18446_s28 + $0x58] sm:$0xff] }
  0x1f   : > { %843 = vmatpush.bf16.msra.mxu0 %v17235_v16  ;;  %v18533_v56 = vld [vmem:[%s18446_s28 + $0x30] sm:$0xff]  ;;  %v541_v6 = vpack.c.b16 %v22670_v1, %v22683_v0  ;;  %v17205_v10 = vld [vmem:[%s22621_s1 + $0x28] sm:$0xff]  ;;  %v18872_v41 = vld [vmem:[%s18446_s28 + $0x140] sm:$0xff] }
  0x20   : > { %922 = vmatpush.bf16.msra.mxu1 %v17243_v17  ;;  %v22689_v60 = vunpack.c.l.b16 %v18533_v56  ;;  %v22687_v62 = vunpack.c.h.b16 %v18533_v56  ;;  %v542_v7 = vpack.c.b16 %v22668_v3, %v22679_v2  ;;  %v17213_v11 = vld [vmem:[%s22621_s1 + $0x68] sm:$0xff]  ;;  %v18581_v12 = vld [vmem:[%s18446_s28 + $0x50] sm:$0xff]  ;;  %v22658_v17 = vunpack.c.l.b16 %v18584_v13  ;;  %22752 = vst [vmem:[#allocation2_spill] sm:$0xff] %v18872_v41 }
  0x21   : > { %1001 = vmatpush.bf16.msra.mxu2 %v17251_v18  ;;  %v18590_v15 = vld [vmem:[%s18446_s28 + $0x68] sm:$0xff]  ;;  %v22677_v16 = vunpack.c.l.b16 %v18581_v12  ;;  %v22671_v18 = vunpack.c.h.b16 %v18581_v12  ;;  %v18869_v2 = vld [vmem:[%s18446_s28 + $0x130] sm:$0xff] }
  0x22   : > { %1080 = vmatpush.bf16.msra.mxu3 %v17259_v19  ;;  %v539_v4 = vpack.c.b16 %v22678_v61, %v22689_v60  ;;  %v540_v5 = vpack.c.b16 %v22676_v63, %v22687_v62  ;;  %v22656_v19 = vunpack.c.h.b16 %v18584_v13  ;;  %v18878_v0 = vld [vmem:[%s18446_s28 + $0x148] sm:$0xff] }
  0x23   : > { %844 = vmatpush.bf16.msra.mxu0 %v17234_v20  ;;  %v22669_v20 = vunpack.c.l.b16 %v18587_v14  ;;  %22753 = vst [vmem:[#allocation3_spill] sm:$0xff] %v18878_v0 }
  0x24   : > { %923 = vmatpush.bf16.msra.mxu1 %v17242_v21  ;;  %v22646_v21 = vunpack.c.l.b16 %v18590_v15 }
  0x25   : > { %1002 = vmatpush.bf16.msra.mxu2 %v17250_v22  ;;  %v22667_v22 = vunpack.c.h.b16 %v18587_v14 }
  0x26   : > { %1081 = vmatpush.bf16.msra.mxu3 %v17258_v23  ;;  %v22644_v23 = vunpack.c.h.b16 %v18590_v15 }
  0x27   : > { %845 = vmatpush.bf16.msra.mxu0 %v17233_v24  ;;  %v543_v24 = vpack.c.b16 %v22658_v17, %v22677_v16 }
  0x28   : > { %924 = vmatpush.bf16.msra.mxu1 %v17241_v25  ;;  %v544_v25 = vpack.c.b16 %v22656_v19, %v22671_v18 }
  0x29   : > { %1003 = vmatpush.bf16.msra.mxu2 %v17249_v26  ;;  %v545_v26 = vpack.c.b16 %v22646_v21, %v22669_v20 }
  0x2a   : > { %1082 = vmatpush.bf16.msra.mxu3 %v17257_v29  ;;  %v546_v29 = vpack.c.b16 %v22644_v23, %v22667_v22 }
  0x2b   : > { %846 = vmatpush.bf16.msra.mxu0 %v17232_v36  ;;  %v18617_v36 = vld [vmem:[%s18446_s28 + $0x70] sm:$0xff] }
  0x2c   : > { %925 = vmatpush.bf16.msra.mxu1 %v17240_v37  ;;  %v18620_v37 = vld [vmem:[%s18446_s28 + $0x80] sm:$0xff] }
  0x2d   : > { %1004 = vmatpush.bf16.msra.mxu2 %v17248_v42  ;;  %v18623_v42 = vld [vmem:[%s18446_s28 + $0x78] sm:$0xff] }
  0x2e   : > { %1083 = vmatpush.bf16.msra.mxu3 %v17256_v43  ;;  %847 = vmatmul.bf16.vlgmr.msra.gmra.mxu0 %v535_v46  ;;  %v18626_v43 = vld [vmem:[%s18446_s28 + $0x88] sm:$0xff]  ;;  %v22649_v46 = vunpack.c.h.b16 %v18617_v36 }
  0x2f   : > { %926 = vmatmul.bf16.vlgmr.msra.gmra.mxu1 %v536_v47  ;;  %1465 = vmatpush.bf16.msrb.mxu0 %v17207_v50  ;;  %v22632_v47 = vunpack.c.h.b16 %v18620_v37  ;;  %v22643_v50 = vunpack.c.h.b16 %v18623_v42 }
  0x30   : > { %1005 = vmatmul.bf16.vlgmr.msra.gmra.mxu2 %v537_v48  ;;  %1544 = vmatpush.bf16.msrb.mxu1 %v17215_v51  ;;  %v22645_v48 = vunpack.c.l.b16 %v18623_v42  ;;  %v22624_v51 = vunpack.c.h.b16 %v18626_v43 }
  0x31   : > { %1623 = vmatpush.bf16.msrb.mxu2 %v17223_v44  ;;  %1084 = vmatmul.bf16.vlgmr.msra.gmra.mxu3 %v538_v49  ;;  %v22657_v44 = vunpack.c.l.b16 %v18617_v36  ;;  %v22625_v49 = vunpack.c.l.b16 %v18626_v43 }
  0x32   : > { %1702 = vmatpush.bf16.msrb.mxu3 %v17231_v45  ;;  %v22634_v45 = vunpack.c.l.b16 %v18620_v37 }
  0x33   : > { %1466 = vmatpush.bf16.msrb.mxu0 %v17206_v54  ;;  %v549_v54 = vpack.c.b16 %v22625_v49, %v22645_v48  ;;  %v18707_v49 = vld [vmem:[%s18446_s28 + $0xb8] sm:$0xff] }
  0x34   : > { %1545 = vmatpush.bf16.msrb.mxu1 %v17214_v55  ;;  %v550_v55 = vpack.c.b16 %v22624_v51, %v22643_v50  ;;  %v18704_v51 = vld [vmem:[%s18446_s28 + $0xc0] sm:$0xff] }
  0x35   : > { %1624 = vmatpush.bf16.msrb.mxu2 %v17222_v52  ;;  %v547_v52 = vpack.c.b16 %v22634_v45, %v22657_v44 }
  0x36   : > { %1703 = vmatpush.bf16.msrb.mxu3 %v17230_v53  ;;  %v548_v53 = vpack.c.b16 %v22632_v47, %v22649_v46  ;;  %v18791_v46 = vld [vmem:[%s18446_s28 + $0xf8] sm:$0xff] }
  0x37   : > { %1467 = vmatpush.bf16.msrb.mxu0 %v17205_v10  ;;  %v18671_v10 = vld [vmem:[%s18446_s28 + $0x98] sm:$0xff] }
  0x38   : > { %1546 = vmatpush.bf16.msrb.mxu1 %v17213_v11  ;;  %v18674_v11 = vld [vmem:[%s18446_s28 + $0xa8] sm:$0xff] }
  0x39   : > { %1625 = vmatpush.bf16.msrb.mxu2 %v17221_v8  ;;  %v18665_v8 = vld [vmem:[%s18446_s28 + $0x90] sm:$0xff] }
  0x3a   : > { %1704 = vmatpush.bf16.msrb.mxu3 %v17229_v9  ;;  %v18668_v9 = vld [vmem:[%s18446_s28 + $0xa0] sm:$0xff] }
  0x3e   : > { %852 = vmatmul.bf16.gmra.mxu0 %v539_v4  ;;  %v17220_v4 = vld [vmem:[%s22621_s1 + $0xa0] sm:$0xff] }
  0x3f   : > { %931 = vmatmul.bf16.gmra.mxu1 %v540_v5  ;;  %v17228_v5 = vld [vmem:[%s22621_s1 + $0xe0] sm:$0xff]  ;;  %1626 = vmatpush.bf16.msrb.mxu2 %v17220_v4 }
  0x40   : > { %1010 = vmatmul.bf16.gmra.mxu2 %v541_v6  ;;  %v17204_v6 = vld [vmem:[%s22621_s1 + $0x20] sm:$0xff]  ;;  %1705 = vmatpush.bf16.msrb.mxu3 %v17228_v5 }
  0x41   : > { %1089 = vmatmul.bf16.gmra.mxu3 %v542_v7  ;;  %v17212_v7 = vld [vmem:[%s22621_s1 + $0x60] sm:$0xff]  ;;  %1468 = vmatpush.bf16.msrb.mxu0 %v17204_v6 }
  0x42   : > { %1547 = vmatpush.bf16.msrb.mxu1 %v17212_v7 }
  0x4e   : > { %857 = vmatmul.bf16.gmra.mxu0 %v543_v24  ;;  %v22633_v24 = vunpack.c.l.b16 %v18665_v8 }
  0x4f   : > { %936 = vmatmul.bf16.gmra.mxu1 %v544_v25  ;;  %v22623_v25 = vunpack.c.l.b16 %v18668_v9 }
  0x50   : > { %1015 = vmatmul.bf16.gmra.mxu2 %v545_v26  ;;  %v22627_v26 = vunpack.c.h.b16 %v18665_v8 }
  0x51   : > { %1094 = vmatmul.bf16.gmra.mxu3 %v546_v29  ;;  %v22626_v29 = vunpack.c.h.b16 %v18668_v9  ;;  %v551_v4 = vpack.c.b16 %v22623_v25, %v22633_v24  ;;  %v18701_v25 = vld [vmem:[%s18446_s28 + $0xb0] sm:$0xff] }
  0x53   : > { %v552_v5 = vpack.c.b16 %v22626_v29, %v22627_v26  ;;  %v18710_v29 = vld [vmem:[%s18446_s28 + $0xc8] sm:$0xff]  ;;  %v22642_v26 = vunpack.c.l.b16 %v18701_v25 }
  0x5e   : > { %862 = vmatmul.bf16.gmra.mxu0 %v547_v52  ;;  %v22629_v52 = vunpack.c.l.b16 %v18671_v10 }
  0x5f   : > { %941 = vmatmul.bf16.gmra.mxu1 %v548_v53  ;;  %v22628_v53 = vunpack.c.l.b16 %v18674_v11 }
  0x60   : > { %1020 = vmatmul.bf16.gmra.mxu2 %v549_v54  ;;  %v22631_v54 = vunpack.c.h.b16 %v18671_v10 }
  0x61   : > { %1099 = vmatmul.bf16.gmra.mxu3 %v550_v55  ;;  %v22630_v55 = vunpack.c.h.b16 %v18674_v11  ;;  %v553_v6 = vpack.c.b16 %v22628_v53, %v22629_v52  ;;  %v22636_v53 = vunpack.c.l.b16 %v18704_v51  ;;  %v22641_v52 = vunpack.c.h.b16 %v18701_v25 }
  0x63   : > { %v554_v7 = vpack.c.b16 %v22630_v55, %v22631_v54  ;;  %v22635_v55 = vunpack.c.h.b16 %v18704_v51  ;;  %v555_v54 = vpack.c.b16 %v22636_v53, %v22642_v26  ;;  %v17227_v53 = vld [vmem:[%s22621_s1 + $0xd8] sm:$0xff] }
  0x64   : > { %1706 = vmatpush.bf16.msrb.mxu3 %v17227_v53 }
  0x65   : > { %v556_v47 = vpack.c.b16 %v22635_v55, %v22641_v52  ;;  %v17219_v55 = vld [vmem:[%s22621_s1 + $0x98] sm:$0xff] }
  0x66   : > { %1627 = vmatpush.bf16.msrb.mxu2 %v17219_v55 }
  0x6e   : > { %867 = vmatmul.bf16.gmra.mxu0 %v551_v4  ;;  %v22640_v4 = vunpack.c.l.b16 %v18707_v49 }
  0x6f   : > { %946 = vmatmul.bf16.gmra.mxu1 %v552_v5  ;;  %v22637_v5 = vunpack.c.l.b16 %v18710_v29 }
  0x70   : > { %1025 = vmatmul.bf16.gmra.mxu2 %v553_v6  ;;  %v22639_v6 = vunpack.c.h.b16 %v18707_v49 }
  0x71   : > { %1104 = vmatmul.bf16.gmra.mxu3 %v554_v7  ;;  %v22638_v7 = vunpack.c.h.b16 %v18710_v29  ;;  %v557_v24 = vpack.c.b16 %v22637_v5, %v22640_v4  ;;  %v17203_v5 = vld [vmem:[%s22621_s1 + $0x18] sm:$0xff] }
  0x72   : > { %1469 = vmatpush.bf16.msrb.mxu0 %v17203_v5 }
  0x73   : > { %v558_v45 = vpack.c.b16 %v22638_v7, %v22639_v6  ;;  %v17211_v7 = vld [vmem:[%s22621_s1 + $0x58] sm:$0xff] }
  0x74   : > { %1548 = vmatpush.bf16.msrb.mxu1 %v17211_v7 }
  0x7e   : > { %872 = vmatmul.bf16.gmra.mxu0 %v555_v54  ;;  %v18758_v54 = vld [vmem:[%s18446_s28 + $0xe8] sm:$0xff] }
  0x7f   : > { %951 = vmatmul.bf16.gmra.mxu1 %v556_v47  ;;  %v18752_v47 = vld [vmem:[%s18446_s28 + $0xe0] sm:$0xff]  ;;  %v22652_v5 = vunpack.c.l.b16 %v18758_v54  ;;  %v22654_v26 = vunpack.c.h.b16 %v18758_v54 }
  0x80   : > { %1030 = vmatmul.bf16.gmra.mxu2 %v557_v24  ;;  %v18755_v24 = vld [vmem:[%s18446_s28 + $0xd8] sm:$0xff]  ;;  %v22647_v4 = vunpack.c.l.b16 %v18752_v47  ;;  %v22650_v53 = vunpack.c.h.b16 %v18752_v47 }
  0x81   : > { %1109 = vmatmul.bf16.gmra.mxu3 %v558_v45  ;;  %v18749_v45 = vld [vmem:[%s18446_s28 + $0xd0] sm:$0xff]  ;;  %v22653_v55 = vunpack.c.l.b16 %v18755_v24  ;;  %v22655_v7 = vunpack.c.h.b16 %v18755_v24 }
  0x82   : > { %v22648_v6 = vunpack.c.l.b16 %v18749_v45  ;;  %v22651_v52 = vunpack.c.h.b16 %v18749_v45 }
  0x83   : > { %v561_v48 = vpack.c.b16 %v22652_v5, %v22653_v55  ;;  %v562_v21 = vpack.c.b16 %v22654_v26, %v22655_v7 }
  0x84   : > { %v559_v50 = vpack.c.b16 %v22647_v4, %v22648_v6  ;;  %v560_v23 = vpack.c.b16 %v22650_v53, %v22651_v52  ;;  %v18785_v4 = vld [vmem:[%s18446_s28 + $0xf0] sm:$0xff]  ;;  %v18788_v6 = vld [vmem:[%s18446_s28 + $0x100] sm:$0xff]  ;;  %v18794_v53 = vld [vmem:[%s18446_s28 + $0x108] sm:$0xff] }
  0x85   : > { %v22666_v52 = vunpack.c.l.b16 %v18785_v4  ;;  %v22659_v5 = vunpack.c.l.b16 %v18788_v6  ;;  %v22665_v55 = vunpack.c.h.b16 %v18785_v4  ;;  %v22660_v26 = vunpack.c.h.b16 %v18788_v6 }
  0x87   : > { %v563_v7 = vpack.c.b16 %v22659_v5, %v22666_v52  ;;  %v564_v19 = vpack.c.b16 %v22660_v26, %v22665_v55  ;;  %v17218_v5 = vld [vmem:[%s22621_s1 + $0x90] sm:$0xff] }
  0x88   : > { %v17226_v26 = vld [vmem:[%s22621_s1 + $0xd0] sm:$0xff]  ;;  %1628 = vmatpush.bf16.msrb.mxu2 %v17218_v5 }
  0x89   : > { %1707 = vmatpush.bf16.msrb.mxu3 %v17226_v26 }
  0x8e   : > { %877 = vmatmul.bf16.gmra.mxu0 %v559_v50  ;;  %v22662_v50 = vunpack.c.h.b16 %v18794_v53 }
  0x8f   : > { %956 = vmatmul.bf16.gmra.mxu1 %v560_v23  ;;  %v22664_v23 = vunpack.c.l.b16 %v18791_v46 }
  0x90   : > { %1035 = vmatmul.bf16.gmra.mxu2 %v561_v48  ;;  %v22663_v48 = vunpack.c.h.b16 %v18791_v46 }
  0x91   : > { %1114 = vmatmul.bf16.gmra.mxu3 %v562_v21  ;;  %v22661_v21 = vunpack.c.l.b16 %v18794_v53 }
  0x92   : > { %v566_v17 = vpack.c.b16 %v22662_v50, %v22663_v48  ;;  %v17210_v50 = vld [vmem:[%s22621_s1 + $0x50] sm:$0xff] }
  0x93   : > { %v565_v44 = vpack.c.b16 %v22661_v21, %v22664_v23  ;;  %v17202_v21 = vld [vmem:[%s22621_s1 + $0x10] sm:$0xff]  ;;  %1549 = vmatpush.bf16.msrb.mxu1 %v17210_v50  ;;  %v18836_v23 = vld [vmem:[%s18446_s28 + $0x120] sm:$0xff] }
  0x94   : > { %1470 = vmatpush.bf16.msrb.mxu0 %v17202_v21  ;;  %v18833_v48 = vld [vmem:[%s18446_s28 + $0x110] sm:$0xff]  ;;  %v22674_v52 = vunpack.c.h.b16 %v18836_v23 }
  0x95   : > { %v22675_v55 = vunpack.c.h.b16 %v18833_v48 }
  0x97   : > { %v568_v3 = vpack.c.b16 %v22674_v52, %v22675_v55 }
  0x9e   : > { %882 = vmatmul.bf16.gmra.mxu0 %v563_v7  ;;  %v18839_v7 = vld [vmem:[%s18446_s28 + $0x118] sm:$0xff] }
  0x9f   : > { %961 = vmatmul.bf16.gmra.mxu1 %v564_v19  ;;  %v18842_v19 = vld [vmem:[%s18446_s28 + $0x128] sm:$0xff]  ;;  %v22682_v26 = vunpack.c.l.b16 %v18839_v7  ;;  %v22685_v21 = vunpack.c.h.b16 %v18839_v7 }
  0xa0   : > { %1040 = vmatmul.bf16.gmra.mxu2 %v565_v44  ;;  %v22672_v44 = vunpack.c.l.b16 %v18836_v23  ;;  %v22681_v5 = vunpack.c.l.b16 %v18842_v19  ;;  %v22684_v50 = vunpack.c.h.b16 %v18842_v19 }
  0xa1   : > { %1119 = vmatmul.bf16.gmra.mxu3 %v566_v17  ;;  %v22673_v17 = vunpack.c.l.b16 %v18833_v48 }
  0xa2   : > { %v569_v18 = vpack.c.b16 %v22681_v5, %v22682_v26  ;;  %v18875_v26 = vld [vmem:[%s18446_s28 + $0x138] sm:$0xff] }
  0xa3   : > { %v567_v22 = vpack.c.b16 %v22672_v44, %v22673_v17  ;;  %v570_v44 = vpack.c.b16 %v22684_v50, %v22685_v21 }
  0xab   : > { %v848_v20 = vpop.f32.mrf.mxu0 }
  0xac   : > { %v927_v1 = vpop.f32.mrf.mxu1 }
  0xad   : > { %v928_v17 = vadd.f32 %v927_v1, %v848_v20  ;;  %v17217_v1 = vld [vmem:[%s22621_s1 + $0x88] sm:$0xff]  ;;  %v22690_v20 = vunpack.c.l.b16 %v18872_v41 }
  0xae   : > { %887 = vmatmul.bf16.gmra.mxu0 %v567_v22  ;;  %v22696_v22 = vunpack.c.l.b16 %v18875_v26  ;;  %1629 = vmatpush.bf16.msrb.mxu2 %v17217_v1 }
  0xaf   : > { %966 = vmatmul.bf16.gmra.mxu1 %v568_v3  ;;  %v17225_v3 = vld [vmem:[%s22621_s1 + $0xc8] sm:$0xff] }
  0xb0   : > { %1045 = vmatmul.bf16.gmra.mxu2 %v569_v18  ;;  %v22691_v18 = vunpack.c.l.b16 %v18869_v2  ;;  %1708 = vmatpush.bf16.msrb.mxu3 %v17225_v3 }
  0xb1   : > { %1124 = vmatmul.bf16.gmra.mxu3 %v570_v44 }
  0xb2   : > { %v571_v21 = vpack.c.b16 %v22690_v20, %v22691_v18 }
  0xb3   : > { %v1006_v52 = vpop.f32.mrf.mxu2  ;;  %v850_v16 = vpop.f32.mrf.mxu0 }
  0xb4   : > { %v1085_v55 = vpop.f32.mrf.mxu3  ;;  %v1007_v63 = vadd.f32 %v1006_v52, %v928_v17  ;;  %v929_v61 = vpop.f32.mrf.mxu1  ;;  %v22695_v52 = vunpack.c.h.b16 %v18875_v26 }
  0xb5   : > { %v930_v5 = vadd.f32 %v929_v61, %v850_v16  ;;  %v22697_v61 = vunpack.c.h.b16 %v18869_v2  ;;  %v22694_v16 = vunpack.c.h.b16 %v18872_v41 }
  0xb6   : > { %v18880_v50 = vadd.f32 %v1085_v55, %v1007_v63  ;;  %v22693_v63 = vunpack.c.l.b16 %v18878_v0  ;;  %v22692_v55 = vunpack.c.h.b16 %v18878_v0 }
  0xb7   : > { %v572_v39 = vpack.c.b16 %v22694_v16, %v22697_v61  ;;  %v18924_v16 = vld [vmem:[%s18446_s28 + $0x160] sm:$0xff]  ;;  %v18930_v61 = vld [vmem:[%s18446_s28 + $0x168] sm:$0xff] }
  0xb8   : > { %v573_v1 = vpack.c.b16 %v22693_v63, %v22696_v22  ;;  %v574_v3 = vpack.c.b16 %v22692_v55, %v22695_v52  ;;  %v18921_v63 = vld [vmem:[%s18446_s28 + $0x150] sm:$0xff]  ;;  %22755 = vst [vmem:[#allocation5_spill] sm:$0xff] %v18924_v16  ;;  %v18927_v22 = vld [vmem:[%s18446_s28 + $0x158] sm:$0xff] }
  0xb9   : > { %22754 = vst [vmem:[#allocation4_spill] sm:$0xff] %v18921_v63 }
  0xba   : > { %22756 = vst [vmem:[#allocation6_spill] sm:$0xff] %v18927_v22 }
  0xbb   : > { %v1008_v17 = vpop.f32.mrf.mxu2  ;;  %v853_v35 = vpop.f32.mrf.mxu0  ;;  %22757 = vst [vmem:[#allocation7_spill] sm:$0xff] %v18930_v61 }
  0xbc   : > { %v1087_v44 = vpop.f32.mrf.mxu3  ;;  %v1009_v62 = vadd.f32 %v1008_v17, %v930_v5  ;;  %v932_v60 = vpop.f32.mrf.mxu1  ;;  %v17201_v5 = vld [vmem:[%s22621_s1 + $0x8] sm:$0xff] }
  0xbd   : > { %v933_v20 = vadd.f32 %v932_v60, %v853_v35  ;;  %v17209_v17 = vld [vmem:[%s22621_s1 + $0x48] sm:$0xff]  ;;  %1471 = vmatpush.bf16.msrb.mxu0 %v17201_v5  ;;  %v22712_v5 = vunpack.c.l.b16 %v18927_v22 }
  0xbe   : > { %v18912_v18 = vadd.f32 %v1087_v44, %v1009_v62  ;;  %892 = vmatmul.bf16.gmra.mxu0 %v571_v21  ;;  %1550 = vmatpush.bf16.msrb.mxu1 %v17209_v17  ;;  %v22711_v17 = vunpack.c.l.b16 %v18930_v61 }
  0xbf   : > { %971 = vmatmul.bf16.gmra.mxu1 %v572_v39  ;;  %v22704_v39 = vunpack.c.l.b16 %v18921_v63 }
  0xc0   : > { %1050 = vmatmul.bf16.gmra.mxu2 %v573_v1  ;;  %v22703_v1 = vunpack.c.l.b16 %v18924_v16  ;;  %v577_v32 = vpack.c.b16 %v22711_v17, %v22712_v5  ;;  %v18961_v17 = vld [vmem:[%s18446_s28 + $0x170] sm:$0xff]  ;;  %v18964_v5 = vld [vmem:[%s18446_s28 + $0x180] sm:$0xff] }
  0xc1   : > { %1129 = vmatmul.bf16.gmra.mxu3 %v574_v3  ;;  %v22708_v3 = vunpack.c.h.b16 %v18921_v63  ;;  %22760 = vst [vmem:[#allocation10_spill] sm:$0xff] %v18961_v17 }
  0xc2   : > { %22761 = vst [vmem:[#allocation11_spill] sm:$0xff] %v18964_v5 }
  0xc3   : > { %v1011_v35 = vpop.f32.mrf.mxu2  ;;  %v855_v44 = vpop.f32.mrf.mxu0 }
  0xc4   : > { %v1090_v60 = vpop.f32.mrf.mxu3  ;;  %v1012_v62 = vadd.f32 %v1011_v35, %v933_v20  ;;  %v934_v55 = vpop.f32.mrf.mxu1  ;;  %v22707_v20 = vunpack.c.h.b16 %v18924_v16  ;;  %v22717_v35 = vunpack.c.h.b16 %v18930_v61 }
  0xc5   : > { %v935_v52 = vadd.f32 %v934_v55, %v855_v44  ;;  %v22718_v55 = vunpack.c.h.b16 %v18927_v22  ;;  %v18967_v22 = vld [vmem:[%s18446_s28 + $0x178] sm:$0xff] }
  0xc6   : > { %v18932_v21 = vadd.f32 %v1090_v60, %v1012_v62  ;;  %v575_v60 = vpack.c.b16 %v22703_v1, %v22704_v39  ;;  %v576_v62 = vpack.c.b16 %v22707_v20, %v22708_v3  ;;  %22762 = vst [vmem:[#allocation12_spill] sm:$0xff] %v18967_v22 }
  0xc7   : > { %v578_v1 = vpack.c.b16 %v22717_v35, %v22718_v55  ;;  %v18970_v35 = vld [vmem:[%s18446_s28 + $0x188] sm:$0xff] }
  0xc8   : > { %22758 = vst [vmem:[#allocation8_spill] sm:$0xff] %v18932_v21  ;;  %v22769_v63 = vunpack.c.h.b16 %v18970_v35 }
  0xc9   : > { %22763 = vst [vmem:[#allocation13_spill] sm:$0xff] %v18970_v35 }
  0xcb   : > { %v1013_v44 = vpop.f32.mrf.mxu2  ;;  %v858_v38 = vpop.f32.mrf.mxu0 }
  0xcc   : > { %v1092_v33 = vpop.f32.mrf.mxu3  ;;  %v1014_v40 = vadd.f32 %v1013_v44, %v935_v52  ;;  %v937_v34 = vpop.f32.mrf.mxu1 }
  0xcd   : > { %v938_v39 = vadd.f32 %v937_v34, %v858_v38  ;;  %v17224_v34 = vld [vmem:[%s22621_s1 + $0xc0] sm:$0xff] }
  0xce   : > { %v18958_v16 = vadd.f32 %v1092_v33, %v1014_v40  ;;  %897 = vmatmul.bf16.gmra.mxu0 %v575_v60  ;;  %v17200_v38 = vld [vmem:[%s22621_s1] sm:$0xff]  ;;  %v22722_v40 = vunpack.c.l.b16 %v18961_v17  ;;  %1709 = vmatpush.bf16.msrb.mxu3 %v17224_v34  ;;  %v22766_v34 = vunpack.c.l.b16 %v18967_v22 }
  0xcf   : > { %976 = vmatmul.bf16.gmra.mxu1 %v576_v62  ;;  %1472 = vmatpush.bf16.msrb.mxu0 %v17200_v38  ;;  %v22767_v38 = vunpack.c.l.b16 %v18970_v35 }
  0xd0   : > { %22759 = vst [vmem:[#allocation9_spill] sm:$0xff] %v18958_v16  ;;  %1055 = vmatmul.bf16.gmra.mxu2 %v577_v32  ;;  %v17216_v32 = vld [vmem:[%s22621_s1 + $0x80] sm:$0xff] }
  0xd1   : > { %1134 = vmatmul.bf16.gmra.mxu3 %v578_v1  ;;  %1630 = vmatpush.bf16.msrb.mxu2 %v17216_v32 }
  0xd3   : > { %v1016_v52 = vpop.f32.mrf.mxu2  ;;  %v860_v3 = vpop.f32.mrf.mxu0 }
  0xd4   : > { %v1095_v44 = vpop.f32.mrf.mxu3  ;;  %v1017_v20 = vadd.f32 %v1016_v52, %v938_v39  ;;  %v939_v0 = vpop.f32.mrf.mxu1  ;;  %v22725_v39 = vunpack.c.h.b16 %v18961_v17  ;;  %v22768_v52 = vunpack.c.h.b16 %v18967_v22  ;;  %v19019_v22 = vld [vmem:[%s18446_s28 + $0x198] sm:$0xff] }
  0xd5   : > { %v940_v61 = vadd.f32 %v939_v0, %v860_v3  ;;  %v22721_v0 = vunpack.c.l.b16 %v18964_v5  ;;  %v17208_v3 = vld [vmem:[%s22621_s1 + $0x40] sm:$0xff]  ;;  %22773 = vst [vmem:[#allocation18_spill] sm:$0xff] %v19019_v22 }
  0xd6   : > { %v18972_v33 = vadd.f32 %v1095_v44, %v1017_v20  ;;  %1551 = vmatpush.bf16.msrb.mxu1 %v17208_v3  ;;  %v22765_v20 = vunpack.c.h.b16 %v18964_v5  ;;  %v581_v3 = vpack.c.b16 %v22767_v38, %v22766_v34  ;;  %v19013_v34 = vld [vmem:[%s18446_s28 + $0x190] sm:$0xff]  ;;  %v19016_v38 = vld [vmem:[%s18446_s28 + $0x1a0] sm:$0xff] }
  0xd7   : > { %v579_v1 = vpack.c.b16 %v22721_v0, %v22722_v40  ;;  %v582_v0 = vpack.c.b16 %v22769_v63, %v22768_v52  ;;  %22771 = vst [vmem:[#allocation16_spill] sm:$0xff] %v19013_v34  ;;  %v19022_v63 = vld [vmem:[%s18446_s28 + $0x1a8] sm:$0xff] }
  0xd8   : > { %22764 = vst [vmem:[#allocation14_spill] sm:$0xff] %v18972_v33  ;;  %v580_v60 = vpack.c.b16 %v22765_v20, %v22725_v39 }
  0xd9   : > { %22772 = vst [vmem:[#allocation17_spill] sm:$0xff] %v19016_v38 }
  0xda   : > { %22774 = vst [vmem:[#allocation19_spill] sm:$0xff] %v19022_v63 }
  0xdb   : > { %v1018_v44 = vpop.f32.mrf.mxu2  ;;  %v863_v62 = vpop.f32.mrf.mxu0 }
  0xdc   : > { %v1097_v55 = vpop.f32.mrf.mxu3  ;;  %v1019_v33 = vadd.f32 %v1018_v44, %v940_v61  ;;  %v942_v32 = vpop.f32.mrf.mxu1 }
  0xdd   : > { %v943_v40 = vadd.f32 %v942_v32, %v863_v62  ;;  %v22776_v62 = vunpack.c.l.b16 %v19019_v22 }
  0xde   : > { %v19010_v5 = vadd.f32 %v1097_v55, %v1019_v33  ;;  %902 = vmatmul.bf16.gmra.mxu0 %v579_v1  ;;  %v22735_v33 = vunpack.c.l.b16 %v19013_v34  ;;  %v22737_v1 = vunpack.c.h.b16 %v19013_v34 }
  0xdf   : > { %981 = vmatmul.bf16.gmra.mxu1 %v580_v60 }
  0xe0   : > { %22770 = vst [vmem:[#allocation15_spill] sm:$0xff] %v19010_v5  ;;  %1060 = vmatmul.bf16.gmra.mxu2 %v581_v3  ;;  %v22779_v5 = vunpack.c.h.b16 %v19022_v63 }
  0xe1   : > { %1139 = vmatmul.bf16.gmra.mxu3 %v582_v0  ;;  %v22734_v0 = vunpack.c.l.b16 %v19016_v38 }
  0xe3   : > { %v1021_v61 = vpop.f32.mrf.mxu2  ;;  %v865_v39 = vpop.f32.mrf.mxu0  ;;  %v583_v3 = vpack.c.b16 %v22734_v0, %v22735_v33 }
  0xe4   : > { %v1100_v20 = vpop.f32.mrf.mxu3  ;;  %v1022_v44 = vadd.f32 %v1021_v61, %v943_v40  ;;  %v944_v17 = vpop.f32.mrf.mxu1  ;;  %v22736_v40 = vunpack.c.h.b16 %v19016_v38 }
  0xe5   : > { %v945_v35 = vadd.f32 %v944_v17, %v865_v39  ;;  %v22777_v17 = vunpack.c.l.b16 %v19022_v63 }
  0xe6   : > { %v19024_v55 = vadd.f32 %v1100_v20, %v1022_v44  ;;  %v584_v61 = vpack.c.b16 %v22736_v40, %v22737_v1 }
  0xe7   : > { %v585_v39 = vpack.c.b16 %v22777_v17, %v22776_v62  ;;  %v17351_v62 = vld [vmem:[%s22621_s1 + $0x2f8] sm:$0xff] }
  0xe8   : > { %22775 = vst [vmem:[#allocation20_spill] sm:$0xff] %v19024_v55  ;;  %v22778_v55 = vunpack.c.h.b16 %v19019_v22  ;;  %2611 = vmatpush.bf16.msra.mxu3 %v17351_v62 }
  0xea   : > { %v586_v41 = vpack.c.b16 %v22779_v5, %v22778_v55 }
  0xeb   : > { %v1023_v52 = vpop.f32.mrf.mxu2  ;;  %v868_v44 = vpop.f32.mrf.mxu0 }
  0xec   : > { %v1102_v32 = vpop.f32.mrf.mxu3  ;;  %v1024_v20 = vadd.f32 %v1023_v52, %v945_v35  ;;  %v947_v60 = vpop.f32.mrf.mxu1  ;;  %v17343_v35 = vld [vmem:[%s22621_s1 + $0x2b8] sm:$0xff] }
  0xed   : > { %v948_v0 = vadd.f32 %v947_v60, %v868_v44  ;;  %2532 = vmatpush.bf16.msra.mxu2 %v17343_v35  ;;  %v17327_v44 = vld [vmem:[%s22621_s1 + $0x238] sm:$0xff] }
  0xee   : > { %v19050_v33 = vadd.f32 %v1102_v32, %v1024_v20  ;;  %907 = vmatmul.bf16.gmra.mxu0 %v583_v3  ;;  %v19059_v32 = vld [vmem:[%s18446_s28 + $0x1b0] sm:$0xff]  ;;  %v300_v3 = vld [vmem:[%s18446_s28 + $0x1c0] sm:$0xff]  ;;  %v17335_v35 = vld [vmem:[%s22621_s1 + $0x278] sm:$0xff] }
  0xef   : > { %986 = vmatmul.bf16.gmra.mxu1 %v584_v61  ;;  %22781 = vst [vmem:[#allocation22_spill] sm:$0xff] %v19059_v32  ;;  %v301_v61 = vld [vmem:[%s18446_s28 + $0x1c8] sm:$0xff]  ;;  %v531_v62 = vunpack.c.l.b16 %v300_v3  ;;  %v532_v40 = vunpack.c.h.b16 %v300_v3  ;;  %2374 = vmatpush.bf16.msra.mxu0 %v17327_v44 }
  0xf0   : > { %22780 = vst [vmem:[#allocation21_spill] sm:$0xff] %v19050_v33  ;;  %1065 = vmatmul.bf16.gmra.mxu2 %v585_v39  ;;  %2453 = vmatpush.bf16.msra.mxu1 %v17335_v35 }
  0xf1   : > { %1144 = vmatmul.bf16.gmra.mxu3 %v586_v41  ;;  %v19063_v41 = vld [vmem:[%s18446_s28 + $0x1b8] sm:$0xff] }
  0xf3   : > { %v1026_v5 = vpop.f32.mrf.mxu2  ;;  %v870_v17 = vpop.f32.mrf.mxu0 }
  0xf4   : > { %v1105_v55 = vpop.f32.mrf.mxu3  ;;  %v1027_v60 = vadd.f32 %v1026_v5, %v948_v0  ;;  %v949_v52 = vpop.f32.mrf.mxu1  ;;  %v22746_v0 = vunpack.c.l.b16 %v19059_v32  ;;  %v22747_v5 = vunpack.c.h.b16 %v19059_v32  ;;  %v181_v32 = vld [vmem:[%s18446_s28 + $0x8] sm:$0xff] }
  0xf5   : > { %v950_v39 = vadd.f32 %v949_v52, %v870_v17  ;;  %v22750_v17 = vunpack.c.l.b16 %v19063_v41  ;;  %v533_v52 = vunpack.c.l.b16 %v301_v61 }
  0xf6   : > { %v19066_v20 = vadd.f32 %v1105_v55, %v1027_v60  ;;  %v22751_v55 = vunpack.c.h.b16 %v19063_v41  ;;  %v534_v60 = vunpack.c.h.b16 %v301_v61  ;;  %v587_v38 = vpack.c.b16 %v531_v62, %v22746_v0 }
  0xf7   : > { %v589_v33 = vpack.c.b16 %v533_v52, %v22750_v17 }
  0xf8   : > { %22782 = vst [vmem:[#allocation23_spill] sm:$0xff] %v19066_v20  ;;  %v588_v20 = vpack.c.b16 %v532_v40, %v22747_v5  ;;  %v590_v61 = vpack.c.b16 %v534_v60, %v22751_v55  ;;  %v180_v40 = vld [vmem:[%s18446_s28] sm:$0xff]  ;;  %v1159_v60 = vunpack.c.l.b16 %v181_v32 }
  0xf9   : > { %v1157_v52 = vunpack.c.l.b16 %v180_v40  ;;  %v1158_v17 = vunpack.c.h.b16 %v180_v40 }
  0xfb   : > { %v1028_v1 = vpop.f32.mrf.mxu2  ;;  %v873_v34 = vpop.f32.mrf.mxu0 }
  0xfc   : > { %v1107_v63 = vpop.f32.mrf.mxu3  ;;  %v1029_v22 = vadd.f32 %v1028_v1, %v950_v39  ;;  %v952_v3 = vpop.f32.mrf.mxu1 }
  0xfd   : > { %v953_v44 = vadd.f32 %v952_v3, %v873_v34  ;;  %v1160_v34 = vunpack.c.h.b16 %v181_v32  ;;  %v17342_v32 = vld [vmem:[%s22621_s1 + $0x2b0] sm:$0xff] }
  0xfe   : > { %v19086_v35 = vadd.f32 %v1107_v63, %v1029_v22  ;;  %912 = vmatmul.bf16.gmra.mxu0 %v587_v38  ;;  %v22783_v22 = vunpack.c.l.b16 %v18458_v27  ;;  %v22784_v63 = vunpack.c.h.b16 %v18458_v27  ;;  %v17350_v27 = vld [vmem:[%s22621_s1 + $0x2f0] sm:$0xff]  ;;  %2533 = vmatpush.bf16.msra.mxu2 %v17342_v32  ;;  %v22791_v32 = vunpack.c.l.b16 %v18470_v31 }
  0xff   : > { %991 = vmatmul.bf16.gmra.mxu1 %v588_v20  ;;  %2612 = vmatpush.bf16.msra.mxu3 %v17350_v27  ;;  %v22792_v27 = vunpack.c.l.b16 %v18539_v58 }
 0x100   : > { %1070 = vmatmul.bf16.gmra.mxu2 %v589_v33  ;;  %v1161_v38 = vpack.c.b16 %v22783_v22, %v1157_v52  ;;  %v1162_v33 = vpack.c.b16 %v22784_v63, %v1158_v17 }
 0x101   : > { %1149 = vmatmul.bf16.gmra.mxu3 %v590_v61  ;;  %v22785_v61 = vunpack.c.l.b16 %v18467_v30 }
 0x103   : > { %v1031_v62 = vpop.f32.mrf.mxu2  ;;  %v875_v39 = vpop.f32.mrf.mxu0 }
 0x104   : > { %v1110_v0 = vpop.f32.mrf.mxu3  ;;  %v1032_v1 = vadd.f32 %v1031_v62, %v953_v44  ;;  %v954_v5 = vpop.f32.mrf.mxu1  ;;  %v1163_v44 = vpack.c.b16 %v22785_v61, %v1159_v60  ;;  %v22786_v62 = vunpack.c.h.b16 %v18467_v30  ;;  %v17326_v30 = vld [vmem:[%s22621_s1 + $0x230] sm:$0xff]  ;;  %v22788_v61 = vunpack.c.l.b16 %v18533_v56 }
 0x105   : > { %v955_v16 = vadd.f32 %v954_v5, %v875_v39  ;;  %2375 = vmatpush.bf16.msra.mxu0 %v17326_v30  ;;  %v1167_v30 = vpack.c.b16 %v22792_v27, %v22791_v32 }
 0x106   : > { %v19090_v21 = vadd.f32 %v1110_v0, %v1032_v1  ;;  %v1164_v5 = vpack.c.b16 %v22786_v62, %v1160_v34  ;;  %v22789_v62 = vunpack.c.h.b16 %v18461_v28 }
 0x10b   : > { %v1033_v20 = vpop.f32.mrf.mxu2  ;;  %v878_v1 = vpop.f32.mrf.mxu0 }
 0x10c   : > { %v1112_v3 = vpop.f32.mrf.mxu3  ;;  %v1034_v0 = vadd.f32 %v1033_v20, %v955_v16  ;;  %v957_v39 = vpop.f32.mrf.mxu1  ;;  %v17334_v16 = vld [vmem:[%s22621_s1 + $0x270] sm:$0xff] }
 0x10d   : > { %v958_v40 = vadd.f32 %v957_v39, %v878_v1  ;;  %2454 = vmatpush.bf16.msra.mxu1 %v17334_v16  ;;  %v22793_v16 = vunpack.c.h.b16 %v18470_v31  ;;  %v17341_v31 = vld [vmem:[%s22621_s1 + $0x2a8] sm:$0xff] }
 0x10e   : > { %v19100_v55 = vadd.f32 %v1112_v3, %v1034_v0  ;;  %1473 = vmatmul.bf16.vlgmr.msrb.gmra.mxu0 %v1161_v38  ;;  %v22787_v3 = vunpack.c.l.b16 %v18461_v28  ;;  %2534 = vmatpush.bf16.msra.mxu2 %v17341_v31 }
 0x10f   : > { %1552 = vmatmul.bf16.vlgmr.msrb.gmra.mxu1 %v1162_v33 }
 0x110   : > { %1631 = vmatmul.bf16.vlgmr.msrb.gmra.mxu2 %v1163_v44  ;;  %v1165_v44 = vpack.c.b16 %v22788_v61, %v22787_v3 }
 0x111   : > { %1710 = vmatmul.bf16.vlgmr.msrb.gmra.mxu3 %v1164_v5  ;;  %v22790_v5 = vunpack.c.h.b16 %v18533_v56 }
 0x113   : > { %v1036_v17 = vpop.f32.mrf.mxu2  ;;  %v880_v34 = vpop.f32.mrf.mxu0  ;;  %v1166_v0 = vpack.c.b16 %v22790_v5, %v22789_v62  ;;  %v22795_v62 = vunpack.c.l.b16 %v18536_v57  ;;  %v22796_v5 = vunpack.c.l.b16 %v18581_v12 }
 0x114   : > { %v1115_v52 = vpop.f32.mrf.mxu3  ;;  %v1037_v60 = vadd.f32 %v1036_v17, %v958_v40  ;;  %v959_v22 = vpop.f32.mrf.mxu1  ;;  %v22794_v17 = vunpack.c.h.b16 %v18539_v58  ;;  %v17349_v58 = vld [vmem:[%s22621_s1 + $0x2e8] sm:$0xff] }
 0x115   : > { %v960_v38 = vadd.f32 %v959_v22, %v880_v34  ;;  %2613 = vmatpush.bf16.msra.mxu3 %v17349_v58 }
 0x116   : > { %v19114_v63 = vadd.f32 %v1115_v52, %v1037_v60  ;;  %v1168_v52 = vpack.c.b16 %v22794_v17, %v22793_v16  ;;  %v22799_v16 = vunpack.c.l.b16 %v18542_v59  ;;  %v22800_v17 = vunpack.c.l.b16 %v18587_v14 }
 0x11b   : > { %v1038_v33 = vpop.f32.mrf.mxu2  ;;  %v883_v39 = vpop.f32.mrf.mxu0 }
 0x11c   : > { %v1117_v20 = vpop.f32.mrf.mxu3  ;;  %v1039_v1 = vadd.f32 %v1038_v33, %v960_v38  ;;  %v962_v40 = vpop.f32.mrf.mxu1 }
 0x11d   : > { %v963_v60 = vadd.f32 %v962_v40, %v883_v39  ;;  %v22798_v39 = vunpack.c.h.b16 %v18581_v12  ;;  %v17333_v12 = vld [vmem:[%s22621_s1 + $0x268] sm:$0xff] }
 0x11e   : > { %v19132_v34 = vadd.f32 %v1117_v20, %v1039_v1  ;;  %1478 = vmatmul.bf16.gmra.mxu0 %v1165_v44  ;;  %v22797_v1 = vunpack.c.h.b16 %v18536_v57  ;;  %v17325_v57 = vld [vmem:[%s22621_s1 + $0x228] sm:$0xff]  ;;  %2455 = vmatpush.bf16.msra.mxu1 %v17333_v12 }
 0x11f   : > { %1557 = vmatmul.bf16.gmra.mxu1 %v1166_v0  ;;  %v1169_v0 = vpack.c.b16 %v22796_v5, %v22795_v62  ;;  %2376 = vmatpush.bf16.msra.mxu0 %v17325_v57  ;;  %v22803_v5 = vunpack.c.l.b16 %v18584_v13 }
 0x120   : > { %1636 = vmatmul.bf16.gmra.mxu2 %v1167_v30  ;;  %v1170_v40 = vpack.c.b16 %v22798_v39, %v22797_v1  ;;  %v22804_v1 = vunpack.c.l.b16 %v18617_v36  ;;  %v22805_v39 = vunpack.c.h.b16 %v18584_v13 }
 0x121   : > { %1715 = vmatmul.bf16.gmra.mxu3 %v1168_v52  ;;  %v1171_v52 = vpack.c.b16 %v22800_v17, %v22799_v16  ;;  %v22807_v17 = vunpack.c.l.b16 %v18590_v15 }
 0x123   : > { %v1041_v28 = vpop.f32.mrf.mxu2  ;;  %v885_v38 = vpop.f32.mrf.mxu0 }
 0x124   : > { %v1120_v56 = vpop.f32.mrf.mxu3  ;;  %v1042_v22 = vadd.f32 %v1041_v28, %v963_v60  ;;  %v964_v33 = vpop.f32.mrf.mxu1  ;;  %v22801_v60 = vunpack.c.h.b16 %v18542_v59  ;;  %v22802_v28 = vunpack.c.h.b16 %v18587_v14 }
 0x125   : > { %v965_v3 = vadd.f32 %v964_v33, %v885_v38 }
 0x126   : > { %v19134_v61 = vadd.f32 %v1120_v56, %v1042_v22  ;;  %v1172_v56 = vpack.c.b16 %v22802_v28, %v22801_v60  ;;  %v22809_v28 = vunpack.c.h.b16 %v18590_v15  ;;  %v17340_v15 = vld [vmem:[%s22621_s1 + $0x2a0] sm:$0xff] }
 0x127   : > { %2535 = vmatpush.bf16.msra.mxu2 %v17340_v15 }
 0x12b   : > { %v1043_v20 = vpop.f32.mrf.mxu2  ;;  %v888_v27 = vpop.f32.mrf.mxu0 }
 0x12c   : > { %v1122_v44 = vpop.f32.mrf.mxu3  ;;  %v1044_v32 = vadd.f32 %v1043_v20, %v965_v3  ;;  %v967_v30 = vpop.f32.mrf.mxu1 }
 0x12d   : > { %v968_v22 = vadd.f32 %v967_v30, %v888_v27 }
 0x12e   : > { %v19158_v38 = vadd.f32 %v1122_v44, %v1044_v32  ;;  %1483 = vmatmul.bf16.gmra.mxu0 %v1169_v0  ;;  %v1173_v0 = vpack.c.b16 %v22804_v1, %v22803_v5  ;;  %v22811_v1 = vunpack.c.l.b16 %v18620_v37 }
 0x12f   : > { %1562 = vmatmul.bf16.gmra.mxu1 %v1170_v40  ;;  %v22806_v40 = vunpack.c.h.b16 %v18617_v36 }
 0x130   : > { %1641 = vmatmul.bf16.gmra.mxu2 %v1171_v52  ;;  %v22808_v52 = vunpack.c.l.b16 %v18623_v42 }
 0x131   : > { %1720 = vmatmul.bf16.gmra.mxu3 %v1172_v56  ;;  %v1174_v32 = vpack.c.b16 %v22806_v40, %v22805_v39  ;;  %v22810_v56 = vunpack.c.h.b16 %v18623_v42  ;;  %v17348_v42 = vld [vmem:[%s22621_s1 + $0x2e0] sm:$0xff]  ;;  %v22813_v40 = vunpack.c.h.b16 %v18620_v37 }
 0x132   : > { %v1175_v60 = vpack.c.b16 %v22808_v52, %v22807_v17  ;;  %2614 = vmatpush.bf16.msra.mxu3 %v17348_v42  ;;  %v22815_v52 = vunpack.c.l.b16 %v18626_v43 }
 0x133   : > { %v1046_v59 = vpop.f32.mrf.mxu2  ;;  %v890_v3 = vpop.f32.mrf.mxu0 }
 0x134   : > { %v1125_v14 = vpop.f32.mrf.mxu3  ;;  %v1047_v33 = vadd.f32 %v1046_v59, %v968_v22  ;;  %v969_v31 = vpop.f32.mrf.mxu1  ;;  %v1176_v22 = vpack.c.b16 %v22810_v56, %v22809_v28  ;;  %v22817_v56 = vunpack.c.h.b16 %v18626_v43 }
 0x135   : > { %v970_v58 = vadd.f32 %v969_v31, %v890_v3 }
 0x136   : > { %v19166_v20 = vadd.f32 %v1125_v14, %v1047_v33 }
 0x13b   : > { %v1048_v44 = vpop.f32.mrf.mxu2  ;;  %v893_v30 = vpop.f32.mrf.mxu0 }
 0x13c   : > { %v1127_v62 = vpop.f32.mrf.mxu3  ;;  %v1049_v27 = vadd.f32 %v1048_v44, %v970_v58  ;;  %v972_v16 = vpop.f32.mrf.mxu1  ;;  %v17324_v58 = vld [vmem:[%s22621_s1 + $0x220] sm:$0xff] }
 0x13d   : > { %v973_v57 = vadd.f32 %v972_v16, %v893_v30  ;;  %v17332_v44 = vld [vmem:[%s22621_s1 + $0x260] sm:$0xff]  ;;  %2377 = vmatpush.bf16.msra.mxu0 %v17324_v58  ;;  %v22820_v58 = vunpack.c.l.b16 %v18701_v25 }
 0x13e   : > { %v19184_v12 = vadd.f32 %v1127_v62, %v1049_v27  ;;  %1488 = vmatmul.bf16.gmra.mxu0 %v1173_v0  ;;  %2456 = vmatpush.bf16.msra.mxu1 %v17332_v44  ;;  %v22812_v0 = vunpack.c.l.b16 %v18665_v8 }
 0x13f   : > { %1567 = vmatmul.bf16.gmra.mxu1 %v1174_v32  ;;  %v22814_v32 = vunpack.c.h.b16 %v18665_v8 }
 0x140   : > { %1646 = vmatmul.bf16.gmra.mxu2 %v1175_v60  ;;  %v1177_v39 = vpack.c.b16 %v22812_v0, %v22811_v1  ;;  %v22816_v60 = vunpack.c.l.b16 %v18671_v10 }
 0x141   : > { %1725 = vmatmul.bf16.gmra.mxu3 %v1176_v22  ;;  %v1178_v27 = vpack.c.b16 %v22814_v32, %v22813_v40  ;;  %v22818_v22 = vunpack.c.h.b16 %v18671_v10  ;;  %v22819_v10 = vunpack.c.l.b16 %v18668_v9  ;;  %v22823_v32 = vunpack.c.l.b16 %v18674_v11 }
 0x142   : > { %v1179_v28 = vpack.c.b16 %v22816_v60, %v22815_v52 }
 0x143   : > { %v1051_v13 = vpop.f32.mrf.mxu2  ;;  %v895_v14 = vpop.f32.mrf.mxu0  ;;  %v1181_v44 = vpack.c.b16 %v22820_v58, %v22819_v10  ;;  %v22829_v10 = vunpack.c.h.b16 %v18704_v51  ;;  %v22830_v58 = vunpack.c.h.b16 %v18749_v45 }
 0x144   : > { %v1130_v36 = vpop.f32.mrf.mxu3  ;;  %v1052_v59 = vadd.f32 %v1051_v13, %v973_v57  ;;  %v974_v33 = vpop.f32.mrf.mxu1  ;;  %v1180_v57 = vpack.c.b16 %v22818_v22, %v22817_v56 }
 0x145   : > { %v975_v3 = vadd.f32 %v974_v33, %v895_v14 }
 0x146   : > { %v19186_v31 = vadd.f32 %v1130_v36, %v1052_v59 }
 0x14b   : > { %v1053_v62 = vpop.f32.mrf.mxu2  ;;  %v898_v16 = vpop.f32.mrf.mxu0 }
 0x14c   : > { %v1132_v5 = vpop.f32.mrf.mxu3  ;;  %v1054_v30 = vadd.f32 %v1053_v62, %v975_v3  ;;  %v977_v17 = vpop.f32.mrf.mxu1  ;;  %v22821_v62 = vunpack.c.h.b16 %v18668_v9  ;;  %v17339_v9 = vld [vmem:[%s22621_s1 + $0x298] sm:$0xff] }
 0x14d   : > { %v978_v13 = vadd.f32 %v977_v17, %v898_v16  ;;  %v22825_v16 = vunpack.c.h.b16 %v18674_v11  ;;  %v22826_v17 = vunpack.c.h.b16 %v18707_v49  ;;  %2536 = vmatpush.bf16.msra.mxu2 %v17339_v9 }
 0x14e   : > { %v19216_v36 = vadd.f32 %v1132_v5, %v1054_v30  ;;  %1493 = vmatmul.bf16.gmra.mxu0 %v1177_v39  ;;  %v22822_v5 = vunpack.c.h.b16 %v18701_v25  ;;  %v17347_v25 = vld [vmem:[%s22621_s1 + $0x2d8] sm:$0xff] }
 0x14f   : > { %1572 = vmatmul.bf16.gmra.mxu1 %v1178_v27  ;;  %v22824_v27 = vunpack.c.l.b16 %v18707_v49  ;;  %v1184_v52 = vpack.c.b16 %v22826_v17, %v22825_v16  ;;  %2615 = vmatpush.bf16.msra.mxu3 %v17347_v25 }
 0x150   : > { %1651 = vmatmul.bf16.gmra.mxu2 %v1179_v28  ;;  %v1182_v1 = vpack.c.b16 %v22822_v5, %v22821_v62 }
 0x151   : > { %1730 = vmatmul.bf16.gmra.mxu3 %v1180_v57  ;;  %v1183_v30 = vpack.c.b16 %v22824_v27, %v22823_v32  ;;  %v22833_v32 = vunpack.c.h.b16 %v18710_v29  ;;  %v22834_v27 = vunpack.c.h.b16 %v18755_v24 }
 0x153   : > { %v1056_v37 = vpop.f32.mrf.mxu2  ;;  %v900_v14 = vpop.f32.mrf.mxu0 }
 0x154   : > { %v1135_v8 = vpop.f32.mrf.mxu3  ;;  %v1057_v59 = vadd.f32 %v1056_v37, %v978_v13  ;;  %v979_v33 = vpop.f32.mrf.mxu1 }
 0x155   : > { %v980_v3 = vadd.f32 %v979_v33, %v900_v14 }
 0x156   : > { %v19218_v15 = vadd.f32 %v1135_v8, %v1057_v59  ;;  %v17323_v8 = vld [vmem:[%s22621_s1 + $0x218] sm:$0xff] }
 0x157   : > { %v17331_v59 = vld [vmem:[%s22621_s1 + $0x258] sm:$0xff]  ;;  %2378 = vmatpush.bf16.msra.mxu0 %v17323_v8 }
 0x158   : > { %2457 = vmatpush.bf16.msra.mxu1 %v17331_v59 }
 0x15b   : > { %v1058_v42 = vpop.f32.mrf.mxu2  ;;  %v903_v39 = vpop.f32.mrf.mxu0 }
 0x15c   : > { %v1137_v43 = vpop.f32.mrf.mxu3  ;;  %v1059_v0 = vadd.f32 %v1058_v42, %v980_v3  ;;  %v982_v40 = vpop.f32.mrf.mxu1  ;;  %v22827_v3 = vunpack.c.l.b16 %v18704_v51  ;;  %v22828_v42 = vunpack.c.l.b16 %v18749_v45 }
 0x15d   : > { %v983_v60 = vadd.f32 %v982_v40, %v903_v39  ;;  %v22832_v39 = vunpack.c.l.b16 %v18755_v24  ;;  %v22835_v24 = vunpack.c.l.b16 %v18752_v47 }
 0x15e   : > { %v19236_v28 = vadd.f32 %v1137_v43, %v1059_v0  ;;  %1498 = vmatmul.bf16.gmra.mxu0 %v1181_v44  ;;  %v1185_v43 = vpack.c.b16 %v22828_v42, %v22827_v3  ;;  %v1186_v44 = vpack.c.b16 %v22830_v58, %v22829_v10  ;;  %v22831_v0 = vunpack.c.l.b16 %v18710_v29 }
 0x15f   : > { %1577 = vmatmul.bf16.gmra.mxu1 %v1182_v1  ;;  %v22839_v3 = vunpack.c.l.b16 %v18758_v54  ;;  %v22840_v42 = vunpack.c.l.b16 %v18791_v46  ;;  %v22841_v10 = vunpack.c.h.b16 %v18758_v54  ;;  %v22842_v58 = vunpack.c.h.b16 %v18791_v46  ;;  %v17322_v46 = vld [vmem:[%s22621_s1 + $0x210] sm:$0xff] }
 0x160   : > { %1656 = vmatmul.bf16.gmra.mxu2 %v1183_v30  ;;  %v1187_v40 = vpack.c.b16 %v22832_v39, %v22831_v0  ;;  %v1188_v30 = vpack.c.b16 %v22834_v27, %v22833_v32  ;;  %v17330_v54 = vld [vmem:[%s22621_s1 + $0x250] sm:$0xff]  ;;  %2379 = vmatpush.bf16.msra.mxu0 %v17322_v46  ;;  %v22851_v46 = vunpack.c.l.b16 %v18836_v23 }
 0x161   : > { %1735 = vmatmul.bf16.gmra.mxu3 %v1184_v52  ;;  %2458 = vmatpush.bf16.msra.mxu1 %v17330_v54  ;;  %v22852_v54 = vunpack.c.l.b16 %v18869_v2 }
 0x163   : > { %v1061_v11 = vpop.f32.mrf.mxu2  ;;  %v905_v22 = vpop.f32.mrf.mxu0 }
 0x164   : > { %v1140_v49 = vpop.f32.mrf.mxu3  ;;  %v1062_v56 = vadd.f32 %v1061_v11, %v983_v60  ;;  %v984_v57 = vpop.f32.mrf.mxu1 }
 0x165   : > { %v985_v13 = vadd.f32 %v984_v57, %v905_v22  ;;  %v22837_v57 = vunpack.c.h.b16 %v18752_v47  ;;  %v17346_v47 = vld [vmem:[%s22621_s1 + $0x2d0] sm:$0xff] }
 0x166   : > { %v19244_v37 = vadd.f32 %v1140_v49, %v1062_v56  ;;  %v22836_v56 = vunpack.c.l.b16 %v18785_v4  ;;  %2616 = vmatpush.bf16.msra.mxu3 %v17346_v47 }
 0x168   : > { %v1189_v22 = vpack.c.b16 %v22836_v56, %v22835_v24 }
 0x16b   : > { %v1063_v14 = vpop.f32.mrf.mxu2  ;;  %v908_v5 = vpop.f32.mrf.mxu0 }
 0x16c   : > { %v1142_v33 = vpop.f32.mrf.mxu3  ;;  %v1064_v62 = vadd.f32 %v1063_v14, %v985_v13  ;;  %v987_v1 = vpop.f32.mrf.mxu1  ;;  %v22838_v13 = vunpack.c.h.b16 %v18785_v4  ;;  %v17338_v4 = vld [vmem:[%s22621_s1 + $0x290] sm:$0xff] }
 0x16d   : > { %v988_v16 = vadd.f32 %v987_v1, %v908_v5  ;;  %2537 = vmatpush.bf16.msra.mxu2 %v17338_v4 }
 0x16e   : > { %v19268_v17 = vadd.f32 %v1142_v33, %v1064_v62  ;;  %1503 = vmatmul.bf16.gmra.mxu0 %v1185_v43  ;;  %v1190_v8 = vpack.c.b16 %v22838_v13, %v22837_v57  ;;  %v1191_v43 = vpack.c.b16 %v22840_v42, %v22839_v3  ;;  %v22848_v57 = vunpack.c.l.b16 %v18839_v7 }
 0x16f   : > { %1582 = vmatmul.bf16.gmra.mxu1 %v1186_v44  ;;  %v1192_v44 = vpack.c.b16 %v22842_v58, %v22841_v10 }
 0x170   : > { %1661 = vmatmul.bf16.gmra.mxu2 %v1187_v40 }
 0x171   : > { %1740 = vmatmul.bf16.gmra.mxu3 %v1188_v30 }
 0x173   : > { %v1066_v51 = vpop.f32.mrf.mxu2  ;;  %v910_v60 = vpop.f32.mrf.mxu0 }
 0x174   : > { %v1145_v45 = vpop.f32.mrf.mxu3  ;;  %v1067_v52 = vadd.f32 %v1066_v51, %v988_v16  ;;  %v989_v9 = vpop.f32.mrf.mxu1 }
 0x175   : > { %v990_v25 = vadd.f32 %v989_v9, %v910_v60  ;;  %v22845_v9 = vunpack.c.h.b16 %v18788_v6 }
 0x176   : > { %v19270_v11 = vadd.f32 %v1145_v45, %v1067_v52  ;;  %v22843_v45 = vunpack.c.l.b16 %v18788_v6  ;;  %v22844_v52 = vunpack.c.l.b16 %v18833_v48 }
 0x178   : > { %v1193_v60 = vpack.c.b16 %v22844_v52, %v22843_v45  ;;  %v22857_v52 = vunpack.c.h.b16 %v18842_v19 }
 0x17b   : > { %v1068_v49 = vpop.f32.mrf.mxu2  ;;  %v913_v14 = vpop.f32.mrf.mxu0 }
 0x17c   : > { %v1147_v29 = vpop.f32.mrf.mxu3  ;;  %v1069_v59 = vadd.f32 %v1068_v49, %v990_v25  ;;  %v992_v33 = vpop.f32.mrf.mxu1  ;;  %v22846_v25 = vunpack.c.h.b16 %v18833_v48 }
 0x17d   : > { %v993_v62 = vadd.f32 %v992_v33, %v913_v14 }
 0x17e   : > { %v19288_v5 = vadd.f32 %v1147_v29, %v1069_v59  ;;  %1508 = vmatmul.bf16.gmra.mxu0 %v1189_v22  ;;  %v1194_v49 = vpack.c.b16 %v22846_v25, %v22845_v9  ;;  %v22847_v22 = vunpack.c.l.b16 %v18794_v53  ;;  %v22850_v59 = vunpack.c.h.b16 %v18839_v7  ;;  %v22859_v25 = vld [vmem:[#allocation8_spill] sm:$0xff] }
 0x17f   : > { %1587 = vmatmul.bf16.gmra.mxu1 %v1190_v8  ;;  %v22849_v8 = vunpack.c.h.b16 %v18794_v53 }
 0x180   : > { %1666 = vmatmul.bf16.gmra.mxu2 %v1191_v43  ;;  %v1195_v13 = vpack.c.b16 %v22848_v57, %v22847_v22 }
 0x181   : > { %1745 = vmatmul.bf16.gmra.mxu3 %v1192_v44  ;;  %v1196_v14 = vpack.c.b16 %v22850_v59, %v22849_v8 }
 0x183   : > { %v1071_v1 = vpop.f32.mrf.mxu2  ;;  %v915_v40 = vpop.f32.mrf.mxu0 }
 0x184   : > { %v1150_v0 = vpop.f32.mrf.mxu3  ;;  %v1072_v39 = vadd.f32 %v1071_v1, %v993_v62  ;;  %v994_v32 = vpop.f32.mrf.mxu1  ;;  %v17345_v62 = vld [vmem:[%s22621_s1 + $0x2c8] sm:$0xff]  ;;  %v22853_v1 = vunpack.c.h.b16 %v18836_v23 }
 0x185   : > { %v995_v27 = vadd.f32 %v994_v32, %v915_v40  ;;  %2617 = vmatpush.bf16.msra.mxu3 %v17345_v62  ;;  %v17329_v23 = vld [vmem:[%s22621_s1 + $0x248] sm:$0xff] }
 0x186   : > { %v19302_v30 = vadd.f32 %v1150_v0, %v1072_v39  ;;  %v22854_v0 = vunpack.c.h.b16 %v18869_v2  ;;  %v17321_v2 = vld [vmem:[%s22621_s1 + $0x208] sm:$0xff]  ;;  %2459 = vmatpush.bf16.msra.mxu1 %v17329_v23 }
 0x187   : > { %2380 = vmatpush.bf16.msra.mxu0 %v17321_v2  ;;  %v22874_v2 = vld [vmem:[#allocation15_spill] sm:$0xff] }
 0x188   : > { %v1198_v39 = vpack.c.b16 %v22854_v0, %v22853_v1 }
 0x18b   : > { %v1073_v16 = vpop.f32.mrf.mxu2  ;;  %v1474_v24 = vpop.f32.mrf.mxu0 }
 0x18c   : > { %v1152_v51 = vpop.f32.mrf.mxu3  ;;  %v1074_v29 = vadd.f32 %v1073_v16, %v995_v27  ;;  %v1553_v56 = vpop.f32.mrf.mxu1  ;;  %v1475_v33 = vadd.f32 %v1474_v24, %v18880_v50  ;;  %v17337_v50 = vld [vmem:[%s22621_s1 + $0x288] sm:$0xff]  ;;  %v22855_v16 = vunpack.c.l.b16 %v18842_v19 }
 0x18d   : > { %2538 = vmatpush.bf16.msra.mxu2 %v17337_v50 }
 0x18e   : > { %v19321_v3 = vadd.f32 %v1152_v51, %v1074_v29  ;;  %v1554_v6 = vadd.f32 %v1553_v56, %v1475_v33  ;;  %1513 = vmatmul.bf16.gmra.mxu0 %v1193_v60  ;;  %v22856_v51 = vunpack.c.l.b16 %v18875_v26  ;;  %v22858_v60 = vunpack.c.h.b16 %v18875_v26 }
 0x18f   : > { %1592 = vmatmul.bf16.gmra.mxu1 %v1194_v49 }
 0x190   : > { %1671 = vmatmul.bf16.gmra.mxu2 %v1195_v13  ;;  %v1199_v45 = vpack.c.b16 %v22856_v51, %v22855_v16  ;;  %v1200_v9 = vpack.c.b16 %v22858_v60, %v22857_v52  ;;  %v22860_v13 = vld [vmem:[#allocation9_spill] sm:$0xff] }
 0x191   : > { %1750 = vmatmul.bf16.gmra.mxu3 %v1196_v14 }
 0x193   : > { %v1632_v48 = vpop.f32.mrf.mxu2  ;;  %v1476_v10 = vpop.f32.mrf.mxu0 }
 0x194   : > { %v1711_v42 = vpop.f32.mrf.mxu3  ;;  %v1633_v43 = vadd.f32 %v1632_v48, %v1554_v6  ;;  %v1555_v58 = vpop.f32.mrf.mxu1  ;;  %v1477_v44 = vadd.f32 %v1476_v10, %v18912_v18  ;;  %v1197_v18 = vpack.c.b16 %v22852_v54, %v22851_v46  ;;  %v22861_v48 = vld [vmem:[#allocation2_spill] sm:$0xff]  ;;  %v22867_v46 = vld [vmem:[#allocation3_spill] sm:$0xff] }
 0x195   : > { %v22868_v54 = vunpack.c.l.b16 %v22867_v46 }
 0x196   : > { %v19324_v53 = vadd.f32 %v1711_v42, %v1633_v43  ;;  %v1556_v7 = vadd.f32 %v1555_v58, %v1477_v44  ;;  %v22862_v42 = vunpack.c.l.b16 %v22861_v48  ;;  %v22863_v43 = vld [vmem:[#allocation4_spill] sm:$0xff]  ;;  %v22865_v44 = vunpack.c.h.b16 %v22861_v48 }
 0x197   : > { %v22864_v10 = vunpack.c.l.b16 %v22863_v43 }
 0x199   : > { %v1201_v58 = vpack.c.b16 %v22864_v10, %v22862_v42 }
 0x19b   : > { %v1634_v4 = vpop.f32.mrf.mxu2  ;;  %v1479_v32 = vpop.f32.mrf.mxu0 }
 0x19c   : > { %v1713_v47 = vpop.f32.mrf.mxu3  ;;  %v1635_v40 = vadd.f32 %v1634_v4, %v1556_v7  ;;  %v1558_v27 = vpop.f32.mrf.mxu1  ;;  %v1480_v49 = vadd.f32 %v1479_v32, %v22859_v25  ;;  %v22866_v7 = vunpack.c.h.b16 %v22863_v43 }
 0x19e   : > { %v19349_v29 = vadd.f32 %v1713_v47, %v1635_v40  ;;  %v1559_v24 = vadd.f32 %v1558_v27, %v1480_v49  ;;  %1518 = vmatmul.bf16.gmra.mxu0 %v1197_v18  ;;  %v1202_v50 = vpack.c.b16 %v22866_v7, %v22865_v44  ;;  %v22869_v18 = vld [vmem:[#allocation6_spill] sm:$0xff] }
 0x19f   : > { %1597 = vmatmul.bf16.gmra.mxu1 %v1198_v39  ;;  %v22870_v1 = vunpack.c.l.b16 %v22869_v18  ;;  %v22871_v39 = vunpack.c.h.b16 %v22867_v46  ;;  %v22872_v40 = vunpack.c.h.b16 %v22869_v18  ;;  %v22873_v27 = vld [vmem:[#allocation14_spill] sm:$0xff] }
 0x1a0   : > { %1676 = vmatmul.bf16.gmra.mxu2 %v1199_v45 }
 0x1a1   : > { %1755 = vmatmul.bf16.gmra.mxu3 %v1200_v9  ;;  %v1203_v0 = vpack.c.b16 %v22870_v1, %v22868_v54  ;;  %v1204_v32 = vpack.c.b16 %v22872_v40, %v22871_v39  ;;  %v22887_v39 = vld [vmem:[#allocation20_spill] sm:$0xff] }
 0x1a3   : > { %v1637_v19 = vpop.f32.mrf.mxu2  ;;  %v1481_v22 = vpop.f32.mrf.mxu0 }
 0x1a4   : > { %v1716_v26 = vpop.f32.mrf.mxu3  ;;  %v1638_v56 = vadd.f32 %v1637_v19, %v1559_v24  ;;  %v1560_v57 = vpop.f32.mrf.mxu1  ;;  %v1482_v8 = vadd.f32 %v1481_v22, %v22860_v13  ;;  %v17336_v19 = vld [vmem:[%s22621_s1 + $0x280] sm:$0xff] }
 0x1a5   : > { %v17320_v22 = vld [vmem:[%s22621_s1 + $0x200] sm:$0xff]  ;;  %2539 = vmatpush.bf16.msra.mxu2 %v17336_v19 }
 0x1a6   : > { %v19358_v59 = vadd.f32 %v1716_v26, %v1638_v56  ;;  %v1561_v14 = vadd.f32 %v1560_v57, %v1482_v8  ;;  %v17344_v56 = vld [vmem:[%s22621_s1 + $0x2c0] sm:$0xff]  ;;  %2381 = vmatpush.bf16.msra.mxu0 %v17320_v22 }
 0x1a7   : > { %v17328_v57 = vld [vmem:[%s22621_s1 + $0x240] sm:$0xff]  ;;  %2618 = vmatpush.bf16.msra.mxu3 %v17344_v56  ;;  %v22889_v56 = vld [vmem:[#allocation11_spill] sm:$0xff] }
 0x1a8   : > { %2460 = vmatpush.bf16.msra.mxu1 %v17328_v57  ;;  %v22890_v22 = vunpack.c.l.b16 %v22889_v56  ;;  %v22891_v57 = vld [vmem:[#allocation16_spill] sm:$0xff] }
 0x1ab   : > { %v1639_v33 = vpop.f32.mrf.mxu2  ;;  %v1484_v4 = vpop.f32.mrf.mxu0 }
 0x1ac   : > { %v1718_v6 = vpop.f32.mrf.mxu3  ;;  %v1640_v62 = vadd.f32 %v1639_v33, %v1561_v14  ;;  %v1563_v47 = vpop.f32.mrf.mxu1  ;;  %v1485_v16 = vadd.f32 %v1484_v4, %v22873_v27  ;;  %v22875_v14 = vld [vmem:[#allocation5_spill] sm:$0xff] }
 0x1ad   : > { %v22876_v33 = vunpack.c.l.b16 %v22875_v14  ;;  %v22879_v43 = vunpack.c.h.b16 %v22875_v14  ;;  %v22893_v14 = vunpack.c.h.b16 %v22889_v56  ;;  %v22902_v56 = vld [vmem:[#allocation17_spill] sm:$0xff] }
 0x1ae   : > { %v19377_v51 = vadd.f32 %v1718_v6, %v1640_v62  ;;  %v1564_v45 = vadd.f32 %v1563_v47, %v1485_v16  ;;  %1523 = vmatmul.bf16.gmra.mxu0 %v1201_v58  ;;  %v22877_v6 = vld [vmem:[#allocation10_spill] sm:$0xff]  ;;  %v22881_v62 = vld [vmem:[#allocation7_spill] sm:$0xff]  ;;  %v22883_v47 = vld [vmem:[#allocation12_spill] sm:$0xff] }
 0x1af   : > { %1602 = vmatmul.bf16.gmra.mxu1 %v1202_v50  ;;  %v22878_v48 = vunpack.c.l.b16 %v22877_v6  ;;  %v22880_v10 = vunpack.c.h.b16 %v22877_v6  ;;  %v22882_v4 = vunpack.c.l.b16 %v22881_v62  ;;  %v22884_v46 = vunpack.c.l.b16 %v22883_v47 }
 0x1b0   : > { %1681 = vmatmul.bf16.gmra.mxu2 %v1203_v0  ;;  %v22885_v18 = vunpack.c.h.b16 %v22881_v62  ;;  %v22886_v1 = vunpack.c.h.b16 %v22883_v47 }
 0x1b1   : > { %1760 = vmatmul.bf16.gmra.mxu3 %v1204_v32  ;;  %v1205_v42 = vpack.c.b16 %v22878_v48, %v22876_v33  ;;  %v1206_v58 = vpack.c.b16 %v22880_v10, %v22879_v43  ;;  %v1207_v54 = vpack.c.b16 %v22884_v46, %v22882_v4  ;;  %v22894_v33 = vunpack.c.h.b16 %v22891_v57  ;;  %v22895_v10 = vld [vmem:[#allocation13_spill] sm:$0xff]  ;;  %v22901_v46 = vld [vmem:[#allocation23_spill] sm:$0xff] }
 0x1b2   : > { %v1208_v0 = vpack.c.b16 %v22886_v1, %v22885_v18  ;;  %v22899_v62 = vunpack.c.h.b16 %v22895_v10 }
 0x1b3   : > { %v1642_v52 = vpop.f32.mrf.mxu2  ;;  %v1486_v25 = vpop.f32.mrf.mxu0  ;;  %v1210_v6 = vpack.c.b16 %v22894_v33, %v22893_v14 }
 0x1b4   : > { %v1721_v60 = vpop.f32.mrf.mxu3  ;;  %v1643_v9 = vadd.f32 %v1642_v52, %v1564_v45  ;;  %v1565_v49 = vpop.f32.mrf.mxu1  ;;  %v1487_v23 = vadd.f32 %v1486_v25, %v22874_v2  ;;  %v22888_v25 = vld [vmem:[#allocation21_spill] sm:$0xff] }
 0x1b6   : > { %v19380_v24 = vadd.f32 %v1721_v60, %v1643_v9  ;;  %v1566_v26 = vadd.f32 %v1565_v49, %v1487_v23 }
 0x1bb   : > { %v1644_v13 = vpop.f32.mrf.mxu2  ;;  %v1489_v7 = vpop.f32.mrf.mxu0 }
 0x1bc   : > { %v1723_v8 = vpop.f32.mrf.mxu3  ;;  %v1645_v44 = vadd.f32 %v1644_v13, %v1566_v26  ;;  %v1568_v50 = vpop.f32.mrf.mxu1  ;;  %v1490_v40 = vadd.f32 %v1489_v7, %v22887_v39  ;;  %v22892_v13 = vunpack.c.l.b16 %v22891_v57  ;;  %v17439_v39 = vld [vmem:[%s22621_s1 + $0x3f8] sm:$0xff]  ;;  %v22904_v57 = vld [vmem:[#allocation22_spill] sm:$0xff] }
 0x1bd   : > { %3548 = vmatpush.bf16.msrb.mxu3 %v17439_v39  ;;  %v22907_v14 = vunpack.c.h.b16 %v22904_v57 }
 0x1be   : > { %v19411_v32 = vadd.f32 %v1723_v8, %v1645_v44  ;;  %v1569_v27 = vadd.f32 %v1568_v50, %v1490_v40  ;;  %1528 = vmatmul.bf16.gmra.mxu0 %v1205_v42  ;;  %v1209_v8 = vpack.c.b16 %v22892_v13, %v22890_v22  ;;  %v22897_v44 = vld [vmem:[#allocation18_spill] sm:$0xff]  ;;  %v22903_v22 = vunpack.c.l.b16 %v22902_v56 }
 0x1bf   : > { %1607 = vmatmul.bf16.gmra.mxu1 %v1206_v58  ;;  %v22896_v58 = vunpack.c.l.b16 %v22895_v10  ;;  %v22898_v7 = vunpack.c.l.b16 %v22897_v44  ;;  %v22900_v4 = vunpack.c.h.b16 %v22897_v44  ;;  %v22905_v13 = vunpack.c.l.b16 %v22904_v57 }
 0x1c0   : > { %1686 = vmatmul.bf16.gmra.mxu2 %v1207_v54 }
 0x1c1   : > { %1765 = vmatmul.bf16.gmra.mxu3 %v1208_v0  ;;  %v1211_v50 = vpack.c.b16 %v22898_v7, %v22896_v58  ;;  %v1212_v47 = vpack.c.b16 %v22900_v4, %v22899_v62  ;;  %v17431_v0 = vld [vmem:[%s22621_s1 + $0x3b8] sm:$0xff]  ;;  %v22910_v58 = vunpack.c.l.b16 %v19063_v41 }
 0x1c2   : > { %3469 = vmatpush.bf16.msrb.mxu2 %v17431_v0 }
 0x1c3   : > { %v1647_v16 = vpop.f32.mrf.mxu2  ;;  %v1491_v60 = vpop.f32.mrf.mxu0 }
 0x1c4   : > { %v1726_v45 = vpop.f32.mrf.mxu3  ;;  %v1648_v52 = vadd.f32 %v1647_v16, %v1569_v27  ;;  %v1570_v9 = vpop.f32.mrf.mxu1  ;;  %v1492_v49 = vadd.f32 %v1491_v60, %v22888_v25  ;;  %v17415_v25 = vld [vmem:[%s22621_s1 + $0x338] sm:$0xff] }
 0x1c5   : > { %3311 = vmatpush.bf16.msrb.mxu0 %v17415_v25  ;;  %v12696_v25 = vld [vmem:[%s18446_s28 + $0x28] sm:$0xf] }
 0x1c6   : > { %v19414_v2 = vadd.f32 %v1726_v45, %v1648_v52  ;;  %v1571_v23 = vadd.f32 %v1570_v9, %v1492_v49  ;;  %v17423_v49 = vld [vmem:[%s22621_s1 + $0x378] sm:$0xff] }
 0x1c7   : > { %3390 = vmatpush.bf16.msrb.mxu1 %v17423_v49  ;;  %v17267_v49 = vld [vmem:[%s18446_s28 + $0x34] sm:$0xf0] }
 0x1cb   : > { %v1649_v19 = vpop.f32.mrf.mxu2  ;;  %v1494_v42 = vpop.f32.mrf.mxu0 }
 0x1cc   : > { %v1728_v26 = vpop.f32.mrf.mxu3  ;;  %v1650_v48 = vadd.f32 %v1649_v19, %v1571_v23  ;;  %v1573_v43 = vpop.f32.mrf.mxu1  ;;  %v1495_v54 = vadd.f32 %v1494_v42, %v22901_v46 }
 0x1ce   : > { %v19433_v18 = vadd.f32 %v1728_v26, %v1650_v48  ;;  %v1574_v1 = vadd.f32 %v1573_v43, %v1495_v54  ;;  %1533 = vmatmul.bf16.gmra.mxu0 %v1209_v8  ;;  %v22906_v8 = vunpack.c.h.b16 %v22902_v56  ;;  %v22908_v43 = vld [vmem:[#allocation19_spill] sm:$0xff] }
 0x1cf   : > { %1612 = vmatmul.bf16.gmra.mxu1 %v1210_v6  ;;  %v22909_v10 = vunpack.c.l.b16 %v22908_v43  ;;  %v22911_v7 = vunpack.c.h.b16 %v22908_v43  ;;  %v17438_v43 = vld [vmem:[%s22621_s1 + $0x3f0] sm:$0xff] }
 0x1d0   : > { %1691 = vmatmul.bf16.gmra.mxu2 %v1211_v50  ;;  %v1214_v33 = vpack.c.b16 %v22907_v14, %v22906_v8  ;;  %v22912_v50 = vunpack.c.h.b16 %v19063_v41  ;;  %v12697_v14 = vor.u32 %v17267_v49, %v12696_v25  ;;  %3549 = vmatpush.bf16.msrb.mxu3 %v17438_v43 }
 0x1d1   : > { %1770 = vmatmul.bf16.gmra.mxu3 %v1212_v47  ;;  %v1215_v44 = vpack.c.b16 %v22910_v58, %v22909_v10  ;;  %v17422_v10 = vld [vmem:[%s22621_s1 + $0x370] sm:$0xff] }
 0x1d2   : > { %v1216_v62 = vpack.c.b16 %v22912_v50, %v22911_v7  ;;  %3391 = vmatpush.bf16.msrb.mxu1 %v17422_v10  ;;  %v17429_v10 = vld [vmem:[%s22621_s1 + $0x3a8] sm:$0xff] }
 0x1d3   : > { %v1652_v40 = vpop.f32.mrf.mxu2  ;;  %v1496_v45 = vpop.f32.mrf.mxu0 }
 0x1d4   : > { %v1731_v27 = vpop.f32.mrf.mxu3  ;;  %v1653_v16 = vadd.f32 %v1652_v40, %v1574_v1  ;;  %v1575_v52 = vpop.f32.mrf.mxu1  ;;  %v1497_v60 = vadd.f32 %v1496_v45, %v19086_v35  ;;  %v1213_v35 = vpack.c.b16 %v22905_v13, %v22903_v22  ;;  %v17266_v45 = vld [vmem:[%s18446_s28 + $0x2c] sm:$0xf0] }
 0x1d6   : > { %v19442_v9 = vadd.f32 %v1731_v27, %v1653_v16  ;;  %v1576_v23 = vadd.f32 %v1575_v52, %v1497_v60  ;;  %v12688_v16 = vld [vmem:[%s18446_s28 + $0x20] sm:$0xf]  ;;  %v17264_v52 = vld [vmem:[%s18446_s28 + $0x24] sm:$0xf]  ;;  %v12690_v60 = vld [vmem:[%s18446_s28 + $0x30] sm:$0xf0] }
 0x1d7   : > { %v12689_v22 = vor.u32 %v17266_v45, %v12688_v16  ;;  %v12693_v57 = vor.u32 %v17264_v52, %v12690_v60  ;;  %v17269_v16 = vld [vmem:[%s18446_s28 + $0x4c] sm:$0xf]  ;;  %v12714_v45 = vld [vmem:[%s18446_s28 + $0x58] sm:$0xf0] }
 0x1db   : > { %v1654_v19 = vpop.f32.mrf.mxu2  ;;  %v1499_v48 = vpop.f32.mrf.mxu0 }
 0x1dc   : > { %v1733_v26 = vpop.f32.mrf.mxu3  ;;  %v1655_v6 = vadd.f32 %v1654_v19, %v1576_v23  ;;  %v1578_v42 = vpop.f32.mrf.mxu1  ;;  %v1500_v4 = vadd.f32 %v1499_v48, %v19090_v21  ;;  %v17265_v23 = vld [vmem:[%s18446_s28 + $0x2c] sm:$0xf]  ;;  %v12698_v19 = vld [vmem:[%s18446_s28 + $0x38] sm:$0xf0]  ;;  %v17430_v48 = vld [vmem:[%s22621_s1 + $0x3b0] sm:$0xff] }
 0x1dd   : > { %3470 = vmatpush.bf16.msrb.mxu2 %v17430_v48 }
 0x1de   : > { %v19467_v47 = vadd.f32 %v1733_v26, %v1655_v6  ;;  %v1579_v46 = vadd.f32 %v1578_v42, %v1500_v4  ;;  %1538 = vmatmul.bf16.gmra.mxu0 %v1213_v35 }
 0x1df   : > { %1617 = vmatmul.bf16.gmra.mxu1 %v1214_v33 }
 0x1e0   : > { %1696 = vmatmul.bf16.gmra.mxu2 %v1215_v44 }
 0x1e1   : > { %1775 = vmatmul.bf16.gmra.mxu3 %v1216_v62  ;;  %3471 = vmatpush.bf16.msrb.mxu2 %v17429_v10 }
 0x1e3   : > { %v1657_v54 = vpop.f32.mrf.mxu2  ;;  %v1501_v0 = vpop.f32.mrf.mxu0 }
 0x1e4   : > { %v1736_v41 = vpop.f32.mrf.mxu3  ;;  %v1658_v1 = vadd.f32 %v1657_v54, %v1579_v46  ;;  %v1580_v39 = vpop.f32.mrf.mxu1  ;;  %v1502_v21 = vadd.f32 %v1501_v0, %v19100_v55  ;;  %v12701_v55 = vor.u32 %v17265_v23, %v12698_v19  ;;  %v17268_v0 = vld [vmem:[%s18446_s28 + $0x44] sm:$0xf] }
 0x1e6   : > { %v19470_v40 = vadd.f32 %v1736_v41, %v1658_v1  ;;  %v1581_v27 = vadd.f32 %v1580_v39, %v1502_v21  ;;  %v12704_v41 = vld [vmem:[%s18446_s28 + $0x40] sm:$0xf]  ;;  %v17270_v1 = vld [vmem:[%s18446_s28 + $0x4c] sm:$0xf0]  ;;  %v12706_v39 = vld [vmem:[%s18446_s28 + $0x50] sm:$0xf0] }
 0x1e7   : > { %v12712_v21 = vld [vmem:[%s18446_s28 + $0x48] sm:$0xf]  ;;  %v12705_v25 = vor.u32 %v17270_v1, %v12704_v41  ;;  %v12709_v49 = vor.u32 %v17268_v0, %v12706_v39 }
 0x1eb   : > { %v1659_v26 = vpop.f32.mrf.mxu2  ;;  %v1504_v35 = vpop.f32.mrf.mxu0 }
 0x1ec   : > { %v1738_v56 = vpop.f32.mrf.mxu3  ;;  %v1660_v13 = vadd.f32 %v1659_v26, %v1581_v27  ;;  %v1583_v8 = vpop.f32.mrf.mxu1  ;;  %v1505_v33 = vadd.f32 %v1504_v35, %v19114_v63  ;;  %v17414_v63 = vld [vmem:[%s22621_s1 + $0x330] sm:$0xff]  ;;  %v17271_v27 = vld [vmem:[%s18446_s28 + $0x54] sm:$0xf0] }
 0x1ed   : > { %3312 = vmatpush.bf16.msrb.mxu0 %v17414_v63  ;;  %v17274_v63 = vld [vmem:[%s18446_s28 + $0x6c] sm:$0xf0] }
 0x1ee   : > { %v19481_v6 = vadd.f32 %v1738_v56, %v1660_v13  ;;  %v1584_v42 = vadd.f32 %v1583_v8, %v1505_v33  ;;  %2382 = vmatmul.bf16.vlgmr.msra.gmra.mxu0 %v12689_v22  ;;  %v12713_v56 = vor.u32 %v17271_v27, %v12712_v21 }
 0x1ef   : > { %2461 = vmatmul.bf16.vlgmr.msra.gmra.mxu1 %v12693_v57 }
 0x1f0   : > { %2540 = vmatmul.bf16.vlgmr.msra.gmra.mxu2 %v12697_v14 }
 0x1f1   : > { %2619 = vmatmul.bf16.vlgmr.msra.gmra.mxu3 %v12701_v55 }
 0x1f3   : > { %v1662_v58 = vpop.f32.mrf.mxu2  ;;  %v1506_v50 = vpop.f32.mrf.mxu0 }
 0x1f4   : > { %v1741_v44 = vpop.f32.mrf.mxu3  ;;  %v1663_v7 = vadd.f32 %v1662_v58, %v1584_v42  ;;  %v1585_v62 = vpop.f32.mrf.mxu1  ;;  %v1507_v4 = vadd.f32 %v1506_v50, %v19132_v34  ;;  %v12717_v34 = vor.u32 %v17269_v16, %v12714_v45  ;;  %v12720_v42 = vld [vmem:[%s18446_s28 + $0x60] sm:$0xf]  ;;  %v17437_v58 = vld [vmem:[%s22621_s1 + $0x3e8] sm:$0xff] }
 0x1f5   : > { %v12728_v50 = vld [vmem:[%s18446_s28 + $0x68] sm:$0xf]  ;;  %3550 = vmatpush.bf16.msrb.mxu3 %v17437_v58  ;;  %v12721_v1 = vor.u32 %v17274_v63, %v12720_v42  ;;  %v17279_v42 = vld [vmem:[%s18446_s28 + $0x94] sm:$0xf0]  ;;  %v12746_v63 = vld [vmem:[%s18446_s28 + $0x98] sm:$0xf0] }
 0x1f6   : > { %v19496_v46 = vadd.f32 %v1741_v44, %v1663_v7  ;;  %v1586_v54 = vadd.f32 %v1585_v62, %v1507_v4  ;;  %v17272_v44 = vld [vmem:[%s18446_s28 + $0x64] sm:$0xf]  ;;  %v12722_v7 = vld [vmem:[%s18446_s28 + $0x70] sm:$0xf0]  ;;  %v17275_v62 = vld [vmem:[%s18446_s28 + $0x74] sm:$0xf0] }
 0x1f7   : > { %v17273_v4 = vld [vmem:[%s18446_s28 + $0x6c] sm:$0xf]  ;;  %v12725_v0 = vor.u32 %v17272_v44, %v12722_v7  ;;  %v12729_v16 = vor.u32 %v17275_v62, %v12728_v50 }
 0x1fb   : > { %v1664_v52 = vpop.f32.mrf.mxu2  ;;  %v1509_v19 = vpop.f32.mrf.mxu0 }
 0x1fc   : > { %v1743_v60 = vpop.f32.mrf.mxu3  ;;  %v1665_v23 = vadd.f32 %v1664_v52, %v1586_v54  ;;  %v1588_v26 = vpop.f32.mrf.mxu1  ;;  %v1510_v22 = vadd.f32 %v1509_v19, %v19134_v61  ;;  %v12730_v54 = vld [vmem:[%s18446_s28 + $0x78] sm:$0xf0] }
 0x1fd   : > { %v12733_v45 = vor.u32 %v17273_v4, %v12730_v54 }
 0x1fe   : > { %v19507_v57 = vadd.f32 %v1743_v60, %v1665_v23  ;;  %v1589_v13 = vadd.f32 %v1588_v26, %v1510_v22  ;;  %2387 = vmatmul.bf16.gmra.mxu0 %v12705_v25  ;;  %v17413_v25 = vld [vmem:[%s22621_s1 + $0x328] sm:$0xff] }
 0x1ff   : > { %2466 = vmatmul.bf16.gmra.mxu1 %v12709_v49  ;;  %v17421_v49 = vld [vmem:[%s22621_s1 + $0x368] sm:$0xff]  ;;  %3313 = vmatpush.bf16.msrb.mxu0 %v17413_v25  ;;  %v17282_v25 = vld [vmem:[%s18446_s28 + $0xac] sm:$0xf0] }
 0x200   : > { %2545 = vmatmul.bf16.gmra.mxu2 %v12713_v56  ;;  %3392 = vmatpush.bf16.msrb.mxu1 %v17421_v49  ;;  %v17428_v49 = vld [vmem:[%s22621_s1 + $0x3a0] sm:$0xff] }
 0x201   : > { %2624 = vmatmul.bf16.gmra.mxu3 %v12717_v34  ;;  %3472 = vmatpush.bf16.msrb.mxu2 %v17428_v49  ;;  %v12778_v49 = vld [vmem:[%s18446_s28 + $0xd8] sm:$0xf0] }
 0x203   : > { %v1667_v35 = vpop.f32.mrf.mxu2  ;;  %v1511_v55 = vpop.f32.mrf.mxu0 }
 0x204   : > { %v1746_v8 = vpop.f32.mrf.mxu3  ;;  %v1668_v14 = vadd.f32 %v1667_v35, %v1589_v13  ;;  %v1590_v33 = vpop.f32.mrf.mxu1  ;;  %v1512_v61 = vadd.f32 %v1511_v55, %v19158_v38  ;;  %v17276_v55 = vld [vmem:[%s18446_s28 + $0x84] sm:$0xf] }
 0x206   : > { %v19510_v48 = vadd.f32 %v1746_v8, %v1668_v14  ;;  %v1591_v43 = vadd.f32 %v1590_v33, %v1512_v61  ;;  %v12736_v8 = vld [vmem:[%s18446_s28 + $0x80] sm:$0xf]  ;;  %v17278_v14 = vld [vmem:[%s18446_s28 + $0x8c] sm:$0xf0]  ;;  %v12738_v33 = vld [vmem:[%s18446_s28 + $0x90] sm:$0xf0] }
 0x207   : > { %v12744_v61 = vld [vmem:[%s18446_s28 + $0x88] sm:$0xf]  ;;  %v12737_v44 = vor.u32 %v17278_v14, %v12736_v8  ;;  %v12741_v7 = vor.u32 %v17276_v55, %v12738_v33  ;;  %v12762_v8 = vld [vmem:[%s18446_s28 + $0xb8] sm:$0xf0] }
 0x208   : > { %v12745_v54 = vor.u32 %v17279_v42, %v12744_v61 }
 0x20b   : > { %v1669_v38 = vpop.f32.mrf.mxu2  ;;  %v1514_v21 = vpop.f32.mrf.mxu0 }
 0x20c   : > { %v1748_v41 = vpop.f32.mrf.mxu3  ;;  %v1670_v39 = vadd.f32 %v1669_v38, %v1591_v43  ;;  %v1593_v27 = vpop.f32.mrf.mxu1  ;;  %v1515_v52 = vadd.f32 %v1514_v21, %v19166_v20  ;;  %v17277_v43 = vld [vmem:[%s18446_s28 + $0x8c] sm:$0xf] }
 0x20e   : > { %v19527_v60 = vadd.f32 %v1748_v41, %v1670_v39  ;;  %v1594_v23 = vadd.f32 %v1593_v27, %v1515_v52  ;;  %2392 = vmatmul.bf16.gmra.mxu0 %v12721_v1  ;;  %v12752_v52 = vld [vmem:[%s18446_s28 + $0xa0] sm:$0xf] }
 0x20f   : > { %2471 = vmatmul.bf16.gmra.mxu1 %v12725_v0  ;;  %v12753_v33 = vor.u32 %v17282_v25, %v12752_v52  ;;  %v17287_v52 = vld [vmem:[%s18446_s28 + $0xd4] sm:$0xf0]  ;;  %v17285_v25 = vld [vmem:[%s18446_s28 + $0xcc] sm:$0xf] }
 0x210   : > { %2550 = vmatmul.bf16.gmra.mxu2 %v12729_v16 }
 0x211   : > { %2629 = vmatmul.bf16.gmra.mxu3 %v12733_v45 }
 0x213   : > { %v1672_v20 = vpop.f32.mrf.mxu2  ;;  %v1516_v56 = vpop.f32.mrf.mxu0 }
 0x214   : > { %v1751_v19 = vpop.f32.mrf.mxu3  ;;  %v1673_v26 = vadd.f32 %v1672_v20, %v1594_v23  ;;  %v1595_v34 = vpop.f32.mrf.mxu1  ;;  %v1517_v22 = vadd.f32 %v1516_v56, %v19184_v12  ;;  %v12749_v12 = vor.u32 %v17277_v43, %v12746_v63  ;;  %v17436_v20 = vld [vmem:[%s22621_s1 + $0x3e0] sm:$0xff]  ;;  %v12754_v56 = vld [vmem:[%s18446_s28 + $0xb0] sm:$0xf0] }
 0x215   : > { %3551 = vmatpush.bf16.msrb.mxu3 %v17436_v20 }
 0x216   : > { %v19536_v13 = vadd.f32 %v1751_v19, %v1673_v26  ;;  %v1596_v35 = vadd.f32 %v1595_v34, %v1517_v22  ;;  %v17412_v19 = vld [vmem:[%s22621_s1 + $0x320] sm:$0xff]  ;;  %v12760_v34 = vld [vmem:[%s18446_s28 + $0xa8] sm:$0xf]  ;;  %v17283_v22 = vld [vmem:[%s18446_s28 + $0xb4] sm:$0xf0] }
 0x217   : > { %v17280_v26 = vld [vmem:[%s18446_s28 + $0xa4] sm:$0xf]  ;;  %3314 = vmatpush.bf16.msrb.mxu0 %v17412_v19 }
 0x218   : > { %v12757_v61 = vor.u32 %v17280_v26, %v12754_v56 }
 0x21b   : > { %v1674_v10 = vpop.f32.mrf.mxu2  ;;  %v1519_v62 = vpop.f32.mrf.mxu0 }
 0x21c   : > { %v1753_v58 = vpop.f32.mrf.mxu3  ;;  %v1675_v50 = vadd.f32 %v1674_v10, %v1596_v35  ;;  %v1598_v4 = vpop.f32.mrf.mxu1  ;;  %v1520_v38 = vadd.f32 %v1519_v62, %v19186_v31  ;;  %v17281_v35 = vld [vmem:[%s18446_s28 + $0xac] sm:$0xf]  ;;  %v12761_v10 = vor.u32 %v17283_v22, %v12760_v34 }
 0x21e   : > { %v19547_v41 = vadd.f32 %v1753_v58, %v1675_v50  ;;  %v1599_v1 = vadd.f32 %v1598_v4, %v1520_v38  ;;  %2397 = vmatmul.bf16.gmra.mxu0 %v12737_v44  ;;  %v12765_v58 = vor.u32 %v17281_v35, %v12762_v8 }
 0x21f   : > { %2476 = vmatmul.bf16.gmra.mxu1 %v12741_v7 }
 0x220   : > { %2555 = vmatmul.bf16.gmra.mxu2 %v12745_v54 }
 0x221   : > { %2634 = vmatmul.bf16.gmra.mxu3 %v12749_v12 }
 0x223   : > { %v1677_v0 = vpop.f32.mrf.mxu2  ;;  %v1521_v27 = vpop.f32.mrf.mxu0 }
 0x224   : > { %v1756_v39 = vpop.f32.mrf.mxu3  ;;  %v1678_v21 = vadd.f32 %v1677_v0, %v1599_v1  ;;  %v1600_v16 = vpop.f32.mrf.mxu1  ;;  %v1522_v31 = vadd.f32 %v1521_v27, %v19216_v36  ;;  %v17420_v36 = vld [vmem:[%s22621_s1 + $0x360] sm:$0xff] }
 0x225   : > { %3393 = vmatpush.bf16.msrb.mxu1 %v17420_v36  ;;  %v17284_v27 = vld [vmem:[%s18446_s28 + $0xc4] sm:$0xf] }
 0x226   : > { %v19550_v45 = vadd.f32 %v1756_v39, %v1678_v21  ;;  %v1601_v23 = vadd.f32 %v1600_v16, %v1522_v31  ;;  %v12768_v39 = vld [vmem:[%s18446_s28 + $0xc0] sm:$0xf]  ;;  %v17286_v21 = vld [vmem:[%s18446_s28 + $0xcc] sm:$0xf0]  ;;  %v12770_v16 = vld [vmem:[%s18446_s28 + $0xd0] sm:$0xf0] }
 0x227   : > { %v12776_v31 = vld [vmem:[%s18446_s28 + $0xc8] sm:$0xf]  ;;  %v12769_v19 = vor.u32 %v17286_v21, %v12768_v39  ;;  %v12773_v36 = vor.u32 %v17284_v27, %v12770_v16  ;;  %v12794_v39 = vld [vmem:[%s18446_s28 + $0xf8] sm:$0xf0] }
 0x228   : > { %v12777_v22 = vor.u32 %v17287_v52, %v12776_v31 }
 0x22b   : > { %v1679_v14 = vpop.f32.mrf.mxu2  ;;  %v1524_v43 = vpop.f32.mrf.mxu0 }
 0x22c   : > { %v1758_v55 = vpop.f32.mrf.mxu3  ;;  %v1680_v42 = vadd.f32 %v1679_v14, %v1601_v23  ;;  %v1603_v63 = vpop.f32.mrf.mxu1  ;;  %v1525_v44 = vadd.f32 %v1524_v43, %v19218_v15 }
 0x22e   : > { %v19573_v7 = vadd.f32 %v1758_v55, %v1680_v42  ;;  %v1604_v50 = vadd.f32 %v1603_v63, %v1525_v44  ;;  %2402 = vmatmul.bf16.gmra.mxu0 %v12753_v33  ;;  %v17427_v55 = vld [vmem:[%s22621_s1 + $0x398] sm:$0xff] }
 0x22f   : > { %2481 = vmatmul.bf16.gmra.mxu1 %v12757_v61  ;;  %v17435_v33 = vld [vmem:[%s22621_s1 + $0x3d8] sm:$0xff]  ;;  %3473 = vmatpush.bf16.msrb.mxu2 %v17427_v55 }
 0x230   : > { %2560 = vmatmul.bf16.gmra.mxu2 %v12761_v10  ;;  %3552 = vmatpush.bf16.msrb.mxu3 %v17435_v33  ;;  %v17411_v44 = vld [vmem:[%s22621_s1 + $0x318] sm:$0xff]  ;;  %v12800_v33 = vld [vmem:[%s18446_s28 + $0x100] sm:$0xf] }
 0x231   : > { %2639 = vmatmul.bf16.gmra.mxu3 %v12765_v58  ;;  %3315 = vmatpush.bf16.msrb.mxu0 %v17411_v44  ;;  %v12810_v44 = vld [vmem:[%s18446_s28 + $0x118] sm:$0xf0] }
 0x233   : > { %v1682_v62 = vpop.f32.mrf.mxu2  ;;  %v1526_v12 = vpop.f32.mrf.mxu0 }
 0x234   : > { %v1761_v4 = vpop.f32.mrf.mxu3  ;;  %v1683_v54 = vadd.f32 %v1682_v62, %v1604_v50  ;;  %v1605_v38 = vpop.f32.mrf.mxu1  ;;  %v1527_v15 = vadd.f32 %v1526_v12, %v19236_v28  ;;  %v12781_v28 = vor.u32 %v17285_v25, %v12778_v49  ;;  %v17419_v50 = vld [vmem:[%s22621_s1 + $0x358] sm:$0xff]  ;;  %v17288_v12 = vld [vmem:[%s18446_s28 + $0xe4] sm:$0xf] }
 0x235   : > { %3394 = vmatpush.bf16.msrb.mxu1 %v17419_v50 }
 0x236   : > { %v19576_v1 = vadd.f32 %v1761_v4, %v1683_v54  ;;  %v1606_v0 = vadd.f32 %v1605_v38, %v1527_v15  ;;  %v12784_v4 = vld [vmem:[%s18446_s28 + $0xe0] sm:$0xf]  ;;  %v17290_v54 = vld [vmem:[%s18446_s28 + $0xec] sm:$0xf0]  ;;  %v12786_v38 = vld [vmem:[%s18446_s28 + $0xf0] sm:$0xf0] }
 0x237   : > { %v12792_v15 = vld [vmem:[%s18446_s28 + $0xe8] sm:$0xf]  ;;  %v12785_v16 = vor.u32 %v17290_v54, %v12784_v4  ;;  %v12789_v31 = vor.u32 %v17288_v12, %v12786_v38 }
 0x23b   : > { %v1684_v23 = vpop.f32.mrf.mxu2  ;;  %v1529_v56 = vpop.f32.mrf.mxu0 }
 0x23c   : > { %v1763_v20 = vpop.f32.mrf.mxu3  ;;  %v1685_v26 = vadd.f32 %v1684_v23, %v1606_v0  ;;  %v1608_v34 = vpop.f32.mrf.mxu1  ;;  %v1530_v35 = vadd.f32 %v1529_v56, %v19244_v37  ;;  %v17291_v0 = vld [vmem:[%s18446_s28 + $0xf4] sm:$0xf0] }
 0x23d   : > { %v12793_v23 = vor.u32 %v17291_v0, %v12792_v15 }
 0x23e   : > { %v19587_v8 = vadd.f32 %v1763_v20, %v1685_v26  ;;  %v1609_v14 = vadd.f32 %v1608_v34, %v1530_v35  ;;  %2407 = vmatmul.bf16.gmra.mxu0 %v12769_v19 }
 0x23f   : > { %2486 = vmatmul.bf16.gmra.mxu1 %v12773_v36 }
 0x240   : > { %2565 = vmatmul.bf16.gmra.mxu2 %v12777_v22 }
 0x241   : > { %2644 = vmatmul.bf16.gmra.mxu3 %v12781_v28 }
 0x243   : > { %v1687_v37 = vpop.f32.mrf.mxu2  ;;  %v1531_v43 = vpop.f32.mrf.mxu0 }
 0x244   : > { %v1766_v61 = vpop.f32.mrf.mxu3  ;;  %v1688_v42 = vadd.f32 %v1687_v37, %v1609_v14  ;;  %v1610_v63 = vpop.f32.mrf.mxu1  ;;  %v1532_v10 = vadd.f32 %v1531_v43, %v19268_v17  ;;  %v17289_v17 = vld [vmem:[%s18446_s28 + $0xec] sm:$0xf]  ;;  %v17294_v37 = vld [vmem:[%s18446_s28 + $0x10c] sm:$0xf0]  ;;  %v12808_v43 = vld [vmem:[%s18446_s28 + $0x108] sm:$0xf] }
 0x245   : > { %v12797_v20 = vor.u32 %v17289_v17, %v12794_v39  ;;  %v12801_v4 = vor.u32 %v17294_v37, %v12800_v33  ;;  %v17297_v33 = vld [vmem:[%s18446_s28 + $0x12c] sm:$0xf]  ;;  %v12826_v37 = vld [vmem:[%s18446_s28 + $0x138] sm:$0xf0] }
 0x246   : > { %v19596_v58 = vadd.f32 %v1766_v61, %v1688_v42  ;;  %v1611_v62 = vadd.f32 %v1610_v63, %v1532_v10  ;;  %v17292_v61 = vld [vmem:[%s18446_s28 + $0x104] sm:$0xf]  ;;  %v12802_v42 = vld [vmem:[%s18446_s28 + $0x110] sm:$0xf0]  ;;  %v17295_v63 = vld [vmem:[%s18446_s28 + $0x114] sm:$0xf0] }
 0x247   : > { %v17293_v10 = vld [vmem:[%s18446_s28 + $0x10c] sm:$0xf]  ;;  %v12805_v54 = vor.u32 %v17292_v61, %v12802_v42  ;;  %v12809_v0 = vor.u32 %v17295_v63, %v12808_v43 }
 0x24b   : > { %v1689_v21 = vpop.f32.mrf.mxu2  ;;  %v1534_v25 = vpop.f32.mrf.mxu0 }
 0x24c   : > { %v1768_v27 = vpop.f32.mrf.mxu3  ;;  %v1690_v52 = vadd.f32 %v1689_v21, %v1611_v62  ;;  %v1613_v49 = vpop.f32.mrf.mxu1  ;;  %v1535_v19 = vadd.f32 %v1534_v25, %v19270_v11 }
 0x24e   : > { %v19613_v36 = vadd.f32 %v1768_v27, %v1690_v52  ;;  %v1614_v26 = vadd.f32 %v1613_v49, %v1535_v19  ;;  %2412 = vmatmul.bf16.gmra.mxu0 %v12785_v16  ;;  %v17426_v27 = vld [vmem:[%s22621_s1 + $0x390] sm:$0xff] }
 0x24f   : > { %2491 = vmatmul.bf16.gmra.mxu1 %v12789_v31  ;;  %v17434_v16 = vld [vmem:[%s22621_s1 + $0x3d0] sm:$0xff]  ;;  %3474 = vmatpush.bf16.msrb.mxu2 %v17426_v27  ;;  %v12832_v27 = vld [vmem:[%s18446_s28 + $0x140] sm:$0xf] }
 0x250   : > { %2570 = vmatmul.bf16.gmra.mxu2 %v12793_v23  ;;  %v17418_v31 = vld [vmem:[%s22621_s1 + $0x350] sm:$0xff]  ;;  %3553 = vmatpush.bf16.msrb.mxu3 %v17434_v16 }
 0x251   : > { %2649 = vmatmul.bf16.gmra.mxu3 %v12797_v20  ;;  %3395 = vmatpush.bf16.msrb.mxu1 %v17418_v31  ;;  %v17302_v16 = vld [vmem:[%s18446_s28 + $0x14c] sm:$0xf0]  ;;  %v12834_v31 = vld [vmem:[%s18446_s28 + $0x150] sm:$0xf0] }
 0x253   : > { %v1692_v56 = vpop.f32.mrf.mxu2  ;;  %v1536_v28 = vpop.f32.mrf.mxu0 }
 0x254   : > { %v1771_v34 = vpop.f32.mrf.mxu3  ;;  %v1693_v22 = vadd.f32 %v1692_v56, %v1614_v26  ;;  %v1615_v35 = vpop.f32.mrf.mxu1  ;;  %v1537_v11 = vadd.f32 %v1536_v28, %v19288_v5  ;;  %v12813_v5 = vor.u32 %v17293_v10, %v12810_v44  ;;  %v17296_v28 = vld [vmem:[%s18446_s28 + $0x124] sm:$0xf] }
 0x256   : > { %v19616_v14 = vadd.f32 %v1771_v34, %v1693_v22  ;;  %v1616_v55 = vadd.f32 %v1615_v35, %v1537_v11  ;;  %v12816_v34 = vld [vmem:[%s18446_s28 + $0x120] sm:$0xf]  ;;  %v17298_v22 = vld [vmem:[%s18446_s28 + $0x12c] sm:$0xf0]  ;;  %v12818_v35 = vld [vmem:[%s18446_s28 + $0x130] sm:$0xf0] }
 0x257   : > { %v12824_v11 = vld [vmem:[%s18446_s28 + $0x128] sm:$0xf]  ;;  %v12817_v43 = vor.u32 %v17298_v22, %v12816_v34  ;;  %v12821_v63 = vor.u32 %v17296_v28, %v12818_v35  ;;  %v12833_v28 = vor.u32 %v17302_v16, %v12832_v27  ;;  %v17307_v27 = vld [vmem:[%s18446_s28 + $0x174] sm:$0xf0]  ;;  %v17305_v16 = vld [vmem:[%s18446_s28 + $0x16c] sm:$0xf] }
 0x25b   : > { %v1694_v50 = vpop.f32.mrf.mxu2  ;;  %v1539_v38 = vpop.f32.mrf.mxu0 }
 0x25c   : > { %v1773_v62 = vpop.f32.mrf.mxu3  ;;  %v1695_v12 = vadd.f32 %v1694_v50, %v1616_v55  ;;  %v1618_v15 = vpop.f32.mrf.mxu1  ;;  %v1540_v17 = vadd.f32 %v1539_v38, %v19302_v30  ;;  %v17410_v30 = vld [vmem:[%s22621_s1 + $0x310] sm:$0xff]  ;;  %v17299_v55 = vld [vmem:[%s18446_s28 + $0x134] sm:$0xf0] }
 0x25d   : > { %3316 = vmatpush.bf16.msrb.mxu0 %v17410_v30  ;;  %v17300_v30 = vld [vmem:[%s18446_s28 + $0x144] sm:$0xf] }
 0x25e   : > { %v19627_v39 = vadd.f32 %v1773_v62, %v1695_v12  ;;  %v1619_v21 = vadd.f32 %v1618_v15, %v1540_v17  ;;  %2417 = vmatmul.bf16.gmra.mxu0 %v12801_v4  ;;  %v12829_v62 = vor.u32 %v17297_v33, %v12826_v37  ;;  %v12837_v35 = vor.u32 %v17300_v30, %v12834_v31  ;;  %v12858_v30 = vld [vmem:[%s18446_s28 + $0x178] sm:$0xf0] }
 0x25f   : > { %2496 = vmatmul.bf16.gmra.mxu1 %v12805_v54 }
 0x260   : > { %2575 = vmatmul.bf16.gmra.mxu2 %v12809_v0 }
 0x261   : > { %2654 = vmatmul.bf16.gmra.mxu3 %v12813_v5 }
 0x263   : > { %v1697_v52 = vpop.f32.mrf.mxu2  ;;  %v1541_v23 = vpop.f32.mrf.mxu0 }
 0x264   : > { %v1776_v25 = vpop.f32.mrf.mxu3  ;;  %v1698_v49 = vadd.f32 %v1697_v52, %v1619_v21  ;;  %v1620_v20 = vpop.f32.mrf.mxu1  ;;  %v1542_v19 = vadd.f32 %v1541_v23, %v19321_v3  ;;  %v12825_v3 = vor.u32 %v17299_v55, %v12824_v11  ;;  %v17433_v23 = vld [vmem:[%s22621_s1 + $0x3c8] sm:$0xff] }
 0x265   : > { %3554 = vmatpush.bf16.msrb.mxu3 %v17433_v23 }
 0x266   : > { %v19642_v26 = vadd.f32 %v1776_v25, %v1698_v49  ;;  %v1621_v56 = vadd.f32 %v1620_v20, %v1542_v19  ;;  %v12840_v25 = vld [vmem:[%s18446_s28 + $0x148] sm:$0xf]  ;;  %v17303_v20 = vld [vmem:[%s18446_s28 + $0x154] sm:$0xf0]  ;;  %v17301_v19 = vld [vmem:[%s18446_s28 + $0x14c] sm:$0xf] }
 0x267   : > { %v17425_v49 = vld [vmem:[%s22621_s1 + $0x388] sm:$0xff]  ;;  %v12841_v33 = vor.u32 %v17303_v20, %v12840_v25 }
 0x268   : > { %3475 = vmatpush.bf16.msrb.mxu2 %v17425_v49 }
 0x26b   : > { %v1699_v61 = vpop.f32.mrf.mxu2  ;;  %v2383_v44 = vpop.f32.mrf.mxu0 }
 0x26c   : > { %v1778_v42 = vpop.f32.mrf.mxu3  ;;  %v1700_v10 = vadd.f32 %v1699_v61, %v1621_v56  ;;  %v2462_v50 = vpop.f32.mrf.mxu1  ;;  %v12842_v56 = vld [vmem:[%s18446_s28 + $0x158] sm:$0xf0] }
 0x26d   : > { %v2463_v4 = vadd.f32 %v2462_v50, %v2383_v44  ;;  %v12845_v37 = vor.u32 %v17301_v19, %v12842_v56 }
 0x26e   : > { %v19652_v54 = vadd.f32 %v1778_v42, %v1700_v10  ;;  %2422 = vmatmul.bf16.gmra.mxu0 %v12817_v43  ;;  %v17417_v10 = vld [vmem:[%s22621_s1 + $0x348] sm:$0xff] }
 0x26f   : > { %2501 = vmatmul.bf16.gmra.mxu1 %v12821_v63  ;;  %v17409_v63 = vld [vmem:[%s22621_s1 + $0x308] sm:$0xff] }
 0x270   : > { %2580 = vmatmul.bf16.gmra.mxu2 %v12825_v3  ;;  %3317 = vmatpush.bf16.msrb.mxu0 %v17409_v63  ;;  %v12864_v63 = vld [vmem:[%s18446_s28 + $0x180] sm:$0xf] }
 0x271   : > { %2659 = vmatmul.bf16.gmra.mxu3 %v12829_v62  ;;  %3396 = vmatpush.bf16.msrb.mxu1 %v17417_v10  ;;  %v17310_v10 = vld [vmem:[%s18446_s28 + $0x18c] sm:$0xf0] }
 0x273   : > { %v2541_v12 = vpop.f32.mrf.mxu2  ;;  %v2385_v0 = vpop.f32.mrf.mxu0 }
 0x274   : > { %v2620_v38 = vpop.f32.mrf.mxu3  ;;  %v2542_v15 = vadd.f32 %v2541_v12, %v2463_v4  ;;  %v2464_v5 = vpop.f32.mrf.mxu1 }
 0x275   : > { %v2465_v17 = vadd.f32 %v2464_v5, %v2385_v0  ;;  %v17304_v5 = vld [vmem:[%s18446_s28 + $0x164] sm:$0xf] }
 0x276   : > { %v2621_v21 = vadd.f32 %v2620_v38, %v2542_v15  ;;  %v12848_v38 = vld [vmem:[%s18446_s28 + $0x160] sm:$0xf]  ;;  %v17306_v15 = vld [vmem:[%s18446_s28 + $0x16c] sm:$0xf0] }
 0x277   : > { %v12849_v49 = vor.u32 %v17306_v15, %v12848_v38  ;;  %v17309_v38 = vld [vmem:[%s18446_s28 + $0x18c] sm:$0xf]  ;;  %v12874_v15 = vld [vmem:[%s18446_s28 + $0x198] sm:$0xf0] }
 0x278   : > { %v19659_v52 = vadd.f32 %v2621_v21, %v19324_v53  ;;  %v12856_v21 = vld [vmem:[%s18446_s28 + $0x168] sm:$0xf] }
 0x27b   : > { %v2543_v34 = vpop.f32.mrf.mxu2  ;;  %v2388_v11 = vpop.f32.mrf.mxu0 }
 0x27c   : > { %v2622_v22 = vpop.f32.mrf.mxu3  ;;  %v2544_v53 = vadd.f32 %v2543_v34, %v2465_v17  ;;  %v2467_v55 = vpop.f32.mrf.mxu1  ;;  %v12850_v17 = vld [vmem:[%s18446_s28 + $0x170] sm:$0xf0]  ;;  %v12857_v34 = vor.u32 %v17307_v27, %v12856_v21  ;;  %v12865_v21 = vor.u32 %v17310_v10, %v12864_v63  ;;  %v17315_v63 = vld [vmem:[%s18446_s28 + $0x1b4] sm:$0xf0]  ;;  %v17313_v10 = vld [vmem:[%s18446_s28 + $0x1ac] sm:$0xf] }
 0x27d   : > { %v2468_v61 = vadd.f32 %v2467_v55, %v2388_v11  ;;  %v12853_v23 = vor.u32 %v17304_v5, %v12850_v17  ;;  %v17416_v5 = vld [vmem:[%s22621_s1 + $0x340] sm:$0xff] }
 0x27e   : > { %v2623_v42 = vadd.f32 %v2622_v22, %v2544_v53  ;;  %2427 = vmatmul.bf16.gmra.mxu0 %v12833_v28  ;;  %v12861_v22 = vor.u32 %v17305_v16, %v12858_v30  ;;  %3397 = vmatpush.bf16.msrb.mxu1 %v17416_v5 }
 0x27f   : > { %2506 = vmatmul.bf16.gmra.mxu1 %v12837_v35 }
 0x280   : > { %v19672_v43 = vadd.f32 %v2623_v42, %v19349_v29  ;;  %2585 = vmatmul.bf16.gmra.mxu2 %v12841_v33 }
 0x281   : > { %2664 = vmatmul.bf16.gmra.mxu3 %v12845_v37 }
 0x283   : > { %v2546_v29 = vpop.f32.mrf.mxu2  ;;  %v2390_v3 = vpop.f32.mrf.mxu0 }
 0x284   : > { %v2625_v44 = vpop.f32.mrf.mxu3  ;;  %v2547_v50 = vadd.f32 %v2546_v29, %v2468_v61  ;;  %v2469_v62 = vpop.f32.mrf.mxu1  ;;  %v17308_v29 = vld [vmem:[%s18446_s28 + $0x184] sm:$0xf] }
 0x285   : > { %v2470_v4 = vadd.f32 %v2469_v62, %v2390_v3  ;;  %v17311_v3 = vld [vmem:[%s18446_s28 + $0x194] sm:$0xf0]  ;;  %v17424_v62 = vld [vmem:[%s22621_s1 + $0x380] sm:$0xff] }
 0x286   : > { %v2626_v12 = vadd.f32 %v2625_v44, %v2547_v50  ;;  %v12866_v44 = vld [vmem:[%s18446_s28 + $0x190] sm:$0xf0]  ;;  %v12872_v50 = vld [vmem:[%s18446_s28 + $0x188] sm:$0xf]  ;;  %3476 = vmatpush.bf16.msrb.mxu2 %v17424_v62 }
 0x287   : > { %v12869_v27 = vor.u32 %v17308_v29, %v12866_v44  ;;  %v12890_v29 = vld [vmem:[%s18446_s28 + $0x1b8] sm:$0xf0] }
 0x288   : > { %v19683_v0 = vadd.f32 %v2626_v12, %v19358_v59  ;;  %v17408_v12 = vld [vmem:[%s22621_s1 + $0x300] sm:$0xff]  ;;  %v12893_v5 = vor.u32 %v17313_v10, %v12890_v29 }
 0x289   : > { %3318 = vmatpush.bf16.msrb.mxu0 %v17408_v12 }
 0x28b   : > { %v2548_v31 = vpop.f32.mrf.mxu2  ;;  %v2393_v19 = vpop.f32.mrf.mxu0 }
 0x28c   : > { %v2627_v25 = vpop.f32.mrf.mxu3  ;;  %v2549_v20 = vadd.f32 %v2548_v31, %v2470_v4  ;;  %v2472_v56 = vpop.f32.mrf.mxu1  ;;  %v17432_v4 = vld [vmem:[%s22621_s1 + $0x3c0] sm:$0xff] }
 0x28d   : > { %v2473_v28 = vadd.f32 %v2472_v56, %v2393_v19  ;;  %3555 = vmatpush.bf16.msrb.mxu3 %v17432_v4 }
 0x28e   : > { %v2628_v59 = vadd.f32 %v2627_v25, %v2549_v20  ;;  %2432 = vmatmul.bf16.gmra.mxu0 %v12849_v49  ;;  %v12873_v25 = vor.u32 %v17311_v3, %v12872_v50  ;;  %v12877_v49 = vor.u32 %v17309_v38, %v12874_v15 }
 0x28f   : > { %2511 = vmatmul.bf16.gmra.mxu1 %v12853_v23 }
 0x290   : > { %v19692_v35 = vadd.f32 %v2628_v59, %v19377_v51  ;;  %2590 = vmatmul.bf16.gmra.mxu2 %v12857_v34 }
 0x291   : > { %2669 = vmatmul.bf16.gmra.mxu3 %v12861_v22 }
 0x293   : > { %v2551_v53 = vpop.f32.mrf.mxu2  ;;  %v2395_v33 = vpop.f32.mrf.mxu0 }
 0x294   : > { %v2630_v11 = vpop.f32.mrf.mxu3  ;;  %v2552_v55 = vadd.f32 %v2551_v53, %v2473_v28  ;;  %v2474_v37 = vpop.f32.mrf.mxu1 }
 0x295   : > { %v2475_v61 = vadd.f32 %v2474_v37, %v2395_v33  ;;  %v17314_v33 = vld [vmem:[%s18446_s28 + $0x1ac] sm:$0xf0] }
 0x296   : > { %v2631_v42 = vadd.f32 %v2630_v11, %v2552_v55  ;;  %v12880_v55 = vld [vmem:[%s18446_s28 + $0x1a0] sm:$0xf] }
 0x297   : > { %v12881_v3 = vor.u32 %v17314_v33, %v12880_v55  ;;  %v17319_v55 = vld [vmem:[%s18446_s28 + $0x1d4] sm:$0xf0]  ;;  %v17317_v33 = vld [vmem:[%s18446_s28 + $0x1cc] sm:$0xf] }
 0x298   : > { %v19701_v51 = vadd.f32 %v2631_v42, %v19380_v24  ;;  %v12888_v42 = vld [vmem:[%s18446_s28 + $0x1a8] sm:$0xf] }
 0x299   : > { %v12889_v15 = vor.u32 %v17315_v63, %v12888_v42 }
 0x29b   : > { %v2553_v24 = vpop.f32.mrf.mxu2  ;;  %v2398_v30 = vpop.f32.mrf.mxu0 }
 0x29c   : > { %v2632_v17 = vpop.f32.mrf.mxu3  ;;  %v2554_v16 = vadd.f32 %v2553_v24, %v2475_v61  ;;  %v2477_v31 = vpop.f32.mrf.mxu1  ;;  %v17312_v61 = vld [vmem:[%s18446_s28 + $0x1a4] sm:$0xf] }
 0x29d   : > { %v2478_v23 = vadd.f32 %v2477_v31, %v2398_v30 }
 0x29e   : > { %v2633_v20 = vadd.f32 %v2632_v17, %v2554_v16  ;;  %2437 = vmatmul.bf16.gmra.mxu0 %v12865_v21  ;;  %v17519_v21 = vld [vmem:[%s22621_s1 + $0x4b8] sm:$0xff] }
 0x29f   : > { %2516 = vmatmul.bf16.gmra.mxu1 %v12869_v27  ;;  %v17527_v27 = vld [vmem:[%s22621_s1 + $0x4f8] sm:$0xff]  ;;  %4406 = vmatpush.bf16.msra.mxu2 %v17519_v21 }
 0x2a0   : > { %v19718_v19 = vadd.f32 %v2633_v20, %v19411_v32  ;;  %2595 = vmatmul.bf16.gmra.mxu2 %v12873_v25  ;;  %v12882_v32 = vld [vmem:[%s18446_s28 + $0x1b0] sm:$0xf0]  ;;  %4485 = vmatpush.bf16.msra.mxu3 %v17527_v27  ;;  %v12896_v20 = vld [vmem:[%s18446_s28 + $0x1c0] sm:$0xf] }
 0x2a1   : > { %2674 = vmatmul.bf16.gmra.mxu3 %v12877_v49  ;;  %v12885_v62 = vor.u32 %v17312_v61, %v12882_v32  ;;  %v12906_v61 = vld [vmem:[%s18446_s28 + $0x1d8] sm:$0xf0] }
 0x2a3   : > { %v2556_v56 = vpop.f32.mrf.mxu2  ;;  %v2400_v28 = vpop.f32.mrf.mxu0 }
 0x2a4   : > { %v2635_v34 = vpop.f32.mrf.mxu3  ;;  %v2557_v22 = vadd.f32 %v2556_v56, %v2478_v23  ;;  %v2479_v59 = vpop.f32.mrf.mxu1  ;;  %v17318_v56 = vld [vmem:[%s18446_s28 + $0x1cc] sm:$0xf0] }
 0x2a5   : > { %v2480_v53 = vadd.f32 %v2479_v59, %v2400_v28  ;;  %v12904_v59 = vld [vmem:[%s18446_s28 + $0x1c8] sm:$0xf]  ;;  %v12897_v63 = vor.u32 %v17318_v56, %v12896_v20  ;;  %v13114_v20 = vld [vmem:[%s18446_s28 + $0x48] sm:$0xf0] }
 0x2a6   : > { %v2636_v11 = vadd.f32 %v2635_v34, %v2557_v22  ;;  %v17316_v34 = vld [vmem:[%s18446_s28 + $0x1c4] sm:$0xf]  ;;  %v12898_v22 = vld [vmem:[%s18446_s28 + $0x1d0] sm:$0xf0] }
 0x2a7   : > { %v12901_v10 = vor.u32 %v17316_v34, %v12898_v22 }
 0x2a8   : > { %v19723_v37 = vadd.f32 %v2636_v11, %v19414_v2  ;;  %v17511_v11 = vld [vmem:[%s22621_s1 + $0x478] sm:$0xff] }
 0x2a9   : > { %4327 = vmatpush.bf16.msra.mxu1 %v17511_v11 }
 0x2ab   : > { %v2558_v44 = vpop.f32.mrf.mxu2  ;;  %v2403_v12 = vpop.f32.mrf.mxu0 }
 0x2ac   : > { %v2637_v50 = vpop.f32.mrf.mxu3  ;;  %v2559_v4 = vadd.f32 %v2558_v44, %v2480_v53  ;;  %v2482_v38 = vpop.f32.mrf.mxu1  ;;  %v17503_v53 = vld [vmem:[%s22621_s1 + $0x438] sm:$0xff] }
 0x2ad   : > { %v2483_v24 = vadd.f32 %v2482_v38, %v2403_v12  ;;  %4248 = vmatpush.bf16.msra.mxu0 %v17503_v53 }
 0x2ae   : > { %v2638_v17 = vadd.f32 %v2637_v50, %v2559_v4  ;;  %2442 = vmatmul.bf16.gmra.mxu0 %v12881_v3  ;;  %v12905_v50 = vor.u32 %v17319_v55, %v12904_v59  ;;  %v12909_v3 = vor.u32 %v17317_v33, %v12906_v61 }
 0x2af   : > { %2521 = vmatmul.bf16.gmra.mxu1 %v12885_v62 }
 0x2b0   : > { %v19732_v2 = vadd.f32 %v2638_v17, %v19433_v18  ;;  %2600 = vmatmul.bf16.gmra.mxu2 %v12889_v15 }
 0x2b1   : > { %2679 = vmatmul.bf16.gmra.mxu3 %v12893_v5 }
 0x2b3   : > { %v2561_v16 = vpop.f32.mrf.mxu2  ;;  %v2405_v31 = vpop.f32.mrf.mxu0 }
 0x2b4   : > { %v2640_v18 = vpop.f32.mrf.mxu3  ;;  %v2562_v30 = vadd.f32 %v2561_v16, %v2483_v24  ;;  %v2484_v25 = vpop.f32.mrf.mxu1  ;;  %v13104_v16 = vld [vmem:[%s18446_s28 + $0x30] sm:$0xf] }
 0x2b5   : > { %v2485_v49 = vadd.f32 %v2484_v25, %v2405_v31  ;;  %v17352_v31 = vld [vmem:[%s18446_s28 + $0x34] sm:$0xf]  ;;  %v13112_v25 = vld [vmem:[%s18446_s28 + $0x38] sm:$0xf] }
 0x2b6   : > { %v2641_v23 = vadd.f32 %v2640_v18, %v2562_v30  ;;  %v17354_v18 = vld [vmem:[%s18446_s28 + $0x3c] sm:$0xf0] }
 0x2b7   : > { %v13105_v22 = vor.u32 %v17354_v18, %v13104_v16  ;;  %v17359_v16 = vld [vmem:[%s18446_s28 + $0x64] sm:$0xf0]  ;;  %v17357_v18 = vld [vmem:[%s18446_s28 + $0x5c] sm:$0xf] }
 0x2b8   : > { %v19745_v28 = vadd.f32 %v2641_v23, %v19442_v9  ;;  %v17353_v23 = vld [vmem:[%s18446_s28 + $0x3c] sm:$0xf] }
 0x2b9   : > { %v13117_v61 = vor.u32 %v17353_v23, %v13114_v20 }
 0x2bb   : > { %v2563_v32 = vpop.f32.mrf.mxu2  ;;  %v2408_v29 = vpop.f32.mrf.mxu0 }
 0x2bc   : > { %v2642_v42 = vpop.f32.mrf.mxu3  ;;  %v2564_v9 = vadd.f32 %v2563_v32, %v2485_v49  ;;  %v2487_v44 = vpop.f32.mrf.mxu1  ;;  %v17355_v49 = vld [vmem:[%s18446_s28 + $0x44] sm:$0xf0] }
 0x2bd   : > { %v2488_v62 = vadd.f32 %v2487_v44, %v2408_v29  ;;  %v13113_v33 = vor.u32 %v17355_v49, %v13112_v25 }
 0x2be   : > { %v2643_v4 = vadd.f32 %v2642_v42, %v2564_v9  ;;  %2447 = vmatmul.bf16.gmra.mxu0 %v12897_v63  ;;  %v17518_v63 = vld [vmem:[%s22621_s1 + $0x4b0] sm:$0xff] }
 0x2bf   : > { %2526 = vmatmul.bf16.gmra.mxu1 %v12901_v10  ;;  %v17526_v10 = vld [vmem:[%s22621_s1 + $0x4f0] sm:$0xff]  ;;  %4407 = vmatpush.bf16.msra.mxu2 %v17518_v63 }
 0x2c0   : > { %v19758_v12 = vadd.f32 %v2643_v4, %v19467_v47  ;;  %2605 = vmatmul.bf16.gmra.mxu2 %v12905_v50  ;;  %v13106_v47 = vld [vmem:[%s18446_s28 + $0x40] sm:$0xf0]  ;;  %v17502_v9 = vld [vmem:[%s22621_s1 + $0x430] sm:$0xff]  ;;  %4486 = vmatpush.bf16.msra.mxu3 %v17526_v10 }
 0x2c1   : > { %2684 = vmatmul.bf16.gmra.mxu3 %v12909_v3  ;;  %v13109_v59 = vor.u32 %v17352_v31, %v13106_v47  ;;  %4249 = vmatpush.bf16.msra.mxu0 %v17502_v9  ;;  %v13130_v31 = vld [vmem:[%s18446_s28 + $0x68] sm:$0xf0]  ;;  %v13136_v9 = vld [vmem:[%s18446_s28 + $0x70] sm:$0xf] }
 0x2c3   : > { %v2566_v38 = vpop.f32.mrf.mxu2  ;;  %v2410_v24 = vpop.f32.mrf.mxu0 }
 0x2c4   : > { %v2645_v15 = vpop.f32.mrf.mxu3  ;;  %v2567_v5 = vadd.f32 %v2566_v38, %v2488_v62  ;;  %v2489_v17 = vpop.f32.mrf.mxu1 }
 0x2c5   : > { %v2490_v21 = vadd.f32 %v2489_v17, %v2410_v24  ;;  %v17356_v17 = vld [vmem:[%s18446_s28 + $0x54] sm:$0xf] }
 0x2c6   : > { %v2646_v27 = vadd.f32 %v2645_v15, %v2567_v5  ;;  %v13120_v15 = vld [vmem:[%s18446_s28 + $0x50] sm:$0xf]  ;;  %v17358_v5 = vld [vmem:[%s18446_s28 + $0x5c] sm:$0xf0] }
 0x2c7   : > { %v13121_v49 = vor.u32 %v17358_v5, %v13120_v15  ;;  %v13146_v15 = vld [vmem:[%s18446_s28 + $0x88] sm:$0xf0] }
 0x2c8   : > { %v19763_v30 = vadd.f32 %v2646_v27, %v19470_v40  ;;  %v13128_v27 = vld [vmem:[%s18446_s28 + $0x58] sm:$0xf] }
 0x2cb   : > { %v2568_v56 = vpop.f32.mrf.mxu2  ;;  %v2413_v11 = vpop.f32.mrf.mxu0 }
 0x2cc   : > { %v2647_v34 = vpop.f32.mrf.mxu3  ;;  %v2569_v53 = vadd.f32 %v2568_v56, %v2490_v21  ;;  %v2492_v55 = vpop.f32.mrf.mxu1  ;;  %v13122_v21 = vld [vmem:[%s18446_s28 + $0x60] sm:$0xf0] }
 0x2cd   : > { %v2493_v32 = vadd.f32 %v2492_v55, %v2413_v11  ;;  %v13125_v23 = vor.u32 %v17356_v17, %v13122_v21 }
 0x2ce   : > { %v2648_v42 = vadd.f32 %v2647_v34, %v2569_v53  ;;  %3319 = vmatmul.bf16.vlgmr.msrb.gmra.mxu0 %v13105_v22  ;;  %v13129_v22 = vor.u32 %v17359_v16, %v13128_v27 }
 0x2cf   : > { %3398 = vmatmul.bf16.vlgmr.msrb.gmra.mxu1 %v13109_v59  ;;  %v13133_v59 = vor.u32 %v17357_v18, %v13130_v31 }
 0x2d0   : > { %v19772_v40 = vadd.f32 %v2648_v42, %v19481_v6  ;;  %3477 = vmatmul.bf16.vlgmr.msrb.gmra.mxu2 %v13113_v33  ;;  %v17510_v6 = vld [vmem:[%s22621_s1 + $0x470] sm:$0xff] }
 0x2d1   : > { %3556 = vmatmul.bf16.vlgmr.msrb.gmra.mxu3 %v13117_v61  ;;  %4328 = vmatpush.bf16.msra.mxu1 %v17510_v6  ;;  %v17362_v6 = vld [vmem:[%s18446_s28 + $0x7c] sm:$0xf0] }
 0x2d2   : > { %v13137_v21 = vor.u32 %v17362_v6, %v13136_v9  ;;  %v17367_v9 = vld [vmem:[%s18446_s28 + $0xa4] sm:$0xf0]  ;;  %v17365_v6 = vld [vmem:[%s18446_s28 + $0x9c] sm:$0xf] }
 0x2d3   : > { %v2571_v29 = vpop.f32.mrf.mxu2  ;;  %v2415_v3 = vpop.f32.mrf.mxu0 }
 0x2d4   : > { %v2650_v44 = vpop.f32.mrf.mxu3  ;;  %v2572_v50 = vadd.f32 %v2571_v29, %v2493_v32  ;;  %v2494_v62 = vpop.f32.mrf.mxu1  ;;  %v17360_v29 = vld [vmem:[%s18446_s28 + $0x74] sm:$0xf] }
 0x2d5   : > { %v2495_v4 = vadd.f32 %v2494_v62, %v2415_v3  ;;  %v17517_v3 = vld [vmem:[%s22621_s1 + $0x4a8] sm:$0xff] }
 0x2d6   : > { %v2651_v38 = vadd.f32 %v2650_v44, %v2572_v50  ;;  %v13138_v44 = vld [vmem:[%s18446_s28 + $0x80] sm:$0xf0]  ;;  %v17525_v62 = vld [vmem:[%s22621_s1 + $0x4e8] sm:$0xff]  ;;  %4408 = vmatpush.bf16.msra.mxu2 %v17517_v3 }
 0x2d7   : > { %4487 = vmatpush.bf16.msra.mxu3 %v17525_v62  ;;  %v13141_v27 = vor.u32 %v17360_v29, %v13138_v44  ;;  %v13162_v29 = vld [vmem:[%s18446_s28 + $0xa8] sm:$0xf0] }
 0x2d8   : > { %v19789_v24 = vadd.f32 %v2651_v38, %v19496_v46  ;;  %v17361_v38 = vld [vmem:[%s18446_s28 + $0x7c] sm:$0xf] }
 0x2db   : > { %v2573_v47 = vpop.f32.mrf.mxu2  ;;  %v2418_v56 = vpop.f32.mrf.mxu0 }
 0x2dc   : > { %v2652_v25 = vpop.f32.mrf.mxu3  ;;  %v2574_v20 = vadd.f32 %v2573_v47, %v2495_v4  ;;  %v2497_v34 = vpop.f32.mrf.mxu1  ;;  %v17363_v4 = vld [vmem:[%s18446_s28 + $0x84] sm:$0xf0]  ;;  %v13149_v47 = vor.u32 %v17361_v38, %v13146_v15 }
 0x2dd   : > { %v2498_v53 = vadd.f32 %v2497_v34, %v2418_v56  ;;  %v17509_v56 = vld [vmem:[%s22621_s1 + $0x468] sm:$0xff] }
 0x2de   : > { %v2653_v46 = vadd.f32 %v2652_v25, %v2574_v20  ;;  %3324 = vmatmul.bf16.gmra.mxu0 %v13121_v49  ;;  %v17501_v20 = vld [vmem:[%s22621_s1 + $0x428] sm:$0xff]  ;;  %4329 = vmatpush.bf16.msra.mxu1 %v17509_v56  ;;  %v17370_v56 = vld [vmem:[%s18446_s28 + $0xbc] sm:$0xf0] }
 0x2df   : > { %3403 = vmatmul.bf16.gmra.mxu1 %v13125_v23  ;;  %4250 = vmatpush.bf16.msra.mxu0 %v17501_v20  ;;  %v13168_v20 = vld [vmem:[%s18446_s28 + $0xb0] sm:$0xf] }
 0x2e0   : > { %v19798_v11 = vadd.f32 %v2653_v46, %v19507_v57  ;;  %3482 = vmatmul.bf16.gmra.mxu2 %v13129_v22  ;;  %v13144_v57 = vld [vmem:[%s18446_s28 + $0x78] sm:$0xf] }
 0x2e1   : > { %3561 = vmatmul.bf16.gmra.mxu3 %v13133_v59  ;;  %v13145_v31 = vor.u32 %v17363_v4, %v13144_v57 }
 0x2e3   : > { %v2576_v55 = vpop.f32.mrf.mxu2  ;;  %v2420_v32 = vpop.f32.mrf.mxu0 }
 0x2e4   : > { %v2655_v33 = vpop.f32.mrf.mxu3  ;;  %v2577_v61 = vadd.f32 %v2576_v55, %v2498_v53  ;;  %v2499_v42 = vpop.f32.mrf.mxu1 }
 0x2e5   : > { %v2500_v63 = vadd.f32 %v2499_v42, %v2420_v32  ;;  %v17364_v42 = vld [vmem:[%s18446_s28 + $0x94] sm:$0xf] }
 0x2e6   : > { %v2656_v10 = vadd.f32 %v2655_v33, %v2577_v61  ;;  %v13152_v33 = vld [vmem:[%s18446_s28 + $0x90] sm:$0xf]  ;;  %v17366_v61 = vld [vmem:[%s18446_s28 + $0x9c] sm:$0xf0] }
 0x2e7   : > { %v13153_v3 = vor.u32 %v17366_v61, %v13152_v33  ;;  %v17369_v33 = vld [vmem:[%s18446_s28 + $0xbc] sm:$0xf]  ;;  %v13178_v61 = vld [vmem:[%s18446_s28 + $0xc8] sm:$0xf0] }
 0x2e8   : > { %v19805_v50 = vadd.f32 %v2656_v10, %v19510_v48  ;;  %v13160_v10 = vld [vmem:[%s18446_s28 + $0x98] sm:$0xf] }
 0x2eb   : > { %v2578_v5 = vpop.f32.mrf.mxu2  ;;  %v2423_v16 = vpop.f32.mrf.mxu0 }
 0x2ec   : > { %v2657_v17 = vpop.f32.mrf.mxu3  ;;  %v2579_v48 = vadd.f32 %v2578_v5, %v2500_v63  ;;  %v2502_v18 = vpop.f32.mrf.mxu1  ;;  %v13154_v63 = vld [vmem:[%s18446_s28 + $0xa0] sm:$0xf0]  ;;  %v13161_v5 = vor.u32 %v17367_v9, %v13160_v10  ;;  %v13169_v10 = vor.u32 %v17370_v56, %v13168_v20  ;;  %v17375_v20 = vld [vmem:[%s18446_s28 + $0xe4] sm:$0xf0]  ;;  %v17373_v56 = vld [vmem:[%s18446_s28 + $0xdc] sm:$0xf] }
 0x2ed   : > { %v2503_v25 = vadd.f32 %v2502_v18, %v2423_v16  ;;  %v13157_v62 = vor.u32 %v17364_v42, %v13154_v63  ;;  %v17508_v42 = vld [vmem:[%s22621_s1 + $0x460] sm:$0xff] }
 0x2ee   : > { %v2658_v49 = vadd.f32 %v2657_v17, %v2579_v48  ;;  %3329 = vmatmul.bf16.gmra.mxu0 %v13137_v21  ;;  %v13165_v17 = vor.u32 %v17365_v6, %v13162_v29  ;;  %4330 = vmatpush.bf16.msra.mxu1 %v17508_v42 }
 0x2ef   : > { %3408 = vmatmul.bf16.gmra.mxu1 %v13141_v27 }
 0x2f0   : > { %v19818_v23 = vadd.f32 %v2658_v49, %v19527_v60  ;;  %3487 = vmatmul.bf16.gmra.mxu2 %v13145_v31 }
 0x2f1   : > { %3566 = vmatmul.bf16.gmra.mxu3 %v13149_v47 }
 0x2f3   : > { %v2581_v60 = vpop.f32.mrf.mxu2  ;;  %v2425_v59 = vpop.f32.mrf.mxu0 }
 0x2f4   : > { %v2660_v34 = vpop.f32.mrf.mxu3  ;;  %v2582_v22 = vadd.f32 %v2581_v60, %v2503_v25  ;;  %v2504_v53 = vpop.f32.mrf.mxu1  ;;  %v17368_v60 = vld [vmem:[%s18446_s28 + $0xb4] sm:$0xf] }
 0x2f5   : > { %v2505_v46 = vadd.f32 %v2504_v53, %v2425_v59  ;;  %v17371_v59 = vld [vmem:[%s18446_s28 + $0xc4] sm:$0xf0]  ;;  %v17516_v53 = vld [vmem:[%s22621_s1 + $0x4a0] sm:$0xff] }
 0x2f6   : > { %v2661_v55 = vadd.f32 %v2660_v34, %v2582_v22  ;;  %v13170_v34 = vld [vmem:[%s18446_s28 + $0xc0] sm:$0xf0]  ;;  %v13176_v22 = vld [vmem:[%s18446_s28 + $0xb8] sm:$0xf]  ;;  %4409 = vmatpush.bf16.msra.mxu2 %v17516_v53 }
 0x2f7   : > { %v13173_v9 = vor.u32 %v17368_v60, %v13170_v34  ;;  %v13194_v60 = vld [vmem:[%s18446_s28 + $0xe8] sm:$0xf0] }
 0x2f8   : > { %v19829_v32 = vadd.f32 %v2661_v55, %v19536_v13  ;;  %v17500_v55 = vld [vmem:[%s22621_s1 + $0x420] sm:$0xff]  ;;  %v13197_v42 = vor.u32 %v17373_v56, %v13194_v60 }
 0x2f9   : > { %4251 = vmatpush.bf16.msra.mxu0 %v17500_v55 }
 0x2fb   : > { %v2583_v44 = vpop.f32.mrf.mxu2  ;;  %v2428_v38 = vpop.f32.mrf.mxu0 }
 0x2fc   : > { %v2662_v57 = vpop.f32.mrf.mxu3  ;;  %v2584_v4 = vadd.f32 %v2583_v44, %v2505_v46  ;;  %v2507_v15 = vpop.f32.mrf.mxu1  ;;  %v17524_v46 = vld [vmem:[%s22621_s1 + $0x4e0] sm:$0xff] }
 0x2fd   : > { %v2508_v21 = vadd.f32 %v2507_v15, %v2428_v38  ;;  %4488 = vmatpush.bf16.msra.mxu3 %v17524_v46 }
 0x2fe   : > { %v2663_v13 = vadd.f32 %v2662_v57, %v2584_v4  ;;  %3334 = vmatmul.bf16.gmra.mxu0 %v13153_v3  ;;  %v13177_v57 = vor.u32 %v17371_v59, %v13176_v22  ;;  %v13181_v3 = vor.u32 %v17369_v33, %v13178_v61 }
 0x2ff   : > { %3413 = vmatmul.bf16.gmra.mxu1 %v13157_v62 }
 0x300   : > { %v19838_v27 = vadd.f32 %v2663_v13, %v19547_v41  ;;  %3492 = vmatmul.bf16.gmra.mxu2 %v13161_v5 }
 0x301   : > { %3571 = vmatmul.bf16.gmra.mxu3 %v13165_v17 }
 0x303   : > { %v2586_v48 = vpop.f32.mrf.mxu2  ;;  %v2430_v31 = vpop.f32.mrf.mxu0 }
 0x304   : > { %v2665_v16 = vpop.f32.mrf.mxu3  ;;  %v2587_v18 = vadd.f32 %v2586_v48, %v2508_v21  ;;  %v2509_v47 = vpop.f32.mrf.mxu1 }
 0x305   : > { %v2510_v25 = vadd.f32 %v2509_v47, %v2430_v31  ;;  %v17374_v31 = vld [vmem:[%s18446_s28 + $0xdc] sm:$0xf0] }
 0x306   : > { %v2666_v49 = vadd.f32 %v2665_v16, %v2587_v18  ;;  %v13184_v18 = vld [vmem:[%s18446_s28 + $0xd0] sm:$0xf] }
 0x307   : > { %v13185_v59 = vor.u32 %v17374_v31, %v13184_v18  ;;  %v17379_v18 = vld [vmem:[%s18446_s28 + $0x104] sm:$0xf0]  ;;  %v17377_v31 = vld [vmem:[%s18446_s28 + $0xfc] sm:$0xf] }
 0x308   : > { %v19847_v41 = vadd.f32 %v2666_v49, %v19550_v45  ;;  %v13192_v49 = vld [vmem:[%s18446_s28 + $0xd8] sm:$0xf] }
 0x309   : > { %v13193_v61 = vor.u32 %v17375_v20, %v13192_v49 }
 0x30b   : > { %v2588_v45 = vpop.f32.mrf.mxu2  ;;  %v2433_v29 = vpop.f32.mrf.mxu0 }
 0x30c   : > { %v2667_v63 = vpop.f32.mrf.mxu3  ;;  %v2589_v6 = vadd.f32 %v2588_v45, %v2510_v25  ;;  %v2512_v44 = vpop.f32.mrf.mxu1  ;;  %v17372_v25 = vld [vmem:[%s18446_s28 + $0xd4] sm:$0xf] }
 0x30d   : > { %v2513_v62 = vadd.f32 %v2512_v44, %v2433_v29 }
 0x30e   : > { %v2668_v4 = vadd.f32 %v2667_v63, %v2589_v6  ;;  %3339 = vmatmul.bf16.gmra.mxu0 %v13169_v10  ;;  %v17515_v10 = vld [vmem:[%s22621_s1 + $0x498] sm:$0xff] }
 0x30f   : > { %3418 = vmatmul.bf16.gmra.mxu1 %v13173_v9  ;;  %v17523_v9 = vld [vmem:[%s22621_s1 + $0x4d8] sm:$0xff]  ;;  %4410 = vmatpush.bf16.msra.mxu2 %v17515_v10 }
 0x310   : > { %v19864_v38 = vadd.f32 %v2668_v4, %v19573_v7  ;;  %3497 = vmatmul.bf16.gmra.mxu2 %v13177_v57  ;;  %v13186_v7 = vld [vmem:[%s18446_s28 + $0xe0] sm:$0xf0]  ;;  %4489 = vmatpush.bf16.msra.mxu3 %v17523_v9  ;;  %v13200_v4 = vld [vmem:[%s18446_s28 + $0xf0] sm:$0xf] }
 0x311   : > { %3576 = vmatmul.bf16.gmra.mxu3 %v13181_v3  ;;  %v13189_v53 = vor.u32 %v17372_v25, %v13186_v7  ;;  %v13210_v25 = vld [vmem:[%s18446_s28 + $0x108] sm:$0xf0] }
 0x313   : > { %v2591_v15 = vpop.f32.mrf.mxu2  ;;  %v2435_v21 = vpop.f32.mrf.mxu0 }
 0x314   : > { %v2670_v5 = vpop.f32.mrf.mxu3  ;;  %v2592_v17 = vadd.f32 %v2591_v15, %v2513_v62  ;;  %v2514_v13 = vpop.f32.mrf.mxu1  ;;  %v17378_v15 = vld [vmem:[%s18446_s28 + $0xfc] sm:$0xf0] }
 0x315   : > { %v2515_v48 = vadd.f32 %v2514_v13, %v2435_v21  ;;  %v13208_v13 = vld [vmem:[%s18446_s28 + $0xf8] sm:$0xf]  ;;  %v13201_v20 = vor.u32 %v17378_v15, %v13200_v4  ;;  %v13226_v4 = vld [vmem:[%s18446_s28 + $0x128] sm:$0xf0] }
 0x316   : > { %v2671_v16 = vadd.f32 %v2670_v5, %v2592_v17  ;;  %v17376_v5 = vld [vmem:[%s18446_s28 + $0xf4] sm:$0xf]  ;;  %v13202_v17 = vld [vmem:[%s18446_s28 + $0x100] sm:$0xf0] }
 0x317   : > { %v13205_v56 = vor.u32 %v17376_v5, %v13202_v17 }
 0x318   : > { %v19869_v47 = vadd.f32 %v2671_v16, %v19576_v1  ;;  %v17507_v16 = vld [vmem:[%s22621_s1 + $0x458] sm:$0xff] }
 0x319   : > { %4331 = vmatpush.bf16.msra.mxu1 %v17507_v16 }
 0x31b   : > { %v2593_v34 = vpop.f32.mrf.mxu2  ;;  %v2438_v55 = vpop.f32.mrf.mxu0 }
 0x31c   : > { %v2672_v22 = vpop.f32.mrf.mxu3  ;;  %v2594_v46 = vadd.f32 %v2593_v34, %v2515_v48  ;;  %v2517_v33 = vpop.f32.mrf.mxu1  ;;  %v17499_v48 = vld [vmem:[%s22621_s1 + $0x418] sm:$0xff] }
 0x31d   : > { %v2518_v45 = vadd.f32 %v2517_v33, %v2438_v55  ;;  %4252 = vmatpush.bf16.msra.mxu0 %v17499_v48 }
 0x31e   : > { %v2673_v63 = vadd.f32 %v2672_v22, %v2594_v46  ;;  %3344 = vmatmul.bf16.gmra.mxu0 %v13185_v59  ;;  %v13209_v22 = vor.u32 %v17379_v18, %v13208_v13  ;;  %v13213_v59 = vor.u32 %v17377_v31, %v13210_v25 }
 0x31f   : > { %3423 = vmatmul.bf16.gmra.mxu1 %v13189_v53 }
 0x320   : > { %v19878_v1 = vadd.f32 %v2673_v63, %v19587_v8  ;;  %3502 = vmatmul.bf16.gmra.mxu2 %v13193_v61 }
 0x321   : > { %3581 = vmatmul.bf16.gmra.mxu3 %v13197_v42 }
 0x323   : > { %v2596_v6 = vpop.f32.mrf.mxu2  ;;  %v2440_v44 = vpop.f32.mrf.mxu0 }
 0x324   : > { %v2675_v8 = vpop.f32.mrf.mxu3  ;;  %v2597_v29 = vadd.f32 %v2596_v6, %v2518_v45  ;;  %v2519_v57 = vpop.f32.mrf.mxu1  ;;  %v13216_v6 = vld [vmem:[%s18446_s28 + $0x110] sm:$0xf] }
 0x325   : > { %v2520_v3 = vadd.f32 %v2519_v57, %v2440_v44  ;;  %v17380_v44 = vld [vmem:[%s18446_s28 + $0x114] sm:$0xf]  ;;  %v13224_v57 = vld [vmem:[%s18446_s28 + $0x118] sm:$0xf] }
 0x326   : > { %v2676_v62 = vadd.f32 %v2675_v8, %v2597_v29  ;;  %v17382_v8 = vld [vmem:[%s18446_s28 + $0x11c] sm:$0xf0] }
 0x327   : > { %v13217_v17 = vor.u32 %v17382_v8, %v13216_v6  ;;  %v17387_v6 = vld [vmem:[%s18446_s28 + $0x144] sm:$0xf0]  ;;  %v17385_v8 = vld [vmem:[%s18446_s28 + $0x13c] sm:$0xf] }
 0x328   : > { %v19891_v21 = vadd.f32 %v2676_v62, %v19596_v58  ;;  %v17381_v62 = vld [vmem:[%s18446_s28 + $0x11c] sm:$0xf] }
 0x329   : > { %v13229_v25 = vor.u32 %v17381_v62, %v13226_v4 }
 0x32b   : > { %v2598_v7 = vpop.f32.mrf.mxu2  ;;  %v2443_v60 = vpop.f32.mrf.mxu0 }
 0x32c   : > { %v2677_v49 = vpop.f32.mrf.mxu3  ;;  %v2599_v58 = vadd.f32 %v2598_v7, %v2520_v3  ;;  %v2522_v34 = vpop.f32.mrf.mxu1  ;;  %v17383_v3 = vld [vmem:[%s18446_s28 + $0x124] sm:$0xf0] }
 0x32d   : > { %v2523_v53 = vadd.f32 %v2522_v34, %v2443_v60  ;;  %v13225_v31 = vor.u32 %v17383_v3, %v13224_v57 }
 0x32e   : > { %v2678_v46 = vadd.f32 %v2677_v49, %v2599_v58  ;;  %3349 = vmatmul.bf16.gmra.mxu0 %v13201_v20  ;;  %v17514_v20 = vld [vmem:[%s22621_s1 + $0x490] sm:$0xff] }
 0x32f   : > { %3428 = vmatmul.bf16.gmra.mxu1 %v13205_v56  ;;  %v17522_v56 = vld [vmem:[%s22621_s1 + $0x4d0] sm:$0xff]  ;;  %4411 = vmatpush.bf16.msra.mxu2 %v17514_v20 }
 0x330   : > { %v19904_v55 = vadd.f32 %v2678_v46, %v19613_v36  ;;  %3507 = vmatmul.bf16.gmra.mxu2 %v13209_v22  ;;  %v13218_v36 = vld [vmem:[%s18446_s28 + $0x120] sm:$0xf0]  ;;  %v17498_v58 = vld [vmem:[%s22621_s1 + $0x410] sm:$0xff]  ;;  %4490 = vmatpush.bf16.msra.mxu3 %v17522_v56 }
 0x331   : > { %3586 = vmatmul.bf16.gmra.mxu3 %v13213_v59  ;;  %v13221_v13 = vor.u32 %v17380_v44, %v13218_v36  ;;  %4253 = vmatpush.bf16.msra.mxu0 %v17498_v58  ;;  %v13242_v44 = vld [vmem:[%s18446_s28 + $0x148] sm:$0xf0]  ;;  %v13248_v58 = vld [vmem:[%s18446_s28 + $0x150] sm:$0xf] }
 0x333   : > { %v2601_v33 = vpop.f32.mrf.mxu2  ;;  %v2445_v45 = vpop.f32.mrf.mxu0 }
 0x334   : > { %v2680_v61 = vpop.f32.mrf.mxu3  ;;  %v2602_v42 = vadd.f32 %v2601_v33, %v2523_v53  ;;  %v2524_v63 = vpop.f32.mrf.mxu1 }
 0x335   : > { %v2525_v10 = vadd.f32 %v2524_v63, %v2445_v45  ;;  %v17384_v63 = vld [vmem:[%s18446_s28 + $0x134] sm:$0xf] }
 0x336   : > { %v2681_v9 = vadd.f32 %v2680_v61, %v2602_v42  ;;  %v13232_v61 = vld [vmem:[%s18446_s28 + $0x130] sm:$0xf]  ;;  %v17386_v42 = vld [vmem:[%s18446_s28 + $0x13c] sm:$0xf0] }
 0x337   : > { %v13233_v3 = vor.u32 %v17386_v42, %v13232_v61  ;;  %v13258_v61 = vld [vmem:[%s18446_s28 + $0x168] sm:$0xf0] }
 0x338   : > { %v19909_v29 = vadd.f32 %v2681_v9, %v19616_v14  ;;  %v13240_v9 = vld [vmem:[%s18446_s28 + $0x138] sm:$0xf] }
 0x33b   : > { %v2603_v15 = vpop.f32.mrf.mxu2  ;;  %v2448_v16 = vpop.f32.mrf.mxu0 }
 0x33c   : > { %v2682_v5 = vpop.f32.mrf.mxu3  ;;  %v2604_v48 = vadd.f32 %v2603_v15, %v2525_v10  ;;  %v2527_v18 = vpop.f32.mrf.mxu1  ;;  %v13234_v10 = vld [vmem:[%s18446_s28 + $0x140] sm:$0xf0] }
 0x33d   : > { %v2528_v7 = vadd.f32 %v2527_v18, %v2448_v16  ;;  %v13237_v62 = vor.u32 %v17384_v63, %v13234_v10 }
 0x33e   : > { %v2683_v49 = vadd.f32 %v2682_v5, %v2604_v48  ;;  %3354 = vmatmul.bf16.gmra.mxu0 %v13217_v17  ;;  %v13241_v17 = vor.u32 %v17387_v6, %v13240_v9 }
 0x33f   : > { %3433 = vmatmul.bf16.gmra.mxu1 %v13221_v13  ;;  %v13245_v13 = vor.u32 %v17385_v8, %v13242_v44 }
 0x340   : > { %v19918_v14 = vadd.f32 %v2683_v49, %v19627_v39  ;;  %3512 = vmatmul.bf16.gmra.mxu2 %v13225_v31  ;;  %v17506_v39 = vld [vmem:[%s22621_s1 + $0x450] sm:$0xff] }
 0x341   : > { %3591 = vmatmul.bf16.gmra.mxu3 %v13229_v25  ;;  %4332 = vmatpush.bf16.msra.mxu1 %v17506_v39  ;;  %v17390_v39 = vld [vmem:[%s18446_s28 + $0x15c] sm:$0xf0] }
 0x342   : > { %v13249_v10 = vor.u32 %v17390_v39, %v13248_v58  ;;  %v17395_v58 = vld [vmem:[%s18446_s28 + $0x184] sm:$0xf0]  ;;  %v17393_v39 = vld [vmem:[%s18446_s28 + $0x17c] sm:$0xf] }
 0x343   : > { %v2606_v60 = vpop.f32.mrf.mxu2  ;;  %v2450_v59 = vpop.f32.mrf.mxu0 }
 0x344   : > { %v2685_v34 = vpop.f32.mrf.mxu3  ;;  %v2607_v22 = vadd.f32 %v2606_v60, %v2528_v7  ;;  %v2529_v53 = vpop.f32.mrf.mxu1  ;;  %v17388_v60 = vld [vmem:[%s18446_s28 + $0x154] sm:$0xf] }
 0x345   : > { %v2530_v46 = vadd.f32 %v2529_v53, %v2450_v59  ;;  %v17513_v59 = vld [vmem:[%s22621_s1 + $0x488] sm:$0xff] }
 0x346   : > { %v2686_v33 = vadd.f32 %v2685_v34, %v2607_v22  ;;  %v13250_v34 = vld [vmem:[%s18446_s28 + $0x160] sm:$0xf0]  ;;  %v17521_v53 = vld [vmem:[%s22621_s1 + $0x4c8] sm:$0xff]  ;;  %4412 = vmatpush.bf16.msra.mxu2 %v17513_v59 }
 0x347   : > { %4491 = vmatpush.bf16.msra.mxu3 %v17521_v53  ;;  %v13253_v9 = vor.u32 %v17388_v60, %v13250_v34  ;;  %v13274_v60 = vld [vmem:[%s18446_s28 + $0x188] sm:$0xf0] }
 0x348   : > { %v19935_v45 = vadd.f32 %v2686_v33, %v19642_v26  ;;  %v17389_v33 = vld [vmem:[%s18446_s28 + $0x15c] sm:$0xf] }
 0x34b   : > { %v2608_v36 = vpop.f32.mrf.mxu2  ;;  %v3320_v15 = vpop.f32.mrf.mxu0 }
 0x34c   : > { %v2687_v57 = vpop.f32.mrf.mxu3  ;;  %v2609_v4 = vadd.f32 %v2608_v36, %v2530_v46  ;;  %v3399_v5 = vpop.f32.mrf.mxu1  ;;  %v17391_v46 = vld [vmem:[%s18446_s28 + $0x164] sm:$0xf0]  ;;  %v13261_v36 = vor.u32 %v17389_v33, %v13258_v61 }
 0x34d   : > { %v3400_v48 = vadd.f32 %v3399_v5, %v3320_v15  ;;  %v17505_v15 = vld [vmem:[%s22621_s1 + $0x448] sm:$0xff] }
 0x34e   : > { %v2688_v26 = vadd.f32 %v2687_v57, %v2609_v4  ;;  %3359 = vmatmul.bf16.gmra.mxu0 %v13233_v3  ;;  %v17497_v4 = vld [vmem:[%s22621_s1 + $0x408] sm:$0xff]  ;;  %4333 = vmatpush.bf16.msra.mxu1 %v17505_v15  ;;  %v17398_v15 = vld [vmem:[%s18446_s28 + $0x19c] sm:$0xf0] }
 0x34f   : > { %3438 = vmatmul.bf16.gmra.mxu1 %v13237_v62  ;;  %4254 = vmatpush.bf16.msra.mxu0 %v17497_v4  ;;  %v13280_v4 = vld [vmem:[%s18446_s28 + $0x190] sm:$0xf] }
 0x350   : > { %v19944_v16 = vadd.f32 %v2688_v26, %v19652_v54  ;;  %3517 = vmatmul.bf16.gmra.mxu2 %v13241_v17  ;;  %v13256_v54 = vld [vmem:[%s18446_s28 + $0x158] sm:$0xf] }
 0x351   : > { %3596 = vmatmul.bf16.gmra.mxu3 %v13245_v13  ;;  %v13257_v44 = vor.u32 %v17391_v46, %v13256_v54 }
 0x353   : > { %v3478_v18 = vpop.f32.mrf.mxu2  ;;  %v3322_v7 = vpop.f32.mrf.mxu0 }
 0x354   : > { %v3557_v31 = vpop.f32.mrf.mxu3  ;;  %v3479_v25 = vadd.f32 %v3478_v18, %v3400_v48  ;;  %v3401_v49 = vpop.f32.mrf.mxu1 }
 0x355   : > { %v3402_v20 = vadd.f32 %v3401_v49, %v3322_v7  ;;  %v17392_v49 = vld [vmem:[%s18446_s28 + $0x174] sm:$0xf] }
 0x356   : > { %v3558_v56 = vadd.f32 %v3557_v31, %v3479_v25  ;;  %v13264_v31 = vld [vmem:[%s18446_s28 + $0x170] sm:$0xf]  ;;  %v17394_v25 = vld [vmem:[%s18446_s28 + $0x17c] sm:$0xf0] }
 0x357   : > { %v13265_v59 = vor.u32 %v17394_v25, %v13264_v31  ;;  %v17397_v31 = vld [vmem:[%s18446_s28 + $0x19c] sm:$0xf]  ;;  %v13290_v25 = vld [vmem:[%s18446_s28 + $0x1a8] sm:$0xf0] }
 0x358   : > { %v19951_v22 = vadd.f32 %v3558_v56, %v19659_v52  ;;  %v13272_v56 = vld [vmem:[%s18446_s28 + $0x178] sm:$0xf] }
 0x35b   : > { %v3480_v42 = vpop.f32.mrf.mxu2  ;;  %v3325_v6 = vpop.f32.mrf.mxu0 }
 0x35c   : > { %v3559_v63 = vpop.f32.mrf.mxu3  ;;  %v3481_v52 = vadd.f32 %v3480_v42, %v3402_v20  ;;  %v3404_v8 = vpop.f32.mrf.mxu1  ;;  %v13266_v20 = vld [vmem:[%s18446_s28 + $0x180] sm:$0xf0]  ;;  %v13273_v42 = vor.u32 %v17395_v58, %v13272_v56  ;;  %v13281_v56 = vor.u32 %v17398_v15, %v13280_v4  ;;  %v17403_v4 = vld [vmem:[%s18446_s28 + $0x1c4] sm:$0xf0]  ;;  %v17401_v15 = vld [vmem:[%s18446_s28 + $0x1bc] sm:$0xf] }
 0x35d   : > { %v3405_v57 = vadd.f32 %v3404_v8, %v3325_v6  ;;  %v13269_v53 = vor.u32 %v17392_v49, %v13266_v20  ;;  %v17504_v49 = vld [vmem:[%s22621_s1 + $0x440] sm:$0xff] }
 0x35e   : > { %v3560_v3 = vadd.f32 %v3559_v63, %v3481_v52  ;;  %3364 = vmatmul.bf16.gmra.mxu0 %v13249_v10  ;;  %v13277_v63 = vor.u32 %v17393_v39, %v13274_v60  ;;  %4334 = vmatpush.bf16.msra.mxu1 %v17504_v49 }
 0x35f   : > { %3443 = vmatmul.bf16.gmra.mxu1 %v13253_v9 }
 0x360   : > { %v19964_v62 = vadd.f32 %v3560_v3, %v19672_v43  ;;  %3522 = vmatmul.bf16.gmra.mxu2 %v13257_v44 }
 0x361   : > { %3601 = vmatmul.bf16.gmra.mxu3 %v13261_v36 }
 0x363   : > { %v3483_v43 = vpop.f32.mrf.mxu2  ;;  %v3327_v13 = vpop.f32.mrf.mxu0 }
 0x364   : > { %v3562_v5 = vpop.f32.mrf.mxu3  ;;  %v3484_v17 = vadd.f32 %v3483_v43, %v3405_v57  ;;  %v3406_v48 = vpop.f32.mrf.mxu1  ;;  %v17396_v43 = vld [vmem:[%s18446_s28 + $0x194] sm:$0xf] }
 0x365   : > { %v3407_v26 = vadd.f32 %v3406_v48, %v3327_v13  ;;  %v17399_v13 = vld [vmem:[%s18446_s28 + $0x1a4] sm:$0xf0]  ;;  %v17512_v48 = vld [vmem:[%s22621_s1 + $0x480] sm:$0xff] }
 0x366   : > { %v3563_v18 = vadd.f32 %v3562_v5, %v3484_v17  ;;  %v13282_v5 = vld [vmem:[%s18446_s28 + $0x1a0] sm:$0xf0]  ;;  %v13288_v17 = vld [vmem:[%s18446_s28 + $0x198] sm:$0xf]  ;;  %4413 = vmatpush.bf16.msra.mxu2 %v17512_v48 }
 0x367   : > { %v13285_v58 = vor.u32 %v17396_v43, %v13282_v5  ;;  %v13306_v43 = vld [vmem:[%s18446_s28 + $0x1c8] sm:$0xf0] }
 0x368   : > { %v19975_v7 = vadd.f32 %v3563_v18, %v19683_v0  ;;  %v17496_v18 = vld [vmem:[%s22621_s1 + $0x400] sm:$0xff]  ;;  %v13309_v49 = vor.u32 %v17401_v15, %v13306_v43 }
 0x369   : > { %4255 = vmatpush.bf16.msra.mxu0 %v17496_v18 }
 0x36b   : > { %v3485_v34 = vpop.f32.mrf.mxu2  ;;  %v3330_v33 = vpop.f32.mrf.mxu0 }
 0x36c   : > { %v3564_v54 = vpop.f32.mrf.mxu3  ;;  %v3486_v46 = vadd.f32 %v3485_v34, %v3407_v26  ;;  %v3409_v61 = vpop.f32.mrf.mxu1  ;;  %v17520_v26 = vld [vmem:[%s22621_s1 + $0x4c0] sm:$0xff] }
 0x36d   : > { %v3410_v10 = vadd.f32 %v3409_v61, %v3330_v33  ;;  %4492 = vmatpush.bf16.msra.mxu3 %v17520_v26 }
 0x36e   : > { %v3565_v0 = vadd.f32 %v3564_v54, %v3486_v46  ;;  %3369 = vmatmul.bf16.gmra.mxu0 %v13265_v59  ;;  %v13289_v54 = vor.u32 %v17399_v13, %v13288_v17  ;;  %v13293_v59 = vor.u32 %v17397_v31, %v13290_v25 }
 0x36f   : > { %3448 = vmatmul.bf16.gmra.mxu1 %v13269_v53 }
 0x370   : > { %v19984_v9 = vadd.f32 %v3565_v0, %v19692_v35  ;;  %3527 = vmatmul.bf16.gmra.mxu2 %v13273_v42 }
 0x371   : > { %3606 = vmatmul.bf16.gmra.mxu3 %v13277_v63 }
 0x373   : > { %v3488_v52 = vpop.f32.mrf.mxu2  ;;  %v3332_v44 = vpop.f32.mrf.mxu0 }
 0x374   : > { %v3567_v6 = vpop.f32.mrf.mxu3  ;;  %v3489_v8 = vadd.f32 %v3488_v52, %v3410_v10  ;;  %v3411_v36 = vpop.f32.mrf.mxu1 }
 0x375   : > { %v3412_v57 = vadd.f32 %v3411_v36, %v3332_v44  ;;  %v17402_v44 = vld [vmem:[%s18446_s28 + $0x1bc] sm:$0xf0] }
 0x376   : > { %v3568_v3 = vadd.f32 %v3567_v6, %v3489_v8  ;;  %v13296_v8 = vld [vmem:[%s18446_s28 + $0x1b0] sm:$0xf] }
 0x377   : > { %v13297_v13 = vor.u32 %v17402_v44, %v13296_v8  ;;  %v17407_v8 = vld [vmem:[%s18446_s28 + $0x1e4] sm:$0xf0]  ;;  %v17405_v44 = vld [vmem:[%s18446_s28 + $0x1dc] sm:$0xf] }
 0x378   : > { %v19993_v35 = vadd.f32 %v3568_v3, %v19701_v51  ;;  %v13304_v3 = vld [vmem:[%s18446_s28 + $0x1b8] sm:$0xf] }
 0x379   : > { %v13305_v25 = vor.u32 %v17403_v4, %v13304_v3 }
 0x37b   : > { %v3490_v51 = vpop.f32.mrf.mxu2  ;;  %v3335_v60 = vpop.f32.mrf.mxu0 }
 0x37c   : > { %v3569_v20 = vpop.f32.mrf.mxu3  ;;  %v3491_v39 = vadd.f32 %v3490_v51, %v3412_v57  ;;  %v3414_v34 = vpop.f32.mrf.mxu1  ;;  %v17400_v57 = vld [vmem:[%s18446_s28 + $0x1b4] sm:$0xf] }
 0x37d   : > { %v3415_v53 = vadd.f32 %v3414_v34, %v3335_v60 }
 0x37e   : > { %v3570_v46 = vadd.f32 %v3569_v20, %v3491_v39  ;;  %3374 = vmatmul.bf16.gmra.mxu0 %v13281_v56  ;;  %v17607_v56 = vld [vmem:[%s22621_s1 + $0x5b8] sm:$0xff] }
 0x37f   : > { %3453 = vmatmul.bf16.gmra.mxu1 %v13285_v58  ;;  %v17615_v58 = vld [vmem:[%s22621_s1 + $0x5f8] sm:$0xff]  ;;  %5343 = vmatpush.bf16.msrb.mxu2 %v17607_v56 }
 0x380   : > { %v20010_v33 = vadd.f32 %v3570_v46, %v19718_v19  ;;  %3532 = vmatmul.bf16.gmra.mxu2 %v13289_v54  ;;  %v13298_v19 = vld [vmem:[%s18446_s28 + $0x1c0] sm:$0xf0]  ;;  %5422 = vmatpush.bf16.msrb.mxu3 %v17615_v58  ;;  %v13312_v46 = vld [vmem:[%s18446_s28 + $0x1d0] sm:$0xf] }
 0x381   : > { %3611 = vmatmul.bf16.gmra.mxu3 %v13293_v59  ;;  %v13301_v48 = vor.u32 %v17400_v57, %v13298_v19  ;;  %v13322_v57 = vld [vmem:[%s18446_s28 + $0x1e8] sm:$0xf0] }
 0x383   : > { %v3493_v61 = vpop.f32.mrf.mxu2  ;;  %v3337_v10 = vpop.f32.mrf.mxu0 }
 0x384   : > { %v3572_v42 = vpop.f32.mrf.mxu3  ;;  %v3494_v63 = vadd.f32 %v3493_v61, %v3415_v53  ;;  %v3416_v0 = vpop.f32.mrf.mxu1  ;;  %v17406_v61 = vld [vmem:[%s18446_s28 + $0x1dc] sm:$0xf0] }
 0x385   : > { %v3417_v52 = vadd.f32 %v3416_v0, %v3337_v10  ;;  %v13320_v0 = vld [vmem:[%s18446_s28 + $0x1d8] sm:$0xf]  ;;  %v13313_v4 = vor.u32 %v17406_v61, %v13312_v46  ;;  %v13530_v46 = vld [vmem:[%s18446_s28 + $0x58] sm:$0xf0] }
 0x386   : > { %v3573_v6 = vadd.f32 %v3572_v42, %v3494_v63  ;;  %v17404_v42 = vld [vmem:[%s18446_s28 + $0x1d4] sm:$0xf]  ;;  %v13314_v63 = vld [vmem:[%s18446_s28 + $0x1e0] sm:$0xf0] }
 0x387   : > { %v13317_v15 = vor.u32 %v17404_v42, %v13314_v63 }
 0x388   : > { %v20015_v36 = vadd.f32 %v3573_v6, %v19723_v37  ;;  %v17599_v6 = vld [vmem:[%s22621_s1 + $0x578] sm:$0xff] }
 0x389   : > { %5264 = vmatpush.bf16.msrb.mxu1 %v17599_v6 }
 0x38b   : > { %v3495_v5 = vpop.f32.mrf.mxu2  ;;  %v3340_v18 = vpop.f32.mrf.mxu0 }
 0x38c   : > { %v3574_v17 = vpop.f32.mrf.mxu3  ;;  %v3496_v26 = vadd.f32 %v3495_v5, %v3417_v52  ;;  %v3419_v31 = vpop.f32.mrf.mxu1  ;;  %v17591_v52 = vld [vmem:[%s22621_s1 + $0x538] sm:$0xff] }
 0x38d   : > { %v3420_v51 = vadd.f32 %v3419_v31, %v3340_v18  ;;  %5185 = vmatpush.bf16.msrb.mxu0 %v17591_v52 }
 0x38e   : > { %v3575_v20 = vadd.f32 %v3574_v17, %v3496_v26  ;;  %3379 = vmatmul.bf16.gmra.mxu0 %v13297_v13  ;;  %v13321_v17 = vor.u32 %v17407_v8, %v13320_v0  ;;  %v13325_v13 = vor.u32 %v17405_v44, %v13322_v57 }
 0x38f   : > { %3458 = vmatmul.bf16.gmra.mxu1 %v13301_v48 }
 0x390   : > { %v20024_v37 = vadd.f32 %v3575_v20, %v19732_v2  ;;  %3537 = vmatmul.bf16.gmra.mxu2 %v13305_v25 }
 0x391   : > { %3616 = vmatmul.bf16.gmra.mxu3 %v13309_v49 }
 0x393   : > { %v3498_v39 = vpop.f32.mrf.mxu2  ;;  %v3342_v34 = vpop.f32.mrf.mxu0 }
 0x394   : > { %v3577_v2 = vpop.f32.mrf.mxu3  ;;  %v3499_v60 = vadd.f32 %v3498_v39, %v3420_v51  ;;  %v3421_v54 = vpop.f32.mrf.mxu1  ;;  %v13520_v39 = vld [vmem:[%s18446_s28 + $0x40] sm:$0xf] }
 0x395   : > { %v3422_v59 = vadd.f32 %v3421_v54, %v3342_v34  ;;  %v17440_v34 = vld [vmem:[%s18446_s28 + $0x44] sm:$0xf]  ;;  %v13528_v54 = vld [vmem:[%s18446_s28 + $0x48] sm:$0xf] }
 0x396   : > { %v3578_v53 = vadd.f32 %v3577_v2, %v3499_v60  ;;  %v17442_v2 = vld [vmem:[%s18446_s28 + $0x4c] sm:$0xf0] }
 0x397   : > { %v13521_v63 = vor.u32 %v17442_v2, %v13520_v39  ;;  %v17447_v39 = vld [vmem:[%s18446_s28 + $0x74] sm:$0xf0]  ;;  %v17445_v2 = vld [vmem:[%s18446_s28 + $0x6c] sm:$0xf] }
 0x398   : > { %v20037_v10 = vadd.f32 %v3578_v53, %v19745_v28  ;;  %v17441_v53 = vld [vmem:[%s18446_s28 + $0x4c] sm:$0xf] }
 0x399   : > { %v13533_v57 = vor.u32 %v17441_v53, %v13530_v46 }
 0x39b   : > { %v3500_v19 = vpop.f32.mrf.mxu2  ;;  %v3345_v43 = vpop.f32.mrf.mxu0 }
 0x39c   : > { %v3579_v3 = vpop.f32.mrf.mxu3  ;;  %v3501_v28 = vadd.f32 %v3500_v19, %v3422_v59  ;;  %v3424_v5 = vpop.f32.mrf.mxu1  ;;  %v17443_v59 = vld [vmem:[%s18446_s28 + $0x54] sm:$0xf0] }
 0x39d   : > { %v3425_v48 = vadd.f32 %v3424_v5, %v3345_v43  ;;  %v13529_v44 = vor.u32 %v17443_v59, %v13528_v54 }
 0x39e   : > { %v3580_v26 = vadd.f32 %v3579_v3, %v3501_v28  ;;  %3384 = vmatmul.bf16.gmra.mxu0 %v13313_v4  ;;  %v17606_v4 = vld [vmem:[%s22621_s1 + $0x5b0] sm:$0xff] }
 0x39f   : > { %3463 = vmatmul.bf16.gmra.mxu1 %v13317_v15  ;;  %v17614_v15 = vld [vmem:[%s22621_s1 + $0x5f0] sm:$0xff]  ;;  %5344 = vmatpush.bf16.msrb.mxu2 %v17606_v4 }
 0x3a0   : > { %v20050_v18 = vadd.f32 %v3580_v26, %v19758_v12  ;;  %3542 = vmatmul.bf16.gmra.mxu2 %v13321_v17  ;;  %v13522_v12 = vld [vmem:[%s18446_s28 + $0x50] sm:$0xf0]  ;;  %5423 = vmatpush.bf16.msrb.mxu3 %v17614_v15 }
 0x3a1   : > { %3621 = vmatmul.bf16.gmra.mxu3 %v13325_v13  ;;  %v13525_v0 = vor.u32 %v17440_v34, %v13522_v12  ;;  %v17590_v28 = vld [vmem:[%s22621_s1 + $0x530] sm:$0xff]  ;;  %v13546_v34 = vld [vmem:[%s18446_s28 + $0x78] sm:$0xf0] }
 0x3a2   : > { %5186 = vmatpush.bf16.msrb.mxu0 %v17590_v28  ;;  %v13552_v28 = vld [vmem:[%s18446_s28 + $0x80] sm:$0xf] }
 0x3a3   : > { %v3503_v31 = vpop.f32.mrf.mxu2  ;;  %v3347_v51 = vpop.f32.mrf.mxu0 }
 0x3a4   : > { %v3582_v25 = vpop.f32.mrf.mxu3  ;;  %v3504_v49 = vadd.f32 %v3503_v31, %v3425_v48  ;;  %v3426_v20 = vpop.f32.mrf.mxu1 }
 0x3a5   : > { %v3427_v56 = vadd.f32 %v3426_v20, %v3347_v51  ;;  %v17444_v20 = vld [vmem:[%s18446_s28 + $0x64] sm:$0xf] }
 0x3a6   : > { %v3583_v58 = vadd.f32 %v3582_v25, %v3504_v49  ;;  %v13536_v25 = vld [vmem:[%s18446_s28 + $0x60] sm:$0xf]  ;;  %v17446_v49 = vld [vmem:[%s18446_s28 + $0x6c] sm:$0xf0] }
 0x3a7   : > { %v13537_v59 = vor.u32 %v17446_v49, %v13536_v25  ;;  %v13562_v25 = vld [vmem:[%s18446_s28 + $0x98] sm:$0xf0] }
 0x3a8   : > { %v20055_v60 = vadd.f32 %v3583_v58, %v19763_v30  ;;  %v13544_v58 = vld [vmem:[%s18446_s28 + $0x68] sm:$0xf] }
 0x3ab   : > { %v3505_v61 = vpop.f32.mrf.mxu2  ;;  %v3350_v6 = vpop.f32.mrf.mxu0 }
 0x3ac   : > { %v3584_v42 = vpop.f32.mrf.mxu3  ;;  %v3506_v52 = vadd.f32 %v3505_v61, %v3427_v56  ;;  %v3429_v8 = vpop.f32.mrf.mxu1  ;;  %v13538_v56 = vld [vmem:[%s18446_s28 + $0x70] sm:$0xf0] }
 0x3ad   : > { %v3430_v19 = vadd.f32 %v3429_v8, %v3350_v6  ;;  %v13541_v53 = vor.u32 %v17444_v20, %v13538_v56 }
 0x3ae   : > { %v3585_v3 = vadd.f32 %v3584_v42, %v3506_v52  ;;  %4256 = vmatmul.bf16.vlgmr.msra.gmra.mxu0 %v13521_v63  ;;  %v13545_v63 = vor.u32 %v17447_v39, %v13544_v58 }
 0x3af   : > { %4335 = vmatmul.bf16.vlgmr.msra.gmra.mxu1 %v13525_v0  ;;  %v13549_v0 = vor.u32 %v17445_v2, %v13546_v34 }
 0x3b0   : > { %v20064_v30 = vadd.f32 %v3585_v3, %v19772_v40  ;;  %4414 = vmatmul.bf16.vlgmr.msra.gmra.mxu2 %v13529_v44  ;;  %v17598_v40 = vld [vmem:[%s22621_s1 + $0x570] sm:$0xff] }
 0x3b1   : > { %4493 = vmatmul.bf16.vlgmr.msra.gmra.mxu3 %v13533_v57  ;;  %5265 = vmatpush.bf16.msrb.mxu1 %v17598_v40  ;;  %v17450_v40 = vld [vmem:[%s18446_s28 + $0x8c] sm:$0xf0] }
 0x3b2   : > { %v13553_v56 = vor.u32 %v17450_v40, %v13552_v28  ;;  %v17455_v28 = vld [vmem:[%s18446_s28 + $0xb4] sm:$0xf0]  ;;  %v17453_v40 = vld [vmem:[%s18446_s28 + $0xac] sm:$0xf] }
 0x3b3   : > { %v3508_v43 = vpop.f32.mrf.mxu2  ;;  %v3352_v13 = vpop.f32.mrf.mxu0 }
 0x3b4   : > { %v3587_v5 = vpop.f32.mrf.mxu3  ;;  %v3509_v17 = vadd.f32 %v3508_v43, %v3430_v19  ;;  %v3431_v48 = vpop.f32.mrf.mxu1  ;;  %v17448_v43 = vld [vmem:[%s18446_s28 + $0x84] sm:$0xf] }
 0x3b5   : > { %v3432_v26 = vadd.f32 %v3431_v48, %v3352_v13  ;;  %v17605_v13 = vld [vmem:[%s22621_s1 + $0x5a8] sm:$0xff] }
 0x3b6   : > { %v3588_v31 = vadd.f32 %v3587_v5, %v3509_v17  ;;  %v13554_v5 = vld [vmem:[%s18446_s28 + $0x90] sm:$0xf0]  ;;  %v17613_v48 = vld [vmem:[%s22621_s1 + $0x5e8] sm:$0xff]  ;;  %5345 = vmatpush.bf16.msrb.mxu2 %v17605_v13 }
 0x3b7   : > { %5424 = vmatpush.bf16.msrb.mxu3 %v17613_v48  ;;  %v13557_v58 = vor.u32 %v17448_v43, %v13554_v5  ;;  %v13578_v43 = vld [vmem:[%s18446_s28 + $0xb8] sm:$0xf0] }
 0x3b8   : > { %v20081_v51 = vadd.f32 %v3588_v31, %v19789_v24  ;;  %v17449_v31 = vld [vmem:[%s18446_s28 + $0x8c] sm:$0xf] }
 0x3bb   : > { %v3510_v12 = vpop.f32.mrf.mxu2  ;;  %v3355_v61 = vpop.f32.mrf.mxu0 }
 0x3bc   : > { %v3589_v54 = vpop.f32.mrf.mxu3  ;;  %v3511_v46 = vadd.f32 %v3510_v12, %v3432_v26  ;;  %v3434_v42 = vpop.f32.mrf.mxu1  ;;  %v17451_v26 = vld [vmem:[%s18446_s28 + $0x94] sm:$0xf0]  ;;  %v13565_v12 = vor.u32 %v17449_v31, %v13562_v25 }
 0x3bd   : > { %v3435_v52 = vadd.f32 %v3434_v42, %v3355_v61  ;;  %v17597_v61 = vld [vmem:[%s22621_s1 + $0x568] sm:$0xff] }
 0x3be   : > { %v3590_v24 = vadd.f32 %v3589_v54, %v3511_v46  ;;  %4261 = vmatmul.bf16.gmra.mxu0 %v13537_v59  ;;  %v17589_v46 = vld [vmem:[%s22621_s1 + $0x528] sm:$0xff]  ;;  %5266 = vmatpush.bf16.msrb.mxu1 %v17597_v61  ;;  %v17458_v61 = vld [vmem:[%s18446_s28 + $0xcc] sm:$0xf0] }
 0x3bf   : > { %4340 = vmatmul.bf16.gmra.mxu1 %v13541_v53  ;;  %5187 = vmatpush.bf16.msrb.mxu0 %v17589_v46  ;;  %v13584_v46 = vld [vmem:[%s18446_s28 + $0xc0] sm:$0xf] }
 0x3c0   : > { %v20090_v6 = vadd.f32 %v3590_v24, %v19798_v11  ;;  %4419 = vmatmul.bf16.gmra.mxu2 %v13545_v63  ;;  %v13560_v11 = vld [vmem:[%s18446_s28 + $0x88] sm:$0xf] }
 0x3c1   : > { %4498 = vmatmul.bf16.gmra.mxu3 %v13549_v0  ;;  %v13561_v34 = vor.u32 %v17451_v26, %v13560_v11 }
 0x3c3   : > { %v3513_v8 = vpop.f32.mrf.mxu2  ;;  %v3357_v19 = vpop.f32.mrf.mxu0 }
 0x3c4   : > { %v3592_v44 = vpop.f32.mrf.mxu3  ;;  %v3514_v57 = vadd.f32 %v3513_v8, %v3435_v52  ;;  %v3436_v3 = vpop.f32.mrf.mxu1 }
 0x3c5   : > { %v3437_v4 = vadd.f32 %v3436_v3, %v3357_v19  ;;  %v17452_v3 = vld [vmem:[%s18446_s28 + $0xa4] sm:$0xf] }
 0x3c6   : > { %v3593_v15 = vadd.f32 %v3592_v44, %v3514_v57  ;;  %v13568_v44 = vld [vmem:[%s18446_s28 + $0xa0] sm:$0xf]  ;;  %v17454_v57 = vld [vmem:[%s18446_s28 + $0xac] sm:$0xf0] }
 0x3c7   : > { %v13569_v13 = vor.u32 %v17454_v57, %v13568_v44  ;;  %v17457_v44 = vld [vmem:[%s18446_s28 + $0xcc] sm:$0xf]  ;;  %v13594_v57 = vld [vmem:[%s18446_s28 + $0xd8] sm:$0xf0] }
 0x3c8   : > { %v20097_v17 = vadd.f32 %v3593_v15, %v19805_v50  ;;  %v13576_v15 = vld [vmem:[%s18446_s28 + $0xa8] sm:$0xf] }
 0x3cb   : > { %v3515_v49 = vpop.f32.mrf.mxu2  ;;  %v3360_v39 = vpop.f32.mrf.mxu0 }
 0x3cc   : > { %v3594_v20 = vpop.f32.mrf.mxu3  ;;  %v3516_v50 = vadd.f32 %v3515_v49, %v3437_v4  ;;  %v3439_v2 = vpop.f32.mrf.mxu1  ;;  %v13570_v4 = vld [vmem:[%s18446_s28 + $0xb0] sm:$0xf0]  ;;  %v13577_v49 = vor.u32 %v17455_v28, %v13576_v15  ;;  %v13585_v15 = vor.u32 %v17458_v61, %v13584_v46  ;;  %v17463_v46 = vld [vmem:[%s18446_s28 + $0xf4] sm:$0xf0]  ;;  %v17461_v61 = vld [vmem:[%s18446_s28 + $0xec] sm:$0xf] }
 0x3cd   : > { %v3440_v54 = vadd.f32 %v3439_v2, %v3360_v39  ;;  %v13573_v48 = vor.u32 %v17452_v3, %v13570_v4  ;;  %v17596_v3 = vld [vmem:[%s22621_s1 + $0x560] sm:$0xff] }
 0x3ce   : > { %v3595_v59 = vadd.f32 %v3594_v20, %v3516_v50  ;;  %4266 = vmatmul.bf16.gmra.mxu0 %v13553_v56  ;;  %v13581_v20 = vor.u32 %v17453_v40, %v13578_v43  ;;  %5267 = vmatpush.bf16.msrb.mxu1 %v17596_v3 }
 0x3cf   : > { %4345 = vmatmul.bf16.gmra.mxu1 %v13557_v58 }
 0x3d0   : > { %v20110_v53 = vadd.f32 %v3595_v59, %v19818_v23  ;;  %4424 = vmatmul.bf16.gmra.mxu2 %v13561_v34 }
 0x3d1   : > { %4503 = vmatmul.bf16.gmra.mxu3 %v13565_v12 }
 0x3d3   : > { %v3518_v23 = vpop.f32.mrf.mxu2  ;;  %v3362_v0 = vpop.f32.mrf.mxu0 }
 0x3d4   : > { %v3597_v42 = vpop.f32.mrf.mxu3  ;;  %v3519_v63 = vadd.f32 %v3518_v23, %v3440_v54  ;;  %v3441_v52 = vpop.f32.mrf.mxu1  ;;  %v17456_v23 = vld [vmem:[%s18446_s28 + $0xc4] sm:$0xf] }
 0x3d5   : > { %v3442_v24 = vadd.f32 %v3441_v52, %v3362_v0  ;;  %v17459_v0 = vld [vmem:[%s18446_s28 + $0xd4] sm:$0xf0]  ;;  %v17604_v52 = vld [vmem:[%s22621_s1 + $0x5a0] sm:$0xff] }
 0x3d6   : > { %v3598_v8 = vadd.f32 %v3597_v42, %v3519_v63  ;;  %v13586_v42 = vld [vmem:[%s18446_s28 + $0xd0] sm:$0xf0]  ;;  %v13592_v63 = vld [vmem:[%s18446_s28 + $0xc8] sm:$0xf]  ;;  %5346 = vmatpush.bf16.msrb.mxu2 %v17604_v52 }
 0x3d7   : > { %v13589_v28 = vor.u32 %v17456_v23, %v13586_v42  ;;  %v13610_v23 = vld [vmem:[%s18446_s28 + $0xf8] sm:$0xf0] }
 0x3d8   : > { %v20121_v19 = vadd.f32 %v3598_v8, %v19829_v32  ;;  %v17588_v8 = vld [vmem:[%s22621_s1 + $0x520] sm:$0xff]  ;;  %v13613_v3 = vor.u32 %v17461_v61, %v13610_v23 }
 0x3d9   : > { %5188 = vmatpush.bf16.msrb.mxu0 %v17588_v8 }
 0x3db   : > { %v3520_v5 = vpop.f32.mrf.mxu2  ;;  %v3365_v31 = vpop.f32.mrf.mxu0 }
 0x3dc   : > { %v3599_v11 = vpop.f32.mrf.mxu3  ;;  %v3521_v26 = vadd.f32 %v3520_v5, %v3442_v24  ;;  %v3444_v25 = vpop.f32.mrf.mxu1  ;;  %v17612_v24 = vld [vmem:[%s22621_s1 + $0x5e0] sm:$0xff] }
 0x3dd   : > { %v3445_v56 = vadd.f32 %v3444_v25, %v3365_v31  ;;  %5425 = vmatpush.bf16.msrb.mxu3 %v17612_v24 }
 0x3de   : > { %v3600_v32 = vadd.f32 %v3599_v11, %v3521_v26  ;;  %4271 = vmatmul.bf16.gmra.mxu0 %v13569_v13  ;;  %v13593_v11 = vor.u32 %v17459_v0, %v13592_v63  ;;  %v13597_v13 = vor.u32 %v17457_v44, %v13594_v57 }
 0x3df   : > { %4350 = vmatmul.bf16.gmra.mxu1 %v13573_v48 }
 0x3e0   : > { %v20130_v58 = vadd.f32 %v3600_v32, %v19838_v27  ;;  %4429 = vmatmul.bf16.gmra.mxu2 %v13577_v49 }
 0x3e1   : > { %4508 = vmatmul.bf16.gmra.mxu3 %v13581_v20 }
 0x3e3   : > { %v3523_v50 = vpop.f32.mrf.mxu2  ;;  %v3367_v34 = vpop.f32.mrf.mxu0 }
 0x3e4   : > { %v3602_v39 = vpop.f32.mrf.mxu3  ;;  %v3524_v2 = vadd.f32 %v3523_v50, %v3445_v56  ;;  %v3446_v12 = vpop.f32.mrf.mxu1 }
 0x3e5   : > { %v3447_v54 = vadd.f32 %v3446_v12, %v3367_v34  ;;  %v17462_v34 = vld [vmem:[%s18446_s28 + $0xec] sm:$0xf0] }
 0x3e6   : > { %v3603_v59 = vadd.f32 %v3602_v39, %v3524_v2  ;;  %v13600_v2 = vld [vmem:[%s18446_s28 + $0xe0] sm:$0xf] }
 0x3e7   : > { %v13601_v0 = vor.u32 %v17462_v34, %v13600_v2  ;;  %v17467_v2 = vld [vmem:[%s18446_s28 + $0x114] sm:$0xf0]  ;;  %v17465_v34 = vld [vmem:[%s18446_s28 + $0x10c] sm:$0xf] }
 0x3e8   : > { %v20139_v27 = vadd.f32 %v3603_v59, %v19847_v41  ;;  %v13608_v59 = vld [vmem:[%s18446_s28 + $0xe8] sm:$0xf] }
 0x3e9   : > { %v13609_v57 = vor.u32 %v17463_v46, %v13608_v59 }
 0x3eb   : > { %v3525_v41 = vpop.f32.mrf.mxu2  ;;  %v3370_v43 = vpop.f32.mrf.mxu0 }
 0x3ec   : > { %v3604_v4 = vpop.f32.mrf.mxu3  ;;  %v3526_v40 = vadd.f32 %v3525_v41, %v3447_v54  ;;  %v3449_v5 = vpop.f32.mrf.mxu1  ;;  %v17460_v54 = vld [vmem:[%s18446_s28 + $0xe4] sm:$0xf] }
 0x3ed   : > { %v3450_v48 = vadd.f32 %v3449_v5, %v3370_v43 }
 0x3ee   : > { %v3605_v26 = vadd.f32 %v3604_v4, %v3526_v40  ;;  %4276 = vmatmul.bf16.gmra.mxu0 %v13585_v15  ;;  %v17603_v15 = vld [vmem:[%s22621_s1 + $0x598] sm:$0xff] }
 0x3ef   : > { %4355 = vmatmul.bf16.gmra.mxu1 %v13589_v28  ;;  %v17611_v28 = vld [vmem:[%s22621_s1 + $0x5d8] sm:$0xff]  ;;  %5347 = vmatpush.bf16.msrb.mxu2 %v17603_v15 }
 0x3f0   : > { %v20156_v31 = vadd.f32 %v3605_v26, %v19864_v38  ;;  %4434 = vmatmul.bf16.gmra.mxu2 %v13593_v11  ;;  %v13602_v38 = vld [vmem:[%s18446_s28 + $0xf0] sm:$0xf0]  ;;  %5426 = vmatpush.bf16.msrb.mxu3 %v17611_v28  ;;  %v13616_v26 = vld [vmem:[%s18446_s28 + $0x100] sm:$0xf] }
 0x3f1   : > { %4513 = vmatmul.bf16.gmra.mxu3 %v13597_v13  ;;  %v13605_v52 = vor.u32 %v17460_v54, %v13602_v38  ;;  %v13626_v54 = vld [vmem:[%s18446_s28 + $0x118] sm:$0xf0] }
 0x3f3   : > { %v3528_v25 = vpop.f32.mrf.mxu2  ;;  %v3372_v56 = vpop.f32.mrf.mxu0 }
 0x3f4   : > { %v3607_v49 = vpop.f32.mrf.mxu3  ;;  %v3529_v20 = vadd.f32 %v3528_v25, %v3450_v48  ;;  %v3451_v32 = vpop.f32.mrf.mxu1  ;;  %v17466_v25 = vld [vmem:[%s18446_s28 + $0x10c] sm:$0xf0] }
 0x3f5   : > { %v3452_v50 = vadd.f32 %v3451_v32, %v3372_v56  ;;  %v13624_v32 = vld [vmem:[%s18446_s28 + $0x108] sm:$0xf]  ;;  %v13617_v46 = vor.u32 %v17466_v25, %v13616_v26  ;;  %v13642_v26 = vld [vmem:[%s18446_s28 + $0x138] sm:$0xf0] }
 0x3f6   : > { %v3608_v39 = vadd.f32 %v3607_v49, %v3529_v20  ;;  %v17464_v49 = vld [vmem:[%s18446_s28 + $0x104] sm:$0xf]  ;;  %v13618_v20 = vld [vmem:[%s18446_s28 + $0x110] sm:$0xf0] }
 0x3f7   : > { %v13621_v61 = vor.u32 %v17464_v49, %v13618_v20 }
 0x3f8   : > { %v20161_v12 = vadd.f32 %v3608_v39, %v19869_v47  ;;  %v17595_v39 = vld [vmem:[%s22621_s1 + $0x558] sm:$0xff] }
 0x3f9   : > { %5268 = vmatpush.bf16.msrb.mxu1 %v17595_v39 }
 0x3fb   : > { %v3530_v42 = vpop.f32.mrf.mxu2  ;;  %v3375_v8 = vpop.f32.mrf.mxu0 }
 0x3fc   : > { %v3609_v63 = vpop.f32.mrf.mxu3  ;;  %v3531_v24 = vadd.f32 %v3530_v42, %v3452_v50  ;;  %v3454_v44 = vpop.f32.mrf.mxu1  ;;  %v17587_v50 = vld [vmem:[%s22621_s1 + $0x518] sm:$0xff] }
 0x3fd   : > { %v3455_v41 = vadd.f32 %v3454_v44, %v3375_v8  ;;  %5189 = vmatpush.bf16.msrb.mxu0 %v17587_v50 }
 0x3fe   : > { %v3610_v4 = vadd.f32 %v3609_v63, %v3531_v24  ;;  %4281 = vmatmul.bf16.gmra.mxu0 %v13601_v0  ;;  %v13625_v63 = vor.u32 %v17467_v2, %v13624_v32  ;;  %v13629_v0 = vor.u32 %v17465_v34, %v13626_v54 }
 0x3ff   : > { %4360 = vmatmul.bf16.gmra.mxu1 %v13605_v52 }
 0x400   : > { %v20170_v47 = vadd.f32 %v3610_v4, %v19878_v1  ;;  %4439 = vmatmul.bf16.gmra.mxu2 %v13609_v57 }
 0x401   : > { %4518 = vmatmul.bf16.gmra.mxu3 %v13613_v3 }
 0x403   : > { %v3533_v40 = vpop.f32.mrf.mxu2  ;;  %v3377_v5 = vpop.f32.mrf.mxu0 }
 0x404   : > { %v3612_v1 = vpop.f32.mrf.mxu3  ;;  %v3534_v43 = vadd.f32 %v3533_v40, %v3455_v41  ;;  %v3456_v11 = vpop.f32.mrf.mxu1  ;;  %v13632_v40 = vld [vmem:[%s18446_s28 + $0x120] sm:$0xf] }
 0x405   : > { %v3457_v13 = vadd.f32 %v3456_v11, %v3377_v5  ;;  %v17468_v5 = vld [vmem:[%s18446_s28 + $0x124] sm:$0xf]  ;;  %v13640_v11 = vld [vmem:[%s18446_s28 + $0x128] sm:$0xf] }
 0x406   : > { %v3613_v48 = vadd.f32 %v3612_v1, %v3534_v43  ;;  %v17470_v1 = vld [vmem:[%s18446_s28 + $0x12c] sm:$0xf0] }
 0x407   : > { %v13633_v20 = vor.u32 %v17470_v1, %v13632_v40  ;;  %v17475_v40 = vld [vmem:[%s18446_s28 + $0x154] sm:$0xf0]  ;;  %v17473_v1 = vld [vmem:[%s18446_s28 + $0x14c] sm:$0xf] }
 0x408   : > { %v20183_v56 = vadd.f32 %v3613_v48, %v19891_v21  ;;  %v17469_v48 = vld [vmem:[%s18446_s28 + $0x12c] sm:$0xf] }
 0x409   : > { %v13645_v54 = vor.u32 %v17469_v48, %v13642_v26 }
 0x40b   : > { %v3535_v38 = vpop.f32.mrf.mxu2  ;;  %v3380_v23 = vpop.f32.mrf.mxu0 }
 0x40c   : > { %v3614_v59 = vpop.f32.mrf.mxu3  ;;  %v3536_v21 = vadd.f32 %v3535_v38, %v3457_v13  ;;  %v3459_v42 = vpop.f32.mrf.mxu1  ;;  %v17471_v13 = vld [vmem:[%s18446_s28 + $0x134] sm:$0xf0] }
 0x40d   : > { %v3460_v52 = vadd.f32 %v3459_v42, %v3380_v23  ;;  %v13641_v34 = vor.u32 %v17471_v13, %v13640_v11 }
 0x40e   : > { %v3615_v24 = vadd.f32 %v3614_v59, %v3536_v21  ;;  %4286 = vmatmul.bf16.gmra.mxu0 %v13617_v46  ;;  %v17602_v46 = vld [vmem:[%s22621_s1 + $0x590] sm:$0xff] }
 0x40f   : > { %4365 = vmatmul.bf16.gmra.mxu1 %v13621_v61  ;;  %v17610_v61 = vld [vmem:[%s22621_s1 + $0x5d0] sm:$0xff]  ;;  %5348 = vmatpush.bf16.msrb.mxu2 %v17602_v46 }
 0x410   : > { %v20196_v8 = vadd.f32 %v3615_v24, %v19904_v55  ;;  %4444 = vmatmul.bf16.gmra.mxu2 %v13625_v63  ;;  %v13634_v55 = vld [vmem:[%s18446_s28 + $0x130] sm:$0xf0]  ;;  %5427 = vmatpush.bf16.msrb.mxu3 %v17610_v61 }
 0x411   : > { %4523 = vmatmul.bf16.gmra.mxu3 %v13629_v0  ;;  %v13637_v32 = vor.u32 %v17468_v5, %v13634_v55  ;;  %v17586_v21 = vld [vmem:[%s22621_s1 + $0x510] sm:$0xff]  ;;  %v13658_v5 = vld [vmem:[%s18446_s28 + $0x158] sm:$0xf0] }
 0x412   : > { %5190 = vmatpush.bf16.msrb.mxu0 %v17586_v21  ;;  %v13664_v21 = vld [vmem:[%s18446_s28 + $0x160] sm:$0xf] }
 0x413   : > { %v3538_v44 = vpop.f32.mrf.mxu2  ;;  %v3382_v41 = vpop.f32.mrf.mxu0 }
 0x414   : > { %v3617_v57 = vpop.f32.mrf.mxu3  ;;  %v3539_v3 = vadd.f32 %v3538_v44, %v3460_v52  ;;  %v3461_v4 = vpop.f32.mrf.mxu1 }
 0x415   : > { %v3462_v15 = vadd.f32 %v3461_v4, %v3382_v41  ;;  %v17472_v4 = vld [vmem:[%s18446_s28 + $0x144] sm:$0xf] }
 0x416   : > { %v3618_v28 = vadd.f32 %v3617_v57, %v3539_v3  ;;  %v13648_v57 = vld [vmem:[%s18446_s28 + $0x140] sm:$0xf]  ;;  %v17474_v3 = vld [vmem:[%s18446_s28 + $0x14c] sm:$0xf0] }
 0x417   : > { %v13649_v13 = vor.u32 %v17474_v3, %v13648_v57  ;;  %v13674_v57 = vld [vmem:[%s18446_s28 + $0x178] sm:$0xf0] }
 0x418   : > { %v20201_v43 = vadd.f32 %v3618_v28, %v19909_v29  ;;  %v13656_v28 = vld [vmem:[%s18446_s28 + $0x148] sm:$0xf] }
 0x41b   : > { %v3540_v25 = vpop.f32.mrf.mxu2  ;;  %v3385_v39 = vpop.f32.mrf.mxu0 }
 0x41c   : > { %v3619_v49 = vpop.f32.mrf.mxu3  ;;  %v3541_v50 = vadd.f32 %v3540_v25, %v3462_v15  ;;  %v3464_v2 = vpop.f32.mrf.mxu1  ;;  %v13650_v15 = vld [vmem:[%s18446_s28 + $0x150] sm:$0xf0] }
 0x41d   : > { %v3465_v38 = vadd.f32 %v3464_v2, %v3385_v39  ;;  %v13653_v48 = vor.u32 %v17472_v4, %v13650_v15 }
 0x41e   : > { %v3620_v59 = vadd.f32 %v3619_v49, %v3541_v50  ;;  %4291 = vmatmul.bf16.gmra.mxu0 %v13633_v20  ;;  %v13657_v20 = vor.u32 %v17475_v40, %v13656_v28 }
 0x41f   : > { %4370 = vmatmul.bf16.gmra.mxu1 %v13637_v32  ;;  %v13661_v32 = vor.u32 %v17473_v1, %v13658_v5 }
 0x420   : > { %v20210_v29 = vadd.f32 %v3620_v59, %v19918_v14  ;;  %4449 = vmatmul.bf16.gmra.mxu2 %v13641_v34  ;;  %v17594_v14 = vld [vmem:[%s22621_s1 + $0x550] sm:$0xff] }
 0x421   : > { %4528 = vmatmul.bf16.gmra.mxu3 %v13645_v54  ;;  %5269 = vmatpush.bf16.msrb.mxu1 %v17594_v14  ;;  %v17478_v14 = vld [vmem:[%s18446_s28 + $0x16c] sm:$0xf0] }
 0x422   : > { %v13665_v15 = vor.u32 %v17478_v14, %v13664_v21  ;;  %v17483_v21 = vld [vmem:[%s18446_s28 + $0x194] sm:$0xf0]  ;;  %v17481_v14 = vld [vmem:[%s18446_s28 + $0x18c] sm:$0xf] }
 0x423   : > { %v3543_v23 = vpop.f32.mrf.mxu2  ;;  %v3387_v0 = vpop.f32.mrf.mxu0 }
 0x424   : > { %v3622_v42 = vpop.f32.mrf.mxu3  ;;  %v3544_v63 = vadd.f32 %v3543_v23, %v3465_v38  ;;  %v3466_v52 = vpop.f32.mrf.mxu1  ;;  %v17476_v23 = vld [vmem:[%s18446_s28 + $0x164] sm:$0xf] }
 0x425   : > { %v3467_v24 = vadd.f32 %v3466_v52, %v3387_v0  ;;  %v17601_v0 = vld [vmem:[%s22621_s1 + $0x588] sm:$0xff] }
 0x426   : > { %v3623_v44 = vadd.f32 %v3622_v42, %v3544_v63  ;;  %v13666_v42 = vld [vmem:[%s18446_s28 + $0x170] sm:$0xf0]  ;;  %v17609_v52 = vld [vmem:[%s22621_s1 + $0x5c8] sm:$0xff]  ;;  %5349 = vmatpush.bf16.msrb.mxu2 %v17601_v0 }
 0x427   : > { %5428 = vmatpush.bf16.msrb.mxu3 %v17609_v52  ;;  %v13669_v28 = vor.u32 %v17476_v23, %v13666_v42  ;;  %v13690_v23 = vld [vmem:[%s18446_s28 + $0x198] sm:$0xf0] }
 0x428   : > { %v20227_v41 = vadd.f32 %v3623_v44, %v19935_v45  ;;  %v17477_v44 = vld [vmem:[%s18446_s28 + $0x16c] sm:$0xf] }
 0x42b   : > { %v3545_v55 = vpop.f32.mrf.mxu2  ;;  %v4257_v25 = vpop.f32.mrf.mxu0 }
 0x42c   : > { %v3624_v11 = vpop.f32.mrf.mxu3  ;;  %v3546_v26 = vadd.f32 %v3545_v55, %v3467_v24  ;;  %v4336_v49 = vpop.f32.mrf.mxu1  ;;  %v17479_v24 = vld [vmem:[%s18446_s28 + $0x174] sm:$0xf0]  ;;  %v13677_v55 = vor.u32 %v17477_v44, %v13674_v57 }
 0x42d   : > { %v4337_v50 = vadd.f32 %v4336_v49, %v4257_v25  ;;  %v17593_v25 = vld [vmem:[%s22621_s1 + $0x548] sm:$0xff] }
 0x42e   : > { %v3625_v45 = vadd.f32 %v3624_v11, %v3546_v26  ;;  %4296 = vmatmul.bf16.gmra.mxu0 %v13649_v13  ;;  %v17585_v26 = vld [vmem:[%s22621_s1 + $0x508] sm:$0xff]  ;;  %5270 = vmatpush.bf16.msrb.mxu1 %v17593_v25  ;;  %v17486_v25 = vld [vmem:[%s18446_s28 + $0x1ac] sm:$0xf0] }
 0x42f   : > { %4375 = vmatmul.bf16.gmra.mxu1 %v13653_v48  ;;  %5191 = vmatpush.bf16.msrb.mxu0 %v17585_v26  ;;  %v13696_v26 = vld [vmem:[%s18446_s28 + $0x1a0] sm:$0xf] }
 0x430   : > { %v20236_v39 = vadd.f32 %v3625_v45, %v19944_v16  ;;  %4454 = vmatmul.bf16.gmra.mxu2 %v13657_v20  ;;  %v13672_v16 = vld [vmem:[%s18446_s28 + $0x168] sm:$0xf] }
 0x431   : > { %4533 = vmatmul.bf16.gmra.mxu3 %v13661_v32  ;;  %v13673_v5 = vor.u32 %v17479_v24, %v13672_v16 }
 0x433   : > { %v4415_v2 = vpop.f32.mrf.mxu2  ;;  %v4259_v38 = vpop.f32.mrf.mxu0 }
 0x434   : > { %v4494_v34 = vpop.f32.mrf.mxu3  ;;  %v4416_v54 = vadd.f32 %v4415_v2, %v4337_v50  ;;  %v4338_v59 = vpop.f32.mrf.mxu1 }
 0x435   : > { %v4339_v46 = vadd.f32 %v4338_v59, %v4259_v38  ;;  %v17480_v59 = vld [vmem:[%s18446_s28 + $0x184] sm:$0xf] }
 0x436   : > { %v4495_v61 = vadd.f32 %v4494_v34, %v4416_v54  ;;  %v13680_v34 = vld [vmem:[%s18446_s28 + $0x180] sm:$0xf]  ;;  %v17482_v54 = vld [vmem:[%s18446_s28 + $0x18c] sm:$0xf0] }
 0x437   : > { %v13681_v0 = vor.u32 %v17482_v54, %v13680_v34  ;;  %v17485_v34 = vld [vmem:[%s18446_s28 + $0x1ac] sm:$0xf]  ;;  %v13706_v54 = vld [vmem:[%s18446_s28 + $0x1b8] sm:$0xf0] }
 0x438   : > { %v20243_v63 = vadd.f32 %v4495_v61, %v19951_v22  ;;  %v13688_v61 = vld [vmem:[%s18446_s28 + $0x188] sm:$0xf] }
 0x43b   : > { %v4417_v3 = vpop.f32.mrf.mxu2  ;;  %v4262_v40 = vpop.f32.mrf.mxu0 }
 0x43c   : > { %v4496_v4 = vpop.f32.mrf.mxu3  ;;  %v4418_v22 = vadd.f32 %v4417_v3, %v4339_v46  ;;  %v4341_v1 = vpop.f32.mrf.mxu1  ;;  %v13682_v46 = vld [vmem:[%s18446_s28 + $0x190] sm:$0xf0]  ;;  %v13689_v3 = vor.u32 %v17483_v21, %v13688_v61  ;;  %v13697_v61 = vor.u32 %v17486_v25, %v13696_v26  ;;  %v17491_v26 = vld [vmem:[%s18446_s28 + $0x1d4] sm:$0xf0]  ;;  %v17489_v25 = vld [vmem:[%s18446_s28 + $0x1cc] sm:$0xf] }
 0x43d   : > { %v4342_v11 = vadd.f32 %v4341_v1, %v4262_v40  ;;  %v13685_v52 = vor.u32 %v17480_v59, %v13682_v46  ;;  %v17592_v59 = vld [vmem:[%s22621_s1 + $0x540] sm:$0xff] }
 0x43e   : > { %v4497_v13 = vadd.f32 %v4496_v4, %v4418_v22  ;;  %4301 = vmatmul.bf16.gmra.mxu0 %v13665_v15  ;;  %v13693_v4 = vor.u32 %v17481_v14, %v13690_v23  ;;  %5271 = vmatpush.bf16.msrb.mxu1 %v17592_v59 }
 0x43f   : > { %4380 = vmatmul.bf16.gmra.mxu1 %v13669_v28 }
 0x440   : > { %v20256_v48 = vadd.f32 %v4497_v13, %v19964_v62  ;;  %4459 = vmatmul.bf16.gmra.mxu2 %v13673_v5 }
 0x441   : > { %4538 = vmatmul.bf16.gmra.mxu3 %v13677_v55 }
 0x443   : > { %v4420_v62 = vpop.f32.mrf.mxu2  ;;  %v4264_v32 = vpop.f32.mrf.mxu0 }
 0x444   : > { %v4499_v49 = vpop.f32.mrf.mxu3  ;;  %v4421_v20 = vadd.f32 %v4420_v62, %v4342_v11  ;;  %v4343_v50 = vpop.f32.mrf.mxu1  ;;  %v17484_v62 = vld [vmem:[%s18446_s28 + $0x1a4] sm:$0xf] }
 0x445   : > { %v4344_v45 = vadd.f32 %v4343_v50, %v4264_v32  ;;  %v17487_v32 = vld [vmem:[%s18446_s28 + $0x1b4] sm:$0xf0]  ;;  %v17600_v50 = vld [vmem:[%s22621_s1 + $0x580] sm:$0xff] }
 0x446   : > { %v4500_v2 = vadd.f32 %v4499_v49, %v4421_v20  ;;  %v13698_v49 = vld [vmem:[%s18446_s28 + $0x1b0] sm:$0xf0]  ;;  %v13704_v20 = vld [vmem:[%s18446_s28 + $0x1a8] sm:$0xf]  ;;  %5350 = vmatpush.bf16.msrb.mxu2 %v17600_v50 }
 0x447   : > { %v13701_v21 = vor.u32 %v17484_v62, %v13698_v49  ;;  %v13722_v62 = vld [vmem:[%s18446_s28 + $0x1d8] sm:$0xf0] }
 0x448   : > { %v20267_v38 = vadd.f32 %v4500_v2, %v19975_v7  ;;  %v17584_v2 = vld [vmem:[%s22621_s1 + $0x500] sm:$0xff]  ;;  %v13725_v59 = vor.u32 %v17489_v25, %v13722_v62 }
 0x449   : > { %5192 = vmatpush.bf16.msrb.mxu0 %v17584_v2 }
 0x44b   : > { %v4422_v42 = vpop.f32.mrf.mxu2  ;;  %v4267_v44 = vpop.f32.mrf.mxu0 }
 0x44c   : > { %v4501_v16 = vpop.f32.mrf.mxu3  ;;  %v4423_v24 = vadd.f32 %v4422_v42, %v4344_v45  ;;  %v4346_v57 = vpop.f32.mrf.mxu1  ;;  %v17608_v45 = vld [vmem:[%s22621_s1 + $0x5c0] sm:$0xff] }
 0x44d   : > { %v4347_v15 = vadd.f32 %v4346_v57, %v4267_v44  ;;  %5429 = vmatpush.bf16.msrb.mxu3 %v17608_v45 }
 0x44e   : > { %v4502_v7 = vadd.f32 %v4501_v16, %v4423_v24  ;;  %4306 = vmatmul.bf16.gmra.mxu0 %v13681_v0  ;;  %v13705_v16 = vor.u32 %v17487_v32, %v13704_v20  ;;  %v13709_v0 = vor.u32 %v17485_v34, %v13706_v54 }
 0x44f   : > { %4385 = vmatmul.bf16.gmra.mxu1 %v13685_v52 }
 0x450   : > { %v20276_v28 = vadd.f32 %v4502_v7, %v19984_v9  ;;  %4464 = vmatmul.bf16.gmra.mxu2 %v13689_v3 }
 0x451   : > { %4543 = vmatmul.bf16.gmra.mxu3 %v13693_v4 }
 0x453   : > { %v4425_v22 = vpop.f32.mrf.mxu2  ;;  %v4269_v5 = vpop.f32.mrf.mxu0 }
 0x454   : > { %v4504_v40 = vpop.f32.mrf.mxu3  ;;  %v4426_v1 = vadd.f32 %v4425_v22, %v4347_v15  ;;  %v4348_v55 = vpop.f32.mrf.mxu1 }
 0x455   : > { %v4349_v11 = vadd.f32 %v4348_v55, %v4269_v5  ;;  %v17490_v5 = vld [vmem:[%s18446_s28 + $0x1cc] sm:$0xf0] }
 0x456   : > { %v4505_v13 = vadd.f32 %v4504_v40, %v4426_v1  ;;  %v13712_v1 = vld [vmem:[%s18446_s28 + $0x1c0] sm:$0xf] }
 0x457   : > { %v13713_v32 = vor.u32 %v17490_v5, %v13712_v1  ;;  %v17495_v1 = vld [vmem:[%s18446_s28 + $0x1f4] sm:$0xf0]  ;;  %v17493_v5 = vld [vmem:[%s18446_s28 + $0x1ec] sm:$0xf] }
 0x458   : > { %v20285_v9 = vadd.f32 %v4505_v13, %v19993_v35  ;;  %v13720_v13 = vld [vmem:[%s18446_s28 + $0x1c8] sm:$0xf] }
 0x459   : > { %v13721_v54 = vor.u32 %v17491_v26, %v13720_v13 }
 0x45b   : > { %v4427_v35 = vpop.f32.mrf.mxu2  ;;  %v4272_v23 = vpop.f32.mrf.mxu0 }
 0x45c   : > { %v4506_v46 = vpop.f32.mrf.mxu3  ;;  %v4428_v14 = vadd.f32 %v4427_v35, %v4349_v11  ;;  %v4351_v42 = vpop.f32.mrf.mxu1  ;;  %v17488_v11 = vld [vmem:[%s18446_s28 + $0x1c4] sm:$0xf] }
 0x45d   : > { %v4352_v52 = vadd.f32 %v4351_v42, %v4272_v23 }
 0x45e   : > { %v4507_v24 = vadd.f32 %v4506_v46, %v4428_v14  ;;  %4311 = vmatmul.bf16.gmra.mxu0 %v13697_v61  ;;  %v17695_v61 = vld [vmem:[%s22621_s1 + $0x6b8] sm:$0xff] }
 0x45f   : > { %4390 = vmatmul.bf16.gmra.mxu1 %v13701_v21  ;;  %v17703_v21 = vld [vmem:[%s22621_s1 + $0x6f8] sm:$0xff]  ;;  %6280 = vmatpush.bf16.msra.mxu2 %v17695_v61 }
 0x460   : > { %v20302_v44 = vadd.f32 %v4507_v24, %v20010_v33  ;;  %4469 = vmatmul.bf16.gmra.mxu2 %v13705_v16  ;;  %v13714_v33 = vld [vmem:[%s18446_s28 + $0x1d0] sm:$0xf0]  ;;  %6359 = vmatpush.bf16.msra.mxu3 %v17703_v21  ;;  %v13728_v24 = vld [vmem:[%s18446_s28 + $0x1e0] sm:$0xf] }
 0x461   : > { %4548 = vmatmul.bf16.gmra.mxu3 %v13709_v0  ;;  %v13717_v50 = vor.u32 %v17488_v11, %v13714_v33  ;;  %v13738_v11 = vld [vmem:[%s18446_s28 + $0x1f8] sm:$0xf0] }
 0x463   : > { %v4430_v57 = vpop.f32.mrf.mxu2  ;;  %v4274_v15 = vpop.f32.mrf.mxu0 }
 0x464   : > { %v4509_v3 = vpop.f32.mrf.mxu3  ;;  %v4431_v4 = vadd.f32 %v4430_v57, %v4352_v52  ;;  %v4353_v7 = vpop.f32.mrf.mxu1  ;;  %v17494_v57 = vld [vmem:[%s18446_s28 + $0x1ec] sm:$0xf0] }
 0x465   : > { %v4354_v22 = vadd.f32 %v4353_v7, %v4274_v15  ;;  %v13736_v7 = vld [vmem:[%s18446_s28 + $0x1e8] sm:$0xf]  ;;  %v13729_v26 = vor.u32 %v17494_v57, %v13728_v24  ;;  %v13946_v24 = vld [vmem:[%s18446_s28 + $0x68] sm:$0xf0] }
 0x466   : > { %v4510_v40 = vadd.f32 %v4509_v3, %v4431_v4  ;;  %v17492_v3 = vld [vmem:[%s18446_s28 + $0x1e4] sm:$0xf]  ;;  %v13730_v4 = vld [vmem:[%s18446_s28 + $0x1f0] sm:$0xf0] }
 0x467   : > { %v13733_v25 = vor.u32 %v17492_v3, %v13730_v4 }
 0x468   : > { %v20307_v55 = vadd.f32 %v4510_v40, %v20015_v36  ;;  %v17687_v40 = vld [vmem:[%s22621_s1 + $0x678] sm:$0xff] }
 0x469   : > { %6201 = vmatpush.bf16.msra.mxu1 %v17687_v40 }
 0x46b   : > { %v4432_v49 = vpop.f32.mrf.mxu2  ;;  %v4277_v2 = vpop.f32.mrf.mxu0 }
 0x46c   : > { %v4511_v20 = vpop.f32.mrf.mxu3  ;;  %v4433_v45 = vadd.f32 %v4432_v49, %v4354_v22  ;;  %v4356_v34 = vpop.f32.mrf.mxu1  ;;  %v17679_v22 = vld [vmem:[%s22621_s1 + $0x638] sm:$0xff] }
 0x46d   : > { %v4357_v35 = vadd.f32 %v4356_v34, %v4277_v2  ;;  %6122 = vmatpush.bf16.msra.mxu0 %v17679_v22 }
 0x46e   : > { %v4512_v46 = vadd.f32 %v4511_v20, %v4433_v45  ;;  %4316 = vmatmul.bf16.gmra.mxu0 %v13713_v32  ;;  %v13737_v20 = vor.u32 %v17495_v1, %v13736_v7  ;;  %v13741_v32 = vor.u32 %v17493_v5, %v13738_v11 }
 0x46f   : > { %4395 = vmatmul.bf16.gmra.mxu1 %v13717_v50 }
 0x470   : > { %v20316_v36 = vadd.f32 %v4512_v46, %v20024_v37  ;;  %4474 = vmatmul.bf16.gmra.mxu2 %v13721_v54 }
 0x471   : > { %4553 = vmatmul.bf16.gmra.mxu3 %v13725_v59 }
 0x473   : > { %v4435_v14 = vpop.f32.mrf.mxu2  ;;  %v4279_v42 = vpop.f32.mrf.mxu0 }
 0x474   : > { %v4514_v37 = vpop.f32.mrf.mxu3  ;;  %v4436_v23 = vadd.f32 %v4435_v14, %v4357_v35  ;;  %v4358_v16 = vpop.f32.mrf.mxu1  ;;  %v13936_v14 = vld [vmem:[%s18446_s28 + $0x50] sm:$0xf] }
 0x475   : > { %v4359_v0 = vadd.f32 %v4358_v16, %v4279_v42  ;;  %v17528_v42 = vld [vmem:[%s18446_s28 + $0x54] sm:$0xf]  ;;  %v13944_v16 = vld [vmem:[%s18446_s28 + $0x58] sm:$0xf] }
 0x476   : > { %v4515_v52 = vadd.f32 %v4514_v37, %v4436_v23  ;;  %v17530_v37 = vld [vmem:[%s18446_s28 + $0x5c] sm:$0xf0] }
 0x477   : > { %v13937_v4 = vor.u32 %v17530_v37, %v13936_v14  ;;  %v17535_v14 = vld [vmem:[%s18446_s28 + $0x84] sm:$0xf0]  ;;  %v17533_v37 = vld [vmem:[%s18446_s28 + $0x7c] sm:$0xf] }
 0x478   : > { %v20329_v15 = vadd.f32 %v4515_v52, %v20037_v10  ;;  %v17529_v52 = vld [vmem:[%s18446_s28 + $0x5c] sm:$0xf] }
 0x479   : > { %v13949_v11 = vor.u32 %v17529_v52, %v13946_v24 }
 0x47b   : > { %v4437_v33 = vpop.f32.mrf.mxu2  ;;  %v4282_v62 = vpop.f32.mrf.mxu0 }
 0x47c   : > { %v4516_v13 = vpop.f32.mrf.mxu3  ;;  %v4438_v10 = vadd.f32 %v4437_v33, %v4359_v0  ;;  %v4361_v49 = vpop.f32.mrf.mxu1  ;;  %v17531_v0 = vld [vmem:[%s18446_s28 + $0x64] sm:$0xf0] }
 0x47d   : > { %v4362_v50 = vadd.f32 %v4361_v49, %v4282_v62  ;;  %v13945_v5 = vor.u32 %v17531_v0, %v13944_v16 }
 0x47e   : > { %v4517_v45 = vadd.f32 %v4516_v13, %v4438_v10  ;;  %4321 = vmatmul.bf16.gmra.mxu0 %v13729_v26  ;;  %v17694_v26 = vld [vmem:[%s22621_s1 + $0x6b0] sm:$0xff] }
 0x47f   : > { %4400 = vmatmul.bf16.gmra.mxu1 %v13733_v25  ;;  %v17702_v25 = vld [vmem:[%s22621_s1 + $0x6f0] sm:$0xff]  ;;  %6281 = vmatpush.bf16.msra.mxu2 %v17694_v26 }
 0x480   : > { %v20342_v2 = vadd.f32 %v4517_v45, %v20050_v18  ;;  %4479 = vmatmul.bf16.gmra.mxu2 %v13737_v20  ;;  %v13938_v18 = vld [vmem:[%s18446_s28 + $0x60] sm:$0xf0]  ;;  %v17678_v10 = vld [vmem:[%s22621_s1 + $0x630] sm:$0xff]  ;;  %6360 = vmatpush.bf16.msra.mxu3 %v17702_v25 }
 0x481   : > { %4558 = vmatmul.bf16.gmra.mxu3 %v13741_v32  ;;  %v13941_v7 = vor.u32 %v17528_v42, %v13938_v18  ;;  %6123 = vmatpush.bf16.msra.mxu0 %v17678_v10  ;;  %v13962_v42 = vld [vmem:[%s18446_s28 + $0x88] sm:$0xf0]  ;;  %v13968_v10 = vld [vmem:[%s18446_s28 + $0x90] sm:$0xf] }
 0x483   : > { %v4440_v34 = vpop.f32.mrf.mxu2  ;;  %v4284_v35 = vpop.f32.mrf.mxu0 }
 0x484   : > { %v4519_v54 = vpop.f32.mrf.mxu3  ;;  %v4441_v59 = vadd.f32 %v4440_v34, %v4362_v50  ;;  %v4363_v46 = vpop.f32.mrf.mxu1 }
 0x485   : > { %v4364_v61 = vadd.f32 %v4363_v46, %v4284_v35  ;;  %v17532_v46 = vld [vmem:[%s18446_s28 + $0x74] sm:$0xf] }
 0x486   : > { %v4520_v21 = vadd.f32 %v4519_v54, %v4441_v59  ;;  %v13952_v54 = vld [vmem:[%s18446_s28 + $0x70] sm:$0xf]  ;;  %v17534_v59 = vld [vmem:[%s18446_s28 + $0x7c] sm:$0xf0] }
 0x487   : > { %v13953_v0 = vor.u32 %v17534_v59, %v13952_v54  ;;  %v13978_v54 = vld [vmem:[%s18446_s28 + $0xa8] sm:$0xf0] }
 0x488   : > { %v20347_v23 = vadd.f32 %v4520_v21, %v20055_v60  ;;  %v13960_v21 = vld [vmem:[%s18446_s28 + $0x78] sm:$0xf] }
 0x48b   : > { %v4442_v57 = vpop.f32.mrf.mxu2  ;;  %v4287_v40 = vpop.f32.mrf.mxu0 }
 0x48c   : > { %v4521_v3 = vpop.f32.mrf.mxu3  ;;  %v4443_v22 = vadd.f32 %v4442_v57, %v4364_v61  ;;  %v4366_v1 = vpop.f32.mrf.mxu1  ;;  %v13954_v61 = vld [vmem:[%s18446_s28 + $0x80] sm:$0xf0] }
 0x48d   : > { %v4367_v33 = vadd.f32 %v4366_v1, %v4287_v40  ;;  %v13957_v52 = vor.u32 %v17532_v46, %v13954_v61 }
 0x48e   : > { %v4522_v13 = vadd.f32 %v4521_v3, %v4443_v22  ;;  %5193 = vmatmul.bf16.vlgmr.msrb.gmra.mxu0 %v13937_v4  ;;  %v13961_v4 = vor.u32 %v17535_v14, %v13960_v21 }
 0x48f   : > { %5272 = vmatmul.bf16.vlgmr.msrb.gmra.mxu1 %v13941_v7  ;;  %v13965_v7 = vor.u32 %v17533_v37, %v13962_v42 }
 0x490   : > { %v20356_v60 = vadd.f32 %v4522_v13, %v20064_v30  ;;  %5351 = vmatmul.bf16.vlgmr.msrb.gmra.mxu2 %v13945_v5  ;;  %v17686_v30 = vld [vmem:[%s22621_s1 + $0x670] sm:$0xff] }
 0x491   : > { %5430 = vmatmul.bf16.vlgmr.msrb.gmra.mxu3 %v13949_v11  ;;  %6202 = vmatpush.bf16.msra.mxu1 %v17686_v30  ;;  %v17538_v30 = vld [vmem:[%s18446_s28 + $0x9c] sm:$0xf0] }
 0x492   : > { %v13969_v61 = vor.u32 %v17538_v30, %v13968_v10  ;;  %v17543_v10 = vld [vmem:[%s18446_s28 + $0xc4] sm:$0xf0]  ;;  %v17541_v30 = vld [vmem:[%s18446_s28 + $0xbc] sm:$0xf] }
 0x493   : > { %v4445_v62 = vpop.f32.mrf.mxu2  ;;  %v4289_v32 = vpop.f32.mrf.mxu0 }
 0x494   : > { %v4524_v49 = vpop.f32.mrf.mxu3  ;;  %v4446_v20 = vadd.f32 %v4445_v62, %v4367_v33  ;;  %v4368_v50 = vpop.f32.mrf.mxu1  ;;  %v17536_v62 = vld [vmem:[%s18446_s28 + $0x94] sm:$0xf] }
 0x495   : > { %v4369_v45 = vadd.f32 %v4368_v50, %v4289_v32  ;;  %v17693_v32 = vld [vmem:[%s22621_s1 + $0x6a8] sm:$0xff] }
 0x496   : > { %v4525_v34 = vadd.f32 %v4524_v49, %v4446_v20  ;;  %v13970_v49 = vld [vmem:[%s18446_s28 + $0xa0] sm:$0xf0]  ;;  %v17701_v50 = vld [vmem:[%s22621_s1 + $0x6e8] sm:$0xff]  ;;  %6282 = vmatpush.bf16.msra.mxu2 %v17693_v32 }
 0x497   : > { %6361 = vmatpush.bf16.msra.mxu3 %v17701_v50  ;;  %v13973_v21 = vor.u32 %v17536_v62, %v13970_v49  ;;  %v13994_v62 = vld [vmem:[%s18446_s28 + $0xc8] sm:$0xf0] }
 0x498   : > { %v20373_v35 = vadd.f32 %v4525_v34, %v20081_v51  ;;  %v17537_v34 = vld [vmem:[%s18446_s28 + $0x9c] sm:$0xf] }
 0x49b   : > { %v4447_v18 = vpop.f32.mrf.mxu2  ;;  %v4292_v57 = vpop.f32.mrf.mxu0 }
 0x49c   : > { %v4526_v16 = vpop.f32.mrf.mxu3  ;;  %v4448_v24 = vadd.f32 %v4447_v18, %v4369_v45  ;;  %v4371_v3 = vpop.f32.mrf.mxu1  ;;  %v17539_v45 = vld [vmem:[%s18446_s28 + $0xa4] sm:$0xf0]  ;;  %v13981_v18 = vor.u32 %v17537_v34, %v13978_v54 }
 0x49d   : > { %v4372_v22 = vadd.f32 %v4371_v3, %v4292_v57  ;;  %v17685_v57 = vld [vmem:[%s22621_s1 + $0x668] sm:$0xff] }
 0x49e   : > { %v4527_v51 = vadd.f32 %v4526_v16, %v4448_v24  ;;  %5198 = vmatmul.bf16.gmra.mxu0 %v13953_v0  ;;  %v17677_v24 = vld [vmem:[%s22621_s1 + $0x628] sm:$0xff]  ;;  %6203 = vmatpush.bf16.msra.mxu1 %v17685_v57  ;;  %v17546_v57 = vld [vmem:[%s18446_s28 + $0xdc] sm:$0xf0] }
 0x49f   : > { %5277 = vmatmul.bf16.gmra.mxu1 %v13957_v52  ;;  %6124 = vmatpush.bf16.msra.mxu0 %v17677_v24  ;;  %v14000_v24 = vld [vmem:[%s18446_s28 + $0xd0] sm:$0xf] }
 0x4a0   : > { %v20382_v40 = vadd.f32 %v4527_v51, %v20090_v6  ;;  %5356 = vmatmul.bf16.gmra.mxu2 %v13961_v4  ;;  %v13976_v6 = vld [vmem:[%s18446_s28 + $0x98] sm:$0xf] }
 0x4a1   : > { %5435 = vmatmul.bf16.gmra.mxu3 %v13965_v7  ;;  %v13977_v42 = vor.u32 %v17539_v45, %v13976_v6 }
 0x4a3   : > { %v4450_v1 = vpop.f32.mrf.mxu2  ;;  %v4294_v33 = vpop.f32.mrf.mxu0 }
 0x4a4   : > { %v4529_v5 = vpop.f32.mrf.mxu3  ;;  %v4451_v11 = vadd.f32 %v4450_v1, %v4372_v22  ;;  %v4373_v13 = vpop.f32.mrf.mxu1 }
 0x4a5   : > { %v4374_v26 = vadd.f32 %v4373_v13, %v4294_v33  ;;  %v17540_v13 = vld [vmem:[%s18446_s28 + $0xb4] sm:$0xf] }
 0x4a6   : > { %v4530_v25 = vadd.f32 %v4529_v5, %v4451_v11  ;;  %v13984_v5 = vld [vmem:[%s18446_s28 + $0xb0] sm:$0xf]  ;;  %v17542_v11 = vld [vmem:[%s18446_s28 + $0xbc] sm:$0xf0] }
 0x4a7   : > { %v13985_v32 = vor.u32 %v17542_v11, %v13984_v5  ;;  %v17545_v5 = vld [vmem:[%s18446_s28 + $0xdc] sm:$0xf]  ;;  %v14010_v11 = vld [vmem:[%s18446_s28 + $0xe8] sm:$0xf0] }
 0x4a8   : > { %v20389_v20 = vadd.f32 %v4530_v25, %v20097_v17  ;;  %v13992_v25 = vld [vmem:[%s18446_s28 + $0xb8] sm:$0xf] }
 0x4ab   : > { %v4452_v59 = vpop.f32.mrf.mxu2  ;;  %v4297_v14 = vpop.f32.mrf.mxu0 }
 0x4ac   : > { %v4531_v46 = vpop.f32.mrf.mxu3  ;;  %v4453_v17 = vadd.f32 %v4452_v59, %v4374_v26  ;;  %v4376_v37 = vpop.f32.mrf.mxu1  ;;  %v13986_v26 = vld [vmem:[%s18446_s28 + $0xc0] sm:$0xf0]  ;;  %v13993_v59 = vor.u32 %v17543_v10, %v13992_v25  ;;  %v14001_v25 = vor.u32 %v17546_v57, %v14000_v24  ;;  %v17551_v24 = vld [vmem:[%s18446_s28 + $0x104] sm:$0xf0]  ;;  %v17549_v57 = vld [vmem:[%s18446_s28 + $0xfc] sm:$0xf] }
 0x4ad   : > { %v4377_v16 = vadd.f32 %v4376_v37, %v4297_v14  ;;  %v13989_v50 = vor.u32 %v17540_v13, %v13986_v26  ;;  %v17684_v13 = vld [vmem:[%s22621_s1 + $0x660] sm:$0xff] }
 0x4ae   : > { %v4532_v0 = vadd.f32 %v4531_v46, %v4453_v17  ;;  %5203 = vmatmul.bf16.gmra.mxu0 %v13969_v61  ;;  %v13997_v46 = vor.u32 %v17541_v30, %v13994_v62  ;;  %6204 = vmatpush.bf16.msra.mxu1 %v17684_v13 }
 0x4af   : > { %5282 = vmatmul.bf16.gmra.mxu1 %v13973_v21 }
 0x4b0   : > { %v20402_v52 = vadd.f32 %v4532_v0, %v20110_v53  ;;  %5361 = vmatmul.bf16.gmra.mxu2 %v13977_v42 }
 0x4b1   : > { %5440 = vmatmul.bf16.gmra.mxu3 %v13981_v18 }
 0x4b3   : > { %v4455_v53 = vpop.f32.mrf.mxu2  ;;  %v4299_v7 = vpop.f32.mrf.mxu0 }
 0x4b4   : > { %v4534_v3 = vpop.f32.mrf.mxu3  ;;  %v4456_v4 = vadd.f32 %v4455_v53, %v4377_v16  ;;  %v4378_v22 = vpop.f32.mrf.mxu1  ;;  %v17544_v53 = vld [vmem:[%s18446_s28 + $0xd4] sm:$0xf] }
 0x4b5   : > { %v4379_v51 = vadd.f32 %v4378_v22, %v4299_v7  ;;  %v17547_v7 = vld [vmem:[%s18446_s28 + $0xe4] sm:$0xf0]  ;;  %v17692_v22 = vld [vmem:[%s22621_s1 + $0x6a0] sm:$0xff] }
 0x4b6   : > { %v4535_v1 = vadd.f32 %v4534_v3, %v4456_v4  ;;  %v14002_v3 = vld [vmem:[%s18446_s28 + $0xe0] sm:$0xf0]  ;;  %v14008_v4 = vld [vmem:[%s18446_s28 + $0xd8] sm:$0xf]  ;;  %6283 = vmatpush.bf16.msra.mxu2 %v17692_v22 }
 0x4b7   : > { %v14005_v10 = vor.u32 %v17544_v53, %v14002_v3  ;;  %v14026_v53 = vld [vmem:[%s18446_s28 + $0x108] sm:$0xf0] }
 0x4b8   : > { %v20413_v33 = vadd.f32 %v4535_v1, %v20121_v19  ;;  %v17676_v1 = vld [vmem:[%s22621_s1 + $0x620] sm:$0xff]  ;;  %v14029_v13 = vor.u32 %v17549_v57, %v14026_v53 }
 0x4b9   : > { %6125 = vmatpush.bf16.msra.mxu0 %v17676_v1 }
 0x4bb   : > { %v4457_v49 = vpop.f32.mrf.mxu2  ;;  %v4302_v34 = vpop.f32.mrf.mxu0 }
 0x4bc   : > { %v4536_v6 = vpop.f32.mrf.mxu3  ;;  %v4458_v45 = vadd.f32 %v4457_v49, %v4379_v51  ;;  %v4381_v54 = vpop.f32.mrf.mxu1  ;;  %v17700_v51 = vld [vmem:[%s22621_s1 + $0x6e0] sm:$0xff] }
 0x4bd   : > { %v4382_v61 = vadd.f32 %v4381_v54, %v4302_v34  ;;  %6362 = vmatpush.bf16.msra.mxu3 %v17700_v51 }
 0x4be   : > { %v4537_v19 = vadd.f32 %v4536_v6, %v4458_v45  ;;  %5208 = vmatmul.bf16.gmra.mxu0 %v13985_v32  ;;  %v14009_v6 = vor.u32 %v17547_v7, %v14008_v4  ;;  %v14013_v32 = vor.u32 %v17545_v5, %v14010_v11 }
 0x4bf   : > { %5287 = vmatmul.bf16.gmra.mxu1 %v13989_v50 }
 0x4c0   : > { %v20422_v21 = vadd.f32 %v4537_v19, %v20130_v58  ;;  %5366 = vmatmul.bf16.gmra.mxu2 %v13993_v59 }
 0x4c1   : > { %5445 = vmatmul.bf16.gmra.mxu3 %v13997_v46 }
 0x4c3   : > { %v4460_v17 = vpop.f32.mrf.mxu2  ;;  %v4304_v42 = vpop.f32.mrf.mxu0 }
 0x4c4   : > { %v4539_v14 = vpop.f32.mrf.mxu3  ;;  %v4461_v37 = vadd.f32 %v4460_v17, %v4382_v61  ;;  %v4383_v18 = vpop.f32.mrf.mxu1 }
 0x4c5   : > { %v4384_v16 = vadd.f32 %v4383_v18, %v4304_v42  ;;  %v17550_v42 = vld [vmem:[%s18446_s28 + $0xfc] sm:$0xf0] }
 0x4c6   : > { %v4540_v0 = vadd.f32 %v4539_v14, %v4461_v37  ;;  %v14016_v37 = vld [vmem:[%s18446_s28 + $0xf0] sm:$0xf] }
 0x4c7   : > { %v14017_v7 = vor.u32 %v17550_v42, %v14016_v37  ;;  %v17555_v37 = vld [vmem:[%s18446_s28 + $0x124] sm:$0xf0]  ;;  %v17553_v42 = vld [vmem:[%s18446_s28 + $0x11c] sm:$0xf] }
 0x4c8   : > { %v20431_v58 = vadd.f32 %v4540_v0, %v20139_v27  ;;  %v14024_v0 = vld [vmem:[%s18446_s28 + $0xf8] sm:$0xf] }
 0x4c9   : > { %v14025_v11 = vor.u32 %v17551_v24, %v14024_v0 }
 0x4cb   : > { %v4462_v27 = vpop.f32.mrf.mxu2  ;;  %v4307_v62 = vpop.f32.mrf.mxu0 }
 0x4cc   : > { %v4541_v26 = vpop.f32.mrf.mxu3  ;;  %v4463_v30 = vadd.f32 %v4462_v27, %v4384_v16  ;;  %v4386_v49 = vpop.f32.mrf.mxu1  ;;  %v17548_v16 = vld [vmem:[%s18446_s28 + $0xf4] sm:$0xf] }
 0x4cd   : > { %v4387_v50 = vadd.f32 %v4386_v49, %v4307_v62 }
 0x4ce   : > { %v4542_v45 = vadd.f32 %v4541_v26, %v4463_v30  ;;  %5213 = vmatmul.bf16.gmra.mxu0 %v14001_v25  ;;  %v17691_v25 = vld [vmem:[%s22621_s1 + $0x698] sm:$0xff] }
 0x4cf   : > { %5292 = vmatmul.bf16.gmra.mxu1 %v14005_v10  ;;  %v17699_v10 = vld [vmem:[%s22621_s1 + $0x6d8] sm:$0xff]  ;;  %6284 = vmatpush.bf16.msra.mxu2 %v17691_v25 }
 0x4d0   : > { %v20448_v34 = vadd.f32 %v4542_v45, %v20156_v31  ;;  %5371 = vmatmul.bf16.gmra.mxu2 %v14009_v6  ;;  %v14018_v31 = vld [vmem:[%s18446_s28 + $0x100] sm:$0xf0]  ;;  %6363 = vmatpush.bf16.msra.mxu3 %v17699_v10  ;;  %v14032_v45 = vld [vmem:[%s18446_s28 + $0x110] sm:$0xf] }
 0x4d1   : > { %5450 = vmatmul.bf16.gmra.mxu3 %v14013_v32  ;;  %v14021_v22 = vor.u32 %v17548_v16, %v14018_v31  ;;  %v14042_v16 = vld [vmem:[%s18446_s28 + $0x128] sm:$0xf0] }
 0x4d3   : > { %v4465_v54 = vpop.f32.mrf.mxu2  ;;  %v4309_v61 = vpop.f32.mrf.mxu0 }
 0x4d4   : > { %v4544_v59 = vpop.f32.mrf.mxu3  ;;  %v4466_v46 = vadd.f32 %v4465_v54, %v4387_v50  ;;  %v4388_v19 = vpop.f32.mrf.mxu1  ;;  %v17554_v54 = vld [vmem:[%s18446_s28 + $0x11c] sm:$0xf0] }
 0x4d5   : > { %v4389_v17 = vadd.f32 %v4388_v19, %v4309_v61  ;;  %v14040_v19 = vld [vmem:[%s18446_s28 + $0x118] sm:$0xf]  ;;  %v14033_v24 = vor.u32 %v17554_v54, %v14032_v45  ;;  %v14058_v45 = vld [vmem:[%s18446_s28 + $0x148] sm:$0xf0] }
 0x4d6   : > { %v4545_v14 = vadd.f32 %v4544_v59, %v4466_v46  ;;  %v17552_v59 = vld [vmem:[%s18446_s28 + $0x114] sm:$0xf]  ;;  %v14034_v46 = vld [vmem:[%s18446_s28 + $0x120] sm:$0xf0] }
 0x4d7   : > { %v14037_v57 = vor.u32 %v17552_v59, %v14034_v46 }
 0x4d8   : > { %v20453_v18 = vadd.f32 %v4545_v14, %v20161_v12  ;;  %v17683_v14 = vld [vmem:[%s22621_s1 + $0x658] sm:$0xff] }
 0x4d9   : > { %6205 = vmatpush.bf16.msra.mxu1 %v17683_v14 }
 0x4db   : > { %v4467_v3 = vpop.f32.mrf.mxu2  ;;  %v4312_v1 = vpop.f32.mrf.mxu0 }
 0x4dc   : > { %v4546_v4 = vpop.f32.mrf.mxu3  ;;  %v4468_v51 = vadd.f32 %v4467_v3, %v4389_v17  ;;  %v4391_v5 = vpop.f32.mrf.mxu1  ;;  %v17675_v17 = vld [vmem:[%s22621_s1 + $0x618] sm:$0xff] }
 0x4dd   : > { %v4392_v27 = vadd.f32 %v4391_v5, %v4312_v1  ;;  %6126 = vmatpush.bf16.msra.mxu0 %v17675_v17 }
 0x4de   : > { %v4547_v26 = vadd.f32 %v4546_v4, %v4468_v51  ;;  %5218 = vmatmul.bf16.gmra.mxu0 %v14017_v7  ;;  %v14041_v4 = vor.u32 %v17555_v37, %v14040_v19  ;;  %v14045_v7 = vor.u32 %v17553_v42, %v14042_v16 }
 0x4df   : > { %5297 = vmatmul.bf16.gmra.mxu1 %v14021_v22 }
 0x4e0   : > { %v20462_v12 = vadd.f32 %v4547_v26, %v20170_v47  ;;  %5376 = vmatmul.bf16.gmra.mxu2 %v14025_v11 }
 0x4e1   : > { %5455 = vmatmul.bf16.gmra.mxu3 %v14029_v13 }
 0x4e3   : > { %v4470_v30 = vpop.f32.mrf.mxu2  ;;  %v4314_v49 = vpop.f32.mrf.mxu0 }
 0x4e4   : > { %v4549_v47 = vpop.f32.mrf.mxu3  ;;  %v4471_v62 = vadd.f32 %v4470_v30, %v4392_v27  ;;  %v4393_v6 = vpop.f32.mrf.mxu1  ;;  %v14048_v30 = vld [vmem:[%s18446_s28 + $0x130] sm:$0xf] }
 0x4e5   : > { %v4394_v32 = vadd.f32 %v4393_v6, %v4314_v49  ;;  %v17556_v49 = vld [vmem:[%s18446_s28 + $0x134] sm:$0xf]  ;;  %v14056_v6 = vld [vmem:[%s18446_s28 + $0x138] sm:$0xf] }
 0x4e6   : > { %v4550_v50 = vadd.f32 %v4549_v47, %v4471_v62  ;;  %v17558_v47 = vld [vmem:[%s18446_s28 + $0x13c] sm:$0xf0] }
 0x4e7   : > { %v14049_v46 = vor.u32 %v17558_v47, %v14048_v30  ;;  %v17563_v30 = vld [vmem:[%s18446_s28 + $0x164] sm:$0xf0]  ;;  %v17561_v47 = vld [vmem:[%s18446_s28 + $0x15c] sm:$0xf] }
 0x4e8   : > { %v20475_v61 = vadd.f32 %v4550_v50, %v20183_v56  ;;  %v17557_v50 = vld [vmem:[%s18446_s28 + $0x13c] sm:$0xf] }
 0x4e9   : > { %v14061_v16 = vor.u32 %v17557_v50, %v14058_v45 }
 0x4eb   : > { %v4472_v31 = vpop.f32.mrf.mxu2  ;;  %v4317_v53 = vpop.f32.mrf.mxu0 }
 0x4ec   : > { %v4551_v0 = vpop.f32.mrf.mxu3  ;;  %v4473_v56 = vadd.f32 %v4472_v31, %v4394_v32  ;;  %v4396_v3 = vpop.f32.mrf.mxu1  ;;  %v17559_v32 = vld [vmem:[%s18446_s28 + $0x144] sm:$0xf0] }
 0x4ed   : > { %v4397_v22 = vadd.f32 %v4396_v3, %v4317_v53  ;;  %v14057_v42 = vor.u32 %v17559_v32, %v14056_v6 }
 0x4ee   : > { %v4552_v51 = vadd.f32 %v4551_v0, %v4473_v56  ;;  %5223 = vmatmul.bf16.gmra.mxu0 %v14033_v24  ;;  %v17690_v24 = vld [vmem:[%s22621_s1 + $0x690] sm:$0xff] }
 0x4ef   : > { %5302 = vmatmul.bf16.gmra.mxu1 %v14037_v57  ;;  %v17698_v57 = vld [vmem:[%s22621_s1 + $0x6d0] sm:$0xff]  ;;  %6285 = vmatpush.bf16.msra.mxu2 %v17690_v24 }
 0x4f0   : > { %v20488_v1 = vadd.f32 %v4552_v51, %v20196_v8  ;;  %5381 = vmatmul.bf16.gmra.mxu2 %v14041_v4  ;;  %v14050_v8 = vld [vmem:[%s18446_s28 + $0x140] sm:$0xf0]  ;;  %v17674_v56 = vld [vmem:[%s22621_s1 + $0x610] sm:$0xff]  ;;  %6364 = vmatpush.bf16.msra.mxu3 %v17698_v57 }
 0x4f1   : > { %5460 = vmatmul.bf16.gmra.mxu3 %v14045_v7  ;;  %v14053_v19 = vor.u32 %v17556_v49, %v14050_v8  ;;  %6127 = vmatpush.bf16.msra.mxu0 %v17674_v56  ;;  %v14074_v49 = vld [vmem:[%s18446_s28 + $0x168] sm:$0xf0]  ;;  %v14080_v56 = vld [vmem:[%s18446_s28 + $0x170] sm:$0xf] }
 0x4f3   : > { %v4475_v5 = vpop.f32.mrf.mxu2  ;;  %v4319_v27 = vpop.f32.mrf.mxu0 }
 0x4f4   : > { %v4554_v11 = vpop.f32.mrf.mxu3  ;;  %v4476_v13 = vadd.f32 %v4475_v5, %v4397_v22  ;;  %v4398_v26 = vpop.f32.mrf.mxu1 }
 0x4f5   : > { %v4399_v25 = vadd.f32 %v4398_v26, %v4319_v27  ;;  %v17560_v26 = vld [vmem:[%s18446_s28 + $0x154] sm:$0xf] }
 0x4f6   : > { %v4555_v10 = vadd.f32 %v4554_v11, %v4476_v13  ;;  %v14064_v11 = vld [vmem:[%s18446_s28 + $0x150] sm:$0xf]  ;;  %v17562_v13 = vld [vmem:[%s18446_s28 + $0x15c] sm:$0xf0] }
 0x4f7   : > { %v14065_v32 = vor.u32 %v17562_v13, %v14064_v11  ;;  %v14090_v11 = vld [vmem:[%s18446_s28 + $0x188] sm:$0xf0] }
 0x4f8   : > { %v20493_v62 = vadd.f32 %v4555_v10, %v20201_v43  ;;  %v14072_v10 = vld [vmem:[%s18446_s28 + $0x158] sm:$0xf] }
 0x4fb   : > { %v4477_v54 = vpop.f32.mrf.mxu2  ;;  %v4322_v14 = vpop.f32.mrf.mxu0 }
 0x4fc   : > { %v4556_v59 = vpop.f32.mrf.mxu3  ;;  %v4478_v17 = vadd.f32 %v4477_v54, %v4399_v25  ;;  %v4401_v37 = vpop.f32.mrf.mxu1  ;;  %v14066_v25 = vld [vmem:[%s18446_s28 + $0x160] sm:$0xf0] }
 0x4fd   : > { %v4402_v31 = vadd.f32 %v4401_v37, %v4322_v14  ;;  %v14069_v50 = vor.u32 %v17560_v26, %v14066_v25 }
 0x4fe   : > { %v4557_v0 = vadd.f32 %v4556_v59, %v4478_v17  ;;  %5228 = vmatmul.bf16.gmra.mxu0 %v14049_v46  ;;  %v14073_v46 = vor.u32 %v17563_v30, %v14072_v10 }
 0x4ff   : > { %5307 = vmatmul.bf16.gmra.mxu1 %v14053_v19  ;;  %v14077_v19 = vor.u32 %v17561_v47, %v14074_v49 }
 0x500   : > { %v20502_v43 = vadd.f32 %v4557_v0, %v20210_v29  ;;  %5386 = vmatmul.bf16.gmra.mxu2 %v14057_v42  ;;  %v17682_v29 = vld [vmem:[%s22621_s1 + $0x650] sm:$0xff] }
 0x501   : > { %5465 = vmatmul.bf16.gmra.mxu3 %v14061_v16  ;;  %6206 = vmatpush.bf16.msra.mxu1 %v17682_v29  ;;  %v17566_v29 = vld [vmem:[%s18446_s28 + $0x17c] sm:$0xf0] }
 0x502   : > { %v14081_v25 = vor.u32 %v17566_v29, %v14080_v56  ;;  %v17571_v56 = vld [vmem:[%s18446_s28 + $0x1a4] sm:$0xf0]  ;;  %v17569_v29 = vld [vmem:[%s18446_s28 + $0x19c] sm:$0xf] }
 0x503   : > { %v4480_v53 = vpop.f32.mrf.mxu2  ;;  %v4324_v7 = vpop.f32.mrf.mxu0 }
 0x504   : > { %v4559_v3 = vpop.f32.mrf.mxu3  ;;  %v4481_v4 = vadd.f32 %v4480_v53, %v4402_v31  ;;  %v4403_v22 = vpop.f32.mrf.mxu1  ;;  %v17564_v53 = vld [vmem:[%s18446_s28 + $0x174] sm:$0xf] }
 0x505   : > { %v4404_v51 = vadd.f32 %v4403_v22, %v4324_v7  ;;  %v17689_v7 = vld [vmem:[%s22621_s1 + $0x688] sm:$0xff] }
 0x506   : > { %v4560_v5 = vadd.f32 %v4559_v3, %v4481_v4  ;;  %v14082_v3 = vld [vmem:[%s18446_s28 + $0x180] sm:$0xf0]  ;;  %v17697_v22 = vld [vmem:[%s22621_s1 + $0x6c8] sm:$0xff]  ;;  %6286 = vmatpush.bf16.msra.mxu2 %v17689_v7 }
 0x507   : > { %6365 = vmatpush.bf16.msra.mxu3 %v17697_v22  ;;  %v14085_v10 = vor.u32 %v17564_v53, %v14082_v3  ;;  %v14106_v53 = vld [vmem:[%s18446_s28 + $0x1a8] sm:$0xf0] }
 0x508   : > { %v20519_v27 = vadd.f32 %v4560_v5, %v20227_v41  ;;  %v17565_v5 = vld [vmem:[%s18446_s28 + $0x17c] sm:$0xf] }
 0x50b   : > { %v4482_v8 = vpop.f32.mrf.mxu2  ;;  %v5194_v54 = vpop.f32.mrf.mxu0 }
 0x50c   : > { %v4561_v6 = vpop.f32.mrf.mxu3  ;;  %v4483_v45 = vadd.f32 %v4482_v8, %v4404_v51  ;;  %v5273_v59 = vpop.f32.mrf.mxu1  ;;  %v17567_v51 = vld [vmem:[%s18446_s28 + $0x184] sm:$0xf0]  ;;  %v14093_v8 = vor.u32 %v17565_v5, %v14090_v11 }
 0x50d   : > { %v5274_v17 = vadd.f32 %v5273_v59, %v5194_v54  ;;  %v17681_v54 = vld [vmem:[%s22621_s1 + $0x648] sm:$0xff] }
 0x50e   : > { %v4562_v41 = vadd.f32 %v4561_v6, %v4483_v45  ;;  %5233 = vmatmul.bf16.gmra.mxu0 %v14065_v32  ;;  %v17673_v45 = vld [vmem:[%s22621_s1 + $0x608] sm:$0xff]  ;;  %6207 = vmatpush.bf16.msra.mxu1 %v17681_v54  ;;  %v17574_v54 = vld [vmem:[%s18446_s28 + $0x1bc] sm:$0xf0] }
 0x50f   : > { %5312 = vmatmul.bf16.gmra.mxu1 %v14069_v50  ;;  %6128 = vmatpush.bf16.msra.mxu0 %v17673_v45  ;;  %v14112_v45 = vld [vmem:[%s18446_s28 + $0x1b0] sm:$0xf] }
 0x510   : > { %v20528_v14 = vadd.f32 %v4562_v41, %v20236_v39  ;;  %5391 = vmatmul.bf16.gmra.mxu2 %v14073_v46  ;;  %v14088_v39 = vld [vmem:[%s18446_s28 + $0x178] sm:$0xf] }
 0x511   : > { %5470 = vmatmul.bf16.gmra.mxu3 %v14077_v19  ;;  %v14089_v49 = vor.u32 %v17567_v51, %v14088_v39 }
 0x513   : > { %v5352_v37 = vpop.f32.mrf.mxu2  ;;  %v5196_v31 = vpop.f32.mrf.mxu0 }
 0x514   : > { %v5431_v42 = vpop.f32.mrf.mxu3  ;;  %v5353_v16 = vadd.f32 %v5352_v37, %v5274_v17  ;;  %v5275_v0 = vpop.f32.mrf.mxu1 }
 0x515   : > { %v5276_v24 = vadd.f32 %v5275_v0, %v5196_v31  ;;  %v17568_v0 = vld [vmem:[%s18446_s28 + $0x194] sm:$0xf] }
 0x516   : > { %v5432_v57 = vadd.f32 %v5431_v42, %v5353_v16  ;;  %v14096_v42 = vld [vmem:[%s18446_s28 + $0x190] sm:$0xf]  ;;  %v17570_v16 = vld [vmem:[%s18446_s28 + $0x19c] sm:$0xf0] }
 0x517   : > { %v14097_v7 = vor.u32 %v17570_v16, %v14096_v42  ;;  %v17573_v42 = vld [vmem:[%s18446_s28 + $0x1bc] sm:$0xf]  ;;  %v14122_v16 = vld [vmem:[%s18446_s28 + $0x1c8] sm:$0xf0] }
 0x518   : > { %v20535_v4 = vadd.f32 %v5432_v57, %v20243_v63  ;;  %v14104_v57 = vld [vmem:[%s18446_s28 + $0x198] sm:$0xf] }
 0x51b   : > { %v5354_v13 = vpop.f32.mrf.mxu2  ;;  %v5199_v30 = vpop.f32.mrf.mxu0 }
 0x51c   : > { %v5433_v26 = vpop.f32.mrf.mxu3  ;;  %v5355_v63 = vadd.f32 %v5354_v13, %v5276_v24  ;;  %v5278_v47 = vpop.f32.mrf.mxu1  ;;  %v14098_v24 = vld [vmem:[%s18446_s28 + $0x1a0] sm:$0xf0]  ;;  %v14105_v13 = vor.u32 %v17571_v56, %v14104_v57  ;;  %v14113_v57 = vor.u32 %v17574_v54, %v14112_v45  ;;  %v17579_v45 = vld [vmem:[%s18446_s28 + $0x1e4] sm:$0xf0]  ;;  %v17577_v54 = vld [vmem:[%s18446_s28 + $0x1dc] sm:$0xf] }
 0x51d   : > { %v5279_v6 = vadd.f32 %v5278_v47, %v5199_v30  ;;  %v14101_v22 = vor.u32 %v17568_v0, %v14098_v24  ;;  %v17680_v0 = vld [vmem:[%s22621_s1 + $0x640] sm:$0xff] }
 0x51e   : > { %v5434_v32 = vadd.f32 %v5433_v26, %v5355_v63  ;;  %5238 = vmatmul.bf16.gmra.mxu0 %v14081_v25  ;;  %v14109_v26 = vor.u32 %v17569_v29, %v14106_v53  ;;  %6208 = vmatpush.bf16.msra.mxu1 %v17680_v0 }
 0x51f   : > { %5317 = vmatmul.bf16.gmra.mxu1 %v14085_v10 }
 0x520   : > { %v20548_v50 = vadd.f32 %v5434_v32, %v20256_v48  ;;  %5396 = vmatmul.bf16.gmra.mxu2 %v14089_v49 }
 0x521   : > { %5475 = vmatmul.bf16.gmra.mxu3 %v14093_v8 }
 0x523   : > { %v5357_v48 = vpop.f32.mrf.mxu2  ;;  %v5201_v19 = vpop.f32.mrf.mxu0 }
 0x524   : > { %v5436_v59 = vpop.f32.mrf.mxu3  ;;  %v5358_v46 = vadd.f32 %v5357_v48, %v5279_v6  ;;  %v5280_v17 = vpop.f32.mrf.mxu1  ;;  %v17572_v48 = vld [vmem:[%s18446_s28 + $0x1b4] sm:$0xf] }
 0x525   : > { %v5281_v41 = vadd.f32 %v5280_v17, %v5201_v19  ;;  %v17575_v19 = vld [vmem:[%s18446_s28 + $0x1c4] sm:$0xf0]  ;;  %v17688_v17 = vld [vmem:[%s22621_s1 + $0x680] sm:$0xff] }
 0x526   : > { %v5437_v37 = vadd.f32 %v5436_v59, %v5358_v46  ;;  %v14114_v59 = vld [vmem:[%s18446_s28 + $0x1c0] sm:$0xf0]  ;;  %v14120_v46 = vld [vmem:[%s18446_s28 + $0x1b8] sm:$0xf]  ;;  %6287 = vmatpush.bf16.msra.mxu2 %v17688_v17 }
 0x527   : > { %v14117_v56 = vor.u32 %v17572_v48, %v14114_v59  ;;  %v14138_v48 = vld [vmem:[%s18446_s28 + $0x1e8] sm:$0xf0] }
 0x528   : > { %v20559_v31 = vadd.f32 %v5437_v37, %v20267_v38  ;;  %v17672_v37 = vld [vmem:[%s22621_s1 + $0x600] sm:$0xff]  ;;  %v14141_v0 = vor.u32 %v17577_v54, %v14138_v48 }
 0x529   : > { %6129 = vmatpush.bf16.msra.mxu0 %v17672_v37 }
 0x52b   : > { %v5359_v3 = vpop.f32.mrf.mxu2  ;;  %v5204_v5 = vpop.f32.mrf.mxu0 }
 0x52c   : > { %v5438_v39 = vpop.f32.mrf.mxu3  ;;  %v5360_v51 = vadd.f32 %v5359_v3, %v5281_v41  ;;  %v5283_v11 = vpop.f32.mrf.mxu1  ;;  %v17696_v41 = vld [vmem:[%s22621_s1 + $0x6c0] sm:$0xff] }
 0x52d   : > { %v5284_v25 = vadd.f32 %v5283_v11, %v5204_v5  ;;  %6366 = vmatpush.bf16.msra.mxu3 %v17696_v41 }
 0x52e   : > { %v5439_v38 = vadd.f32 %v5438_v39, %v5360_v51  ;;  %5243 = vmatmul.bf16.gmra.mxu0 %v14097_v7  ;;  %v14121_v39 = vor.u32 %v17575_v19, %v14120_v46  ;;  %v14125_v7 = vor.u32 %v17573_v42, %v14122_v16 }
 0x52f   : > { %5322 = vmatmul.bf16.gmra.mxu1 %v14101_v22 }
 0x530   : > { %v20568_v10 = vadd.f32 %v5439_v38, %v20276_v28  ;;  %5401 = vmatmul.bf16.gmra.mxu2 %v14105_v13 }
 0x531   : > { %5480 = vmatmul.bf16.gmra.mxu3 %v14109_v26 }
 0x533   : > { %v5362_v63 = vpop.f32.mrf.mxu2  ;;  %v5206_v49 = vpop.f32.mrf.mxu0 }
 0x534   : > { %v5441_v30 = vpop.f32.mrf.mxu3  ;;  %v5363_v47 = vadd.f32 %v5362_v63, %v5284_v25  ;;  %v5285_v8 = vpop.f32.mrf.mxu1 }
 0x535   : > { %v5286_v6 = vadd.f32 %v5285_v8, %v5206_v49  ;;  %v17578_v49 = vld [vmem:[%s18446_s28 + $0x1dc] sm:$0xf0] }
 0x536   : > { %v5442_v32 = vadd.f32 %v5441_v30, %v5363_v47  ;;  %v14128_v47 = vld [vmem:[%s18446_s28 + $0x1d0] sm:$0xf] }
 0x537   : > { %v14129_v19 = vor.u32 %v17578_v49, %v14128_v47  ;;  %v17583_v47 = vld [vmem:[%s18446_s28 + $0x204] sm:$0xf0]  ;;  %v17581_v49 = vld [vmem:[%s18446_s28 + $0x1fc] sm:$0xf] }
 0x538   : > { %v20577_v28 = vadd.f32 %v5442_v32, %v20285_v9  ;;  %v14136_v32 = vld [vmem:[%s18446_s28 + $0x1d8] sm:$0xf] }
 0x539   : > { %v14137_v16 = vor.u32 %v17579_v45, %v14136_v32 }
 0x53b   : > { %v5364_v9 = vpop.f32.mrf.mxu2  ;;  %v5209_v53 = vpop.f32.mrf.mxu0 }
 0x53c   : > { %v5443_v24 = vpop.f32.mrf.mxu3  ;;  %v5365_v29 = vadd.f32 %v5364_v9, %v5286_v6  ;;  %v5288_v3 = vpop.f32.mrf.mxu1  ;;  %v17576_v6 = vld [vmem:[%s18446_s28 + $0x1d4] sm:$0xf] }
 0x53d   : > { %v5289_v22 = vadd.f32 %v5288_v3, %v5209_v53 }
 0x53e   : > { %v5444_v51 = vadd.f32 %v5443_v24, %v5365_v29  ;;  %5248 = vmatmul.bf16.gmra.mxu0 %v14113_v57  ;;  %v17783_v57 = vld [vmem:[%s22621_s1 + $0x7b8] sm:$0xff] }
 0x53f   : > { %5327 = vmatmul.bf16.gmra.mxu1 %v14117_v56  ;;  %v17791_v56 = vld [vmem:[%s22621_s1 + $0x7f8] sm:$0xff]  ;;  %7217 = vmatpush.bf16.msrb.mxu2 %v17783_v57 }
 0x540   : > { %v20594_v5 = vadd.f32 %v5444_v51, %v20302_v44  ;;  %5406 = vmatmul.bf16.gmra.mxu2 %v14121_v39  ;;  %v14130_v44 = vld [vmem:[%s18446_s28 + $0x1e0] sm:$0xf0]  ;;  %7296 = vmatpush.bf16.msrb.mxu3 %v17791_v56  ;;  %v14144_v51 = vld [vmem:[%s18446_s28 + $0x1f0] sm:$0xf] }
 0x541   : > { %5485 = vmatmul.bf16.gmra.mxu3 %v14125_v7  ;;  %v14133_v17 = vor.u32 %v17576_v6, %v14130_v44  ;;  %v14154_v6 = vld [vmem:[%s18446_s28 + $0x208] sm:$0xf0] }
 0x543   : > { %v5367_v11 = vpop.f32.mrf.mxu2  ;;  %v5211_v25 = vpop.f32.mrf.mxu0 }
 0x544   : > { %v5446_v13 = vpop.f32.mrf.mxu3  ;;  %v5368_v26 = vadd.f32 %v5367_v11, %v5289_v22  ;;  %v5290_v38 = vpop.f32.mrf.mxu1  ;;  %v17582_v11 = vld [vmem:[%s18446_s28 + $0x1fc] sm:$0xf0] }
 0x545   : > { %v5291_v63 = vadd.f32 %v5290_v38, %v5211_v25  ;;  %v14152_v38 = vld [vmem:[%s18446_s28 + $0x1f8] sm:$0xf]  ;;  %v14145_v45 = vor.u32 %v17582_v11, %v14144_v51  ;;  %v14362_v51 = vld [vmem:[%s18446_s28 + $0x78] sm:$0xf0] }
 0x546   : > { %v5447_v30 = vadd.f32 %v5446_v13, %v5368_v26  ;;  %v17580_v13 = vld [vmem:[%s18446_s28 + $0x1f4] sm:$0xf]  ;;  %v14146_v26 = vld [vmem:[%s18446_s28 + $0x200] sm:$0xf0] }
 0x547   : > { %v14149_v54 = vor.u32 %v17580_v13, %v14146_v26 }
 0x548   : > { %v20599_v8 = vadd.f32 %v5447_v30, %v20307_v55  ;;  %v17775_v30 = vld [vmem:[%s22621_s1 + $0x778] sm:$0xff] }
 0x549   : > { %7138 = vmatpush.bf16.msrb.mxu1 %v17775_v30 }
 0x54b   : > { %v5369_v59 = vpop.f32.mrf.mxu2  ;;  %v5214_v37 = vpop.f32.mrf.mxu0 }
 0x54c   : > { %v5448_v46 = vpop.f32.mrf.mxu3  ;;  %v5370_v41 = vadd.f32 %v5369_v59, %v5291_v63  ;;  %v5293_v42 = vpop.f32.mrf.mxu1  ;;  %v17767_v63 = vld [vmem:[%s22621_s1 + $0x738] sm:$0xff] }
 0x54d   : > { %v5294_v9 = vadd.f32 %v5293_v42, %v5214_v37  ;;  %7059 = vmatpush.bf16.msrb.mxu0 %v17767_v63 }
 0x54e   : > { %v5449_v24 = vadd.f32 %v5448_v46, %v5370_v41  ;;  %5253 = vmatmul.bf16.gmra.mxu0 %v14129_v19  ;;  %v14153_v46 = vor.u32 %v17583_v47, %v14152_v38  ;;  %v14157_v19 = vor.u32 %v17581_v49, %v14154_v6 }
 0x54f   : > { %5332 = vmatmul.bf16.gmra.mxu1 %v14133_v17 }
 0x550   : > { %v20608_v55 = vadd.f32 %v5449_v24, %v20316_v36  ;;  %5411 = vmatmul.bf16.gmra.mxu2 %v14137_v16 }
 0x551   : > { %5490 = vmatmul.bf16.gmra.mxu3 %v14141_v0 }
 0x553   : > { %v5372_v29 = vpop.f32.mrf.mxu2  ;;  %v5216_v3 = vpop.f32.mrf.mxu0 }
 0x554   : > { %v5451_v36 = vpop.f32.mrf.mxu3  ;;  %v5373_v53 = vadd.f32 %v5372_v29, %v5294_v9  ;;  %v5295_v39 = vpop.f32.mrf.mxu1  ;;  %v14352_v29 = vld [vmem:[%s18446_s28 + $0x60] sm:$0xf] }
 0x555   : > { %v5296_v7 = vadd.f32 %v5295_v39, %v5216_v3  ;;  %v17616_v3 = vld [vmem:[%s18446_s28 + $0x64] sm:$0xf]  ;;  %v14360_v39 = vld [vmem:[%s18446_s28 + $0x68] sm:$0xf] }
 0x556   : > { %v5452_v22 = vadd.f32 %v5451_v36, %v5373_v53  ;;  %v17618_v36 = vld [vmem:[%s18446_s28 + $0x6c] sm:$0xf0] }
 0x557   : > { %v14353_v26 = vor.u32 %v17618_v36, %v14352_v29  ;;  %v17623_v29 = vld [vmem:[%s18446_s28 + $0x94] sm:$0xf0]  ;;  %v17621_v36 = vld [vmem:[%s18446_s28 + $0x8c] sm:$0xf] }
 0x558   : > { %v20621_v25 = vadd.f32 %v5452_v22, %v20329_v15  ;;  %v17617_v22 = vld [vmem:[%s18446_s28 + $0x6c] sm:$0xf] }
 0x559   : > { %v14365_v6 = vor.u32 %v17617_v22, %v14362_v51 }
 0x55b   : > { %v5374_v44 = vpop.f32.mrf.mxu2  ;;  %v5219_v48 = vpop.f32.mrf.mxu0 }
 0x55c   : > { %v5453_v32 = vpop.f32.mrf.mxu3  ;;  %v5375_v15 = vadd.f32 %v5374_v44, %v5296_v7  ;;  %v5298_v59 = vpop.f32.mrf.mxu1  ;;  %v17619_v7 = vld [vmem:[%s18446_s28 + $0x74] sm:$0xf0] }
 0x55d   : > { %v5299_v17 = vadd.f32 %v5298_v59, %v5219_v48  ;;  %v14361_v49 = vor.u32 %v17619_v7, %v14360_v39 }
 0x55e   : > { %v5454_v41 = vadd.f32 %v5453_v32, %v5375_v15  ;;  %5258 = vmatmul.bf16.gmra.mxu0 %v14145_v45  ;;  %v17782_v45 = vld [vmem:[%s22621_s1 + $0x7b0] sm:$0xff] }
 0x55f   : > { %5337 = vmatmul.bf16.gmra.mxu1 %v14149_v54  ;;  %v17790_v54 = vld [vmem:[%s22621_s1 + $0x7f0] sm:$0xff]  ;;  %7218 = vmatpush.bf16.msrb.mxu2 %v17782_v45 }
 0x560   : > { %v20634_v37 = vadd.f32 %v5454_v41, %v20342_v2  ;;  %5416 = vmatmul.bf16.gmra.mxu2 %v14153_v46  ;;  %v14354_v2 = vld [vmem:[%s18446_s28 + $0x70] sm:$0xf0]  ;;  %7297 = vmatpush.bf16.msrb.mxu3 %v17790_v54 }
 0x561   : > { %5495 = vmatmul.bf16.gmra.mxu3 %v14157_v19  ;;  %v14357_v38 = vor.u32 %v17616_v3, %v14354_v2  ;;  %v17766_v15 = vld [vmem:[%s22621_s1 + $0x730] sm:$0xff]  ;;  %v14378_v3 = vld [vmem:[%s18446_s28 + $0x98] sm:$0xf0] }
 0x562   : > { %7060 = vmatpush.bf16.msrb.mxu0 %v17766_v15  ;;  %v14384_v15 = vld [vmem:[%s18446_s28 + $0xa0] sm:$0xf] }
 0x563   : > { %v5377_v42 = vpop.f32.mrf.mxu2  ;;  %v5221_v9 = vpop.f32.mrf.mxu0 }
 0x564   : > { %v5456_v16 = vpop.f32.mrf.mxu3  ;;  %v5378_v0 = vadd.f32 %v5377_v42, %v5299_v17  ;;  %v5300_v24 = vpop.f32.mrf.mxu1 }
 0x565   : > { %v5301_v57 = vadd.f32 %v5300_v24, %v5221_v9  ;;  %v17620_v24 = vld [vmem:[%s18446_s28 + $0x84] sm:$0xf] }
 0x566   : > { %v5457_v56 = vadd.f32 %v5456_v16, %v5378_v0  ;;  %v14368_v16 = vld [vmem:[%s18446_s28 + $0x80] sm:$0xf]  ;;  %v17622_v0 = vld [vmem:[%s18446_s28 + $0x8c] sm:$0xf0] }
 0x567   : > { %v14369_v7 = vor.u32 %v17622_v0, %v14368_v16  ;;  %v14394_v16 = vld [vmem:[%s18446_s28 + $0xb8] sm:$0xf0] }
 0x568   : > { %v20639_v53 = vadd.f32 %v5457_v56, %v20347_v23  ;;  %v14376_v56 = vld [vmem:[%s18446_s28 + $0x88] sm:$0xf] }
 0x56b   : > { %v5379_v11 = vpop.f32.mrf.mxu2  ;;  %v5224_v30 = vpop.f32.mrf.mxu0 }
 0x56c   : > { %v5458_v13 = vpop.f32.mrf.mxu3  ;;  %v5380_v63 = vadd.f32 %v5379_v11, %v5301_v57  ;;  %v5303_v47 = vpop.f32.mrf.mxu1  ;;  %v14370_v57 = vld [vmem:[%s18446_s28 + $0x90] sm:$0xf0] }
 0x56d   : > { %v5304_v44 = vadd.f32 %v5303_v47, %v5224_v30  ;;  %v14373_v22 = vor.u32 %v17620_v24, %v14370_v57 }
 0x56e   : > { %v5459_v32 = vadd.f32 %v5458_v13, %v5380_v63  ;;  %6130 = vmatmul.bf16.vlgmr.msra.gmra.mxu0 %v14353_v26  ;;  %v14377_v26 = vor.u32 %v17623_v29, %v14376_v56 }
 0x56f   : > { %6209 = vmatmul.bf16.vlgmr.msra.gmra.mxu1 %v14357_v38  ;;  %v14381_v38 = vor.u32 %v17621_v36, %v14378_v3 }
 0x570   : > { %v20648_v23 = vadd.f32 %v5459_v32, %v20356_v60  ;;  %6288 = vmatmul.bf16.vlgmr.msra.gmra.mxu2 %v14361_v49  ;;  %v17774_v60 = vld [vmem:[%s22621_s1 + $0x770] sm:$0xff] }
 0x571   : > { %6367 = vmatmul.bf16.vlgmr.msra.gmra.mxu3 %v14365_v6  ;;  %7139 = vmatpush.bf16.msrb.mxu1 %v17774_v60  ;;  %v17626_v60 = vld [vmem:[%s18446_s28 + $0xac] sm:$0xf0] }
 0x572   : > { %v14385_v57 = vor.u32 %v17626_v60, %v14384_v15  ;;  %v17631_v15 = vld [vmem:[%s18446_s28 + $0xd4] sm:$0xf0]  ;;  %v17629_v60 = vld [vmem:[%s18446_s28 + $0xcc] sm:$0xf] }
 0x573   : > { %v5382_v48 = vpop.f32.mrf.mxu2  ;;  %v5226_v19 = vpop.f32.mrf.mxu0 }
 0x574   : > { %v5461_v59 = vpop.f32.mrf.mxu3  ;;  %v5383_v46 = vadd.f32 %v5382_v48, %v5304_v44  ;;  %v5305_v17 = vpop.f32.mrf.mxu1  ;;  %v17624_v48 = vld [vmem:[%s18446_s28 + $0xa4] sm:$0xf] }
 0x575   : > { %v5306_v41 = vadd.f32 %v5305_v17, %v5226_v19  ;;  %v17781_v19 = vld [vmem:[%s22621_s1 + $0x7a8] sm:$0xff] }
 0x576   : > { %v5462_v42 = vadd.f32 %v5461_v59, %v5383_v46  ;;  %v14386_v59 = vld [vmem:[%s18446_s28 + $0xb0] sm:$0xf0]  ;;  %v17789_v17 = vld [vmem:[%s22621_s1 + $0x7e8] sm:$0xff]  ;;  %7219 = vmatpush.bf16.msrb.mxu2 %v17781_v19 }
 0x577   : > { %7298 = vmatpush.bf16.msrb.mxu3 %v17789_v17  ;;  %v14389_v56 = vor.u32 %v17624_v48, %v14386_v59  ;;  %v14410_v48 = vld [vmem:[%s18446_s28 + $0xd8] sm:$0xf0] }
 0x578   : > { %v20665_v9 = vadd.f32 %v5462_v42, %v20373_v35  ;;  %v17625_v42 = vld [vmem:[%s18446_s28 + $0xac] sm:$0xf] }
 0x57b   : > { %v5384_v2 = vpop.f32.mrf.mxu2  ;;  %v5229_v11 = vpop.f32.mrf.mxu0 }
 0x57c   : > { %v5463_v39 = vpop.f32.mrf.mxu3  ;;  %v5385_v51 = vadd.f32 %v5384_v2, %v5306_v41  ;;  %v5308_v13 = vpop.f32.mrf.mxu1  ;;  %v17627_v41 = vld [vmem:[%s18446_s28 + $0xb4] sm:$0xf0]  ;;  %v14397_v2 = vor.u32 %v17625_v42, %v14394_v16 }
 0x57d   : > { %v5309_v63 = vadd.f32 %v5308_v13, %v5229_v11  ;;  %v17773_v11 = vld [vmem:[%s22621_s1 + $0x768] sm:$0xff] }
 0x57e   : > { %v5464_v35 = vadd.f32 %v5463_v39, %v5385_v51  ;;  %6135 = vmatmul.bf16.gmra.mxu0 %v14369_v7  ;;  %v17765_v51 = vld [vmem:[%s22621_s1 + $0x728] sm:$0xff]  ;;  %7140 = vmatpush.bf16.msrb.mxu1 %v17773_v11  ;;  %v17634_v11 = vld [vmem:[%s18446_s28 + $0xec] sm:$0xf0] }
 0x57f   : > { %6214 = vmatmul.bf16.gmra.mxu1 %v14373_v22  ;;  %7061 = vmatpush.bf16.msrb.mxu0 %v17765_v51  ;;  %v14416_v51 = vld [vmem:[%s18446_s28 + $0xe0] sm:$0xf] }
 0x580   : > { %v20674_v30 = vadd.f32 %v5464_v35, %v20382_v40  ;;  %6293 = vmatmul.bf16.gmra.mxu2 %v14377_v26  ;;  %v14392_v40 = vld [vmem:[%s18446_s28 + $0xa8] sm:$0xf] }
 0x581   : > { %6372 = vmatmul.bf16.gmra.mxu3 %v14381_v38  ;;  %v14393_v3 = vor.u32 %v17627_v41, %v14392_v40 }
 0x583   : > { %v5387_v47 = vpop.f32.mrf.mxu2  ;;  %v5231_v44 = vpop.f32.mrf.mxu0 }
 0x584   : > { %v5466_v49 = vpop.f32.mrf.mxu3  ;;  %v5388_v6 = vadd.f32 %v5387_v47, %v5309_v63  ;;  %v5310_v32 = vpop.f32.mrf.mxu1 }
 0x585   : > { %v5311_v45 = vadd.f32 %v5310_v32, %v5231_v44  ;;  %v17628_v32 = vld [vmem:[%s18446_s28 + $0xc4] sm:$0xf] }
 0x586   : > { %v5467_v54 = vadd.f32 %v5466_v49, %v5388_v6  ;;  %v14400_v49 = vld [vmem:[%s18446_s28 + $0xc0] sm:$0xf]  ;;  %v17630_v6 = vld [vmem:[%s18446_s28 + $0xcc] sm:$0xf0] }
 0x587   : > { %v14401_v19 = vor.u32 %v17630_v6, %v14400_v49  ;;  %v17633_v49 = vld [vmem:[%s18446_s28 + $0xec] sm:$0xf]  ;;  %v14426_v6 = vld [vmem:[%s18446_s28 + $0xf8] sm:$0xf0] }
 0x588   : > { %v20681_v46 = vadd.f32 %v5467_v54, %v20389_v20  ;;  %v14408_v54 = vld [vmem:[%s18446_s28 + $0xc8] sm:$0xf] }
 0x58b   : > { %v5389_v0 = vpop.f32.mrf.mxu2  ;;  %v5234_v29 = vpop.f32.mrf.mxu0 }
 0x58c   : > { %v5468_v24 = vpop.f32.mrf.mxu3  ;;  %v5390_v20 = vadd.f32 %v5389_v0, %v5311_v45  ;;  %v5313_v36 = vpop.f32.mrf.mxu1  ;;  %v14402_v45 = vld [vmem:[%s18446_s28 + $0xd0] sm:$0xf0]  ;;  %v14409_v0 = vor.u32 %v17631_v15, %v14408_v54  ;;  %v14417_v54 = vor.u32 %v17634_v11, %v14416_v51  ;;  %v17639_v51 = vld [vmem:[%s18446_s28 + $0x114] sm:$0xf0]  ;;  %v17637_v11 = vld [vmem:[%s18446_s28 + $0x10c] sm:$0xf] }
 0x58d   : > { %v5314_v39 = vadd.f32 %v5313_v36, %v5234_v29  ;;  %v14405_v17 = vor.u32 %v17628_v32, %v14402_v45  ;;  %v17772_v32 = vld [vmem:[%s22621_s1 + $0x760] sm:$0xff] }
 0x58e   : > { %v5469_v7 = vadd.f32 %v5468_v24, %v5390_v20  ;;  %6140 = vmatmul.bf16.gmra.mxu0 %v14385_v57  ;;  %v14413_v24 = vor.u32 %v17629_v60, %v14410_v48  ;;  %7141 = vmatpush.bf16.msrb.mxu1 %v17772_v32 }
 0x58f   : > { %6219 = vmatmul.bf16.gmra.mxu1 %v14389_v56 }
 0x590   : > { %v20694_v22 = vadd.f32 %v5469_v7, %v20402_v52  ;;  %6298 = vmatmul.bf16.gmra.mxu2 %v14393_v3 }
 0x591   : > { %6377 = vmatmul.bf16.gmra.mxu3 %v14397_v2 }
 0x593   : > { %v5392_v52 = vpop.f32.mrf.mxu2  ;;  %v5236_v38 = vpop.f32.mrf.mxu0 }
 0x594   : > { %v5471_v13 = vpop.f32.mrf.mxu3  ;;  %v5393_v26 = vadd.f32 %v5392_v52, %v5314_v39  ;;  %v5315_v63 = vpop.f32.mrf.mxu1  ;;  %v17632_v52 = vld [vmem:[%s18446_s28 + $0xe4] sm:$0xf] }
 0x595   : > { %v5316_v35 = vadd.f32 %v5315_v63, %v5236_v38  ;;  %v17635_v38 = vld [vmem:[%s18446_s28 + $0xf4] sm:$0xf0]  ;;  %v17780_v63 = vld [vmem:[%s22621_s1 + $0x7a0] sm:$0xff] }
 0x596   : > { %v5472_v47 = vadd.f32 %v5471_v13, %v5393_v26  ;;  %v14418_v13 = vld [vmem:[%s18446_s28 + $0xf0] sm:$0xf0]  ;;  %v14424_v26 = vld [vmem:[%s18446_s28 + $0xe8] sm:$0xf]  ;;  %7220 = vmatpush.bf16.msrb.mxu2 %v17780_v63 }
 0x597   : > { %v14421_v15 = vor.u32 %v17632_v52, %v14418_v13  ;;  %v14442_v52 = vld [vmem:[%s18446_s28 + $0x118] sm:$0xf0] }
 0x598   : > { %v20705_v44 = vadd.f32 %v5472_v47, %v20413_v33  ;;  %v17764_v47 = vld [vmem:[%s22621_s1 + $0x720] sm:$0xff]  ;;  %v14445_v32 = vor.u32 %v17637_v11, %v14442_v52 }
 0x599   : > { %7062 = vmatpush.bf16.msrb.mxu0 %v17764_v47 }
 0x59b   : > { %v5394_v59 = vpop.f32.mrf.mxu2  ;;  %v5239_v42 = vpop.f32.mrf.mxu0 }
 0x59c   : > { %v5473_v40 = vpop.f32.mrf.mxu3  ;;  %v5395_v41 = vadd.f32 %v5394_v59, %v5316_v35  ;;  %v5318_v16 = vpop.f32.mrf.mxu1  ;;  %v17788_v35 = vld [vmem:[%s22621_s1 + $0x7e0] sm:$0xff] }
 0x59d   : > { %v5319_v57 = vadd.f32 %v5318_v16, %v5239_v42  ;;  %7299 = vmatpush.bf16.msrb.mxu3 %v17788_v35 }
 0x59e   : > { %v5474_v33 = vadd.f32 %v5473_v40, %v5395_v41  ;;  %6145 = vmatmul.bf16.gmra.mxu0 %v14401_v19  ;;  %v14425_v40 = vor.u32 %v17635_v38, %v14424_v26  ;;  %v14429_v19 = vor.u32 %v17633_v49, %v14426_v6 }
 0x59f   : > { %6224 = vmatmul.bf16.gmra.mxu1 %v14405_v17 }
 0x5a0   : > { %v20714_v56 = vadd.f32 %v5474_v33, %v20422_v21  ;;  %6303 = vmatmul.bf16.gmra.mxu2 %v14409_v0 }
 0x5a1   : > { %6382 = vmatmul.bf16.gmra.mxu3 %v14413_v24 }
 0x5a3   : > { %v5397_v20 = vpop.f32.mrf.mxu2  ;;  %v5241_v3 = vpop.f32.mrf.mxu0 }
 0x5a4   : > { %v5476_v29 = vpop.f32.mrf.mxu3  ;;  %v5398_v36 = vadd.f32 %v5397_v20, %v5319_v57  ;;  %v5320_v2 = vpop.f32.mrf.mxu1 }
 0x5a5   : > { %v5321_v39 = vadd.f32 %v5320_v2, %v5241_v3  ;;  %v17638_v3 = vld [vmem:[%s18446_s28 + $0x10c] sm:$0xf0] }
 0x5a6   : > { %v5477_v7 = vadd.f32 %v5476_v29, %v5398_v36  ;;  %v14432_v36 = vld [vmem:[%s18446_s28 + $0x100] sm:$0xf] }
 0x5a7   : > { %v14433_v38 = vor.u32 %v17638_v3, %v14432_v36  ;;  %v17643_v36 = vld [vmem:[%s18446_s28 + $0x134] sm:$0xf0]  ;;  %v17641_v3 = vld [vmem:[%s18446_s28 + $0x12c] sm:$0xf] }
 0x5a8   : > { %v20723_v21 = vadd.f32 %v5477_v7, %v20431_v58  ;;  %v14440_v7 = vld [vmem:[%s18446_s28 + $0x108] sm:$0xf] }
 0x5a9   : > { %v14441_v6 = vor.u32 %v17639_v51, %v14440_v7 }
 0x5ab   : > { %v5399_v58 = vpop.f32.mrf.mxu2  ;;  %v5244_v48 = vpop.f32.mrf.mxu0 }
 0x5ac   : > { %v5478_v45 = vpop.f32.mrf.mxu3  ;;  %v5400_v60 = vadd.f32 %v5399_v58, %v5321_v39  ;;  %v5323_v59 = vpop.f32.mrf.mxu1  ;;  %v17636_v39 = vld [vmem:[%s18446_s28 + $0x104] sm:$0xf] }
 0x5ad   : > { %v5324_v17 = vadd.f32 %v5323_v59, %v5244_v48 }
 0x5ae   : > { %v5479_v41 = vadd.f32 %v5478_v45, %v5400_v60  ;;  %6150 = vmatmul.bf16.gmra.mxu0 %v14417_v54  ;;  %v17779_v54 = vld [vmem:[%s22621_s1 + $0x798] sm:$0xff] }
 0x5af   : > { %6229 = vmatmul.bf16.gmra.mxu1 %v14421_v15  ;;  %v17787_v15 = vld [vmem:[%s22621_s1 + $0x7d8] sm:$0xff]  ;;  %7221 = vmatpush.bf16.msrb.mxu2 %v17779_v54 }
 0x5b0   : > { %v20740_v42 = vadd.f32 %v5479_v41, %v20448_v34  ;;  %6308 = vmatmul.bf16.gmra.mxu2 %v14425_v40  ;;  %v14434_v34 = vld [vmem:[%s18446_s28 + $0x110] sm:$0xf0]  ;;  %7300 = vmatpush.bf16.msrb.mxu3 %v17787_v15  ;;  %v14448_v41 = vld [vmem:[%s18446_s28 + $0x120] sm:$0xf] }
 0x5b1   : > { %6387 = vmatmul.bf16.gmra.mxu3 %v14429_v19  ;;  %v14437_v63 = vor.u32 %v17636_v39, %v14434_v34  ;;  %v14458_v39 = vld [vmem:[%s18446_s28 + $0x138] sm:$0xf0] }
 0x5b3   : > { %v5402_v16 = vpop.f32.mrf.mxu2  ;;  %v5246_v57 = vpop.f32.mrf.mxu0 }
 0x5b4   : > { %v5481_v0 = vpop.f32.mrf.mxu3  ;;  %v5403_v24 = vadd.f32 %v5402_v16, %v5324_v17  ;;  %v5325_v33 = vpop.f32.mrf.mxu1  ;;  %v17642_v16 = vld [vmem:[%s18446_s28 + $0x12c] sm:$0xf0] }
 0x5b5   : > { %v5326_v20 = vadd.f32 %v5325_v33, %v5246_v57  ;;  %v14456_v33 = vld [vmem:[%s18446_s28 + $0x128] sm:$0xf]  ;;  %v14449_v51 = vor.u32 %v17642_v16, %v14448_v41  ;;  %v14474_v41 = vld [vmem:[%s18446_s28 + $0x158] sm:$0xf0] }
 0x5b6   : > { %v5482_v29 = vadd.f32 %v5481_v0, %v5403_v24  ;;  %v17640_v0 = vld [vmem:[%s18446_s28 + $0x124] sm:$0xf]  ;;  %v14450_v24 = vld [vmem:[%s18446_s28 + $0x130] sm:$0xf0] }
 0x5b7   : > { %v14453_v11 = vor.u32 %v17640_v0, %v14450_v24 }
 0x5b8   : > { %v20745_v2 = vadd.f32 %v5482_v29, %v20453_v18  ;;  %v17771_v29 = vld [vmem:[%s22621_s1 + $0x758] sm:$0xff] }
 0x5b9   : > { %7142 = vmatpush.bf16.msrb.mxu1 %v17771_v29 }
 0x5bb   : > { %v5404_v13 = vpop.f32.mrf.mxu2  ;;  %v5249_v47 = vpop.f32.mrf.mxu0 }
 0x5bc   : > { %v5483_v26 = vpop.f32.mrf.mxu3  ;;  %v5405_v35 = vadd.f32 %v5404_v13, %v5326_v20  ;;  %v5328_v49 = vpop.f32.mrf.mxu1  ;;  %v17763_v20 = vld [vmem:[%s22621_s1 + $0x718] sm:$0xff] }
 0x5bd   : > { %v5329_v58 = vadd.f32 %v5328_v49, %v5249_v47  ;;  %7063 = vmatpush.bf16.msrb.mxu0 %v17763_v20 }
 0x5be   : > { %v5484_v45 = vadd.f32 %v5483_v26, %v5405_v35  ;;  %6155 = vmatmul.bf16.gmra.mxu0 %v14433_v38  ;;  %v14457_v26 = vor.u32 %v17643_v36, %v14456_v33  ;;  %v14461_v38 = vor.u32 %v17641_v3, %v14458_v39 }
 0x5bf   : > { %6234 = vmatmul.bf16.gmra.mxu1 %v14437_v63 }
 0x5c0   : > { %v20754_v18 = vadd.f32 %v5484_v45, %v20462_v12  ;;  %6313 = vmatmul.bf16.gmra.mxu2 %v14441_v6 }
 0x5c1   : > { %6392 = vmatmul.bf16.gmra.mxu3 %v14445_v32 }
 0x5c3   : > { %v5407_v60 = vpop.f32.mrf.mxu2  ;;  %v5251_v59 = vpop.f32.mrf.mxu0 }
 0x5c4   : > { %v5486_v12 = vpop.f32.mrf.mxu3  ;;  %v5408_v48 = vadd.f32 %v5407_v60, %v5329_v58  ;;  %v5330_v40 = vpop.f32.mrf.mxu1  ;;  %v14464_v60 = vld [vmem:[%s18446_s28 + $0x140] sm:$0xf] }
 0x5c5   : > { %v5331_v19 = vadd.f32 %v5330_v40, %v5251_v59  ;;  %v17644_v59 = vld [vmem:[%s18446_s28 + $0x144] sm:$0xf]  ;;  %v14472_v40 = vld [vmem:[%s18446_s28 + $0x148] sm:$0xf] }
 0x5c6   : > { %v5487_v17 = vadd.f32 %v5486_v12, %v5408_v48  ;;  %v17646_v12 = vld [vmem:[%s18446_s28 + $0x14c] sm:$0xf0] }
 0x5c7   : > { %v14465_v24 = vor.u32 %v17646_v12, %v14464_v60  ;;  %v17651_v60 = vld [vmem:[%s18446_s28 + $0x174] sm:$0xf0]  ;;  %v17649_v12 = vld [vmem:[%s18446_s28 + $0x16c] sm:$0xf] }
 0x5c8   : > { %v20767_v57 = vadd.f32 %v5487_v17, %v20475_v61  ;;  %v17645_v17 = vld [vmem:[%s18446_s28 + $0x14c] sm:$0xf] }
 0x5c9   : > { %v14477_v39 = vor.u32 %v17645_v17, %v14474_v41 }
 0x5cb   : > { %v5409_v34 = vpop.f32.mrf.mxu2  ;;  %v5254_v52 = vpop.f32.mrf.mxu0 }
 0x5cc   : > { %v5488_v7 = vpop.f32.mrf.mxu3  ;;  %v5410_v61 = vadd.f32 %v5409_v34, %v5331_v19  ;;  %v5333_v13 = vpop.f32.mrf.mxu1  ;;  %v17647_v19 = vld [vmem:[%s18446_s28 + $0x154] sm:$0xf0] }
 0x5cd   : > { %v5334_v63 = vadd.f32 %v5333_v13, %v5254_v52  ;;  %v14473_v3 = vor.u32 %v17647_v19, %v14472_v40 }
 0x5ce   : > { %v5489_v35 = vadd.f32 %v5488_v7, %v5410_v61  ;;  %6160 = vmatmul.bf16.gmra.mxu0 %v14449_v51  ;;  %v17778_v51 = vld [vmem:[%s22621_s1 + $0x790] sm:$0xff] }
 0x5cf   : > { %6239 = vmatmul.bf16.gmra.mxu1 %v14453_v11  ;;  %v17786_v11 = vld [vmem:[%s22621_s1 + $0x7d0] sm:$0xff]  ;;  %7222 = vmatpush.bf16.msrb.mxu2 %v17778_v51 }
 0x5d0   : > { %v20780_v47 = vadd.f32 %v5489_v35, %v20488_v1  ;;  %6318 = vmatmul.bf16.gmra.mxu2 %v14457_v26  ;;  %v14466_v1 = vld [vmem:[%s18446_s28 + $0x150] sm:$0xf0]  ;;  %7301 = vmatpush.bf16.msrb.mxu3 %v17786_v11 }
 0x5d1   : > { %6397 = vmatmul.bf16.gmra.mxu3 %v14461_v38  ;;  %v14469_v33 = vor.u32 %v17644_v59, %v14466_v1  ;;  %v17762_v61 = vld [vmem:[%s22621_s1 + $0x710] sm:$0xff]  ;;  %v14490_v59 = vld [vmem:[%s18446_s28 + $0x178] sm:$0xf0] }
 0x5d2   : > { %7064 = vmatpush.bf16.msrb.mxu0 %v17762_v61  ;;  %v14496_v61 = vld [vmem:[%s18446_s28 + $0x180] sm:$0xf] }
 0x5d3   : > { %v5412_v49 = vpop.f32.mrf.mxu2  ;;  %v5256_v58 = vpop.f32.mrf.mxu0 }
 0x5d4   : > { %v5491_v6 = vpop.f32.mrf.mxu3  ;;  %v5413_v32 = vadd.f32 %v5412_v49, %v5334_v63  ;;  %v5335_v45 = vpop.f32.mrf.mxu1 }
 0x5d5   : > { %v5336_v54 = vadd.f32 %v5335_v45, %v5256_v58  ;;  %v17648_v45 = vld [vmem:[%s18446_s28 + $0x164] sm:$0xf] }
 0x5d6   : > { %v5492_v15 = vadd.f32 %v5491_v6, %v5413_v32  ;;  %v14480_v6 = vld [vmem:[%s18446_s28 + $0x160] sm:$0xf]  ;;  %v17650_v32 = vld [vmem:[%s18446_s28 + $0x16c] sm:$0xf0] }
 0x5d7   : > { %v14481_v19 = vor.u32 %v17650_v32, %v14480_v6  ;;  %v14506_v6 = vld [vmem:[%s18446_s28 + $0x198] sm:$0xf0] }
 0x5d8   : > { %v20785_v48 = vadd.f32 %v5492_v15, %v20493_v62  ;;  %v14488_v15 = vld [vmem:[%s18446_s28 + $0x168] sm:$0xf] }
 0x5db   : > { %v5414_v16 = vpop.f32.mrf.mxu2  ;;  %v5259_v29 = vpop.f32.mrf.mxu0 }
 0x5dc   : > { %v5493_v0 = vpop.f32.mrf.mxu3  ;;  %v5415_v20 = vadd.f32 %v5414_v16, %v5336_v54  ;;  %v5338_v36 = vpop.f32.mrf.mxu1  ;;  %v14482_v54 = vld [vmem:[%s18446_s28 + $0x170] sm:$0xf0] }
 0x5dd   : > { %v5339_v34 = vadd.f32 %v5338_v36, %v5259_v29  ;;  %v14485_v17 = vor.u32 %v17648_v45, %v14482_v54 }
 0x5de   : > { %v5494_v7 = vadd.f32 %v5493_v0, %v5415_v20  ;;  %6165 = vmatmul.bf16.gmra.mxu0 %v14465_v24  ;;  %v14489_v24 = vor.u32 %v17651_v60, %v14488_v15 }
 0x5df   : > { %6244 = vmatmul.bf16.gmra.mxu1 %v14469_v33  ;;  %v14493_v33 = vor.u32 %v17649_v12, %v14490_v59 }
 0x5e0   : > { %v20794_v62 = vadd.f32 %v5494_v7, %v20502_v43  ;;  %6323 = vmatmul.bf16.gmra.mxu2 %v14473_v3  ;;  %v17770_v43 = vld [vmem:[%s22621_s1 + $0x750] sm:$0xff] }
 0x5e1   : > { %6402 = vmatmul.bf16.gmra.mxu3 %v14477_v39  ;;  %7143 = vmatpush.bf16.msrb.mxu1 %v17770_v43  ;;  %v17654_v43 = vld [vmem:[%s18446_s28 + $0x18c] sm:$0xf0] }
 0x5e2   : > { %v14497_v54 = vor.u32 %v17654_v43, %v14496_v61  ;;  %v17659_v61 = vld [vmem:[%s18446_s28 + $0x1b4] sm:$0xf0]  ;;  %v17657_v43 = vld [vmem:[%s18446_s28 + $0x1ac] sm:$0xf] }
 0x5e3   : > { %v5417_v52 = vpop.f32.mrf.mxu2  ;;  %v5261_v38 = vpop.f32.mrf.mxu0 }
 0x5e4   : > { %v5496_v13 = vpop.f32.mrf.mxu3  ;;  %v5418_v26 = vadd.f32 %v5417_v52, %v5339_v34  ;;  %v5340_v63 = vpop.f32.mrf.mxu1  ;;  %v17652_v52 = vld [vmem:[%s18446_s28 + $0x184] sm:$0xf] }
 0x5e5   : > { %v5341_v35 = vadd.f32 %v5340_v63, %v5261_v38  ;;  %v17777_v38 = vld [vmem:[%s22621_s1 + $0x788] sm:$0xff] }
 0x5e6   : > { %v5497_v49 = vadd.f32 %v5496_v13, %v5418_v26  ;;  %v14498_v13 = vld [vmem:[%s18446_s28 + $0x190] sm:$0xf0]  ;;  %v17785_v63 = vld [vmem:[%s22621_s1 + $0x7c8] sm:$0xff]  ;;  %7223 = vmatpush.bf16.msrb.mxu2 %v17777_v38 }
 0x5e7   : > { %7302 = vmatpush.bf16.msrb.mxu3 %v17785_v63  ;;  %v14501_v15 = vor.u32 %v17652_v52, %v14498_v13  ;;  %v14522_v52 = vld [vmem:[%s18446_s28 + $0x1b8] sm:$0xf0] }
 0x5e8   : > { %v20811_v58 = vadd.f32 %v5497_v49, %v20519_v27  ;;  %v17653_v49 = vld [vmem:[%s18446_s28 + $0x18c] sm:$0xf] }
 0x5eb   : > { %v5419_v1 = vpop.f32.mrf.mxu2  ;;  %v6131_v16 = vpop.f32.mrf.mxu0 }
 0x5ec   : > { %v5498_v40 = vpop.f32.mrf.mxu3  ;;  %v5420_v41 = vadd.f32 %v5419_v1, %v5341_v35  ;;  %v6210_v0 = vpop.f32.mrf.mxu1  ;;  %v17655_v35 = vld [vmem:[%s18446_s28 + $0x194] sm:$0xf0]  ;;  %v14509_v1 = vor.u32 %v17653_v49, %v14506_v6 }
 0x5ed   : > { %v6211_v20 = vadd.f32 %v6210_v0, %v6131_v16  ;;  %v17769_v16 = vld [vmem:[%s22621_s1 + $0x748] sm:$0xff] }
 0x5ee   : > { %v5499_v27 = vadd.f32 %v5498_v40, %v5420_v41  ;;  %6170 = vmatmul.bf16.gmra.mxu0 %v14481_v19  ;;  %v17761_v41 = vld [vmem:[%s22621_s1 + $0x708] sm:$0xff]  ;;  %7144 = vmatpush.bf16.msrb.mxu1 %v17769_v16  ;;  %v17662_v16 = vld [vmem:[%s18446_s28 + $0x1cc] sm:$0xf0] }
 0x5ef   : > { %6249 = vmatmul.bf16.gmra.mxu1 %v14485_v17  ;;  %7065 = vmatpush.bf16.msrb.mxu0 %v17761_v41  ;;  %v14528_v41 = vld [vmem:[%s18446_s28 + $0x1c0] sm:$0xf] }
 0x5f0   : > { %v20820_v29 = vadd.f32 %v5499_v27, %v20528_v14  ;;  %6328 = vmatmul.bf16.gmra.mxu2 %v14489_v24  ;;  %v14504_v14 = vld [vmem:[%s18446_s28 + $0x188] sm:$0xf] }
 0x5f1   : > { %6407 = vmatmul.bf16.gmra.mxu3 %v14493_v33  ;;  %v14505_v59 = vor.u32 %v17655_v35, %v14504_v14 }
 0x5f3   : > { %v6289_v36 = vpop.f32.mrf.mxu2  ;;  %v6133_v34 = vpop.f32.mrf.mxu0 }
 0x5f4   : > { %v6368_v3 = vpop.f32.mrf.mxu3  ;;  %v6290_v39 = vadd.f32 %v6289_v36, %v6211_v20  ;;  %v6212_v7 = vpop.f32.mrf.mxu1 }
 0x5f5   : > { %v6213_v51 = vadd.f32 %v6212_v7, %v6133_v34  ;;  %v17656_v7 = vld [vmem:[%s18446_s28 + $0x1a4] sm:$0xf] }
 0x5f6   : > { %v6369_v11 = vadd.f32 %v6368_v3, %v6290_v39  ;;  %v14512_v3 = vld [vmem:[%s18446_s28 + $0x1a0] sm:$0xf]  ;;  %v17658_v39 = vld [vmem:[%s18446_s28 + $0x1ac] sm:$0xf0] }
 0x5f7   : > { %v14513_v38 = vor.u32 %v17658_v39, %v14512_v3  ;;  %v17661_v3 = vld [vmem:[%s18446_s28 + $0x1cc] sm:$0xf]  ;;  %v14538_v39 = vld [vmem:[%s18446_s28 + $0x1d8] sm:$0xf0] }
 0x5f8   : > { %v20827_v26 = vadd.f32 %v6369_v11, %v20535_v4  ;;  %v14520_v11 = vld [vmem:[%s18446_s28 + $0x1a8] sm:$0xf] }
 0x5fb   : > { %v6291_v32 = vpop.f32.mrf.mxu2  ;;  %v6136_v60 = vpop.f32.mrf.mxu0 }
 0x5fc   : > { %v6370_v45 = vpop.f32.mrf.mxu3  ;;  %v6292_v4 = vadd.f32 %v6291_v32, %v6213_v51  ;;  %v6215_v12 = vpop.f32.mrf.mxu1  ;;  %v14514_v51 = vld [vmem:[%s18446_s28 + $0x1b0] sm:$0xf0]  ;;  %v14521_v32 = vor.u32 %v17659_v61, %v14520_v11  ;;  %v14529_v11 = vor.u32 %v17662_v16, %v14528_v41  ;;  %v17667_v41 = vld [vmem:[%s18446_s28 + $0x1f4] sm:$0xf0]  ;;  %v17665_v16 = vld [vmem:[%s18446_s28 + $0x1ec] sm:$0xf] }
 0x5fd   : > { %v6216_v40 = vadd.f32 %v6215_v12, %v6136_v60  ;;  %v14517_v63 = vor.u32 %v17656_v7, %v14514_v51  ;;  %v17768_v7 = vld [vmem:[%s22621_s1 + $0x740] sm:$0xff] }
 0x5fe   : > { %v6371_v19 = vadd.f32 %v6370_v45, %v6292_v4  ;;  %6175 = vmatmul.bf16.gmra.mxu0 %v14497_v54  ;;  %v14525_v45 = vor.u32 %v17657_v43, %v14522_v52  ;;  %7145 = vmatpush.bf16.msrb.mxu1 %v17768_v7 }
 0x5ff   : > { %6254 = vmatmul.bf16.gmra.mxu1 %v14501_v15 }
 0x600   : > { %v20840_v17 = vadd.f32 %v6371_v19, %v20548_v50  ;;  %6333 = vmatmul.bf16.gmra.mxu2 %v14505_v59 }
 0x601   : > { %6412 = vmatmul.bf16.gmra.mxu3 %v14509_v1 }
 0x603   : > { %v6294_v50 = vpop.f32.mrf.mxu2  ;;  %v6138_v33 = vpop.f32.mrf.mxu0 }
 0x604   : > { %v6373_v0 = vpop.f32.mrf.mxu3  ;;  %v6295_v24 = vadd.f32 %v6294_v50, %v6216_v40  ;;  %v6217_v20 = vpop.f32.mrf.mxu1  ;;  %v17660_v50 = vld [vmem:[%s18446_s28 + $0x1c4] sm:$0xf] }
 0x605   : > { %v6218_v27 = vadd.f32 %v6217_v20, %v6138_v33  ;;  %v17663_v33 = vld [vmem:[%s18446_s28 + $0x1d4] sm:$0xf0]  ;;  %v17776_v20 = vld [vmem:[%s22621_s1 + $0x780] sm:$0xff] }
 0x606   : > { %v6374_v36 = vadd.f32 %v6373_v0, %v6295_v24  ;;  %v14530_v0 = vld [vmem:[%s18446_s28 + $0x1d0] sm:$0xf0]  ;;  %v14536_v24 = vld [vmem:[%s18446_s28 + $0x1c8] sm:$0xf]  ;;  %7224 = vmatpush.bf16.msrb.mxu2 %v17776_v20 }
 0x607   : > { %v14533_v61 = vor.u32 %v17660_v50, %v14530_v0  ;;  %v14554_v50 = vld [vmem:[%s18446_s28 + $0x1f8] sm:$0xf0] }
 0x608   : > { %v20851_v34 = vadd.f32 %v6374_v36, %v20559_v31  ;;  %v17760_v36 = vld [vmem:[%s22621_s1 + $0x700] sm:$0xff]  ;;  %v14557_v7 = vor.u32 %v17665_v16, %v14554_v50 }
 0x609   : > { %7066 = vmatpush.bf16.msrb.mxu0 %v17760_v36 }
 0x60b   : > { %v6296_v13 = vpop.f32.mrf.mxu2  ;;  %v6141_v49 = vpop.f32.mrf.mxu0 }
 0x60c   : > { %v6375_v14 = vpop.f32.mrf.mxu3  ;;  %v6297_v35 = vadd.f32 %v6296_v13, %v6218_v27  ;;  %v6220_v6 = vpop.f32.mrf.mxu1  ;;  %v17784_v27 = vld [vmem:[%s22621_s1 + $0x7c0] sm:$0xff] }
 0x60d   : > { %v6221_v54 = vadd.f32 %v6220_v6, %v6141_v49  ;;  %7303 = vmatpush.bf16.msrb.mxu3 %v17784_v27 }
 0x60e   : > { %v6376_v31 = vadd.f32 %v6375_v14, %v6297_v35  ;;  %6180 = vmatmul.bf16.gmra.mxu0 %v14513_v38  ;;  %v14537_v14 = vor.u32 %v17663_v33, %v14536_v24  ;;  %v14541_v38 = vor.u32 %v17661_v3, %v14538_v39 }
 0x60f   : > { %6259 = vmatmul.bf16.gmra.mxu1 %v14517_v63 }
 0x610   : > { %v20860_v15 = vadd.f32 %v6376_v31, %v20568_v10  ;;  %6338 = vmatmul.bf16.gmra.mxu2 %v14521_v32 }
 0x611   : > { %6417 = vmatmul.bf16.gmra.mxu3 %v14525_v45 }
 0x613   : > { %v6299_v4 = vpop.f32.mrf.mxu2  ;;  %v6143_v59 = vpop.f32.mrf.mxu0 }
 0x614   : > { %v6378_v60 = vpop.f32.mrf.mxu3  ;;  %v6300_v12 = vadd.f32 %v6299_v4, %v6221_v54  ;;  %v6222_v1 = vpop.f32.mrf.mxu1 }
 0x615   : > { %v6223_v40 = vadd.f32 %v6222_v1, %v6143_v59  ;;  %v17666_v59 = vld [vmem:[%s18446_s28 + $0x1ec] sm:$0xf0] }
 0x616   : > { %v6379_v19 = vadd.f32 %v6378_v60, %v6300_v12  ;;  %v14544_v12 = vld [vmem:[%s18446_s28 + $0x1e0] sm:$0xf] }
 0x617   : > { %v14545_v33 = vor.u32 %v17666_v59, %v14544_v12  ;;  %v17671_v12 = vld [vmem:[%s18446_s28 + $0x214] sm:$0xf0]  ;;  %v17669_v59 = vld [vmem:[%s18446_s28 + $0x20c] sm:$0xf] }
 0x618   : > { %v20869_v10 = vadd.f32 %v6379_v19, %v20577_v28  ;;  %v14552_v19 = vld [vmem:[%s18446_s28 + $0x1e8] sm:$0xf] }
 0x619   : > { %v14553_v39 = vor.u32 %v17667_v41, %v14552_v19 }
 0x61b   : > { %v6301_v28 = vpop.f32.mrf.mxu2  ;;  %v6146_v52 = vpop.f32.mrf.mxu0 }
 0x61c   : > { %v6380_v51 = vpop.f32.mrf.mxu3  ;;  %v6302_v43 = vadd.f32 %v6301_v28, %v6223_v40  ;;  %v6225_v13 = vpop.f32.mrf.mxu1  ;;  %v17664_v40 = vld [vmem:[%s18446_s28 + $0x1e4] sm:$0xf] }
 0x61d   : > { %v6226_v63 = vadd.f32 %v6225_v13, %v6146_v52 }
 0x61e   : > { %v6381_v35 = vadd.f32 %v6380_v51, %v6302_v43  ;;  %6185 = vmatmul.bf16.gmra.mxu0 %v14529_v11  ;;  %v17871_v11 = vld [vmem:[%s22621_s1 + $0x8b8] sm:$0xff] }
 0x61f   : > { %6264 = vmatmul.bf16.gmra.mxu1 %v14533_v61  ;;  %v17879_v61 = vld [vmem:[%s22621_s1 + $0x8f8] sm:$0xff]  ;;  %8154 = vmatpush.bf16.msra.mxu2 %v17871_v11 }
 0x620   : > { %v20886_v49 = vadd.f32 %v6381_v35, %v20594_v5  ;;  %6343 = vmatmul.bf16.gmra.mxu2 %v14537_v14  ;;  %v14546_v5 = vld [vmem:[%s18446_s28 + $0x1f0] sm:$0xf0]  ;;  %8233 = vmatpush.bf16.msra.mxu3 %v17879_v61  ;;  %v14560_v35 = vld [vmem:[%s18446_s28 + $0x200] sm:$0xf] }
 0x621   : > { %6422 = vmatmul.bf16.gmra.mxu3 %v14541_v38  ;;  %v14549_v20 = vor.u32 %v17664_v40, %v14546_v5  ;;  %v14570_v40 = vld [vmem:[%s18446_s28 + $0x218] sm:$0xf0] }
 0x623   : > { %v6304_v6 = vpop.f32.mrf.mxu2  ;;  %v6148_v54 = vpop.f32.mrf.mxu0 }
 0x624   : > { %v6383_v32 = vpop.f32.mrf.mxu3  ;;  %v6305_v45 = vadd.f32 %v6304_v6, %v6226_v63  ;;  %v6227_v31 = vpop.f32.mrf.mxu1  ;;  %v17670_v6 = vld [vmem:[%s18446_s28 + $0x20c] sm:$0xf0] }
 0x625   : > { %v6228_v4 = vadd.f32 %v6227_v31, %v6148_v54  ;;  %v14568_v31 = vld [vmem:[%s18446_s28 + $0x208] sm:$0xf]  ;;  %v14561_v41 = vor.u32 %v17670_v6, %v14560_v35  ;;  %v14778_v35 = vld [vmem:[%s18446_s28 + $0x88] sm:$0xf0] }
 0x626   : > { %v6384_v60 = vadd.f32 %v6383_v32, %v6305_v45  ;;  %v17668_v32 = vld [vmem:[%s18446_s28 + $0x204] sm:$0xf]  ;;  %v14562_v45 = vld [vmem:[%s18446_s28 + $0x210] sm:$0xf0] }
 0x627   : > { %v14565_v16 = vor.u32 %v17668_v32, %v14562_v45 }
 0x628   : > { %v20891_v1 = vadd.f32 %v6384_v60, %v20599_v8  ;;  %v17863_v60 = vld [vmem:[%s22621_s1 + $0x878] sm:$0xff] }
 0x629   : > { %8075 = vmatpush.bf16.msra.mxu1 %v17863_v60 }
 0x62b   : > { %v6306_v0 = vpop.f32.mrf.mxu2  ;;  %v6151_v36 = vpop.f32.mrf.mxu0 }
 0x62c   : > { %v6385_v24 = vpop.f32.mrf.mxu3  ;;  %v6307_v27 = vadd.f32 %v6306_v0, %v6228_v4  ;;  %v6230_v3 = vpop.f32.mrf.mxu1  ;;  %v17855_v4 = vld [vmem:[%s22621_s1 + $0x838] sm:$0xff] }
 0x62d   : > { %v6231_v28 = vadd.f32 %v6230_v3, %v6151_v36  ;;  %7996 = vmatpush.bf16.msra.mxu0 %v17855_v4 }
 0x62e   : > { %v6386_v51 = vadd.f32 %v6385_v24, %v6307_v27  ;;  %6190 = vmatmul.bf16.gmra.mxu0 %v14545_v33  ;;  %v14569_v24 = vor.u32 %v17671_v12, %v14568_v31  ;;  %v14573_v33 = vor.u32 %v17669_v59, %v14570_v40 }
 0x62f   : > { %6269 = vmatmul.bf16.gmra.mxu1 %v14549_v20 }
 0x630   : > { %v20900_v8 = vadd.f32 %v6386_v51, %v20608_v55  ;;  %6348 = vmatmul.bf16.gmra.mxu2 %v14553_v39 }
 0x631   : > { %6427 = vmatmul.bf16.gmra.mxu3 %v14557_v7 }
 0x633   : > { %v6309_v43 = vpop.f32.mrf.mxu2  ;;  %v6153_v13 = vpop.f32.mrf.mxu0 }
 0x634   : > { %v6388_v55 = vpop.f32.mrf.mxu3  ;;  %v6310_v52 = vadd.f32 %v6309_v43, %v6231_v28  ;;  %v6232_v14 = vpop.f32.mrf.mxu1  ;;  %v14768_v43 = vld [vmem:[%s18446_s28 + $0x70] sm:$0xf] }
 0x635   : > { %v6233_v38 = vadd.f32 %v6232_v14, %v6153_v13  ;;  %v17704_v13 = vld [vmem:[%s18446_s28 + $0x74] sm:$0xf]  ;;  %v14776_v14 = vld [vmem:[%s18446_s28 + $0x78] sm:$0xf] }
 0x636   : > { %v6389_v63 = vadd.f32 %v6388_v55, %v6310_v52  ;;  %v17706_v55 = vld [vmem:[%s18446_s28 + $0x7c] sm:$0xf0] }
 0x637   : > { %v14769_v45 = vor.u32 %v17706_v55, %v14768_v43  ;;  %v17711_v43 = vld [vmem:[%s18446_s28 + $0xa4] sm:$0xf0]  ;;  %v17709_v55 = vld [vmem:[%s18446_s28 + $0x9c] sm:$0xf] }
 0x638   : > { %v20913_v54 = vadd.f32 %v6389_v63, %v20621_v25  ;;  %v17705_v63 = vld [vmem:[%s18446_s28 + $0x7c] sm:$0xf] }
 0x639   : > { %v14781_v40 = vor.u32 %v17705_v63, %v14778_v35 }
 0x63b   : > { %v6311_v5 = vpop.f32.mrf.mxu2  ;;  %v6156_v50 = vpop.f32.mrf.mxu0 }
 0x63c   : > { %v6390_v19 = vpop.f32.mrf.mxu3  ;;  %v6312_v25 = vadd.f32 %v6311_v5, %v6233_v38  ;;  %v6235_v0 = vpop.f32.mrf.mxu1  ;;  %v17707_v38 = vld [vmem:[%s18446_s28 + $0x84] sm:$0xf0] }
 0x63d   : > { %v6236_v20 = vadd.f32 %v6235_v0, %v6156_v50  ;;  %v14777_v59 = vor.u32 %v17707_v38, %v14776_v14 }
 0x63e   : > { %v6391_v27 = vadd.f32 %v6390_v19, %v6312_v25  ;;  %6195 = vmatmul.bf16.gmra.mxu0 %v14561_v41  ;;  %v17870_v41 = vld [vmem:[%s22621_s1 + $0x8b0] sm:$0xff] }
 0x63f   : > { %6274 = vmatmul.bf16.gmra.mxu1 %v14565_v16  ;;  %v17878_v16 = vld [vmem:[%s22621_s1 + $0x8f0] sm:$0xff]  ;;  %8155 = vmatpush.bf16.msra.mxu2 %v17870_v41 }
 0x640   : > { %v20926_v36 = vadd.f32 %v6391_v27, %v20634_v37  ;;  %6353 = vmatmul.bf16.gmra.mxu2 %v14569_v24  ;;  %v14770_v37 = vld [vmem:[%s18446_s28 + $0x80] sm:$0xf0]  ;;  %v17854_v25 = vld [vmem:[%s22621_s1 + $0x830] sm:$0xff]  ;;  %8234 = vmatpush.bf16.msra.mxu3 %v17878_v16 }
 0x641   : > { %6432 = vmatmul.bf16.gmra.mxu3 %v14573_v33  ;;  %v14773_v31 = vor.u32 %v17704_v13, %v14770_v37  ;;  %7997 = vmatpush.bf16.msra.mxu0 %v17854_v25  ;;  %v14794_v13 = vld [vmem:[%s18446_s28 + $0xa8] sm:$0xf0]  ;;  %v14800_v25 = vld [vmem:[%s18446_s28 + $0xb0] sm:$0xf] }
 0x643   : > { %v6314_v3 = vpop.f32.mrf.mxu2  ;;  %v6158_v28 = vpop.f32.mrf.mxu0 }
 0x644   : > { %v6393_v39 = vpop.f32.mrf.mxu3  ;;  %v6315_v7 = vadd.f32 %v6314_v3, %v6236_v20  ;;  %v6237_v51 = vpop.f32.mrf.mxu1 }
 0x645   : > { %v6238_v11 = vadd.f32 %v6237_v51, %v6158_v28  ;;  %v17708_v51 = vld [vmem:[%s18446_s28 + $0x94] sm:$0xf] }
 0x646   : > { %v6394_v61 = vadd.f32 %v6393_v39, %v6315_v7  ;;  %v14784_v39 = vld [vmem:[%s18446_s28 + $0x90] sm:$0xf]  ;;  %v17710_v7 = vld [vmem:[%s18446_s28 + $0x9c] sm:$0xf0] }
 0x647   : > { %v14785_v38 = vor.u32 %v17710_v7, %v14784_v39  ;;  %v14810_v39 = vld [vmem:[%s18446_s28 + $0xc8] sm:$0xf0] }
 0x648   : > { %v20931_v52 = vadd.f32 %v6394_v61, %v20639_v53  ;;  %v14792_v61 = vld [vmem:[%s18446_s28 + $0x98] sm:$0xf] }
 0x64b   : > { %v6316_v6 = vpop.f32.mrf.mxu2  ;;  %v6161_v60 = vpop.f32.mrf.mxu0 }
 0x64c   : > { %v6395_v32 = vpop.f32.mrf.mxu3  ;;  %v6317_v4 = vadd.f32 %v6316_v6, %v6238_v11  ;;  %v6240_v12 = vpop.f32.mrf.mxu1  ;;  %v14786_v11 = vld [vmem:[%s18446_s28 + $0xa0] sm:$0xf0] }
 0x64d   : > { %v6241_v5 = vadd.f32 %v6240_v12, %v6161_v60  ;;  %v14789_v63 = vor.u32 %v17708_v51, %v14786_v11 }
 0x64e   : > { %v6396_v19 = vadd.f32 %v6395_v32, %v6317_v4  ;;  %7067 = vmatmul.bf16.vlgmr.msrb.gmra.mxu0 %v14769_v45  ;;  %v14793_v45 = vor.u32 %v17711_v43, %v14792_v61 }
 0x64f   : > { %7146 = vmatmul.bf16.vlgmr.msrb.gmra.mxu1 %v14773_v31  ;;  %v14797_v31 = vor.u32 %v17709_v55, %v14794_v13 }
 0x650   : > { %v20940_v53 = vadd.f32 %v6396_v19, %v20648_v23  ;;  %7225 = vmatmul.bf16.vlgmr.msrb.gmra.mxu2 %v14777_v59  ;;  %v17862_v23 = vld [vmem:[%s22621_s1 + $0x870] sm:$0xff] }
 0x651   : > { %7304 = vmatmul.bf16.vlgmr.msrb.gmra.mxu3 %v14781_v40  ;;  %8076 = vmatpush.bf16.msra.mxu1 %v17862_v23  ;;  %v17714_v23 = vld [vmem:[%s18446_s28 + $0xbc] sm:$0xf0] }
 0x652   : > { %v14801_v11 = vor.u32 %v17714_v23, %v14800_v25  ;;  %v17719_v25 = vld [vmem:[%s18446_s28 + $0xe4] sm:$0xf0]  ;;  %v17717_v23 = vld [vmem:[%s18446_s28 + $0xdc] sm:$0xf] }
 0x653   : > { %v6319_v50 = vpop.f32.mrf.mxu2  ;;  %v6163_v33 = vpop.f32.mrf.mxu0 }
 0x654   : > { %v6398_v0 = vpop.f32.mrf.mxu3  ;;  %v6320_v24 = vadd.f32 %v6319_v50, %v6241_v5  ;;  %v6242_v20 = vpop.f32.mrf.mxu1  ;;  %v17712_v50 = vld [vmem:[%s18446_s28 + $0xb4] sm:$0xf] }
 0x655   : > { %v6243_v27 = vadd.f32 %v6242_v20, %v6163_v33  ;;  %v17869_v33 = vld [vmem:[%s22621_s1 + $0x8a8] sm:$0xff] }
 0x656   : > { %v6399_v3 = vadd.f32 %v6398_v0, %v6320_v24  ;;  %v14802_v0 = vld [vmem:[%s18446_s28 + $0xc0] sm:$0xf0]  ;;  %v17877_v20 = vld [vmem:[%s22621_s1 + $0x8e8] sm:$0xff]  ;;  %8156 = vmatpush.bf16.msra.mxu2 %v17869_v33 }
 0x657   : > { %8235 = vmatpush.bf16.msra.mxu3 %v17877_v20  ;;  %v14805_v61 = vor.u32 %v17712_v50, %v14802_v0  ;;  %v14826_v50 = vld [vmem:[%s18446_s28 + $0xe8] sm:$0xf0] }
 0x658   : > { %v20957_v28 = vadd.f32 %v6399_v3, %v20665_v9  ;;  %v17713_v3 = vld [vmem:[%s18446_s28 + $0xbc] sm:$0xf] }
 0x65b   : > { %v6321_v37 = vpop.f32.mrf.mxu2  ;;  %v6166_v6 = vpop.f32.mrf.mxu0 }
 0x65c   : > { %v6400_v14 = vpop.f32.mrf.mxu3  ;;  %v6322_v35 = vadd.f32 %v6321_v37, %v6243_v27  ;;  %v6245_v32 = vpop.f32.mrf.mxu1  ;;  %v17715_v27 = vld [vmem:[%s18446_s28 + $0xc4] sm:$0xf0]  ;;  %v14813_v37 = vor.u32 %v17713_v3, %v14810_v39 }
 0x65d   : > { %v6246_v4 = vadd.f32 %v6245_v32, %v6166_v6  ;;  %v17861_v6 = vld [vmem:[%s22621_s1 + $0x868] sm:$0xff] }
 0x65e   : > { %v6401_v9 = vadd.f32 %v6400_v14, %v6322_v35  ;;  %7072 = vmatmul.bf16.gmra.mxu0 %v14785_v38  ;;  %v17853_v35 = vld [vmem:[%s22621_s1 + $0x828] sm:$0xff]  ;;  %8077 = vmatpush.bf16.msra.mxu1 %v17861_v6  ;;  %v17722_v6 = vld [vmem:[%s18446_s28 + $0xfc] sm:$0xf0] }
 0x65f   : > { %7151 = vmatmul.bf16.gmra.mxu1 %v14789_v63  ;;  %7998 = vmatpush.bf16.msra.mxu0 %v17853_v35  ;;  %v14832_v35 = vld [vmem:[%s18446_s28 + $0xf0] sm:$0xf] }
 0x660   : > { %v20966_v60 = vadd.f32 %v6401_v9, %v20674_v30  ;;  %7230 = vmatmul.bf16.gmra.mxu2 %v14793_v45  ;;  %v14808_v30 = vld [vmem:[%s18446_s28 + $0xb8] sm:$0xf] }
 0x661   : > { %7309 = vmatmul.bf16.gmra.mxu3 %v14797_v31  ;;  %v14809_v13 = vor.u32 %v17715_v27, %v14808_v30 }
 0x663   : > { %v6324_v12 = vpop.f32.mrf.mxu2  ;;  %v6168_v5 = vpop.f32.mrf.mxu0 }
 0x664   : > { %v6403_v59 = vpop.f32.mrf.mxu3  ;;  %v6325_v40 = vadd.f32 %v6324_v12, %v6246_v4  ;;  %v6247_v19 = vpop.f32.mrf.mxu1 }
 0x665   : > { %v6248_v41 = vadd.f32 %v6247_v19, %v6168_v5  ;;  %v17716_v19 = vld [vmem:[%s18446_s28 + $0xd4] sm:$0xf] }
 0x666   : > { %v6404_v16 = vadd.f32 %v6403_v59, %v6325_v40  ;;  %v14816_v59 = vld [vmem:[%s18446_s28 + $0xd0] sm:$0xf]  ;;  %v17718_v40 = vld [vmem:[%s18446_s28 + $0xdc] sm:$0xf0] }
 0x667   : > { %v14817_v33 = vor.u32 %v17718_v40, %v14816_v59  ;;  %v17721_v59 = vld [vmem:[%s18446_s28 + $0xfc] sm:$0xf]  ;;  %v14842_v40 = vld [vmem:[%s18446_s28 + $0x108] sm:$0xf0] }
 0x668   : > { %v20973_v24 = vadd.f32 %v6404_v16, %v20681_v46  ;;  %v14824_v16 = vld [vmem:[%s18446_s28 + $0xd8] sm:$0xf] }
 0x66b   : > { %v6326_v7 = vpop.f32.mrf.mxu2  ;;  %v6171_v43 = vpop.f32.mrf.mxu0 }
 0x66c   : > { %v6405_v51 = vpop.f32.mrf.mxu3  ;;  %v6327_v46 = vadd.f32 %v6326_v7, %v6248_v41  ;;  %v6250_v55 = vpop.f32.mrf.mxu1  ;;  %v14818_v41 = vld [vmem:[%s18446_s28 + $0xe0] sm:$0xf0]  ;;  %v14825_v7 = vor.u32 %v17719_v25, %v14824_v16  ;;  %v14833_v16 = vor.u32 %v17722_v6, %v14832_v35  ;;  %v17727_v35 = vld [vmem:[%s18446_s28 + $0x124] sm:$0xf0]  ;;  %v17725_v6 = vld [vmem:[%s18446_s28 + $0x11c] sm:$0xf] }
 0x66d   : > { %v6251_v14 = vadd.f32 %v6250_v55, %v6171_v43  ;;  %v14821_v20 = vor.u32 %v17716_v19, %v14818_v41  ;;  %v17860_v19 = vld [vmem:[%s22621_s1 + $0x860] sm:$0xff] }
 0x66e   : > { %v6406_v38 = vadd.f32 %v6405_v51, %v6327_v46  ;;  %7077 = vmatmul.bf16.gmra.mxu0 %v14801_v11  ;;  %v14829_v51 = vor.u32 %v17717_v23, %v14826_v50  ;;  %8078 = vmatpush.bf16.msra.mxu1 %v17860_v19 }
 0x66f   : > { %7156 = vmatmul.bf16.gmra.mxu1 %v14805_v61 }
 0x670   : > { %v20986_v63 = vadd.f32 %v6406_v38, %v20694_v22  ;;  %7235 = vmatmul.bf16.gmra.mxu2 %v14809_v13 }
 0x671   : > { %7314 = vmatmul.bf16.gmra.mxu3 %v14813_v37 }
 0x673   : > { %v6329_v22 = vpop.f32.mrf.mxu2  ;;  %v6173_v31 = vpop.f32.mrf.mxu0 }
 0x674   : > { %v6408_v32 = vpop.f32.mrf.mxu3  ;;  %v6330_v45 = vadd.f32 %v6329_v22, %v6251_v14  ;;  %v6252_v4 = vpop.f32.mrf.mxu1  ;;  %v17720_v22 = vld [vmem:[%s18446_s28 + $0xf4] sm:$0xf] }
 0x675   : > { %v6253_v9 = vadd.f32 %v6252_v4, %v6173_v31  ;;  %v17723_v31 = vld [vmem:[%s18446_s28 + $0x104] sm:$0xf0]  ;;  %v17868_v4 = vld [vmem:[%s22621_s1 + $0x8a0] sm:$0xff] }
 0x676   : > { %v6409_v12 = vadd.f32 %v6408_v32, %v6330_v45  ;;  %v14834_v32 = vld [vmem:[%s18446_s28 + $0x100] sm:$0xf0]  ;;  %v14840_v45 = vld [vmem:[%s18446_s28 + $0xf8] sm:$0xf]  ;;  %8157 = vmatpush.bf16.msra.mxu2 %v17868_v4 }
 0x677   : > { %v14837_v25 = vor.u32 %v17720_v22, %v14834_v32  ;;  %v14858_v22 = vld [vmem:[%s18446_s28 + $0x128] sm:$0xf0] }
 0x678   : > { %v20997_v5 = vadd.f32 %v6409_v12, %v20705_v44  ;;  %v17852_v12 = vld [vmem:[%s22621_s1 + $0x820] sm:$0xff]  ;;  %v14861_v19 = vor.u32 %v17725_v6, %v14858_v22 }
 0x679   : > { %7999 = vmatpush.bf16.msra.mxu0 %v17852_v12 }
 0x67b   : > { %v6331_v0 = vpop.f32.mrf.mxu2  ;;  %v6176_v3 = vpop.f32.mrf.mxu0 }
 0x67c   : > { %v6410_v30 = vpop.f32.mrf.mxu3  ;;  %v6332_v27 = vadd.f32 %v6331_v0, %v6253_v9  ;;  %v6255_v39 = vpop.f32.mrf.mxu1  ;;  %v17876_v9 = vld [vmem:[%s22621_s1 + $0x8e0] sm:$0xff] }
 0x67d   : > { %v6256_v11 = vadd.f32 %v6255_v39, %v6176_v3  ;;  %8236 = vmatpush.bf16.msra.mxu3 %v17876_v9 }
 0x67e   : > { %v6411_v44 = vadd.f32 %v6410_v30, %v6332_v27  ;;  %7082 = vmatmul.bf16.gmra.mxu0 %v14817_v33  ;;  %v14841_v30 = vor.u32 %v17723_v31, %v14840_v45  ;;  %v14845_v33 = vor.u32 %v17721_v59, %v14842_v40 }
 0x67f   : > { %7161 = vmatmul.bf16.gmra.mxu1 %v14821_v20 }
 0x680   : > { %v21006_v61 = vadd.f32 %v6411_v44, %v20714_v56  ;;  %7240 = vmatmul.bf16.gmra.mxu2 %v14825_v7 }
 0x681   : > { %7319 = vmatmul.bf16.gmra.mxu3 %v14829_v51 }
 0x683   : > { %v6334_v46 = vpop.f32.mrf.mxu2  ;;  %v6178_v13 = vpop.f32.mrf.mxu0 }
 0x684   : > { %v6413_v43 = vpop.f32.mrf.mxu3  ;;  %v6335_v55 = vadd.f32 %v6334_v46, %v6256_v11  ;;  %v6257_v37 = vpop.f32.mrf.mxu1 }
 0x685   : > { %v6258_v14 = vadd.f32 %v6257_v37, %v6178_v13  ;;  %v17726_v13 = vld [vmem:[%s18446_s28 + $0x11c] sm:$0xf0] }
 0x686   : > { %v6414_v38 = vadd.f32 %v6413_v43, %v6335_v55  ;;  %v14848_v55 = vld [vmem:[%s18446_s28 + $0x110] sm:$0xf] }
 0x687   : > { %v14849_v31 = vor.u32 %v17726_v13, %v14848_v55  ;;  %v17731_v55 = vld [vmem:[%s18446_s28 + $0x144] sm:$0xf0]  ;;  %v17729_v13 = vld [vmem:[%s18446_s28 + $0x13c] sm:$0xf] }
 0x688   : > { %v21015_v56 = vadd.f32 %v6414_v38, %v20723_v21  ;;  %v14856_v38 = vld [vmem:[%s18446_s28 + $0x118] sm:$0xf] }
 0x689   : > { %v14857_v40 = vor.u32 %v17727_v35, %v14856_v38 }
 0x68b   : > { %v6336_v21 = vpop.f32.mrf.mxu2  ;;  %v6181_v50 = vpop.f32.mrf.mxu0 }
 0x68c   : > { %v6415_v41 = vpop.f32.mrf.mxu3  ;;  %v6337_v23 = vadd.f32 %v6336_v21, %v6258_v14  ;;  %v6260_v0 = vpop.f32.mrf.mxu1  ;;  %v17724_v14 = vld [vmem:[%s18446_s28 + $0x114] sm:$0xf] }
 0x68d   : > { %v6261_v20 = vadd.f32 %v6260_v0, %v6181_v50 }
 0x68e   : > { %v6416_v27 = vadd.f32 %v6415_v41, %v6337_v23  ;;  %7087 = vmatmul.bf16.gmra.mxu0 %v14833_v16  ;;  %v17867_v16 = vld [vmem:[%s22621_s1 + $0x898] sm:$0xff] }
 0x68f   : > { %7166 = vmatmul.bf16.gmra.mxu1 %v14837_v25  ;;  %v17875_v25 = vld [vmem:[%s22621_s1 + $0x8d8] sm:$0xff]  ;;  %8158 = vmatpush.bf16.msra.mxu2 %v17867_v16 }
 0x690   : > { %v21032_v3 = vadd.f32 %v6416_v27, %v20740_v42  ;;  %7245 = vmatmul.bf16.gmra.mxu2 %v14841_v30  ;;  %v14850_v42 = vld [vmem:[%s18446_s28 + $0x120] sm:$0xf0]  ;;  %8237 = vmatpush.bf16.msra.mxu3 %v17875_v25  ;;  %v14864_v27 = vld [vmem:[%s18446_s28 + $0x130] sm:$0xf] }
 0x691   : > { %7324 = vmatmul.bf16.gmra.mxu3 %v14845_v33  ;;  %v14853_v4 = vor.u32 %v17724_v14, %v14850_v42  ;;  %v14874_v14 = vld [vmem:[%s18446_s28 + $0x148] sm:$0xf0] }
 0x693   : > { %v6339_v39 = vpop.f32.mrf.mxu2  ;;  %v6183_v11 = vpop.f32.mrf.mxu0 }
 0x694   : > { %v6418_v7 = vpop.f32.mrf.mxu3  ;;  %v6340_v51 = vadd.f32 %v6339_v39, %v6261_v20  ;;  %v6262_v44 = vpop.f32.mrf.mxu1  ;;  %v17730_v39 = vld [vmem:[%s18446_s28 + $0x13c] sm:$0xf0] }
 0x695   : > { %v6263_v46 = vadd.f32 %v6262_v44, %v6183_v11  ;;  %v14872_v44 = vld [vmem:[%s18446_s28 + $0x138] sm:$0xf]  ;;  %v14865_v35 = vor.u32 %v17730_v39, %v14864_v27  ;;  %v14890_v27 = vld [vmem:[%s18446_s28 + $0x168] sm:$0xf0] }
 0x696   : > { %v6419_v43 = vadd.f32 %v6418_v7, %v6340_v51  ;;  %v17728_v7 = vld [vmem:[%s18446_s28 + $0x134] sm:$0xf]  ;;  %v14866_v51 = vld [vmem:[%s18446_s28 + $0x140] sm:$0xf0] }
 0x697   : > { %v14869_v6 = vor.u32 %v17728_v7, %v14866_v51 }
 0x698   : > { %v21037_v37 = vadd.f32 %v6419_v43, %v20745_v2  ;;  %v17859_v43 = vld [vmem:[%s22621_s1 + $0x858] sm:$0xff] }
 0x699   : > { %8079 = vmatpush.bf16.msra.mxu1 %v17859_v43 }
 0x69b   : > { %v6341_v32 = vpop.f32.mrf.mxu2  ;;  %v6186_v12 = vpop.f32.mrf.mxu0 }
 0x69c   : > { %v6420_v45 = vpop.f32.mrf.mxu3  ;;  %v6342_v9 = vadd.f32 %v6341_v32, %v6263_v46  ;;  %v6265_v59 = vpop.f32.mrf.mxu1  ;;  %v17851_v46 = vld [vmem:[%s22621_s1 + $0x818] sm:$0xff] }
 0x69d   : > { %v6266_v21 = vadd.f32 %v6265_v59, %v6186_v12  ;;  %8000 = vmatpush.bf16.msra.mxu0 %v17851_v46 }
 0x69e   : > { %v6421_v41 = vadd.f32 %v6420_v45, %v6342_v9  ;;  %7092 = vmatmul.bf16.gmra.mxu0 %v14849_v31  ;;  %v14873_v45 = vor.u32 %v17731_v55, %v14872_v44  ;;  %v14877_v31 = vor.u32 %v17729_v13, %v14874_v14 }
 0x69f   : > { %7171 = vmatmul.bf16.gmra.mxu1 %v14853_v4 }
 0x6a0   : > { %v21046_v2 = vadd.f32 %v6421_v41, %v20754_v18  ;;  %7250 = vmatmul.bf16.gmra.mxu2 %v14857_v40 }
 0x6a1   : > { %7329 = vmatmul.bf16.gmra.mxu3 %v14861_v19 }
 0x6a3   : > { %v6344_v23 = vpop.f32.mrf.mxu2  ;;  %v6188_v0 = vpop.f32.mrf.mxu0 }
 0x6a4   : > { %v6423_v18 = vpop.f32.mrf.mxu3  ;;  %v6345_v50 = vadd.f32 %v6344_v23, %v6266_v21  ;;  %v6267_v30 = vpop.f32.mrf.mxu1  ;;  %v14880_v23 = vld [vmem:[%s18446_s28 + $0x150] sm:$0xf] }
 0x6a5   : > { %v6268_v33 = vadd.f32 %v6267_v30, %v6188_v0  ;;  %v17732_v0 = vld [vmem:[%s18446_s28 + $0x154] sm:$0xf]  ;;  %v14888_v30 = vld [vmem:[%s18446_s28 + $0x158] sm:$0xf] }
 0x6a6   : > { %v6424_v20 = vadd.f32 %v6423_v18, %v6345_v50  ;;  %v17734_v18 = vld [vmem:[%s18446_s28 + $0x15c] sm:$0xf0] }
 0x6a7   : > { %v14881_v51 = vor.u32 %v17734_v18, %v14880_v23  ;;  %v17739_v23 = vld [vmem:[%s18446_s28 + $0x184] sm:$0xf0]  ;;  %v17737_v18 = vld [vmem:[%s18446_s28 + $0x17c] sm:$0xf] }
 0x6a8   : > { %v21059_v11 = vadd.f32 %v6424_v20, %v20767_v57  ;;  %v17733_v20 = vld [vmem:[%s18446_s28 + $0x15c] sm:$0xf] }
 0x6a9   : > { %v14893_v14 = vor.u32 %v17733_v20, %v14890_v27 }
 0x6ab   : > { %v6346_v42 = vpop.f32.mrf.mxu2  ;;  %v6191_v22 = vpop.f32.mrf.mxu0 }
 0x6ac   : > { %v6425_v38 = vpop.f32.mrf.mxu3  ;;  %v6347_v57 = vadd.f32 %v6346_v42, %v6268_v33  ;;  %v6270_v32 = vpop.f32.mrf.mxu1  ;;  %v17735_v33 = vld [vmem:[%s18446_s28 + $0x164] sm:$0xf0] }
 0x6ad   : > { %v6271_v4 = vadd.f32 %v6270_v32, %v6191_v22  ;;  %v14889_v13 = vor.u32 %v17735_v33, %v14888_v30 }
 0x6ae   : > { %v6426_v9 = vadd.f32 %v6425_v38, %v6347_v57  ;;  %7097 = vmatmul.bf16.gmra.mxu0 %v14865_v35  ;;  %v17866_v35 = vld [vmem:[%s22621_s1 + $0x890] sm:$0xff] }
 0x6af   : > { %7176 = vmatmul.bf16.gmra.mxu1 %v14869_v6  ;;  %v17874_v6 = vld [vmem:[%s22621_s1 + $0x8d0] sm:$0xff]  ;;  %8159 = vmatpush.bf16.msra.mxu2 %v17866_v35 }
 0x6b0   : > { %v21072_v12 = vadd.f32 %v6426_v9, %v20780_v47  ;;  %7255 = vmatmul.bf16.gmra.mxu2 %v14873_v45  ;;  %v14882_v47 = vld [vmem:[%s18446_s28 + $0x160] sm:$0xf0]  ;;  %v17850_v57 = vld [vmem:[%s22621_s1 + $0x810] sm:$0xff]  ;;  %8238 = vmatpush.bf16.msra.mxu3 %v17874_v6 }
 0x6b1   : > { %7334 = vmatmul.bf16.gmra.mxu3 %v14877_v31  ;;  %v14885_v44 = vor.u32 %v17732_v0, %v14882_v47  ;;  %8001 = vmatpush.bf16.msra.mxu0 %v17850_v57  ;;  %v14906_v0 = vld [vmem:[%s18446_s28 + $0x188] sm:$0xf0]  ;;  %v14912_v57 = vld [vmem:[%s18446_s28 + $0x190] sm:$0xf] }
 0x6b3   : > { %v6349_v59 = vpop.f32.mrf.mxu2  ;;  %v6193_v21 = vpop.f32.mrf.mxu0 }
 0x6b4   : > { %v6428_v40 = vpop.f32.mrf.mxu3  ;;  %v6350_v19 = vadd.f32 %v6349_v59, %v6271_v4  ;;  %v6272_v41 = vpop.f32.mrf.mxu1 }
 0x6b5   : > { %v6273_v16 = vadd.f32 %v6272_v41, %v6193_v21  ;;  %v17736_v41 = vld [vmem:[%s18446_s28 + $0x174] sm:$0xf] }
 0x6b6   : > { %v6429_v25 = vadd.f32 %v6428_v40, %v6350_v19  ;;  %v14896_v40 = vld [vmem:[%s18446_s28 + $0x170] sm:$0xf]  ;;  %v17738_v19 = vld [vmem:[%s18446_s28 + $0x17c] sm:$0xf0] }
 0x6b7   : > { %v14897_v33 = vor.u32 %v17738_v19, %v14896_v40  ;;  %v14922_v40 = vld [vmem:[%s18446_s28 + $0x1a8] sm:$0xf0] }
 0x6b8   : > { %v21077_v50 = vadd.f32 %v6429_v25, %v20785_v48  ;;  %v14904_v25 = vld [vmem:[%s18446_s28 + $0x178] sm:$0xf] }
 0x6bb   : > { %v6351_v39 = vpop.f32.mrf.mxu2  ;;  %v6196_v43 = vpop.f32.mrf.mxu0 }
 0x6bc   : > { %v6430_v7 = vpop.f32.mrf.mxu3  ;;  %v6352_v46 = vadd.f32 %v6351_v39, %v6273_v16  ;;  %v6275_v55 = vpop.f32.mrf.mxu1  ;;  %v14898_v16 = vld [vmem:[%s18446_s28 + $0x180] sm:$0xf0] }
 0x6bd   : > { %v6276_v42 = vadd.f32 %v6275_v55, %v6196_v43  ;;  %v14901_v20 = vor.u32 %v17736_v41, %v14898_v16 }
 0x6be   : > { %v6431_v38 = vadd.f32 %v6430_v7, %v6352_v46  ;;  %7102 = vmatmul.bf16.gmra.mxu0 %v14881_v51  ;;  %v14905_v51 = vor.u32 %v17739_v23, %v14904_v25 }
 0x6bf   : > { %7181 = vmatmul.bf16.gmra.mxu1 %v14885_v44  ;;  %v14909_v44 = vor.u32 %v17737_v18, %v14906_v0 }
 0x6c0   : > { %v21086_v48 = vadd.f32 %v6431_v38, %v20794_v62  ;;  %7260 = vmatmul.bf16.gmra.mxu2 %v14889_v13  ;;  %v17858_v62 = vld [vmem:[%s22621_s1 + $0x850] sm:$0xff] }
 0x6c1   : > { %7339 = vmatmul.bf16.gmra.mxu3 %v14893_v14  ;;  %8080 = vmatpush.bf16.msra.mxu1 %v17858_v62  ;;  %v17742_v62 = vld [vmem:[%s18446_s28 + $0x19c] sm:$0xf0] }
 0x6c2   : > { %v14913_v16 = vor.u32 %v17742_v62, %v14912_v57  ;;  %v17747_v57 = vld [vmem:[%s18446_s28 + $0x1c4] sm:$0xf0]  ;;  %v17745_v62 = vld [vmem:[%s18446_s28 + $0x1bc] sm:$0xf] }
 0x6c3   : > { %v6354_v22 = vpop.f32.mrf.mxu2  ;;  %v6198_v31 = vpop.f32.mrf.mxu0 }
 0x6c4   : > { %v6433_v32 = vpop.f32.mrf.mxu3  ;;  %v6355_v45 = vadd.f32 %v6354_v22, %v6276_v42  ;;  %v6277_v4 = vpop.f32.mrf.mxu1  ;;  %v17740_v22 = vld [vmem:[%s18446_s28 + $0x194] sm:$0xf] }
 0x6c5   : > { %v6278_v9 = vadd.f32 %v6277_v4, %v6198_v31  ;;  %v17865_v31 = vld [vmem:[%s22621_s1 + $0x888] sm:$0xff] }
 0x6c6   : > { %v6434_v59 = vadd.f32 %v6433_v32, %v6355_v45  ;;  %v14914_v32 = vld [vmem:[%s18446_s28 + $0x1a0] sm:$0xf0]  ;;  %v17873_v4 = vld [vmem:[%s22621_s1 + $0x8c8] sm:$0xff]  ;;  %8160 = vmatpush.bf16.msra.mxu2 %v17865_v31 }
 0x6c7   : > { %8239 = vmatpush.bf16.msra.mxu3 %v17873_v4  ;;  %v14917_v25 = vor.u32 %v17740_v22, %v14914_v32  ;;  %v14938_v22 = vld [vmem:[%s18446_s28 + $0x1c8] sm:$0xf0] }
 0x6c8   : > { %v21103_v21 = vadd.f32 %v6434_v59, %v20811_v58  ;;  %v17741_v59 = vld [vmem:[%s18446_s28 + $0x19c] sm:$0xf] }
 0x6cb   : > { %v6356_v47 = vpop.f32.mrf.mxu2  ;;  %v7068_v39 = vpop.f32.mrf.mxu0 }
 0x6cc   : > { %v6435_v30 = vpop.f32.mrf.mxu3  ;;  %v6357_v27 = vadd.f32 %v6356_v47, %v6278_v9  ;;  %v7147_v7 = vpop.f32.mrf.mxu1  ;;  %v17743_v9 = vld [vmem:[%s18446_s28 + $0x1a4] sm:$0xf0]  ;;  %v14925_v47 = vor.u32 %v17741_v59, %v14922_v40 }
 0x6cd   : > { %v7148_v46 = vadd.f32 %v7147_v7, %v7068_v39  ;;  %v17857_v39 = vld [vmem:[%s22621_s1 + $0x848] sm:$0xff] }
 0x6ce   : > { %v6436_v58 = vadd.f32 %v6435_v30, %v6357_v27  ;;  %7107 = vmatmul.bf16.gmra.mxu0 %v14897_v33  ;;  %v17849_v27 = vld [vmem:[%s22621_s1 + $0x808] sm:$0xff]  ;;  %8081 = vmatpush.bf16.msra.mxu1 %v17857_v39  ;;  %v17750_v39 = vld [vmem:[%s18446_s28 + $0x1dc] sm:$0xf0] }
 0x6cf   : > { %7186 = vmatmul.bf16.gmra.mxu1 %v14901_v20  ;;  %8002 = vmatpush.bf16.msra.mxu0 %v17849_v27  ;;  %v14944_v27 = vld [vmem:[%s18446_s28 + $0x1d0] sm:$0xf] }
 0x6d0   : > { %v21112_v43 = vadd.f32 %v6436_v58, %v20820_v29  ;;  %7265 = vmatmul.bf16.gmra.mxu2 %v14905_v51  ;;  %v14920_v29 = vld [vmem:[%s18446_s28 + $0x198] sm:$0xf] }
 0x6d1   : > { %7344 = vmatmul.bf16.gmra.mxu3 %v14909_v44  ;;  %v14921_v0 = vor.u32 %v17743_v9, %v14920_v29 }
 0x6d3   : > { %v7226_v55 = vpop.f32.mrf.mxu2  ;;  %v7070_v42 = vpop.f32.mrf.mxu0 }
 0x6d4   : > { %v7305_v13 = vpop.f32.mrf.mxu3  ;;  %v7227_v14 = vadd.f32 %v7226_v55, %v7148_v46  ;;  %v7149_v38 = vpop.f32.mrf.mxu1 }
 0x6d5   : > { %v7150_v35 = vadd.f32 %v7149_v38, %v7070_v42  ;;  %v17744_v38 = vld [vmem:[%s18446_s28 + $0x1b4] sm:$0xf] }
 0x6d6   : > { %v7306_v6 = vadd.f32 %v7305_v13, %v7227_v14  ;;  %v14928_v13 = vld [vmem:[%s18446_s28 + $0x1b0] sm:$0xf]  ;;  %v17746_v14 = vld [vmem:[%s18446_s28 + $0x1bc] sm:$0xf0] }
 0x6d7   : > { %v14929_v31 = vor.u32 %v17746_v14, %v14928_v13  ;;  %v17749_v13 = vld [vmem:[%s18446_s28 + $0x1dc] sm:$0xf]  ;;  %v14954_v14 = vld [vmem:[%s18446_s28 + $0x1e8] sm:$0xf0] }
 0x6d8   : > { %v21119_v45 = vadd.f32 %v7306_v6, %v20827_v26  ;;  %v14936_v6 = vld [vmem:[%s18446_s28 + $0x1b8] sm:$0xf] }
 0x6db   : > { %v7228_v19 = vpop.f32.mrf.mxu2  ;;  %v7073_v23 = vpop.f32.mrf.mxu0 }
 0x6dc   : > { %v7307_v41 = vpop.f32.mrf.mxu3  ;;  %v7229_v26 = vadd.f32 %v7228_v19, %v7150_v35  ;;  %v7152_v18 = vpop.f32.mrf.mxu1  ;;  %v14930_v35 = vld [vmem:[%s18446_s28 + $0x1c0] sm:$0xf0]  ;;  %v14937_v19 = vor.u32 %v17747_v57, %v14936_v6  ;;  %v14945_v6 = vor.u32 %v17750_v39, %v14944_v27  ;;  %v17755_v27 = vld [vmem:[%s18446_s28 + $0x204] sm:$0xf0]  ;;  %v17753_v39 = vld [vmem:[%s18446_s28 + $0x1fc] sm:$0xf] }
 0x6dd   : > { %v7153_v30 = vadd.f32 %v7152_v18, %v7073_v23  ;;  %v14933_v4 = vor.u32 %v17744_v38, %v14930_v35  ;;  %v17856_v38 = vld [vmem:[%s22621_s1 + $0x840] sm:$0xff] }
 0x6de   : > { %v7308_v33 = vadd.f32 %v7307_v41, %v7229_v26  ;;  %7112 = vmatmul.bf16.gmra.mxu0 %v14913_v16  ;;  %v14941_v41 = vor.u32 %v17745_v62, %v14938_v22  ;;  %8082 = vmatpush.bf16.msra.mxu1 %v17856_v38 }
 0x6df   : > { %7191 = vmatmul.bf16.gmra.mxu1 %v14917_v25 }
 0x6e0   : > { %v21132_v20 = vadd.f32 %v7308_v33, %v20840_v17  ;;  %7270 = vmatmul.bf16.gmra.mxu2 %v14921_v0 }
 0x6e1   : > { %7349 = vmatmul.bf16.gmra.mxu3 %v14925_v47 }
 0x6e3   : > { %v7231_v17 = vpop.f32.mrf.mxu2  ;;  %v7075_v44 = vpop.f32.mrf.mxu0 }
 0x6e4   : > { %v7310_v7 = vpop.f32.mrf.mxu3  ;;  %v7232_v51 = vadd.f32 %v7231_v17, %v7153_v30  ;;  %v7154_v46 = vpop.f32.mrf.mxu1  ;;  %v17748_v17 = vld [vmem:[%s18446_s28 + $0x1d4] sm:$0xf] }
 0x6e5   : > { %v7155_v58 = vadd.f32 %v7154_v46, %v7075_v44  ;;  %v17751_v44 = vld [vmem:[%s18446_s28 + $0x1e4] sm:$0xf0]  ;;  %v17864_v46 = vld [vmem:[%s22621_s1 + $0x880] sm:$0xff] }
 0x6e6   : > { %v7311_v55 = vadd.f32 %v7310_v7, %v7232_v51  ;;  %v14946_v7 = vld [vmem:[%s18446_s28 + $0x1e0] sm:$0xf0]  ;;  %v14952_v51 = vld [vmem:[%s18446_s28 + $0x1d8] sm:$0xf]  ;;  %8161 = vmatpush.bf16.msra.mxu2 %v17864_v46 }
 0x6e7   : > { %v14949_v57 = vor.u32 %v17748_v17, %v14946_v7  ;;  %v14970_v17 = vld [vmem:[%s18446_s28 + $0x208] sm:$0xf0] }
 0x6e8   : > { %v21143_v42 = vadd.f32 %v7311_v55, %v20851_v34  ;;  %v17848_v55 = vld [vmem:[%s22621_s1 + $0x800] sm:$0xff]  ;;  %v14973_v38 = vor.u32 %v17753_v39, %v14970_v17 }
 0x6e9   : > { %8003 = vmatpush.bf16.msra.mxu0 %v17848_v55 }
 0x6eb   : > { %v7233_v32 = vpop.f32.mrf.mxu2  ;;  %v7078_v59 = vpop.f32.mrf.mxu0 }
 0x6ec   : > { %v7312_v29 = vpop.f32.mrf.mxu3  ;;  %v7234_v9 = vadd.f32 %v7233_v32, %v7155_v58  ;;  %v7157_v40 = vpop.f32.mrf.mxu1  ;;  %v17872_v58 = vld [vmem:[%s22621_s1 + $0x8c0] sm:$0xff] }
 0x6ed   : > { %v7158_v16 = vadd.f32 %v7157_v40, %v7078_v59  ;;  %8240 = vmatpush.bf16.msra.mxu3 %v17872_v58 }
 0x6ee   : > { %v7313_v34 = vadd.f32 %v7312_v29, %v7234_v9  ;;  %7117 = vmatmul.bf16.gmra.mxu0 %v14929_v31  ;;  %v14953_v29 = vor.u32 %v17751_v44, %v14952_v51  ;;  %v14957_v31 = vor.u32 %v17749_v13, %v14954_v14 }
 0x6ef   : > { %7196 = vmatmul.bf16.gmra.mxu1 %v14933_v4 }
 0x6f0   : > { %v21152_v25 = vadd.f32 %v7313_v34, %v20860_v15  ;;  %7275 = vmatmul.bf16.gmra.mxu2 %v14937_v19 }
 0x6f1   : > { %7354 = vmatmul.bf16.gmra.mxu3 %v14941_v41 }
 0x6f3   : > { %v7236_v26 = vpop.f32.mrf.mxu2  ;;  %v7080_v0 = vpop.f32.mrf.mxu0 }
 0x6f4   : > { %v7315_v23 = vpop.f32.mrf.mxu3  ;;  %v7237_v18 = vadd.f32 %v7236_v26, %v7158_v16  ;;  %v7159_v47 = vpop.f32.mrf.mxu1 }
 0x6f5   : > { %v7160_v30 = vadd.f32 %v7159_v47, %v7080_v0  ;;  %v17754_v0 = vld [vmem:[%s18446_s28 + $0x1fc] sm:$0xf0] }
 0x6f6   : > { %v7316_v33 = vadd.f32 %v7315_v23, %v7237_v18  ;;  %v14960_v18 = vld [vmem:[%s18446_s28 + $0x1f0] sm:$0xf] }
 0x6f7   : > { %v14961_v44 = vor.u32 %v17754_v0, %v14960_v18  ;;  %v17759_v18 = vld [vmem:[%s18446_s28 + $0x224] sm:$0xf0]  ;;  %v17757_v0 = vld [vmem:[%s18446_s28 + $0x21c] sm:$0xf] }
 0x6f8   : > { %v21161_v15 = vadd.f32 %v7316_v33, %v20869_v10  ;;  %v14968_v33 = vld [vmem:[%s18446_s28 + $0x1f8] sm:$0xf] }
 0x6f9   : > { %v14969_v14 = vor.u32 %v17755_v27, %v14968_v33 }
 0x6fb   : > { %v7238_v10 = vpop.f32.mrf.mxu2  ;;  %v7083_v22 = vpop.f32.mrf.mxu0 }
 0x6fc   : > { %v7317_v35 = vpop.f32.mrf.mxu3  ;;  %v7239_v62 = vadd.f32 %v7238_v10, %v7160_v30  ;;  %v7162_v32 = vpop.f32.mrf.mxu1  ;;  %v17752_v30 = vld [vmem:[%s18446_s28 + $0x1f4] sm:$0xf] }
 0x6fd   : > { %v7163_v4 = vadd.f32 %v7162_v32, %v7083_v22 }
 0x6fe   : > { %v7318_v9 = vadd.f32 %v7317_v35, %v7239_v62  ;;  %7122 = vmatmul.bf16.gmra.mxu0 %v14945_v6  ;;  %v17959_v6 = vld [vmem:[%s22621_s1 + $0x9b8] sm:$0xff] }
 0x6ff   : > { %7201 = vmatmul.bf16.gmra.mxu1 %v14949_v57  ;;  %v17967_v57 = vld [vmem:[%s22621_s1 + $0x9f8] sm:$0xff]  ;;  %9091 = vmatpush.bf16.msrb.mxu2 %v17959_v6 }
 0x700   : > { %v21178_v59 = vadd.f32 %v7318_v9, %v20886_v49  ;;  %7280 = vmatmul.bf16.gmra.mxu2 %v14953_v29  ;;  %v14962_v49 = vld [vmem:[%s18446_s28 + $0x200] sm:$0xf0]  ;;  %9170 = vmatpush.bf16.msrb.mxu3 %v17967_v57  ;;  %v14976_v9 = vld [vmem:[%s18446_s28 + $0x210] sm:$0xf] }
 0x701   : > { %7359 = vmatmul.bf16.gmra.mxu3 %v14957_v31  ;;  %v14965_v46 = vor.u32 %v17752_v30, %v14962_v49  ;;  %v14986_v30 = vld [vmem:[%s18446_s28 + $0x228] sm:$0xf0] }
 0x703   : > { %v7241_v40 = vpop.f32.mrf.mxu2  ;;  %v7085_v16 = vpop.f32.mrf.mxu0 }
 0x704   : > { %v7320_v19 = vpop.f32.mrf.mxu3  ;;  %v7242_v41 = vadd.f32 %v7241_v40, %v7163_v4  ;;  %v7164_v34 = vpop.f32.mrf.mxu1  ;;  %v17758_v40 = vld [vmem:[%s18446_s28 + $0x21c] sm:$0xf0] }
 0x705   : > { %v7165_v26 = vadd.f32 %v7164_v34, %v7085_v16  ;;  %v14984_v34 = vld [vmem:[%s18446_s28 + $0x218] sm:$0xf]  ;;  %v14977_v27 = vor.u32 %v17758_v40, %v14976_v9  ;;  %v15194_v9 = vld [vmem:[%s18446_s28 + $0x98] sm:$0xf0] }
 0x706   : > { %v7321_v23 = vadd.f32 %v7320_v19, %v7242_v41  ;;  %v17756_v19 = vld [vmem:[%s18446_s28 + $0x214] sm:$0xf]  ;;  %v14978_v41 = vld [vmem:[%s18446_s28 + $0x220] sm:$0xf0] }
 0x707   : > { %v14981_v39 = vor.u32 %v17756_v19, %v14978_v41 }
 0x708   : > { %v21183_v47 = vadd.f32 %v7321_v23, %v20891_v1  ;;  %v17951_v23 = vld [vmem:[%s22621_s1 + $0x978] sm:$0xff] }
 0x709   : > { %9012 = vmatpush.bf16.msrb.mxu1 %v17951_v23 }
 0x70b   : > { %v7243_v7 = vpop.f32.mrf.mxu2  ;;  %v7088_v55 = vpop.f32.mrf.mxu0 }
 0x70c   : > { %v7322_v51 = vpop.f32.mrf.mxu3  ;;  %v7244_v58 = vadd.f32 %v7243_v7, %v7165_v26  ;;  %v7167_v13 = vpop.f32.mrf.mxu1  ;;  %v17943_v26 = vld [vmem:[%s22621_s1 + $0x938] sm:$0xff] }
 0x70d   : > { %v7168_v10 = vadd.f32 %v7167_v13, %v7088_v55  ;;  %8933 = vmatpush.bf16.msrb.mxu0 %v17943_v26 }
 0x70e   : > { %v7323_v35 = vadd.f32 %v7322_v51, %v7244_v58  ;;  %7127 = vmatmul.bf16.gmra.mxu0 %v14961_v44  ;;  %v14985_v51 = vor.u32 %v17759_v18, %v14984_v34  ;;  %v14989_v44 = vor.u32 %v17757_v0, %v14986_v30 }
 0x70f   : > { %7206 = vmatmul.bf16.gmra.mxu1 %v14965_v46 }
 0x710   : > { %v21192_v1 = vadd.f32 %v7323_v35, %v20900_v8  ;;  %7285 = vmatmul.bf16.gmra.mxu2 %v14969_v14 }
 0x711   : > { %7364 = vmatmul.bf16.gmra.mxu3 %v14973_v38 }
 0x713   : > { %v7246_v62 = vpop.f32.mrf.mxu2  ;;  %v7090_v32 = vpop.f32.mrf.mxu0 }
 0x714   : > { %v7325_v8 = vpop.f32.mrf.mxu3  ;;  %v7247_v22 = vadd.f32 %v7246_v62, %v7168_v10  ;;  %v7169_v29 = vpop.f32.mrf.mxu1  ;;  %v15184_v62 = vld [vmem:[%s18446_s28 + $0x80] sm:$0xf] }
 0x715   : > { %v7170_v31 = vadd.f32 %v7169_v29, %v7090_v32  ;;  %v17792_v32 = vld [vmem:[%s18446_s28 + $0x84] sm:$0xf]  ;;  %v15192_v29 = vld [vmem:[%s18446_s28 + $0x88] sm:$0xf] }
 0x716   : > { %v7326_v4 = vadd.f32 %v7325_v8, %v7247_v22  ;;  %v17794_v8 = vld [vmem:[%s18446_s28 + $0x8c] sm:$0xf0] }
 0x717   : > { %v15185_v41 = vor.u32 %v17794_v8, %v15184_v62  ;;  %v17799_v62 = vld [vmem:[%s18446_s28 + $0xb4] sm:$0xf0]  ;;  %v17797_v8 = vld [vmem:[%s18446_s28 + $0xac] sm:$0xf] }
 0x718   : > { %v21205_v16 = vadd.f32 %v7326_v4, %v20913_v54  ;;  %v17793_v4 = vld [vmem:[%s18446_s28 + $0x8c] sm:$0xf] }
 0x719   : > { %v15197_v30 = vor.u32 %v17793_v4, %v15194_v9 }
 0x71b   : > { %v7248_v49 = vpop.f32.mrf.mxu2  ;;  %v7093_v17 = vpop.f32.mrf.mxu0 }
 0x71c   : > { %v7327_v33 = vpop.f32.mrf.mxu3  ;;  %v7249_v54 = vadd.f32 %v7248_v49, %v7170_v31  ;;  %v7172_v7 = vpop.f32.mrf.mxu1  ;;  %v17795_v31 = vld [vmem:[%s18446_s28 + $0x94] sm:$0xf0] }
 0x71d   : > { %v7173_v46 = vadd.f32 %v7172_v7, %v7093_v17  ;;  %v15193_v0 = vor.u32 %v17795_v31, %v15192_v29 }
 0x71e   : > { %v7328_v58 = vadd.f32 %v7327_v33, %v7249_v54  ;;  %7132 = vmatmul.bf16.gmra.mxu0 %v14977_v27  ;;  %v17958_v27 = vld [vmem:[%s22621_s1 + $0x9b0] sm:$0xff] }
 0x71f   : > { %7211 = vmatmul.bf16.gmra.mxu1 %v14981_v39  ;;  %v17966_v39 = vld [vmem:[%s22621_s1 + $0x9f0] sm:$0xff]  ;;  %9092 = vmatpush.bf16.msrb.mxu2 %v17958_v27 }
 0x720   : > { %v21218_v55 = vadd.f32 %v7328_v58, %v20926_v36  ;;  %7290 = vmatmul.bf16.gmra.mxu2 %v14985_v51  ;;  %v15186_v36 = vld [vmem:[%s18446_s28 + $0x90] sm:$0xf0]  ;;  %9171 = vmatpush.bf16.msrb.mxu3 %v17966_v39 }
 0x721   : > { %7369 = vmatmul.bf16.gmra.mxu3 %v14989_v44  ;;  %v15189_v34 = vor.u32 %v17792_v32, %v15186_v36  ;;  %v17942_v54 = vld [vmem:[%s22621_s1 + $0x930] sm:$0xff]  ;;  %v15210_v32 = vld [vmem:[%s18446_s28 + $0xb8] sm:$0xf0] }
 0x722   : > { %8934 = vmatpush.bf16.msrb.mxu0 %v17942_v54  ;;  %v15216_v54 = vld [vmem:[%s18446_s28 + $0xc0] sm:$0xf] }
 0x723   : > { %v7251_v13 = vpop.f32.mrf.mxu2  ;;  %v7095_v10 = vpop.f32.mrf.mxu0 }
 0x724   : > { %v7330_v14 = vpop.f32.mrf.mxu3  ;;  %v7252_v38 = vadd.f32 %v7251_v13, %v7173_v46  ;;  %v7174_v35 = vpop.f32.mrf.mxu1 }
 0x725   : > { %v7175_v6 = vadd.f32 %v7174_v35, %v7095_v10  ;;  %v17796_v35 = vld [vmem:[%s18446_s28 + $0xa4] sm:$0xf] }
 0x726   : > { %v7331_v57 = vadd.f32 %v7330_v14, %v7252_v38  ;;  %v15200_v14 = vld [vmem:[%s18446_s28 + $0xa0] sm:$0xf]  ;;  %v17798_v38 = vld [vmem:[%s18446_s28 + $0xac] sm:$0xf0] }
 0x727   : > { %v15201_v31 = vor.u32 %v17798_v38, %v15200_v14  ;;  %v15226_v14 = vld [vmem:[%s18446_s28 + $0xd8] sm:$0xf0] }
 0x728   : > { %v21223_v22 = vadd.f32 %v7331_v57, %v20931_v52  ;;  %v15208_v57 = vld [vmem:[%s18446_s28 + $0xa8] sm:$0xf] }
 0x72b   : > { %v7253_v40 = vpop.f32.mrf.mxu2  ;;  %v7098_v23 = vpop.f32.mrf.mxu0 }
 0x72c   : > { %v7332_v19 = vpop.f32.mrf.mxu3  ;;  %v7254_v26 = vadd.f32 %v7253_v40, %v7175_v6  ;;  %v7177_v18 = vpop.f32.mrf.mxu1  ;;  %v15202_v6 = vld [vmem:[%s18446_s28 + $0xb0] sm:$0xf0] }
 0x72d   : > { %v7178_v49 = vadd.f32 %v7177_v18, %v7098_v23  ;;  %v15205_v4 = vor.u32 %v17796_v35, %v15202_v6 }
 0x72e   : > { %v7333_v33 = vadd.f32 %v7332_v19, %v7254_v26  ;;  %8004 = vmatmul.bf16.vlgmr.msra.gmra.mxu0 %v15185_v41  ;;  %v15209_v41 = vor.u32 %v17799_v62, %v15208_v57 }
 0x72f   : > { %8083 = vmatmul.bf16.vlgmr.msra.gmra.mxu1 %v15189_v34  ;;  %v15213_v34 = vor.u32 %v17797_v8, %v15210_v32 }
 0x730   : > { %v21232_v52 = vadd.f32 %v7333_v33, %v20940_v53  ;;  %8162 = vmatmul.bf16.vlgmr.msra.gmra.mxu2 %v15193_v0  ;;  %v17950_v53 = vld [vmem:[%s22621_s1 + $0x970] sm:$0xff] }
 0x731   : > { %8241 = vmatmul.bf16.vlgmr.msra.gmra.mxu3 %v15197_v30  ;;  %9013 = vmatpush.bf16.msrb.mxu1 %v17950_v53  ;;  %v17802_v53 = vld [vmem:[%s18446_s28 + $0xcc] sm:$0xf0] }
 0x732   : > { %v15217_v6 = vor.u32 %v17802_v53, %v15216_v54  ;;  %v17807_v54 = vld [vmem:[%s18446_s28 + $0xf4] sm:$0xf0]  ;;  %v17805_v53 = vld [vmem:[%s18446_s28 + $0xec] sm:$0xf] }
 0x733   : > { %v7256_v17 = vpop.f32.mrf.mxu2  ;;  %v7100_v44 = vpop.f32.mrf.mxu0 }
 0x734   : > { %v7335_v7 = vpop.f32.mrf.mxu3  ;;  %v7257_v51 = vadd.f32 %v7256_v17, %v7178_v49  ;;  %v7179_v46 = vpop.f32.mrf.mxu1  ;;  %v17800_v17 = vld [vmem:[%s18446_s28 + $0xc4] sm:$0xf] }
 0x735   : > { %v7180_v58 = vadd.f32 %v7179_v46, %v7100_v44  ;;  %v17957_v44 = vld [vmem:[%s22621_s1 + $0x9a8] sm:$0xff] }
 0x736   : > { %v7336_v13 = vadd.f32 %v7335_v7, %v7257_v51  ;;  %v15218_v7 = vld [vmem:[%s18446_s28 + $0xd0] sm:$0xf0]  ;;  %v17965_v46 = vld [vmem:[%s22621_s1 + $0x9e8] sm:$0xff]  ;;  %9093 = vmatpush.bf16.msrb.mxu2 %v17957_v44 }
 0x737   : > { %9172 = vmatpush.bf16.msrb.mxu3 %v17965_v46  ;;  %v15221_v57 = vor.u32 %v17800_v17, %v15218_v7  ;;  %v15242_v17 = vld [vmem:[%s18446_s28 + $0xf8] sm:$0xf0] }
 0x738   : > { %v21249_v10 = vadd.f32 %v7336_v13, %v20957_v28  ;;  %v17801_v13 = vld [vmem:[%s18446_s28 + $0xcc] sm:$0xf] }
 0x73b   : > { %v7258_v36 = vpop.f32.mrf.mxu2  ;;  %v7103_v40 = vpop.f32.mrf.mxu0 }
 0x73c   : > { %v7337_v29 = vpop.f32.mrf.mxu3  ;;  %v7259_v9 = vadd.f32 %v7258_v36, %v7180_v58  ;;  %v7182_v19 = vpop.f32.mrf.mxu1  ;;  %v17803_v58 = vld [vmem:[%s18446_s28 + $0xd4] sm:$0xf0]  ;;  %v15229_v36 = vor.u32 %v17801_v13, %v15226_v14 }
 0x73d   : > { %v7183_v26 = vadd.f32 %v7182_v19, %v7103_v40  ;;  %v17949_v40 = vld [vmem:[%s22621_s1 + $0x968] sm:$0xff] }
 0x73e   : > { %v7338_v28 = vadd.f32 %v7337_v29, %v7259_v9  ;;  %8009 = vmatmul.bf16.gmra.mxu0 %v15201_v31  ;;  %v17941_v9 = vld [vmem:[%s22621_s1 + $0x928] sm:$0xff]  ;;  %9014 = vmatpush.bf16.msrb.mxu1 %v17949_v40  ;;  %v17810_v40 = vld [vmem:[%s18446_s28 + $0x10c] sm:$0xf0] }
 0x73f   : > { %8088 = vmatmul.bf16.gmra.mxu1 %v15205_v4  ;;  %8935 = vmatpush.bf16.msrb.mxu0 %v17941_v9  ;;  %v15248_v9 = vld [vmem:[%s18446_s28 + $0x100] sm:$0xf] }
 0x740   : > { %v21258_v23 = vadd.f32 %v7338_v28, %v20966_v60  ;;  %8167 = vmatmul.bf16.gmra.mxu2 %v15209_v41  ;;  %v15224_v60 = vld [vmem:[%s18446_s28 + $0xc8] sm:$0xf] }
 0x741   : > { %8246 = vmatmul.bf16.gmra.mxu3 %v15213_v34  ;;  %v15225_v32 = vor.u32 %v17803_v58, %v15224_v60 }
 0x743   : > { %v7261_v18 = vpop.f32.mrf.mxu2  ;;  %v7105_v49 = vpop.f32.mrf.mxu0 }
 0x744   : > { %v7340_v0 = vpop.f32.mrf.mxu3  ;;  %v7262_v30 = vadd.f32 %v7261_v18, %v7183_v26  ;;  %v7184_v33 = vpop.f32.mrf.mxu1 }
 0x745   : > { %v7185_v27 = vadd.f32 %v7184_v33, %v7105_v49  ;;  %v17804_v33 = vld [vmem:[%s18446_s28 + $0xe4] sm:$0xf] }
 0x746   : > { %v7341_v39 = vadd.f32 %v7340_v0, %v7262_v30  ;;  %v15232_v0 = vld [vmem:[%s18446_s28 + $0xe0] sm:$0xf]  ;;  %v17806_v30 = vld [vmem:[%s18446_s28 + $0xec] sm:$0xf0] }
 0x747   : > { %v15233_v44 = vor.u32 %v17806_v30, %v15232_v0  ;;  %v17809_v0 = vld [vmem:[%s18446_s28 + $0x10c] sm:$0xf]  ;;  %v15258_v30 = vld [vmem:[%s18446_s28 + $0x118] sm:$0xf0] }
 0x748   : > { %v21265_v51 = vadd.f32 %v7341_v39, %v20973_v24  ;;  %v15240_v39 = vld [vmem:[%s18446_s28 + $0xe8] sm:$0xf] }
 0x74b   : > { %v7263_v38 = vpop.f32.mrf.mxu2  ;;  %v7108_v62 = vpop.f32.mrf.mxu0 }
 0x74c   : > { %v7342_v35 = vpop.f32.mrf.mxu3  ;;  %v7264_v24 = vadd.f32 %v7263_v38, %v7185_v27  ;;  %v7187_v8 = vpop.f32.mrf.mxu1  ;;  %v15234_v27 = vld [vmem:[%s18446_s28 + $0xf0] sm:$0xf0]  ;;  %v15241_v38 = vor.u32 %v17807_v54, %v15240_v39  ;;  %v15249_v39 = vor.u32 %v17810_v40, %v15248_v9  ;;  %v17815_v9 = vld [vmem:[%s18446_s28 + $0x134] sm:$0xf0]  ;;  %v17813_v40 = vld [vmem:[%s18446_s28 + $0x12c] sm:$0xf] }
 0x74d   : > { %v7188_v29 = vadd.f32 %v7187_v8, %v7108_v62  ;;  %v15237_v46 = vor.u32 %v17804_v33, %v15234_v27  ;;  %v17948_v33 = vld [vmem:[%s22621_s1 + $0x960] sm:$0xff] }
 0x74e   : > { %v7343_v31 = vadd.f32 %v7342_v35, %v7264_v24  ;;  %8014 = vmatmul.bf16.gmra.mxu0 %v15217_v6  ;;  %v15245_v35 = vor.u32 %v17805_v53, %v15242_v17  ;;  %9015 = vmatpush.bf16.msrb.mxu1 %v17948_v33 }
 0x74f   : > { %8093 = vmatmul.bf16.gmra.mxu1 %v15221_v57 }
 0x750   : > { %v21278_v4 = vadd.f32 %v7343_v31, %v20986_v63  ;;  %8172 = vmatmul.bf16.gmra.mxu2 %v15225_v32 }
 0x751   : > { %8251 = vmatmul.bf16.gmra.mxu3 %v15229_v36 }
 0x753   : > { %v7266_v63 = vpop.f32.mrf.mxu2  ;;  %v7110_v34 = vpop.f32.mrf.mxu0 }
 0x754   : > { %v7345_v19 = vpop.f32.mrf.mxu3  ;;  %v7267_v41 = vadd.f32 %v7266_v63, %v7188_v29  ;;  %v7189_v26 = vpop.f32.mrf.mxu1  ;;  %v17808_v63 = vld [vmem:[%s18446_s28 + $0x104] sm:$0xf] }
 0x755   : > { %v7190_v28 = vadd.f32 %v7189_v26, %v7110_v34  ;;  %v17811_v34 = vld [vmem:[%s18446_s28 + $0x114] sm:$0xf0]  ;;  %v17956_v26 = vld [vmem:[%s22621_s1 + $0x9a0] sm:$0xff] }
 0x756   : > { %v7346_v18 = vadd.f32 %v7345_v19, %v7267_v41  ;;  %v15250_v19 = vld [vmem:[%s18446_s28 + $0x110] sm:$0xf0]  ;;  %v15256_v41 = vld [vmem:[%s18446_s28 + $0x108] sm:$0xf]  ;;  %9094 = vmatpush.bf16.msrb.mxu2 %v17956_v26 }
 0x757   : > { %v15253_v54 = vor.u32 %v17808_v63, %v15250_v19  ;;  %v15274_v63 = vld [vmem:[%s18446_s28 + $0x138] sm:$0xf0] }
 0x758   : > { %v21289_v49 = vadd.f32 %v7346_v18, %v20997_v5  ;;  %v17940_v18 = vld [vmem:[%s22621_s1 + $0x920] sm:$0xff]  ;;  %v15277_v33 = vor.u32 %v17813_v40, %v15274_v63 }
 0x759   : > { %8936 = vmatpush.bf16.msrb.mxu0 %v17940_v18 }
 0x75b   : > { %v7268_v7 = vpop.f32.mrf.mxu2  ;;  %v7113_v13 = vpop.f32.mrf.mxu0 }
 0x75c   : > { %v7347_v60 = vpop.f32.mrf.mxu3  ;;  %v7269_v58 = vadd.f32 %v7268_v7, %v7190_v28  ;;  %v7192_v14 = vpop.f32.mrf.mxu1  ;;  %v17964_v28 = vld [vmem:[%s22621_s1 + $0x9e0] sm:$0xff] }
 0x75d   : > { %v7193_v6 = vadd.f32 %v7192_v14, %v7113_v13  ;;  %9173 = vmatpush.bf16.msrb.mxu3 %v17964_v28 }
 0x75e   : > { %v7348_v5 = vadd.f32 %v7347_v60, %v7269_v58  ;;  %8019 = vmatmul.bf16.gmra.mxu0 %v15233_v44  ;;  %v15257_v60 = vor.u32 %v17811_v34, %v15256_v41  ;;  %v15261_v44 = vor.u32 %v17809_v0, %v15258_v30 }
 0x75f   : > { %8098 = vmatmul.bf16.gmra.mxu1 %v15237_v46 }
 0x760   : > { %v21298_v57 = vadd.f32 %v7348_v5, %v21006_v61  ;;  %8177 = vmatmul.bf16.gmra.mxu2 %v15241_v38 }
 0x761   : > { %8256 = vmatmul.bf16.gmra.mxu3 %v15245_v35 }
 0x763   : > { %v7271_v24 = vpop.f32.mrf.mxu2  ;;  %v7115_v32 = vpop.f32.mrf.mxu0 }
 0x764   : > { %v7350_v62 = vpop.f32.mrf.mxu3  ;;  %v7272_v8 = vadd.f32 %v7271_v24, %v7193_v6  ;;  %v7194_v36 = vpop.f32.mrf.mxu1 }
 0x765   : > { %v7195_v29 = vadd.f32 %v7194_v36, %v7115_v32  ;;  %v17814_v32 = vld [vmem:[%s18446_s28 + $0x12c] sm:$0xf0] }
 0x766   : > { %v7351_v31 = vadd.f32 %v7350_v62, %v7272_v8  ;;  %v15264_v8 = vld [vmem:[%s18446_s28 + $0x120] sm:$0xf] }
 0x767   : > { %v15265_v34 = vor.u32 %v17814_v32, %v15264_v8  ;;  %v17819_v8 = vld [vmem:[%s18446_s28 + $0x154] sm:$0xf0]  ;;  %v17817_v32 = vld [vmem:[%s18446_s28 + $0x14c] sm:$0xf] }
 0x768   : > { %v21307_v61 = vadd.f32 %v7351_v31, %v21015_v56  ;;  %v15272_v31 = vld [vmem:[%s18446_s28 + $0x128] sm:$0xf] }
 0x769   : > { %v15273_v30 = vor.u32 %v17815_v9, %v15272_v31 }
 0x76b   : > { %v7273_v56 = vpop.f32.mrf.mxu2  ;;  %v7118_v17 = vpop.f32.mrf.mxu0 }
 0x76c   : > { %v7352_v27 = vpop.f32.mrf.mxu3  ;;  %v7274_v53 = vadd.f32 %v7273_v56, %v7195_v29  ;;  %v7197_v7 = vpop.f32.mrf.mxu1  ;;  %v17812_v29 = vld [vmem:[%s18446_s28 + $0x124] sm:$0xf] }
 0x76d   : > { %v7198_v46 = vadd.f32 %v7197_v7, %v7118_v17 }
 0x76e   : > { %v7353_v58 = vadd.f32 %v7352_v27, %v7274_v53  ;;  %8024 = vmatmul.bf16.gmra.mxu0 %v15249_v39  ;;  %v17955_v39 = vld [vmem:[%s22621_s1 + $0x998] sm:$0xff] }
 0x76f   : > { %8103 = vmatmul.bf16.gmra.mxu1 %v15253_v54  ;;  %v17963_v54 = vld [vmem:[%s22621_s1 + $0x9d8] sm:$0xff]  ;;  %9095 = vmatpush.bf16.msrb.mxu2 %v17955_v39 }
 0x770   : > { %v21324_v13 = vadd.f32 %v7353_v58, %v21032_v3  ;;  %8182 = vmatmul.bf16.gmra.mxu2 %v15257_v60  ;;  %v15266_v3 = vld [vmem:[%s18446_s28 + $0x130] sm:$0xf0]  ;;  %9174 = vmatpush.bf16.msrb.mxu3 %v17963_v54  ;;  %v15280_v58 = vld [vmem:[%s18446_s28 + $0x140] sm:$0xf] }
 0x771   : > { %8261 = vmatmul.bf16.gmra.mxu3 %v15261_v44  ;;  %v15269_v26 = vor.u32 %v17812_v29, %v15266_v3  ;;  %v15290_v29 = vld [vmem:[%s18446_s28 + $0x158] sm:$0xf0] }
 0x773   : > { %v7276_v14 = vpop.f32.mrf.mxu2  ;;  %v7120_v6 = vpop.f32.mrf.mxu0 }
 0x774   : > { %v7355_v38 = vpop.f32.mrf.mxu3  ;;  %v7277_v35 = vadd.f32 %v7276_v14, %v7198_v46  ;;  %v7199_v5 = vpop.f32.mrf.mxu1  ;;  %v17818_v14 = vld [vmem:[%s18446_s28 + $0x14c] sm:$0xf0] }
 0x775   : > { %v7200_v24 = vadd.f32 %v7199_v5, %v7120_v6  ;;  %v15288_v5 = vld [vmem:[%s18446_s28 + $0x148] sm:$0xf]  ;;  %v15281_v9 = vor.u32 %v17818_v14, %v15280_v58  ;;  %v15306_v58 = vld [vmem:[%s18446_s28 + $0x178] sm:$0xf0] }
 0x776   : > { %v7356_v62 = vadd.f32 %v7355_v38, %v7277_v35  ;;  %v17816_v38 = vld [vmem:[%s18446_s28 + $0x144] sm:$0xf]  ;;  %v15282_v35 = vld [vmem:[%s18446_s28 + $0x150] sm:$0xf0] }
 0x777   : > { %v15285_v40 = vor.u32 %v17816_v38, %v15282_v35 }
 0x778   : > { %v21329_v36 = vadd.f32 %v7356_v62, %v21037_v37  ;;  %v17947_v62 = vld [vmem:[%s22621_s1 + $0x958] sm:$0xff] }
 0x779   : > { %9016 = vmatpush.bf16.msrb.mxu1 %v17947_v62 }
 0x77b   : > { %v7278_v19 = vpop.f32.mrf.mxu2  ;;  %v7123_v18 = vpop.f32.mrf.mxu0 }
 0x77c   : > { %v7357_v41 = vpop.f32.mrf.mxu3  ;;  %v7279_v28 = vadd.f32 %v7278_v19, %v7200_v24  ;;  %v7202_v0 = vpop.f32.mrf.mxu1  ;;  %v17939_v24 = vld [vmem:[%s22621_s1 + $0x918] sm:$0xff] }
 0x77d   : > { %v7203_v56 = vadd.f32 %v7202_v0, %v7123_v18  ;;  %8937 = vmatpush.bf16.msrb.mxu0 %v17939_v24 }
 0x77e   : > { %v7358_v27 = vadd.f32 %v7357_v41, %v7279_v28  ;;  %8029 = vmatmul.bf16.gmra.mxu0 %v15265_v34  ;;  %v15289_v41 = vor.u32 %v17819_v8, %v15288_v5  ;;  %v15293_v34 = vor.u32 %v17817_v32, %v15290_v29 }
 0x77f   : > { %8108 = vmatmul.bf16.gmra.mxu1 %v15269_v26 }
 0x780   : > { %v21338_v37 = vadd.f32 %v7358_v27, %v21046_v2  ;;  %8187 = vmatmul.bf16.gmra.mxu2 %v15273_v30 }
 0x781   : > { %8266 = vmatmul.bf16.gmra.mxu3 %v15277_v33 }
 0x783   : > { %v7281_v53 = vpop.f32.mrf.mxu2  ;;  %v7125_v7 = vpop.f32.mrf.mxu0 }
 0x784   : > { %v7360_v2 = vpop.f32.mrf.mxu3  ;;  %v7282_v17 = vadd.f32 %v7281_v53, %v7203_v56  ;;  %v7204_v60 = vpop.f32.mrf.mxu1  ;;  %v15296_v53 = vld [vmem:[%s18446_s28 + $0x160] sm:$0xf] }
 0x785   : > { %v7205_v44 = vadd.f32 %v7204_v60, %v7125_v7  ;;  %v17820_v7 = vld [vmem:[%s18446_s28 + $0x164] sm:$0xf]  ;;  %v15304_v60 = vld [vmem:[%s18446_s28 + $0x168] sm:$0xf] }
 0x786   : > { %v7361_v46 = vadd.f32 %v7360_v2, %v7282_v17  ;;  %v17822_v2 = vld [vmem:[%s18446_s28 + $0x16c] sm:$0xf0] }
 0x787   : > { %v15297_v35 = vor.u32 %v17822_v2, %v15296_v53  ;;  %v17827_v53 = vld [vmem:[%s18446_s28 + $0x194] sm:$0xf0]  ;;  %v17825_v2 = vld [vmem:[%s18446_s28 + $0x18c] sm:$0xf] }
 0x788   : > { %v21351_v6 = vadd.f32 %v7361_v46, %v21059_v11  ;;  %v17821_v46 = vld [vmem:[%s18446_s28 + $0x16c] sm:$0xf] }
 0x789   : > { %v15309_v29 = vor.u32 %v17821_v46, %v15306_v58 }
 0x78b   : > { %v7283_v3 = vpop.f32.mrf.mxu2  ;;  %v7128_v63 = vpop.f32.mrf.mxu0 }
 0x78c   : > { %v7362_v31 = vpop.f32.mrf.mxu3  ;;  %v7284_v11 = vadd.f32 %v7283_v3, %v7205_v44  ;;  %v7207_v19 = vpop.f32.mrf.mxu1  ;;  %v17823_v44 = vld [vmem:[%s18446_s28 + $0x174] sm:$0xf0] }
 0x78d   : > { %v7208_v26 = vadd.f32 %v7207_v19, %v7128_v63  ;;  %v15305_v32 = vor.u32 %v17823_v44, %v15304_v60 }
 0x78e   : > { %v7363_v28 = vadd.f32 %v7362_v31, %v7284_v11  ;;  %8034 = vmatmul.bf16.gmra.mxu0 %v15281_v9  ;;  %v17954_v9 = vld [vmem:[%s22621_s1 + $0x990] sm:$0xff] }
 0x78f   : > { %8113 = vmatmul.bf16.gmra.mxu1 %v15285_v40  ;;  %v17962_v40 = vld [vmem:[%s22621_s1 + $0x9d0] sm:$0xff]  ;;  %9096 = vmatpush.bf16.msrb.mxu2 %v17954_v9 }
 0x790   : > { %v21364_v18 = vadd.f32 %v7363_v28, %v21072_v12  ;;  %8192 = vmatmul.bf16.gmra.mxu2 %v15289_v41  ;;  %v15298_v12 = vld [vmem:[%s18446_s28 + $0x170] sm:$0xf0]  ;;  %9175 = vmatpush.bf16.msrb.mxu3 %v17962_v40 }
 0x791   : > { %8271 = vmatmul.bf16.gmra.mxu3 %v15293_v34  ;;  %v15301_v5 = vor.u32 %v17820_v7, %v15298_v12  ;;  %v17938_v11 = vld [vmem:[%s22621_s1 + $0x910] sm:$0xff]  ;;  %v15322_v7 = vld [vmem:[%s18446_s28 + $0x198] sm:$0xf0] }
 0x792   : > { %8938 = vmatpush.bf16.msrb.mxu0 %v17938_v11  ;;  %v15328_v11 = vld [vmem:[%s18446_s28 + $0x1a0] sm:$0xf] }
 0x793   : > { %v7286_v0 = vpop.f32.mrf.mxu2  ;;  %v7130_v56 = vpop.f32.mrf.mxu0 }
 0x794   : > { %v7365_v30 = vpop.f32.mrf.mxu3  ;;  %v7287_v33 = vadd.f32 %v7286_v0, %v7208_v26  ;;  %v7209_v27 = vpop.f32.mrf.mxu1 }
 0x795   : > { %v7210_v39 = vadd.f32 %v7209_v27, %v7130_v56  ;;  %v17824_v27 = vld [vmem:[%s18446_s28 + $0x184] sm:$0xf] }
 0x796   : > { %v7366_v54 = vadd.f32 %v7365_v30, %v7287_v33  ;;  %v15312_v30 = vld [vmem:[%s18446_s28 + $0x180] sm:$0xf]  ;;  %v17826_v33 = vld [vmem:[%s18446_s28 + $0x18c] sm:$0xf0] }
 0x797   : > { %v15313_v44 = vor.u32 %v17826_v33, %v15312_v30  ;;  %v15338_v30 = vld [vmem:[%s18446_s28 + $0x1b8] sm:$0xf0] }
 0x798   : > { %v21369_v17 = vadd.f32 %v7366_v54, %v21077_v50  ;;  %v15320_v54 = vld [vmem:[%s18446_s28 + $0x188] sm:$0xf] }
 0x79b   : > { %v7288_v14 = vpop.f32.mrf.mxu2  ;;  %v7133_v62 = vpop.f32.mrf.mxu0 }
 0x79c   : > { %v7367_v38 = vpop.f32.mrf.mxu3  ;;  %v7289_v24 = vadd.f32 %v7288_v14, %v7210_v39  ;;  %v7212_v8 = vpop.f32.mrf.mxu1  ;;  %v15314_v39 = vld [vmem:[%s18446_s28 + $0x190] sm:$0xf0] }
 0x79d   : > { %v7213_v3 = vadd.f32 %v7212_v8, %v7133_v62  ;;  %v15317_v46 = vor.u32 %v17824_v27, %v15314_v39 }
 0x79e   : > { %v7368_v31 = vadd.f32 %v7367_v38, %v7289_v24  ;;  %8039 = vmatmul.bf16.gmra.mxu0 %v15297_v35  ;;  %v15321_v35 = vor.u32 %v17827_v53, %v15320_v54 }
 0x79f   : > { %8118 = vmatmul.bf16.gmra.mxu1 %v15301_v5  ;;  %v15325_v5 = vor.u32 %v17825_v2, %v15322_v7 }
 0x7a0   : > { %v21378_v50 = vadd.f32 %v7368_v31, %v21086_v48  ;;  %8197 = vmatmul.bf16.gmra.mxu2 %v15305_v32  ;;  %v17946_v48 = vld [vmem:[%s22621_s1 + $0x950] sm:$0xff] }
 0x7a1   : > { %8276 = vmatmul.bf16.gmra.mxu3 %v15309_v29  ;;  %9017 = vmatpush.bf16.msrb.mxu1 %v17946_v48  ;;  %v17830_v48 = vld [vmem:[%s18446_s28 + $0x1ac] sm:$0xf0] }
 0x7a2   : > { %v15329_v39 = vor.u32 %v17830_v48, %v15328_v11  ;;  %v17835_v11 = vld [vmem:[%s18446_s28 + $0x1d4] sm:$0xf0]  ;;  %v17833_v48 = vld [vmem:[%s18446_s28 + $0x1cc] sm:$0xf] }
 0x7a3   : > { %v7291_v63 = vpop.f32.mrf.mxu2  ;;  %v7135_v34 = vpop.f32.mrf.mxu0 }
 0x7a4   : > { %v7370_v19 = vpop.f32.mrf.mxu3  ;;  %v7292_v41 = vadd.f32 %v7291_v63, %v7213_v3  ;;  %v7214_v26 = vpop.f32.mrf.mxu1  ;;  %v17828_v63 = vld [vmem:[%s18446_s28 + $0x1a4] sm:$0xf] }
 0x7a5   : > { %v7215_v28 = vadd.f32 %v7214_v26, %v7135_v34  ;;  %v17953_v34 = vld [vmem:[%s22621_s1 + $0x988] sm:$0xff] }
 0x7a6   : > { %v7371_v0 = vadd.f32 %v7370_v19, %v7292_v41  ;;  %v15330_v19 = vld [vmem:[%s18446_s28 + $0x1b0] sm:$0xf0]  ;;  %v17961_v26 = vld [vmem:[%s22621_s1 + $0x9c8] sm:$0xff]  ;;  %9097 = vmatpush.bf16.msrb.mxu2 %v17953_v34 }
 0x7a7   : > { %9176 = vmatpush.bf16.msrb.mxu3 %v17961_v26  ;;  %v15333_v54 = vor.u32 %v17828_v63, %v15330_v19  ;;  %v15354_v63 = vld [vmem:[%s18446_s28 + $0x1d8] sm:$0xf0] }
 0x7a8   : > { %v21395_v56 = vadd.f32 %v7371_v0, %v21103_v21  ;;  %v17829_v0 = vld [vmem:[%s18446_s28 + $0x1ac] sm:$0xf] }
 0x7ab   : > { %v7293_v12 = vpop.f32.mrf.mxu2  ;;  %v8005_v14 = vpop.f32.mrf.mxu0 }
 0x7ac   : > { %v7372_v60 = vpop.f32.mrf.mxu3  ;;  %v7294_v58 = vadd.f32 %v7293_v12, %v7215_v28  ;;  %v8084_v38 = vpop.f32.mrf.mxu1  ;;  %v17831_v28 = vld [vmem:[%s18446_s28 + $0x1b4] sm:$0xf0]  ;;  %v15341_v12 = vor.u32 %v17829_v0, %v15338_v30 }
 0x7ad   : > { %v8085_v24 = vadd.f32 %v8084_v38, %v8005_v14  ;;  %v17945_v14 = vld [vmem:[%s22621_s1 + $0x948] sm:$0xff] }
 0x7ae   : > { %v7373_v21 = vadd.f32 %v7372_v60, %v7294_v58  ;;  %8044 = vmatmul.bf16.gmra.mxu0 %v15313_v44  ;;  %v17937_v58 = vld [vmem:[%s22621_s1 + $0x908] sm:$0xff]  ;;  %9018 = vmatpush.bf16.msrb.mxu1 %v17945_v14  ;;  %v17838_v14 = vld [vmem:[%s18446_s28 + $0x1ec] sm:$0xf0] }
 0x7af   : > { %8123 = vmatmul.bf16.gmra.mxu1 %v15317_v46  ;;  %8939 = vmatpush.bf16.msrb.mxu0 %v17937_v58  ;;  %v15360_v58 = vld [vmem:[%s18446_s28 + $0x1e0] sm:$0xf] }
 0x7b0   : > { %v21404_v62 = vadd.f32 %v7373_v21, %v21112_v43  ;;  %8202 = vmatmul.bf16.gmra.mxu2 %v15321_v35  ;;  %v15336_v43 = vld [vmem:[%s18446_s28 + $0x1a8] sm:$0xf] }
 0x7b1   : > { %8281 = vmatmul.bf16.gmra.mxu3 %v15325_v5  ;;  %v15337_v7 = vor.u32 %v17831_v28, %v15336_v43 }
 0x7b3   : > { %v8163_v8 = vpop.f32.mrf.mxu2  ;;  %v8007_v3 = vpop.f32.mrf.mxu0 }
 0x7b4   : > { %v8242_v32 = vpop.f32.mrf.mxu3  ;;  %v8164_v29 = vadd.f32 %v8163_v8, %v8085_v24  ;;  %v8086_v31 = vpop.f32.mrf.mxu1 }
 0x7b5   : > { %v8087_v9 = vadd.f32 %v8086_v31, %v8007_v3  ;;  %v17832_v31 = vld [vmem:[%s18446_s28 + $0x1c4] sm:$0xf] }
 0x7b6   : > { %v8243_v40 = vadd.f32 %v8242_v32, %v8164_v29  ;;  %v15344_v32 = vld [vmem:[%s18446_s28 + $0x1c0] sm:$0xf]  ;;  %v17834_v29 = vld [vmem:[%s18446_s28 + $0x1cc] sm:$0xf0] }
 0x7b7   : > { %v15345_v34 = vor.u32 %v17834_v29, %v15344_v32  ;;  %v17837_v32 = vld [vmem:[%s18446_s28 + $0x1ec] sm:$0xf]  ;;  %v15370_v29 = vld [vmem:[%s18446_s28 + $0x1f8] sm:$0xf0] }
 0x7b8   : > { %v21411_v41 = vadd.f32 %v8243_v40, %v21119_v45  ;;  %v15352_v40 = vld [vmem:[%s18446_s28 + $0x1c8] sm:$0xf] }
 0x7bb   : > { %v8165_v33 = vpop.f32.mrf.mxu2  ;;  %v8010_v53 = vpop.f32.mrf.mxu0 }
 0x7bc   : > { %v8244_v27 = vpop.f32.mrf.mxu3  ;;  %v8166_v45 = vadd.f32 %v8165_v33, %v8087_v9  ;;  %v8089_v2 = vpop.f32.mrf.mxu1  ;;  %v15346_v9 = vld [vmem:[%s18446_s28 + $0x1d0] sm:$0xf0]  ;;  %v15353_v33 = vor.u32 %v17835_v11, %v15352_v40  ;;  %v15361_v40 = vor.u32 %v17838_v14, %v15360_v58  ;;  %v17843_v58 = vld [vmem:[%s18446_s28 + $0x214] sm:$0xf0]  ;;  %v17841_v14 = vld [vmem:[%s18446_s28 + $0x20c] sm:$0xf] }
 0x7bd   : > { %v8090_v60 = vadd.f32 %v8089_v2, %v8010_v53  ;;  %v15349_v26 = vor.u32 %v17832_v31, %v15346_v9  ;;  %v17944_v31 = vld [vmem:[%s22621_s1 + $0x940] sm:$0xff] }
 0x7be   : > { %v8245_v44 = vadd.f32 %v8244_v27, %v8166_v45  ;;  %8049 = vmatmul.bf16.gmra.mxu0 %v15329_v39  ;;  %v15357_v27 = vor.u32 %v17833_v48, %v15354_v63  ;;  %9019 = vmatpush.bf16.msrb.mxu1 %v17944_v31 }
 0x7bf   : > { %8128 = vmatmul.bf16.gmra.mxu1 %v15333_v54 }
 0x7c0   : > { %v21424_v46 = vadd.f32 %v8245_v44, %v21132_v20  ;;  %8207 = vmatmul.bf16.gmra.mxu2 %v15337_v7 }
 0x7c1   : > { %8286 = vmatmul.bf16.gmra.mxu3 %v15341_v12 }
 0x7c3   : > { %v8168_v20 = vpop.f32.mrf.mxu2  ;;  %v8012_v5 = vpop.f32.mrf.mxu0 }
 0x7c4   : > { %v8247_v38 = vpop.f32.mrf.mxu3  ;;  %v8169_v35 = vadd.f32 %v8168_v20, %v8090_v60  ;;  %v8091_v24 = vpop.f32.mrf.mxu1  ;;  %v17836_v20 = vld [vmem:[%s18446_s28 + $0x1e4] sm:$0xf] }
 0x7c5   : > { %v8092_v21 = vadd.f32 %v8091_v24, %v8012_v5  ;;  %v17839_v5 = vld [vmem:[%s18446_s28 + $0x1f4] sm:$0xf0]  ;;  %v17952_v24 = vld [vmem:[%s22621_s1 + $0x980] sm:$0xff] }
 0x7c6   : > { %v8248_v8 = vadd.f32 %v8247_v38, %v8169_v35  ;;  %v15362_v38 = vld [vmem:[%s18446_s28 + $0x1f0] sm:$0xf0]  ;;  %v15368_v35 = vld [vmem:[%s18446_s28 + $0x1e8] sm:$0xf]  ;;  %9098 = vmatpush.bf16.msrb.mxu2 %v17952_v24 }
 0x7c7   : > { %v15365_v11 = vor.u32 %v17836_v20, %v15362_v38  ;;  %v15386_v20 = vld [vmem:[%s18446_s28 + $0x218] sm:$0xf0] }
 0x7c8   : > { %v21435_v3 = vadd.f32 %v8248_v8, %v21143_v42  ;;  %v17936_v8 = vld [vmem:[%s22621_s1 + $0x900] sm:$0xff]  ;;  %v15389_v31 = vor.u32 %v17841_v14, %v15386_v20 }
 0x7c9   : > { %8940 = vmatpush.bf16.msrb.mxu0 %v17936_v8 }
 0x7cb   : > { %v8170_v19 = vpop.f32.mrf.mxu2  ;;  %v8015_v0 = vpop.f32.mrf.mxu0 }
 0x7cc   : > { %v8249_v43 = vpop.f32.mrf.mxu3  ;;  %v8171_v28 = vadd.f32 %v8170_v19, %v8092_v21  ;;  %v8094_v30 = vpop.f32.mrf.mxu1  ;;  %v17960_v21 = vld [vmem:[%s22621_s1 + $0x9c0] sm:$0xff] }
 0x7cd   : > { %v8095_v39 = vadd.f32 %v8094_v30, %v8015_v0  ;;  %9177 = vmatpush.bf16.msrb.mxu3 %v17960_v21 }
 0x7ce   : > { %v8250_v42 = vadd.f32 %v8249_v43, %v8171_v28  ;;  %8054 = vmatmul.bf16.gmra.mxu0 %v15345_v34  ;;  %v15369_v43 = vor.u32 %v17839_v5, %v15368_v35  ;;  %v15373_v34 = vor.u32 %v17837_v32, %v15370_v29 }
 0x7cf   : > { %8133 = vmatmul.bf16.gmra.mxu1 %v15349_v26 }
 0x7d0   : > { %v21444_v54 = vadd.f32 %v8250_v42, %v21152_v25  ;;  %8212 = vmatmul.bf16.gmra.mxu2 %v15353_v33 }
 0x7d1   : > { %8291 = vmatmul.bf16.gmra.mxu3 %v15357_v27 }
 0x7d3   : > { %v8173_v45 = vpop.f32.mrf.mxu2  ;;  %v8017_v7 = vpop.f32.mrf.mxu0 }
 0x7d4   : > { %v8252_v53 = vpop.f32.mrf.mxu3  ;;  %v8174_v2 = vadd.f32 %v8173_v45, %v8095_v39  ;;  %v8096_v12 = vpop.f32.mrf.mxu1 }
 0x7d5   : > { %v8097_v60 = vadd.f32 %v8096_v12, %v8017_v7  ;;  %v17842_v7 = vld [vmem:[%s18446_s28 + $0x20c] sm:$0xf0] }
 0x7d6   : > { %v8253_v44 = vadd.f32 %v8252_v53, %v8174_v2  ;;  %v15376_v2 = vld [vmem:[%s18446_s28 + $0x200] sm:$0xf] }
 0x7d7   : > { %v15377_v5 = vor.u32 %v17842_v7, %v15376_v2  ;;  %v17847_v2 = vld [vmem:[%s18446_s28 + $0x234] sm:$0xf0]  ;;  %v17845_v7 = vld [vmem:[%s18446_s28 + $0x22c] sm:$0xf] }
 0x7d8   : > { %v21453_v25 = vadd.f32 %v8253_v44, %v21161_v15  ;;  %v15384_v44 = vld [vmem:[%s18446_s28 + $0x208] sm:$0xf] }
 0x7d9   : > { %v15385_v29 = vor.u32 %v17843_v58, %v15384_v44 }
 0x7db   : > { %v8175_v15 = vpop.f32.mrf.mxu2  ;;  %v8020_v63 = vpop.f32.mrf.mxu0 }
 0x7dc   : > { %v8254_v9 = vpop.f32.mrf.mxu3  ;;  %v8176_v48 = vadd.f32 %v8175_v15, %v8097_v60  ;;  %v8099_v19 = vpop.f32.mrf.mxu1  ;;  %v17840_v60 = vld [vmem:[%s18446_s28 + $0x204] sm:$0xf] }
 0x7dd   : > { %v8100_v26 = vadd.f32 %v8099_v19, %v8020_v63 }
 0x7de   : > { %v8255_v28 = vadd.f32 %v8254_v9, %v8176_v48  ;;  %8059 = vmatmul.bf16.gmra.mxu0 %v15361_v40  ;;  %v18047_v40 = vld [vmem:[%s22621_s1 + $0xab8] sm:$0xff] }
 0x7df   : > { %8138 = vmatmul.bf16.gmra.mxu1 %v15365_v11  ;;  %v18055_v11 = vld [vmem:[%s22621_s1 + $0xaf8] sm:$0xff]  ;;  %10028 = vmatpush.bf16.msra.mxu2 %v18047_v40 }
 0x7e0   : > { %v21470_v0 = vadd.f32 %v8255_v28, %v21178_v59  ;;  %8217 = vmatmul.bf16.gmra.mxu2 %v15369_v43  ;;  %v15378_v59 = vld [vmem:[%s18446_s28 + $0x210] sm:$0xf0]  ;;  %10107 = vmatpush.bf16.msra.mxu3 %v18055_v11  ;;  %v15392_v28 = vld [vmem:[%s18446_s28 + $0x220] sm:$0xf] }
 0x7e1   : > { %8296 = vmatmul.bf16.gmra.mxu3 %v15373_v34  ;;  %v15381_v24 = vor.u32 %v17840_v60, %v15378_v59  ;;  %v15402_v60 = vld [vmem:[%s18446_s28 + $0x238] sm:$0xf0] }
 0x7e3   : > { %v8178_v30 = vpop.f32.mrf.mxu2  ;;  %v8022_v39 = vpop.f32.mrf.mxu0 }
 0x7e4   : > { %v8257_v33 = vpop.f32.mrf.mxu3  ;;  %v8179_v27 = vadd.f32 %v8178_v30, %v8100_v26  ;;  %v8101_v42 = vpop.f32.mrf.mxu1  ;;  %v17846_v30 = vld [vmem:[%s18446_s28 + $0x22c] sm:$0xf0] }
 0x7e5   : > { %v8102_v45 = vadd.f32 %v8101_v42, %v8022_v39  ;;  %v15400_v42 = vld [vmem:[%s18446_s28 + $0x228] sm:$0xf]  ;;  %v15393_v58 = vor.u32 %v17846_v30, %v15392_v28  ;;  %v15610_v28 = vld [vmem:[%s18446_s28 + $0xa8] sm:$0xf0] }
 0x7e6   : > { %v8258_v53 = vadd.f32 %v8257_v33, %v8179_v27  ;;  %v17844_v33 = vld [vmem:[%s18446_s28 + $0x224] sm:$0xf]  ;;  %v15394_v27 = vld [vmem:[%s18446_s28 + $0x230] sm:$0xf0] }
 0x7e7   : > { %v15397_v14 = vor.u32 %v17844_v33, %v15394_v27 }
 0x7e8   : > { %v21475_v12 = vadd.f32 %v8258_v53, %v21183_v47  ;;  %v18039_v53 = vld [vmem:[%s22621_s1 + $0xa78] sm:$0xff] }
 0x7e9   : > { %9949 = vmatpush.bf16.msra.mxu1 %v18039_v53 }
 0x7eb   : > { %v8180_v38 = vpop.f32.mrf.mxu2  ;;  %v8025_v8 = vpop.f32.mrf.mxu0 }
 0x7ec   : > { %v8259_v35 = vpop.f32.mrf.mxu3  ;;  %v8181_v21 = vadd.f32 %v8180_v38, %v8102_v45  ;;  %v8104_v32 = vpop.f32.mrf.mxu1  ;;  %v18031_v45 = vld [vmem:[%s22621_s1 + $0xa38] sm:$0xff] }
 0x7ed   : > { %v8105_v15 = vadd.f32 %v8104_v32, %v8025_v8  ;;  %9870 = vmatpush.bf16.msra.mxu0 %v18031_v45 }
 0x7ee   : > { %v8260_v9 = vadd.f32 %v8259_v35, %v8181_v21  ;;  %8064 = vmatmul.bf16.gmra.mxu0 %v15377_v5  ;;  %v15401_v35 = vor.u32 %v17847_v2, %v15400_v42  ;;  %v15405_v5 = vor.u32 %v17845_v7, %v15402_v60 }
 0x7ef   : > { %8143 = vmatmul.bf16.gmra.mxu1 %v15381_v24 }
 0x7f0   : > { %v21484_v47 = vadd.f32 %v8260_v9, %v21192_v1  ;;  %8222 = vmatmul.bf16.gmra.mxu2 %v15385_v29 }
 0x7f1   : > { %8301 = vmatmul.bf16.gmra.mxu3 %v15389_v31 }
 0x7f3   : > { %v8183_v48 = vpop.f32.mrf.mxu2  ;;  %v8027_v19 = vpop.f32.mrf.mxu0 }
 0x7f4   : > { %v8262_v1 = vpop.f32.mrf.mxu3  ;;  %v8184_v63 = vadd.f32 %v8183_v48, %v8105_v15  ;;  %v8106_v43 = vpop.f32.mrf.mxu1  ;;  %v15600_v48 = vld [vmem:[%s18446_s28 + $0x90] sm:$0xf] }
 0x7f5   : > { %v8107_v34 = vadd.f32 %v8106_v43, %v8027_v19  ;;  %v17880_v19 = vld [vmem:[%s18446_s28 + $0x94] sm:$0xf]  ;;  %v15608_v43 = vld [vmem:[%s18446_s28 + $0x98] sm:$0xf] }
 0x7f6   : > { %v8263_v26 = vadd.f32 %v8262_v1, %v8184_v63  ;;  %v17882_v1 = vld [vmem:[%s18446_s28 + $0x9c] sm:$0xf0] }
 0x7f7   : > { %v15601_v27 = vor.u32 %v17882_v1, %v15600_v48  ;;  %v17887_v48 = vld [vmem:[%s18446_s28 + $0xc4] sm:$0xf0]  ;;  %v17885_v1 = vld [vmem:[%s18446_s28 + $0xbc] sm:$0xf] }
 0x7f8   : > { %v21497_v39 = vadd.f32 %v8263_v26, %v21205_v16  ;;  %v17881_v26 = vld [vmem:[%s18446_s28 + $0x9c] sm:$0xf] }
 0x7f9   : > { %v15613_v60 = vor.u32 %v17881_v26, %v15610_v28 }
 0x7fb   : > { %v8185_v59 = vpop.f32.mrf.mxu2  ;;  %v8030_v20 = vpop.f32.mrf.mxu0 }
 0x7fc   : > { %v8264_v44 = vpop.f32.mrf.mxu3  ;;  %v8186_v16 = vadd.f32 %v8185_v59, %v8107_v34  ;;  %v8109_v38 = vpop.f32.mrf.mxu1  ;;  %v17883_v34 = vld [vmem:[%s18446_s28 + $0xa4] sm:$0xf0] }
 0x7fd   : > { %v8110_v24 = vadd.f32 %v8109_v38, %v8030_v20  ;;  %v15609_v7 = vor.u32 %v17883_v34, %v15608_v43 }
 0x7fe   : > { %v8265_v21 = vadd.f32 %v8264_v44, %v8186_v16  ;;  %8069 = vmatmul.bf16.gmra.mxu0 %v15393_v58  ;;  %v18046_v58 = vld [vmem:[%s22621_s1 + $0xab0] sm:$0xff] }
 0x7ff   : > { %8148 = vmatmul.bf16.gmra.mxu1 %v15397_v14  ;;  %v18054_v14 = vld [vmem:[%s22621_s1 + $0xaf0] sm:$0xff]  ;;  %10029 = vmatpush.bf16.msra.mxu2 %v18046_v58 }
 0x800   : > { %v21510_v8 = vadd.f32 %v8265_v21, %v21218_v55  ;;  %8227 = vmatmul.bf16.gmra.mxu2 %v15401_v35  ;;  %v15602_v55 = vld [vmem:[%s18446_s28 + $0xa0] sm:$0xf0]  ;;  %v18030_v16 = vld [vmem:[%s22621_s1 + $0xa30] sm:$0xff]  ;;  %10108 = vmatpush.bf16.msra.mxu3 %v18054_v14 }
 0x801   : > { %8306 = vmatmul.bf16.gmra.mxu3 %v15405_v5  ;;  %v15605_v42 = vor.u32 %v17880_v19, %v15602_v55  ;;  %9871 = vmatpush.bf16.msra.mxu0 %v18030_v16  ;;  %v15626_v19 = vld [vmem:[%s18446_s28 + $0xc8] sm:$0xf0]  ;;  %v15632_v16 = vld [vmem:[%s18446_s28 + $0xd0] sm:$0xf] }
 0x803   : > { %v8188_v32 = vpop.f32.mrf.mxu2  ;;  %v8032_v15 = vpop.f32.mrf.mxu0 }
 0x804   : > { %v8267_v29 = vpop.f32.mrf.mxu3  ;;  %v8189_v31 = vadd.f32 %v8188_v32, %v8110_v24  ;;  %v8111_v9 = vpop.f32.mrf.mxu1 }
 0x805   : > { %v8112_v40 = vadd.f32 %v8111_v9, %v8032_v15  ;;  %v17884_v9 = vld [vmem:[%s18446_s28 + $0xb4] sm:$0xf] }
 0x806   : > { %v8268_v11 = vadd.f32 %v8267_v29, %v8189_v31  ;;  %v15616_v29 = vld [vmem:[%s18446_s28 + $0xb0] sm:$0xf]  ;;  %v17886_v31 = vld [vmem:[%s18446_s28 + $0xbc] sm:$0xf0] }
 0x807   : > { %v15617_v34 = vor.u32 %v17886_v31, %v15616_v29  ;;  %v15642_v29 = vld [vmem:[%s18446_s28 + $0xe8] sm:$0xf0] }
 0x808   : > { %v21515_v63 = vadd.f32 %v8268_v11, %v21223_v22  ;;  %v15624_v11 = vld [vmem:[%s18446_s28 + $0xb8] sm:$0xf] }
 0x80b   : > { %v8190_v30 = vpop.f32.mrf.mxu2  ;;  %v8035_v53 = vpop.f32.mrf.mxu0 }
 0x80c   : > { %v8269_v33 = vpop.f32.mrf.mxu3  ;;  %v8191_v45 = vadd.f32 %v8190_v30, %v8112_v40  ;;  %v8114_v2 = vpop.f32.mrf.mxu1  ;;  %v15618_v40 = vld [vmem:[%s18446_s28 + $0xc0] sm:$0xf0] }
 0x80d   : > { %v8115_v59 = vadd.f32 %v8114_v2, %v8035_v53  ;;  %v15621_v26 = vor.u32 %v17884_v9, %v15618_v40 }
 0x80e   : > { %v8270_v44 = vadd.f32 %v8269_v33, %v8191_v45  ;;  %8941 = vmatmul.bf16.vlgmr.msrb.gmra.mxu0 %v15601_v27  ;;  %v15625_v27 = vor.u32 %v17887_v48, %v15624_v11 }
 0x80f   : > { %9020 = vmatmul.bf16.vlgmr.msrb.gmra.mxu1 %v15605_v42  ;;  %v15629_v42 = vor.u32 %v17885_v1, %v15626_v19 }
 0x810   : > { %v21524_v22 = vadd.f32 %v8270_v44, %v21232_v52  ;;  %9099 = vmatmul.bf16.vlgmr.msrb.gmra.mxu2 %v15609_v7  ;;  %v18038_v52 = vld [vmem:[%s22621_s1 + $0xa70] sm:$0xff] }
 0x811   : > { %9178 = vmatmul.bf16.vlgmr.msrb.gmra.mxu3 %v15613_v60  ;;  %9950 = vmatpush.bf16.msra.mxu1 %v18038_v52  ;;  %v17890_v52 = vld [vmem:[%s18446_s28 + $0xdc] sm:$0xf0] }
 0x812   : > { %v15633_v40 = vor.u32 %v17890_v52, %v15632_v16  ;;  %v17895_v16 = vld [vmem:[%s18446_s28 + $0x104] sm:$0xf0]  ;;  %v17893_v52 = vld [vmem:[%s18446_s28 + $0xfc] sm:$0xf] }
 0x813   : > { %v8193_v20 = vpop.f32.mrf.mxu2  ;;  %v8037_v5 = vpop.f32.mrf.mxu0 }
 0x814   : > { %v8272_v38 = vpop.f32.mrf.mxu3  ;;  %v8194_v35 = vadd.f32 %v8193_v20, %v8115_v59  ;;  %v8116_v24 = vpop.f32.mrf.mxu1  ;;  %v17888_v20 = vld [vmem:[%s18446_s28 + $0xd4] sm:$0xf] }
 0x815   : > { %v8117_v21 = vadd.f32 %v8116_v24, %v8037_v5  ;;  %v18045_v5 = vld [vmem:[%s22621_s1 + $0xaa8] sm:$0xff] }
 0x816   : > { %v8273_v32 = vadd.f32 %v8272_v38, %v8194_v35  ;;  %v15634_v38 = vld [vmem:[%s18446_s28 + $0xe0] sm:$0xf0]  ;;  %v18053_v24 = vld [vmem:[%s22621_s1 + $0xae8] sm:$0xff]  ;;  %10030 = vmatpush.bf16.msra.mxu2 %v18045_v5 }
 0x817   : > { %10109 = vmatpush.bf16.msra.mxu3 %v18053_v24  ;;  %v15637_v11 = vor.u32 %v17888_v20, %v15634_v38  ;;  %v15658_v20 = vld [vmem:[%s18446_s28 + $0x108] sm:$0xf0] }
 0x818   : > { %v21541_v15 = vadd.f32 %v8273_v32, %v21249_v10  ;;  %v17889_v32 = vld [vmem:[%s18446_s28 + $0xdc] sm:$0xf] }
 0x81b   : > { %v8195_v55 = vpop.f32.mrf.mxu2  ;;  %v8040_v30 = vpop.f32.mrf.mxu0 }
 0x81c   : > { %v8274_v43 = vpop.f32.mrf.mxu3  ;;  %v8196_v28 = vadd.f32 %v8195_v55, %v8117_v21  ;;  %v8119_v33 = vpop.f32.mrf.mxu1  ;;  %v17891_v21 = vld [vmem:[%s18446_s28 + $0xe4] sm:$0xf0]  ;;  %v15645_v55 = vor.u32 %v17889_v32, %v15642_v29 }
 0x81d   : > { %v8120_v45 = vadd.f32 %v8119_v33, %v8040_v30  ;;  %v18037_v30 = vld [vmem:[%s22621_s1 + $0xa68] sm:$0xff] }
 0x81e   : > { %v8275_v10 = vadd.f32 %v8274_v43, %v8196_v28  ;;  %8946 = vmatmul.bf16.gmra.mxu0 %v15617_v34  ;;  %v18029_v28 = vld [vmem:[%s22621_s1 + $0xa28] sm:$0xff]  ;;  %9951 = vmatpush.bf16.msra.mxu1 %v18037_v30  ;;  %v17898_v30 = vld [vmem:[%s18446_s28 + $0x11c] sm:$0xf0] }
 0x81f   : > { %9025 = vmatmul.bf16.gmra.mxu1 %v15621_v26  ;;  %9872 = vmatpush.bf16.msra.mxu0 %v18029_v28  ;;  %v15664_v28 = vld [vmem:[%s18446_s28 + $0x110] sm:$0xf] }
 0x820   : > { %v21550_v53 = vadd.f32 %v8275_v10, %v21258_v23  ;;  %9104 = vmatmul.bf16.gmra.mxu2 %v15625_v27  ;;  %v15640_v23 = vld [vmem:[%s18446_s28 + $0xd8] sm:$0xf] }
 0x821   : > { %9183 = vmatmul.bf16.gmra.mxu3 %v15629_v42  ;;  %v15641_v19 = vor.u32 %v17891_v21, %v15640_v23 }
 0x823   : > { %v8198_v2 = vpop.f32.mrf.mxu2  ;;  %v8042_v59 = vpop.f32.mrf.mxu0 }
 0x824   : > { %v8277_v7 = vpop.f32.mrf.mxu3  ;;  %v8199_v60 = vadd.f32 %v8198_v2, %v8120_v45  ;;  %v8121_v44 = vpop.f32.mrf.mxu1 }
 0x825   : > { %v8122_v58 = vadd.f32 %v8121_v44, %v8042_v59  ;;  %v17892_v44 = vld [vmem:[%s18446_s28 + $0xf4] sm:$0xf] }
 0x826   : > { %v8278_v14 = vadd.f32 %v8277_v7, %v8199_v60  ;;  %v15648_v7 = vld [vmem:[%s18446_s28 + $0xf0] sm:$0xf]  ;;  %v17894_v60 = vld [vmem:[%s18446_s28 + $0xfc] sm:$0xf0] }
 0x827   : > { %v15649_v5 = vor.u32 %v17894_v60, %v15648_v7  ;;  %v17897_v7 = vld [vmem:[%s18446_s28 + $0x11c] sm:$0xf]  ;;  %v15674_v60 = vld [vmem:[%s18446_s28 + $0x128] sm:$0xf0] }
 0x828   : > { %v21557_v35 = vadd.f32 %v8278_v14, %v21265_v51  ;;  %v15656_v14 = vld [vmem:[%s18446_s28 + $0xf8] sm:$0xf] }
 0x82b   : > { %v8200_v31 = vpop.f32.mrf.mxu2  ;;  %v8045_v48 = vpop.f32.mrf.mxu0 }
 0x82c   : > { %v8279_v9 = vpop.f32.mrf.mxu3  ;;  %v8201_v51 = vadd.f32 %v8200_v31, %v8122_v58  ;;  %v8124_v1 = vpop.f32.mrf.mxu1  ;;  %v15650_v58 = vld [vmem:[%s18446_s28 + $0x100] sm:$0xf0]  ;;  %v15657_v31 = vor.u32 %v17895_v16, %v15656_v14  ;;  %v15665_v14 = vor.u32 %v17898_v30, %v15664_v28  ;;  %v17903_v28 = vld [vmem:[%s18446_s28 + $0x144] sm:$0xf0]  ;;  %v17901_v30 = vld [vmem:[%s18446_s28 + $0x13c] sm:$0xf] }
 0x82d   : > { %v8125_v43 = vadd.f32 %v8124_v1, %v8045_v48  ;;  %v15653_v24 = vor.u32 %v17892_v44, %v15650_v58  ;;  %v18036_v44 = vld [vmem:[%s22621_s1 + $0xa60] sm:$0xff] }
 0x82e   : > { %v8280_v34 = vadd.f32 %v8279_v9, %v8201_v51  ;;  %8951 = vmatmul.bf16.gmra.mxu0 %v15633_v40  ;;  %v15661_v9 = vor.u32 %v17893_v52, %v15658_v20  ;;  %9952 = vmatpush.bf16.msra.mxu1 %v18036_v44 }
 0x82f   : > { %9030 = vmatmul.bf16.gmra.mxu1 %v15637_v11 }
 0x830   : > { %v21570_v26 = vadd.f32 %v8280_v34, %v21278_v4  ;;  %9109 = vmatmul.bf16.gmra.mxu2 %v15641_v19 }
 0x831   : > { %9188 = vmatmul.bf16.gmra.mxu3 %v15645_v55 }
 0x833   : > { %v8203_v4 = vpop.f32.mrf.mxu2  ;;  %v8047_v42 = vpop.f32.mrf.mxu0 }
 0x834   : > { %v8282_v33 = vpop.f32.mrf.mxu3  ;;  %v8204_v27 = vadd.f32 %v8203_v4, %v8125_v43  ;;  %v8126_v45 = vpop.f32.mrf.mxu1  ;;  %v17896_v4 = vld [vmem:[%s18446_s28 + $0x114] sm:$0xf] }
 0x835   : > { %v8127_v10 = vadd.f32 %v8126_v45, %v8047_v42  ;;  %v17899_v42 = vld [vmem:[%s18446_s28 + $0x124] sm:$0xf0]  ;;  %v18044_v45 = vld [vmem:[%s22621_s1 + $0xaa0] sm:$0xff] }
 0x836   : > { %v8283_v2 = vadd.f32 %v8282_v33, %v8204_v27  ;;  %v15666_v33 = vld [vmem:[%s18446_s28 + $0x120] sm:$0xf0]  ;;  %v15672_v27 = vld [vmem:[%s18446_s28 + $0x118] sm:$0xf]  ;;  %10031 = vmatpush.bf16.msra.mxu2 %v18044_v45 }
 0x837   : > { %v15669_v16 = vor.u32 %v17896_v4, %v15666_v33  ;;  %v15690_v4 = vld [vmem:[%s18446_s28 + $0x148] sm:$0xf0] }
 0x838   : > { %v21581_v59 = vadd.f32 %v8283_v2, %v21289_v49  ;;  %v18028_v2 = vld [vmem:[%s22621_s1 + $0xa20] sm:$0xff]  ;;  %v15693_v44 = vor.u32 %v17901_v30, %v15690_v4 }
 0x839   : > { %9873 = vmatpush.bf16.msra.mxu0 %v18028_v2 }
 0x83b   : > { %v8205_v38 = vpop.f32.mrf.mxu2  ;;  %v8050_v32 = vpop.f32.mrf.mxu0 }
 0x83c   : > { %v8284_v23 = vpop.f32.mrf.mxu3  ;;  %v8206_v21 = vadd.f32 %v8205_v38, %v8127_v10  ;;  %v8129_v29 = vpop.f32.mrf.mxu1  ;;  %v18052_v10 = vld [vmem:[%s22621_s1 + $0xae0] sm:$0xff] }
 0x83d   : > { %v8130_v40 = vadd.f32 %v8129_v29, %v8050_v32  ;;  %10110 = vmatpush.bf16.msra.mxu3 %v18052_v10 }
 0x83e   : > { %v8285_v49 = vadd.f32 %v8284_v23, %v8206_v21  ;;  %8956 = vmatmul.bf16.gmra.mxu0 %v15649_v5  ;;  %v15673_v23 = vor.u32 %v17899_v42, %v15672_v27  ;;  %v15677_v5 = vor.u32 %v17897_v7, %v15674_v60 }
 0x83f   : > { %9035 = vmatmul.bf16.gmra.mxu1 %v15653_v24 }
 0x840   : > { %v21590_v11 = vadd.f32 %v8285_v49, %v21298_v57  ;;  %9114 = vmatmul.bf16.gmra.mxu2 %v15657_v31 }
 0x841   : > { %9193 = vmatmul.bf16.gmra.mxu3 %v15661_v9 }
 0x843   : > { %v8208_v51 = vpop.f32.mrf.mxu2  ;;  %v8052_v19 = vpop.f32.mrf.mxu0 }
 0x844   : > { %v8287_v48 = vpop.f32.mrf.mxu3  ;;  %v8209_v1 = vadd.f32 %v8208_v51, %v8130_v40  ;;  %v8131_v55 = vpop.f32.mrf.mxu1 }
 0x845   : > { %v8132_v43 = vadd.f32 %v8131_v55, %v8052_v19  ;;  %v17902_v19 = vld [vmem:[%s18446_s28 + $0x13c] sm:$0xf0] }
 0x846   : > { %v8288_v34 = vadd.f32 %v8287_v48, %v8209_v1  ;;  %v15680_v1 = vld [vmem:[%s18446_s28 + $0x130] sm:$0xf] }
 0x847   : > { %v15681_v42 = vor.u32 %v17902_v19, %v15680_v1  ;;  %v17907_v1 = vld [vmem:[%s18446_s28 + $0x164] sm:$0xf0]  ;;  %v17905_v19 = vld [vmem:[%s18446_s28 + $0x15c] sm:$0xf] }
 0x848   : > { %v21599_v57 = vadd.f32 %v8288_v34, %v21307_v61  ;;  %v15688_v34 = vld [vmem:[%s18446_s28 + $0x138] sm:$0xf] }
 0x849   : > { %v15689_v60 = vor.u32 %v17903_v28, %v15688_v34 }
 0x84b   : > { %v8210_v61 = vpop.f32.mrf.mxu2  ;;  %v8055_v20 = vpop.f32.mrf.mxu0 }
 0x84c   : > { %v8289_v58 = vpop.f32.mrf.mxu3  ;;  %v8211_v52 = vadd.f32 %v8210_v61, %v8132_v43  ;;  %v8134_v38 = vpop.f32.mrf.mxu1  ;;  %v17900_v43 = vld [vmem:[%s18446_s28 + $0x134] sm:$0xf] }
 0x84d   : > { %v8135_v24 = vadd.f32 %v8134_v38, %v8055_v20 }
 0x84e   : > { %v8290_v21 = vadd.f32 %v8289_v58, %v8211_v52  ;;  %8961 = vmatmul.bf16.gmra.mxu0 %v15665_v14  ;;  %v18043_v14 = vld [vmem:[%s22621_s1 + $0xa98] sm:$0xff] }
 0x84f   : > { %9040 = vmatmul.bf16.gmra.mxu1 %v15669_v16  ;;  %v18051_v16 = vld [vmem:[%s22621_s1 + $0xad8] sm:$0xff]  ;;  %10032 = vmatpush.bf16.msra.mxu2 %v18043_v14 }
 0x850   : > { %v21616_v32 = vadd.f32 %v8290_v21, %v21324_v13  ;;  %9119 = vmatmul.bf16.gmra.mxu2 %v15673_v23  ;;  %v15682_v13 = vld [vmem:[%s18446_s28 + $0x140] sm:$0xf0]  ;;  %10111 = vmatpush.bf16.msra.mxu3 %v18051_v16  ;;  %v15696_v21 = vld [vmem:[%s18446_s28 + $0x150] sm:$0xf] }
 0x851   : > { %9198 = vmatmul.bf16.gmra.mxu3 %v15677_v5  ;;  %v15685_v45 = vor.u32 %v17900_v43, %v15682_v13  ;;  %v15706_v43 = vld [vmem:[%s18446_s28 + $0x168] sm:$0xf0] }
 0x853   : > { %v8213_v29 = vpop.f32.mrf.mxu2  ;;  %v8057_v40 = vpop.f32.mrf.mxu0 }
 0x854   : > { %v8292_v31 = vpop.f32.mrf.mxu3  ;;  %v8214_v9 = vadd.f32 %v8213_v29, %v8135_v24  ;;  %v8136_v49 = vpop.f32.mrf.mxu1  ;;  %v17906_v29 = vld [vmem:[%s18446_s28 + $0x15c] sm:$0xf0] }
 0x855   : > { %v8137_v51 = vadd.f32 %v8136_v49, %v8057_v40  ;;  %v15704_v49 = vld [vmem:[%s18446_s28 + $0x158] sm:$0xf]  ;;  %v15697_v28 = vor.u32 %v17906_v29, %v15696_v21  ;;  %v15722_v21 = vld [vmem:[%s18446_s28 + $0x188] sm:$0xf0] }
 0x856   : > { %v8293_v48 = vadd.f32 %v8292_v31, %v8214_v9  ;;  %v17904_v31 = vld [vmem:[%s18446_s28 + $0x154] sm:$0xf]  ;;  %v15698_v9 = vld [vmem:[%s18446_s28 + $0x160] sm:$0xf0] }
 0x857   : > { %v15701_v30 = vor.u32 %v17904_v31, %v15698_v9 }
 0x858   : > { %v21621_v55 = vadd.f32 %v8293_v48, %v21329_v36  ;;  %v18035_v48 = vld [vmem:[%s22621_s1 + $0xa58] sm:$0xff] }
 0x859   : > { %9953 = vmatpush.bf16.msra.mxu1 %v18035_v48 }
 0x85b   : > { %v8215_v33 = vpop.f32.mrf.mxu2  ;;  %v8060_v2 = vpop.f32.mrf.mxu0 }
 0x85c   : > { %v8294_v27 = vpop.f32.mrf.mxu3  ;;  %v8216_v10 = vadd.f32 %v8215_v33, %v8137_v51  ;;  %v8139_v7 = vpop.f32.mrf.mxu1  ;;  %v18027_v51 = vld [vmem:[%s22621_s1 + $0xa18] sm:$0xff] }
 0x85d   : > { %v8140_v61 = vadd.f32 %v8139_v7, %v8060_v2  ;;  %9874 = vmatpush.bf16.msra.mxu0 %v18027_v51 }
 0x85e   : > { %v8295_v58 = vadd.f32 %v8294_v27, %v8216_v10  ;;  %8966 = vmatmul.bf16.gmra.mxu0 %v15681_v42  ;;  %v15705_v27 = vor.u32 %v17907_v1, %v15704_v49  ;;  %v15709_v42 = vor.u32 %v17905_v19, %v15706_v43 }
 0x85f   : > { %9045 = vmatmul.bf16.gmra.mxu1 %v15685_v45 }
 0x860   : > { %v21630_v36 = vadd.f32 %v8295_v58, %v21338_v37  ;;  %9124 = vmatmul.bf16.gmra.mxu2 %v15689_v60 }
 0x861   : > { %9203 = vmatmul.bf16.gmra.mxu3 %v15693_v44 }
 0x863   : > { %v8218_v52 = vpop.f32.mrf.mxu2  ;;  %v8062_v38 = vpop.f32.mrf.mxu0 }
 0x864   : > { %v8297_v37 = vpop.f32.mrf.mxu3  ;;  %v8219_v20 = vadd.f32 %v8218_v52, %v8140_v61  ;;  %v8141_v23 = vpop.f32.mrf.mxu1  ;;  %v15712_v52 = vld [vmem:[%s18446_s28 + $0x170] sm:$0xf] }
 0x865   : > { %v8142_v5 = vadd.f32 %v8141_v23, %v8062_v38  ;;  %v17908_v38 = vld [vmem:[%s18446_s28 + $0x174] sm:$0xf]  ;;  %v15720_v23 = vld [vmem:[%s18446_s28 + $0x178] sm:$0xf] }
 0x866   : > { %v8298_v24 = vadd.f32 %v8297_v37, %v8219_v20  ;;  %v17910_v37 = vld [vmem:[%s18446_s28 + $0x17c] sm:$0xf0] }
 0x867   : > { %v15713_v9 = vor.u32 %v17910_v37, %v15712_v52  ;;  %v17915_v52 = vld [vmem:[%s18446_s28 + $0x1a4] sm:$0xf0]  ;;  %v17913_v37 = vld [vmem:[%s18446_s28 + $0x19c] sm:$0xf] }
 0x868   : > { %v21643_v40 = vadd.f32 %v8298_v24, %v21351_v6  ;;  %v17909_v24 = vld [vmem:[%s18446_s28 + $0x17c] sm:$0xf] }
 0x869   : > { %v15725_v43 = vor.u32 %v17909_v24, %v15722_v21 }
 0x86b   : > { %v8220_v13 = vpop.f32.mrf.mxu2  ;;  %v8065_v4 = vpop.f32.mrf.mxu0 }
 0x86c   : > { %v8299_v34 = vpop.f32.mrf.mxu3  ;;  %v8221_v6 = vadd.f32 %v8220_v13, %v8142_v5  ;;  %v8144_v33 = vpop.f32.mrf.mxu1  ;;  %v17911_v5 = vld [vmem:[%s18446_s28 + $0x184] sm:$0xf0] }
 0x86d   : > { %v8145_v45 = vadd.f32 %v8144_v33, %v8065_v4  ;;  %v15721_v19 = vor.u32 %v17911_v5, %v15720_v23 }
 0x86e   : > { %v8300_v10 = vadd.f32 %v8299_v34, %v8221_v6  ;;  %8971 = vmatmul.bf16.gmra.mxu0 %v15697_v28  ;;  %v18042_v28 = vld [vmem:[%s22621_s1 + $0xa90] sm:$0xff] }
 0x86f   : > { %9050 = vmatmul.bf16.gmra.mxu1 %v15701_v30  ;;  %v18050_v30 = vld [vmem:[%s22621_s1 + $0xad0] sm:$0xff]  ;;  %10033 = vmatpush.bf16.msra.mxu2 %v18042_v28 }
 0x870   : > { %v21656_v2 = vadd.f32 %v8300_v10, %v21364_v18  ;;  %9129 = vmatmul.bf16.gmra.mxu2 %v15705_v27  ;;  %v15714_v18 = vld [vmem:[%s18446_s28 + $0x180] sm:$0xf0]  ;;  %v18026_v6 = vld [vmem:[%s22621_s1 + $0xa10] sm:$0xff]  ;;  %10112 = vmatpush.bf16.msra.mxu3 %v18050_v30 }
 0x871   : > { %9208 = vmatmul.bf16.gmra.mxu3 %v15709_v42  ;;  %v15717_v49 = vor.u32 %v17908_v38, %v15714_v18  ;;  %9875 = vmatpush.bf16.msra.mxu0 %v18026_v6  ;;  %v15738_v38 = vld [vmem:[%s18446_s28 + $0x1a8] sm:$0xf0]  ;;  %v15744_v6 = vld [vmem:[%s18446_s28 + $0x1b0] sm:$0xf] }
 0x873   : > { %v8223_v7 = vpop.f32.mrf.mxu2  ;;  %v8067_v61 = vpop.f32.mrf.mxu0 }
 0x874   : > { %v8302_v60 = vpop.f32.mrf.mxu3  ;;  %v8224_v44 = vadd.f32 %v8223_v7, %v8145_v45  ;;  %v8146_v58 = vpop.f32.mrf.mxu1 }
 0x875   : > { %v8147_v14 = vadd.f32 %v8146_v58, %v8067_v61  ;;  %v17912_v58 = vld [vmem:[%s18446_s28 + $0x194] sm:$0xf] }
 0x876   : > { %v8303_v16 = vadd.f32 %v8302_v60, %v8224_v44  ;;  %v15728_v60 = vld [vmem:[%s18446_s28 + $0x190] sm:$0xf]  ;;  %v17914_v44 = vld [vmem:[%s18446_s28 + $0x19c] sm:$0xf0] }
 0x877   : > { %v15729_v5 = vor.u32 %v17914_v44, %v15728_v60  ;;  %v15754_v60 = vld [vmem:[%s18446_s28 + $0x1c8] sm:$0xf0] }
 0x878   : > { %v21661_v20 = vadd.f32 %v8303_v16, %v21369_v17  ;;  %v15736_v16 = vld [vmem:[%s18446_s28 + $0x198] sm:$0xf] }
 0x87b   : > { %v8225_v29 = vpop.f32.mrf.mxu2  ;;  %v8070_v48 = vpop.f32.mrf.mxu0 }
 0x87c   : > { %v8304_v31 = vpop.f32.mrf.mxu3  ;;  %v8226_v51 = vadd.f32 %v8225_v29, %v8147_v14  ;;  %v8149_v1 = vpop.f32.mrf.mxu1  ;;  %v15730_v14 = vld [vmem:[%s18446_s28 + $0x1a0] sm:$0xf0] }
 0x87d   : > { %v8150_v13 = vadd.f32 %v8149_v1, %v8070_v48  ;;  %v15733_v24 = vor.u32 %v17912_v58, %v15730_v14 }
 0x87e   : > { %v8305_v34 = vadd.f32 %v8304_v31, %v8226_v51  ;;  %8976 = vmatmul.bf16.gmra.mxu0 %v15713_v9  ;;  %v15737_v9 = vor.u32 %v17915_v52, %v15736_v16 }
 0x87f   : > { %9055 = vmatmul.bf16.gmra.mxu1 %v15717_v49  ;;  %v15741_v49 = vor.u32 %v17913_v37, %v15738_v38 }
 0x880   : > { %v21670_v17 = vadd.f32 %v8305_v34, %v21378_v50  ;;  %9134 = vmatmul.bf16.gmra.mxu2 %v15721_v19  ;;  %v18034_v50 = vld [vmem:[%s22621_s1 + $0xa50] sm:$0xff] }
 0x881   : > { %9213 = vmatmul.bf16.gmra.mxu3 %v15725_v43  ;;  %9954 = vmatpush.bf16.msra.mxu1 %v18034_v50  ;;  %v17918_v50 = vld [vmem:[%s18446_s28 + $0x1bc] sm:$0xf0] }
 0x882   : > { %v15745_v14 = vor.u32 %v17918_v50, %v15744_v6  ;;  %v17923_v6 = vld [vmem:[%s18446_s28 + $0x1e4] sm:$0xf0]  ;;  %v17921_v50 = vld [vmem:[%s18446_s28 + $0x1dc] sm:$0xf] }
 0x883   : > { %v8228_v4 = vpop.f32.mrf.mxu2  ;;  %v8072_v42 = vpop.f32.mrf.mxu0 }
 0x884   : > { %v8307_v33 = vpop.f32.mrf.mxu3  ;;  %v8229_v27 = vadd.f32 %v8228_v4, %v8150_v13  ;;  %v8151_v45 = vpop.f32.mrf.mxu1  ;;  %v17916_v4 = vld [vmem:[%s18446_s28 + $0x1b4] sm:$0xf] }
 0x885   : > { %v8152_v10 = vadd.f32 %v8151_v45, %v8072_v42  ;;  %v18041_v42 = vld [vmem:[%s22621_s1 + $0xa88] sm:$0xff] }
 0x886   : > { %v8308_v7 = vadd.f32 %v8307_v33, %v8229_v27  ;;  %v15746_v33 = vld [vmem:[%s18446_s28 + $0x1c0] sm:$0xf0]  ;;  %v18049_v45 = vld [vmem:[%s22621_s1 + $0xac8] sm:$0xff]  ;;  %10034 = vmatpush.bf16.msra.mxu2 %v18041_v42 }
 0x887   : > { %10113 = vmatpush.bf16.msra.mxu3 %v18049_v45  ;;  %v15749_v16 = vor.u32 %v17916_v4, %v15746_v33  ;;  %v15770_v4 = vld [vmem:[%s18446_s28 + $0x1e8] sm:$0xf0] }
 0x888   : > { %v21687_v61 = vadd.f32 %v8308_v7, %v21395_v56  ;;  %v17917_v7 = vld [vmem:[%s18446_s28 + $0x1bc] sm:$0xf] }
 0x88b   : > { %v8230_v18 = vpop.f32.mrf.mxu2  ;;  %v8942_v29 = vpop.f32.mrf.mxu0 }
 0x88c   : > { %v8309_v23 = vpop.f32.mrf.mxu3  ;;  %v8231_v21 = vadd.f32 %v8230_v18, %v8152_v10  ;;  %v9021_v31 = vpop.f32.mrf.mxu1  ;;  %v17919_v10 = vld [vmem:[%s18446_s28 + $0x1c4] sm:$0xf0]  ;;  %v15757_v18 = vor.u32 %v17917_v7, %v15754_v60 }
 0x88d   : > { %v9022_v51 = vadd.f32 %v9021_v31, %v8942_v29  ;;  %v18033_v29 = vld [vmem:[%s22621_s1 + $0xa48] sm:$0xff] }
 0x88e   : > { %v8310_v56 = vadd.f32 %v8309_v23, %v8231_v21  ;;  %8981 = vmatmul.bf16.gmra.mxu0 %v15729_v5  ;;  %v18025_v21 = vld [vmem:[%s22621_s1 + $0xa08] sm:$0xff]  ;;  %9955 = vmatpush.bf16.msra.mxu1 %v18033_v29  ;;  %v17926_v29 = vld [vmem:[%s18446_s28 + $0x1fc] sm:$0xf0] }
 0x88f   : > { %9060 = vmatmul.bf16.gmra.mxu1 %v15733_v24  ;;  %9876 = vmatpush.bf16.msra.mxu0 %v18025_v21  ;;  %v15776_v21 = vld [vmem:[%s18446_s28 + $0x1f0] sm:$0xf] }
 0x890   : > { %v21696_v48 = vadd.f32 %v8310_v56, %v21404_v62  ;;  %9139 = vmatmul.bf16.gmra.mxu2 %v15737_v9  ;;  %v15752_v62 = vld [vmem:[%s18446_s28 + $0x1b8] sm:$0xf] }
 0x891   : > { %9218 = vmatmul.bf16.gmra.mxu3 %v15741_v49  ;;  %v15753_v38 = vor.u32 %v17919_v10, %v15752_v62 }
 0x893   : > { %v9100_v1 = vpop.f32.mrf.mxu2  ;;  %v8944_v13 = vpop.f32.mrf.mxu0 }
 0x894   : > { %v9179_v19 = vpop.f32.mrf.mxu3  ;;  %v9101_v43 = vadd.f32 %v9100_v1, %v9022_v51  ;;  %v9023_v34 = vpop.f32.mrf.mxu1 }
 0x895   : > { %v9024_v28 = vadd.f32 %v9023_v34, %v8944_v13  ;;  %v17920_v34 = vld [vmem:[%s18446_s28 + $0x1d4] sm:$0xf] }
 0x896   : > { %v9180_v30 = vadd.f32 %v9179_v19, %v9101_v43  ;;  %v15760_v19 = vld [vmem:[%s18446_s28 + $0x1d0] sm:$0xf]  ;;  %v17922_v43 = vld [vmem:[%s18446_s28 + $0x1dc] sm:$0xf0] }
 0x897   : > { %v15761_v42 = vor.u32 %v17922_v43, %v15760_v19  ;;  %v17925_v19 = vld [vmem:[%s18446_s28 + $0x1fc] sm:$0xf]  ;;  %v15786_v43 = vld [vmem:[%s18446_s28 + $0x208] sm:$0xf0] }
 0x898   : > { %v21703_v27 = vadd.f32 %v9180_v30, %v21411_v41  ;;  %v15768_v30 = vld [vmem:[%s18446_s28 + $0x1d8] sm:$0xf] }
 0x89b   : > { %v9102_v44 = vpop.f32.mrf.mxu2  ;;  %v8947_v52 = vpop.f32.mrf.mxu0 }
 0x89c   : > { %v9181_v58 = vpop.f32.mrf.mxu3  ;;  %v9103_v41 = vadd.f32 %v9102_v44, %v9024_v28  ;;  %v9026_v37 = vpop.f32.mrf.mxu1  ;;  %v15762_v28 = vld [vmem:[%s18446_s28 + $0x1e0] sm:$0xf0]  ;;  %v15769_v44 = vor.u32 %v17923_v6, %v15768_v30  ;;  %v15777_v30 = vor.u32 %v17926_v29, %v15776_v21  ;;  %v17931_v21 = vld [vmem:[%s18446_s28 + $0x224] sm:$0xf0]  ;;  %v17929_v29 = vld [vmem:[%s18446_s28 + $0x21c] sm:$0xf] }
 0x89d   : > { %v9027_v23 = vadd.f32 %v9026_v37, %v8947_v52  ;;  %v15765_v45 = vor.u32 %v17920_v34, %v15762_v28  ;;  %v18032_v34 = vld [vmem:[%s22621_s1 + $0xa40] sm:$0xff] }
 0x89e   : > { %v9182_v5 = vadd.f32 %v9181_v58, %v9103_v41  ;;  %8986 = vmatmul.bf16.gmra.mxu0 %v15745_v14  ;;  %v15773_v58 = vor.u32 %v17921_v50, %v15770_v4  ;;  %9956 = vmatpush.bf16.msra.mxu1 %v18032_v34 }
 0x89f   : > { %9065 = vmatmul.bf16.gmra.mxu1 %v15749_v16 }
 0x8a0   : > { %v21716_v24 = vadd.f32 %v9182_v5, %v21424_v46  ;;  %9144 = vmatmul.bf16.gmra.mxu2 %v15753_v38 }
 0x8a1   : > { %9223 = vmatmul.bf16.gmra.mxu3 %v15757_v18 }
 0x8a3   : > { %v9105_v46 = vpop.f32.mrf.mxu2  ;;  %v8949_v49 = vpop.f32.mrf.mxu0 }
 0x8a4   : > { %v9184_v31 = vpop.f32.mrf.mxu3  ;;  %v9106_v9 = vadd.f32 %v9105_v46, %v9027_v23  ;;  %v9028_v51 = vpop.f32.mrf.mxu1  ;;  %v17924_v46 = vld [vmem:[%s18446_s28 + $0x1f4] sm:$0xf] }
 0x8a5   : > { %v9029_v56 = vadd.f32 %v9028_v51, %v8949_v49  ;;  %v17927_v49 = vld [vmem:[%s18446_s28 + $0x204] sm:$0xf0]  ;;  %v18040_v51 = vld [vmem:[%s22621_s1 + $0xa80] sm:$0xff] }
 0x8a6   : > { %v9185_v1 = vadd.f32 %v9184_v31, %v9106_v9  ;;  %v15778_v31 = vld [vmem:[%s18446_s28 + $0x200] sm:$0xf0]  ;;  %v15784_v9 = vld [vmem:[%s18446_s28 + $0x1f8] sm:$0xf]  ;;  %10035 = vmatpush.bf16.msra.mxu2 %v18040_v51 }
 0x8a7   : > { %v15781_v6 = vor.u32 %v17924_v46, %v15778_v31  ;;  %v15802_v46 = vld [vmem:[%s18446_s28 + $0x228] sm:$0xf0] }
 0x8a8   : > { %v21727_v13 = vadd.f32 %v9185_v1, %v21435_v3  ;;  %v18024_v1 = vld [vmem:[%s22621_s1 + $0xa00] sm:$0xff]  ;;  %v15805_v34 = vor.u32 %v17929_v29, %v15802_v46 }
 0x8a9   : > { %9877 = vmatpush.bf16.msra.mxu0 %v18024_v1 }
 0x8ab   : > { %v9107_v33 = vpop.f32.mrf.mxu2  ;;  %v8952_v7 = vpop.f32.mrf.mxu0 }
 0x8ac   : > { %v9186_v62 = vpop.f32.mrf.mxu3  ;;  %v9108_v10 = vadd.f32 %v9107_v33, %v9029_v56  ;;  %v9031_v60 = vpop.f32.mrf.mxu1  ;;  %v18048_v56 = vld [vmem:[%s22621_s1 + $0xac0] sm:$0xff] }
 0x8ad   : > { %v9032_v14 = vadd.f32 %v9031_v60, %v8952_v7  ;;  %10114 = vmatpush.bf16.msra.mxu3 %v18048_v56 }
 0x8ae   : > { %v9187_v3 = vadd.f32 %v9186_v62, %v9108_v10  ;;  %8991 = vmatmul.bf16.gmra.mxu0 %v15761_v42  ;;  %v15785_v62 = vor.u32 %v17927_v49, %v15784_v9  ;;  %v15789_v42 = vor.u32 %v17925_v19, %v15786_v43 }
 0x8af   : > { %9070 = vmatmul.bf16.gmra.mxu1 %v15765_v45 }
 0x8b0   : > { %v21736_v16 = vadd.f32 %v9187_v3, %v21444_v54  ;;  %9149 = vmatmul.bf16.gmra.mxu2 %v15769_v44 }
 0x8b1   : > { %9228 = vmatmul.bf16.gmra.mxu3 %v15773_v58 }
 0x8b3   : > { %v9110_v41 = vpop.f32.mrf.mxu2  ;;  %v8954_v38 = vpop.f32.mrf.mxu0 }
 0x8b4   : > { %v9189_v52 = vpop.f32.mrf.mxu3  ;;  %v9111_v37 = vadd.f32 %v9110_v41, %v9032_v14  ;;  %v9033_v18 = vpop.f32.mrf.mxu1 }
 0x8b5   : > { %v9034_v23 = vadd.f32 %v9033_v18, %v8954_v38  ;;  %v17930_v38 = vld [vmem:[%s18446_s28 + $0x21c] sm:$0xf0] }
 0x8b6   : > { %v9190_v5 = vadd.f32 %v9189_v52, %v9111_v37  ;;  %v15792_v37 = vld [vmem:[%s18446_s28 + $0x210] sm:$0xf] }
 0x8b7   : > { %v15793_v49 = vor.u32 %v17930_v38, %v15792_v37  ;;  %v17935_v37 = vld [vmem:[%s18446_s28 + $0x244] sm:$0xf0]  ;;  %v17933_v38 = vld [vmem:[%s18446_s28 + $0x23c] sm:$0xf] }
 0x8b8   : > { %v21745_v54 = vadd.f32 %v9190_v5, %v21453_v25  ;;  %v15800_v5 = vld [vmem:[%s18446_s28 + $0x218] sm:$0xf] }
 0x8b9   : > { %v15801_v43 = vor.u32 %v17931_v21, %v15800_v5 }
 0x8bb   : > { %v9112_v25 = vpop.f32.mrf.mxu2  ;;  %v8957_v4 = vpop.f32.mrf.mxu0 }
 0x8bc   : > { %v9191_v28 = vpop.f32.mrf.mxu3  ;;  %v9113_v50 = vadd.f32 %v9112_v25, %v9034_v23  ;;  %v9036_v33 = vpop.f32.mrf.mxu1  ;;  %v17928_v23 = vld [vmem:[%s18446_s28 + $0x214] sm:$0xf] }
 0x8bd   : > { %v9037_v45 = vadd.f32 %v9036_v33, %v8957_v4 }
 0x8be   : > { %v9192_v10 = vadd.f32 %v9191_v28, %v9113_v50  ;;  %8996 = vmatmul.bf16.gmra.mxu0 %v15777_v30  ;;  %v18135_v30 = vld [vmem:[%s22621_s1 + $0xbb8] sm:$0xff] }
 0x8bf   : > { %9075 = vmatmul.bf16.gmra.mxu1 %v15781_v6  ;;  %v18143_v6 = vld [vmem:[%s22621_s1 + $0xbf8] sm:$0xff]  ;;  %10965 = vmatpush.bf16.msrb.mxu2 %v18135_v30 }
 0x8c0   : > { %v21762_v7 = vadd.f32 %v9192_v10, %v21470_v0  ;;  %9154 = vmatmul.bf16.gmra.mxu2 %v15785_v62  ;;  %v15794_v0 = vld [vmem:[%s18446_s28 + $0x220] sm:$0xf0]  ;;  %11044 = vmatpush.bf16.msrb.mxu3 %v18143_v6  ;;  %v15808_v10 = vld [vmem:[%s18446_s28 + $0x230] sm:$0xf] }
 0x8c1   : > { %9233 = vmatmul.bf16.gmra.mxu3 %v15789_v42  ;;  %v15797_v51 = vor.u32 %v17928_v23, %v15794_v0  ;;  %v15818_v23 = vld [vmem:[%s18446_s28 + $0x248] sm:$0xf0] }
 0x8c3   : > { %v9115_v60 = vpop.f32.mrf.mxu2  ;;  %v8959_v14 = vpop.f32.mrf.mxu0 }
 0x8c4   : > { %v9194_v44 = vpop.f32.mrf.mxu3  ;;  %v9116_v58 = vadd.f32 %v9115_v60, %v9037_v45  ;;  %v9038_v3 = vpop.f32.mrf.mxu1  ;;  %v17934_v60 = vld [vmem:[%s18446_s28 + $0x23c] sm:$0xf0] }
 0x8c5   : > { %v9039_v41 = vadd.f32 %v9038_v3, %v8959_v14  ;;  %v15816_v3 = vld [vmem:[%s18446_s28 + $0x238] sm:$0xf]  ;;  %v15809_v21 = vor.u32 %v17934_v60, %v15808_v10  ;;  %v16026_v10 = vld [vmem:[%s18446_s28 + $0xb8] sm:$0xf0] }
 0x8c6   : > { %v9195_v52 = vadd.f32 %v9194_v44, %v9116_v58  ;;  %v17932_v44 = vld [vmem:[%s18446_s28 + $0x234] sm:$0xf]  ;;  %v15810_v58 = vld [vmem:[%s18446_s28 + $0x240] sm:$0xf0] }
 0x8c7   : > { %v15813_v29 = vor.u32 %v17932_v44, %v15810_v58 }
 0x8c8   : > { %v21767_v18 = vadd.f32 %v9195_v52, %v21475_v12  ;;  %v18127_v52 = vld [vmem:[%s22621_s1 + $0xb78] sm:$0xff] }
 0x8c9   : > { %10886 = vmatpush.bf16.msrb.mxu1 %v18127_v52 }
 0x8cb   : > { %v9117_v31 = vpop.f32.mrf.mxu2  ;;  %v8962_v1 = vpop.f32.mrf.mxu0 }
 0x8cc   : > { %v9196_v9 = vpop.f32.mrf.mxu3  ;;  %v9118_v56 = vadd.f32 %v9117_v31, %v9039_v41  ;;  %v9041_v19 = vpop.f32.mrf.mxu1  ;;  %v18119_v41 = vld [vmem:[%s22621_s1 + $0xb38] sm:$0xff] }
 0x8cd   : > { %v9042_v25 = vadd.f32 %v9041_v19, %v8962_v1  ;;  %10807 = vmatpush.bf16.msrb.mxu0 %v18119_v41 }
 0x8ce   : > { %v9197_v28 = vadd.f32 %v9196_v9, %v9118_v56  ;;  %9001 = vmatmul.bf16.gmra.mxu0 %v15793_v49  ;;  %v15817_v9 = vor.u32 %v17935_v37, %v15816_v3  ;;  %v15821_v49 = vor.u32 %v17933_v38, %v15818_v23 }
 0x8cf   : > { %9080 = vmatmul.bf16.gmra.mxu1 %v15797_v51 }
 0x8d0   : > { %v21776_v12 = vadd.f32 %v9197_v28, %v21484_v47  ;;  %9159 = vmatmul.bf16.gmra.mxu2 %v15801_v43 }
 0x8d1   : > { %9238 = vmatmul.bf16.gmra.mxu3 %v15805_v34 }
 0x8d3   : > { %v9120_v50 = vpop.f32.mrf.mxu2  ;;  %v8964_v33 = vpop.f32.mrf.mxu0 }
 0x8d4   : > { %v9199_v47 = vpop.f32.mrf.mxu3  ;;  %v9121_v4 = vadd.f32 %v9120_v50, %v9042_v25  ;;  %v9043_v62 = vpop.f32.mrf.mxu1  ;;  %v16016_v50 = vld [vmem:[%s18446_s28 + $0xa0] sm:$0xf] }
 0x8d5   : > { %v9044_v42 = vadd.f32 %v9043_v62, %v8964_v33  ;;  %v17968_v33 = vld [vmem:[%s18446_s28 + $0xa4] sm:$0xf]  ;;  %v16024_v62 = vld [vmem:[%s18446_s28 + $0xa8] sm:$0xf] }
 0x8d6   : > { %v9200_v45 = vadd.f32 %v9199_v47, %v9121_v4  ;;  %v17970_v47 = vld [vmem:[%s18446_s28 + $0xac] sm:$0xf0] }
 0x8d7   : > { %v16017_v58 = vor.u32 %v17970_v47, %v16016_v50  ;;  %v17975_v50 = vld [vmem:[%s18446_s28 + $0xd4] sm:$0xf0]  ;;  %v17973_v47 = vld [vmem:[%s18446_s28 + $0xcc] sm:$0xf] }
 0x8d8   : > { %v21789_v14 = vadd.f32 %v9200_v45, %v21497_v39  ;;  %v17969_v45 = vld [vmem:[%s18446_s28 + $0xac] sm:$0xf] }
 0x8d9   : > { %v16029_v23 = vor.u32 %v17969_v45, %v16026_v10 }
 0x8db   : > { %v9122_v0 = vpop.f32.mrf.mxu2  ;;  %v8967_v46 = vpop.f32.mrf.mxu0 }
 0x8dc   : > { %v9201_v5 = vpop.f32.mrf.mxu3  ;;  %v9123_v39 = vadd.f32 %v9122_v0, %v9044_v42  ;;  %v9046_v31 = vpop.f32.mrf.mxu1  ;;  %v17971_v42 = vld [vmem:[%s18446_s28 + $0xb4] sm:$0xf0] }
 0x8dd   : > { %v9047_v51 = vadd.f32 %v9046_v31, %v8967_v46  ;;  %v16025_v38 = vor.u32 %v17971_v42, %v16024_v62 }
 0x8de   : > { %v9202_v56 = vadd.f32 %v9201_v5, %v9123_v39  ;;  %9006 = vmatmul.bf16.gmra.mxu0 %v15809_v21  ;;  %v18134_v21 = vld [vmem:[%s22621_s1 + $0xbb0] sm:$0xff] }
 0x8df   : > { %9085 = vmatmul.bf16.gmra.mxu1 %v15813_v29  ;;  %v18142_v29 = vld [vmem:[%s22621_s1 + $0xbf0] sm:$0xff]  ;;  %10966 = vmatpush.bf16.msrb.mxu2 %v18134_v21 }
 0x8e0   : > { %v21802_v1 = vadd.f32 %v9202_v56, %v21510_v8  ;;  %9164 = vmatmul.bf16.gmra.mxu2 %v15817_v9  ;;  %v16018_v8 = vld [vmem:[%s18446_s28 + $0xb0] sm:$0xf0]  ;;  %11045 = vmatpush.bf16.msrb.mxu3 %v18142_v29 }
 0x8e1   : > { %9243 = vmatmul.bf16.gmra.mxu3 %v15821_v49  ;;  %v16021_v3 = vor.u32 %v17968_v33, %v16018_v8  ;;  %v18118_v39 = vld [vmem:[%s22621_s1 + $0xb30] sm:$0xff]  ;;  %v16042_v33 = vld [vmem:[%s18446_s28 + $0xd8] sm:$0xf0] }
 0x8e2   : > { %10808 = vmatpush.bf16.msrb.mxu0 %v18118_v39  ;;  %v16048_v39 = vld [vmem:[%s18446_s28 + $0xe0] sm:$0xf] }
 0x8e3   : > { %v9125_v19 = vpop.f32.mrf.mxu2  ;;  %v8969_v25 = vpop.f32.mrf.mxu0 }
 0x8e4   : > { %v9204_v43 = vpop.f32.mrf.mxu3  ;;  %v9126_v34 = vadd.f32 %v9125_v19, %v9047_v51  ;;  %v9048_v28 = vpop.f32.mrf.mxu1 }
 0x8e5   : > { %v9049_v30 = vadd.f32 %v9048_v28, %v8969_v25  ;;  %v17972_v28 = vld [vmem:[%s18446_s28 + $0xc4] sm:$0xf] }
 0x8e6   : > { %v9205_v6 = vadd.f32 %v9204_v43, %v9126_v34  ;;  %v16032_v43 = vld [vmem:[%s18446_s28 + $0xc0] sm:$0xf]  ;;  %v17974_v34 = vld [vmem:[%s18446_s28 + $0xcc] sm:$0xf0] }
 0x8e7   : > { %v16033_v42 = vor.u32 %v17974_v34, %v16032_v43  ;;  %v16058_v43 = vld [vmem:[%s18446_s28 + $0xf8] sm:$0xf0] }
 0x8e8   : > { %v21807_v4 = vadd.f32 %v9205_v6, %v21515_v63  ;;  %v16040_v6 = vld [vmem:[%s18446_s28 + $0xc8] sm:$0xf] }
 0x8eb   : > { %v9127_v60 = vpop.f32.mrf.mxu2  ;;  %v8972_v52 = vpop.f32.mrf.mxu0 }
 0x8ec   : > { %v9206_v44 = vpop.f32.mrf.mxu3  ;;  %v9128_v41 = vadd.f32 %v9127_v60, %v9049_v30  ;;  %v9051_v37 = vpop.f32.mrf.mxu1  ;;  %v16034_v30 = vld [vmem:[%s18446_s28 + $0xd0] sm:$0xf0] }
 0x8ed   : > { %v9052_v0 = vadd.f32 %v9051_v37, %v8972_v52  ;;  %v16037_v45 = vor.u32 %v17972_v28, %v16034_v30 }
 0x8ee   : > { %v9207_v5 = vadd.f32 %v9206_v44, %v9128_v41  ;;  %9878 = vmatmul.bf16.vlgmr.msra.gmra.mxu0 %v16017_v58  ;;  %v16041_v58 = vor.u32 %v17975_v50, %v16040_v6 }
 0x8ef   : > { %9957 = vmatmul.bf16.vlgmr.msra.gmra.mxu1 %v16021_v3  ;;  %v16045_v3 = vor.u32 %v17973_v47, %v16042_v33 }
 0x8f0   : > { %v21816_v63 = vadd.f32 %v9207_v5, %v21524_v22  ;;  %10036 = vmatmul.bf16.vlgmr.msra.gmra.mxu2 %v16025_v38  ;;  %v18126_v22 = vld [vmem:[%s22621_s1 + $0xb70] sm:$0xff] }
 0x8f1   : > { %10115 = vmatmul.bf16.vlgmr.msra.gmra.mxu3 %v16029_v23  ;;  %10887 = vmatpush.bf16.msrb.mxu1 %v18126_v22  ;;  %v17978_v22 = vld [vmem:[%s18446_s28 + $0xec] sm:$0xf0] }
 0x8f2   : > { %v16049_v30 = vor.u32 %v17978_v22, %v16048_v39  ;;  %v17983_v39 = vld [vmem:[%s18446_s28 + $0x114] sm:$0xf0]  ;;  %v17981_v22 = vld [vmem:[%s18446_s28 + $0x10c] sm:$0xf] }
 0x8f3   : > { %v9130_v46 = vpop.f32.mrf.mxu2  ;;  %v8974_v49 = vpop.f32.mrf.mxu0 }
 0x8f4   : > { %v9209_v31 = vpop.f32.mrf.mxu3  ;;  %v9131_v9 = vadd.f32 %v9130_v46, %v9052_v0  ;;  %v9053_v51 = vpop.f32.mrf.mxu1  ;;  %v17976_v46 = vld [vmem:[%s18446_s28 + $0xe4] sm:$0xf] }
 0x8f5   : > { %v9054_v56 = vadd.f32 %v9053_v51, %v8974_v49  ;;  %v18133_v49 = vld [vmem:[%s22621_s1 + $0xba8] sm:$0xff] }
 0x8f6   : > { %v9210_v19 = vadd.f32 %v9209_v31, %v9131_v9  ;;  %v16050_v31 = vld [vmem:[%s18446_s28 + $0xf0] sm:$0xf0]  ;;  %v18141_v51 = vld [vmem:[%s22621_s1 + $0xbe8] sm:$0xff]  ;;  %10967 = vmatpush.bf16.msrb.mxu2 %v18133_v49 }
 0x8f7   : > { %11046 = vmatpush.bf16.msrb.mxu3 %v18141_v51  ;;  %v16053_v6 = vor.u32 %v17976_v46, %v16050_v31  ;;  %v16074_v46 = vld [vmem:[%s18446_s28 + $0x118] sm:$0xf0] }
 0x8f8   : > { %v21833_v25 = vadd.f32 %v9210_v19, %v21541_v15  ;;  %v17977_v19 = vld [vmem:[%s18446_s28 + $0xec] sm:$0xf] }
 0x8fb   : > { %v9132_v8 = vpop.f32.mrf.mxu2  ;;  %v8977_v60 = vpop.f32.mrf.mxu0 }
 0x8fc   : > { %v9211_v62 = vpop.f32.mrf.mxu3  ;;  %v9133_v10 = vadd.f32 %v9132_v8, %v9054_v56  ;;  %v9056_v44 = vpop.f32.mrf.mxu1  ;;  %v17979_v56 = vld [vmem:[%s18446_s28 + $0xf4] sm:$0xf0]  ;;  %v16061_v8 = vor.u32 %v17977_v19, %v16058_v43 }
 0x8fd   : > { %v9057_v41 = vadd.f32 %v9056_v44, %v8977_v60  ;;  %v18125_v60 = vld [vmem:[%s22621_s1 + $0xb68] sm:$0xff] }
 0x8fe   : > { %v9212_v15 = vadd.f32 %v9211_v62, %v9133_v10  ;;  %9883 = vmatmul.bf16.gmra.mxu0 %v16033_v42  ;;  %v18117_v10 = vld [vmem:[%s22621_s1 + $0xb28] sm:$0xff]  ;;  %10888 = vmatpush.bf16.msrb.mxu1 %v18125_v60  ;;  %v17986_v60 = vld [vmem:[%s18446_s28 + $0x12c] sm:$0xf0] }
 0x8ff   : > { %9962 = vmatmul.bf16.gmra.mxu1 %v16037_v45  ;;  %10809 = vmatpush.bf16.msrb.mxu0 %v18117_v10  ;;  %v16080_v10 = vld [vmem:[%s18446_s28 + $0x120] sm:$0xf] }
 0x900   : > { %v21842_v52 = vadd.f32 %v9212_v15, %v21550_v53  ;;  %10041 = vmatmul.bf16.gmra.mxu2 %v16041_v58  ;;  %v16056_v53 = vld [vmem:[%s18446_s28 + $0xe8] sm:$0xf] }
 0x901   : > { %10120 = vmatmul.bf16.gmra.mxu3 %v16045_v3  ;;  %v16057_v33 = vor.u32 %v17979_v56, %v16056_v53 }
 0x903   : > { %v9135_v37 = vpop.f32.mrf.mxu2  ;;  %v8979_v0 = vpop.f32.mrf.mxu0 }
 0x904   : > { %v9214_v38 = vpop.f32.mrf.mxu3  ;;  %v9136_v23 = vadd.f32 %v9135_v37, %v9057_v41  ;;  %v9058_v5 = vpop.f32.mrf.mxu1 }
 0x905   : > { %v9059_v21 = vadd.f32 %v9058_v5, %v8979_v0  ;;  %v17980_v5 = vld [vmem:[%s18446_s28 + $0x104] sm:$0xf] }
 0x906   : > { %v9215_v29 = vadd.f32 %v9214_v38, %v9136_v23  ;;  %v16064_v38 = vld [vmem:[%s18446_s28 + $0x100] sm:$0xf]  ;;  %v17982_v23 = vld [vmem:[%s18446_s28 + $0x10c] sm:$0xf0] }
 0x907   : > { %v16065_v49 = vor.u32 %v17982_v23, %v16064_v38  ;;  %v17985_v38 = vld [vmem:[%s18446_s28 + $0x12c] sm:$0xf]  ;;  %v16090_v23 = vld [vmem:[%s18446_s28 + $0x138] sm:$0xf0] }
 0x908   : > { %v21849_v9 = vadd.f32 %v9215_v29, %v21557_v35  ;;  %v16072_v29 = vld [vmem:[%s18446_s28 + $0x108] sm:$0xf] }
 0x90b   : > { %v9137_v34 = vpop.f32.mrf.mxu2  ;;  %v8982_v50 = vpop.f32.mrf.mxu0 }
 0x90c   : > { %v9216_v28 = vpop.f32.mrf.mxu3  ;;  %v9138_v35 = vadd.f32 %v9137_v34, %v9059_v21  ;;  %v9061_v47 = vpop.f32.mrf.mxu1  ;;  %v16066_v21 = vld [vmem:[%s18446_s28 + $0x110] sm:$0xf0]  ;;  %v16073_v34 = vor.u32 %v17983_v39, %v16072_v29  ;;  %v16081_v29 = vor.u32 %v17986_v60, %v16080_v10  ;;  %v17991_v10 = vld [vmem:[%s18446_s28 + $0x154] sm:$0xf0]  ;;  %v17989_v60 = vld [vmem:[%s18446_s28 + $0x14c] sm:$0xf] }
 0x90d   : > { %v9062_v62 = vadd.f32 %v9061_v47, %v8982_v50  ;;  %v16069_v51 = vor.u32 %v17980_v5, %v16066_v21  ;;  %v18124_v5 = vld [vmem:[%s22621_s1 + $0xb60] sm:$0xff] }
 0x90e   : > { %v9217_v42 = vadd.f32 %v9216_v28, %v9138_v35  ;;  %9888 = vmatmul.bf16.gmra.mxu0 %v16049_v30  ;;  %v16077_v28 = vor.u32 %v17981_v22, %v16074_v46  ;;  %10889 = vmatpush.bf16.msrb.mxu1 %v18124_v5 }
 0x90f   : > { %9967 = vmatmul.bf16.gmra.mxu1 %v16053_v6 }
 0x910   : > { %v21862_v45 = vadd.f32 %v9217_v42, %v21570_v26  ;;  %10046 = vmatmul.bf16.gmra.mxu2 %v16057_v33 }
 0x911   : > { %10125 = vmatmul.bf16.gmra.mxu3 %v16061_v8 }
 0x913   : > { %v9140_v26 = vpop.f32.mrf.mxu2  ;;  %v8984_v3 = vpop.f32.mrf.mxu0 }
 0x914   : > { %v9219_v44 = vpop.f32.mrf.mxu3  ;;  %v9141_v58 = vadd.f32 %v9140_v26, %v9062_v62  ;;  %v9063_v41 = vpop.f32.mrf.mxu1  ;;  %v17984_v26 = vld [vmem:[%s18446_s28 + $0x124] sm:$0xf] }
 0x915   : > { %v9064_v15 = vadd.f32 %v9063_v41, %v8984_v3  ;;  %v17987_v3 = vld [vmem:[%s18446_s28 + $0x134] sm:$0xf0]  ;;  %v18132_v41 = vld [vmem:[%s22621_s1 + $0xba0] sm:$0xff] }
 0x916   : > { %v9220_v37 = vadd.f32 %v9219_v44, %v9141_v58  ;;  %v16082_v44 = vld [vmem:[%s18446_s28 + $0x130] sm:$0xf0]  ;;  %v16088_v58 = vld [vmem:[%s18446_s28 + $0x128] sm:$0xf]  ;;  %10968 = vmatpush.bf16.msrb.mxu2 %v18132_v41 }
 0x917   : > { %v16085_v39 = vor.u32 %v17984_v26, %v16082_v44  ;;  %v16106_v26 = vld [vmem:[%s18446_s28 + $0x158] sm:$0xf0] }
 0x918   : > { %v21873_v0 = vadd.f32 %v9220_v37, %v21581_v59  ;;  %v18116_v37 = vld [vmem:[%s22621_s1 + $0xb20] sm:$0xff]  ;;  %v16109_v5 = vor.u32 %v17989_v60, %v16106_v26 }
 0x919   : > { %10810 = vmatpush.bf16.msrb.mxu0 %v18116_v37 }
 0x91b   : > { %v9142_v31 = vpop.f32.mrf.mxu2  ;;  %v8987_v19 = vpop.f32.mrf.mxu0 }
 0x91c   : > { %v9221_v53 = vpop.f32.mrf.mxu3  ;;  %v9143_v56 = vadd.f32 %v9142_v31, %v9064_v15  ;;  %v9066_v43 = vpop.f32.mrf.mxu1  ;;  %v18140_v15 = vld [vmem:[%s22621_s1 + $0xbe0] sm:$0xff] }
 0x91d   : > { %v9067_v30 = vadd.f32 %v9066_v43, %v8987_v19  ;;  %11047 = vmatpush.bf16.msrb.mxu3 %v18140_v15 }
 0x91e   : > { %v9222_v59 = vadd.f32 %v9221_v53, %v9143_v56  ;;  %9893 = vmatmul.bf16.gmra.mxu0 %v16065_v49  ;;  %v16089_v53 = vor.u32 %v17987_v3, %v16088_v58  ;;  %v16093_v49 = vor.u32 %v17985_v38, %v16090_v23 }
 0x91f   : > { %9972 = vmatmul.bf16.gmra.mxu1 %v16069_v51 }
 0x920   : > { %v21882_v6 = vadd.f32 %v9222_v59, %v21590_v11  ;;  %10051 = vmatmul.bf16.gmra.mxu2 %v16073_v34 }
 0x921   : > { %10130 = vmatmul.bf16.gmra.mxu3 %v16077_v28 }
 0x923   : > { %v9145_v35 = vpop.f32.mrf.mxu2  ;;  %v8989_v33 = vpop.f32.mrf.mxu0 }
 0x924   : > { %v9224_v50 = vpop.f32.mrf.mxu3  ;;  %v9146_v47 = vadd.f32 %v9145_v35, %v9067_v30  ;;  %v9068_v8 = vpop.f32.mrf.mxu1 }
 0x925   : > { %v9069_v62 = vadd.f32 %v9068_v8, %v8989_v33  ;;  %v17990_v33 = vld [vmem:[%s18446_s28 + $0x14c] sm:$0xf0] }
 0x926   : > { %v9225_v42 = vadd.f32 %v9224_v50, %v9146_v47  ;;  %v16096_v47 = vld [vmem:[%s18446_s28 + $0x140] sm:$0xf] }
 0x927   : > { %v16097_v3 = vor.u32 %v17990_v33, %v16096_v47  ;;  %v17995_v47 = vld [vmem:[%s18446_s28 + $0x174] sm:$0xf0]  ;;  %v17993_v33 = vld [vmem:[%s18446_s28 + $0x16c] sm:$0xf] }
 0x928   : > { %v21891_v11 = vadd.f32 %v9225_v42, %v21599_v57  ;;  %v16104_v42 = vld [vmem:[%s18446_s28 + $0x148] sm:$0xf] }
 0x929   : > { %v16105_v23 = vor.u32 %v17991_v10, %v16104_v42 }
 0x92b   : > { %v9147_v57 = vpop.f32.mrf.mxu2  ;;  %v8992_v46 = vpop.f32.mrf.mxu0 }
 0x92c   : > { %v9226_v21 = vpop.f32.mrf.mxu3  ;;  %v9148_v22 = vadd.f32 %v9147_v57, %v9069_v62  ;;  %v9071_v31 = vpop.f32.mrf.mxu1  ;;  %v17988_v62 = vld [vmem:[%s18446_s28 + $0x144] sm:$0xf] }
 0x92d   : > { %v9072_v51 = vadd.f32 %v9071_v31, %v8992_v46 }
 0x92e   : > { %v9227_v56 = vadd.f32 %v9226_v21, %v9148_v22  ;;  %9898 = vmatmul.bf16.gmra.mxu0 %v16081_v29  ;;  %v18131_v29 = vld [vmem:[%s22621_s1 + $0xb98] sm:$0xff] }
 0x92f   : > { %9977 = vmatmul.bf16.gmra.mxu1 %v16085_v39  ;;  %v18139_v39 = vld [vmem:[%s22621_s1 + $0xbd8] sm:$0xff]  ;;  %10969 = vmatpush.bf16.msrb.mxu2 %v18131_v29 }
 0x930   : > { %v21908_v19 = vadd.f32 %v9227_v56, %v21616_v32  ;;  %10056 = vmatmul.bf16.gmra.mxu2 %v16089_v53  ;;  %v16098_v32 = vld [vmem:[%s18446_s28 + $0x150] sm:$0xf0]  ;;  %11048 = vmatpush.bf16.msrb.mxu3 %v18139_v39  ;;  %v16112_v56 = vld [vmem:[%s18446_s28 + $0x160] sm:$0xf] }
 0x931   : > { %10135 = vmatmul.bf16.gmra.mxu3 %v16093_v49  ;;  %v16101_v41 = vor.u32 %v17988_v62, %v16098_v32  ;;  %v16122_v62 = vld [vmem:[%s18446_s28 + $0x178] sm:$0xf0] }
 0x933   : > { %v9150_v43 = vpop.f32.mrf.mxu2  ;;  %v8994_v30 = vpop.f32.mrf.mxu0 }
 0x934   : > { %v9229_v34 = vpop.f32.mrf.mxu3  ;;  %v9151_v28 = vadd.f32 %v9150_v43, %v9072_v51  ;;  %v9073_v59 = vpop.f32.mrf.mxu1  ;;  %v17994_v43 = vld [vmem:[%s18446_s28 + $0x16c] sm:$0xf0] }
 0x935   : > { %v9074_v35 = vadd.f32 %v9073_v59, %v8994_v30  ;;  %v16120_v59 = vld [vmem:[%s18446_s28 + $0x168] sm:$0xf]  ;;  %v16113_v10 = vor.u32 %v17994_v43, %v16112_v56  ;;  %v16138_v56 = vld [vmem:[%s18446_s28 + $0x198] sm:$0xf0] }
 0x936   : > { %v9230_v50 = vadd.f32 %v9229_v34, %v9151_v28  ;;  %v17992_v34 = vld [vmem:[%s18446_s28 + $0x164] sm:$0xf]  ;;  %v16114_v28 = vld [vmem:[%s18446_s28 + $0x170] sm:$0xf0] }
 0x937   : > { %v16117_v60 = vor.u32 %v17992_v34, %v16114_v28 }
 0x938   : > { %v21913_v8 = vadd.f32 %v9230_v50, %v21621_v55  ;;  %v18123_v50 = vld [vmem:[%s22621_s1 + $0xb58] sm:$0xff] }
 0x939   : > { %10890 = vmatpush.bf16.msrb.mxu1 %v18123_v50 }
 0x93b   : > { %v9152_v44 = vpop.f32.mrf.mxu2  ;;  %v8997_v37 = vpop.f32.mrf.mxu0 }
 0x93c   : > { %v9231_v58 = vpop.f32.mrf.mxu3  ;;  %v9153_v15 = vadd.f32 %v9152_v44, %v9074_v35  ;;  %v9076_v38 = vpop.f32.mrf.mxu1  ;;  %v18115_v35 = vld [vmem:[%s22621_s1 + $0xb18] sm:$0xff] }
 0x93d   : > { %v9077_v57 = vadd.f32 %v9076_v38, %v8997_v37  ;;  %10811 = vmatpush.bf16.msrb.mxu0 %v18115_v35 }
 0x93e   : > { %v9232_v21 = vadd.f32 %v9231_v58, %v9153_v15  ;;  %9903 = vmatmul.bf16.gmra.mxu0 %v16097_v3  ;;  %v16121_v58 = vor.u32 %v17995_v47, %v16120_v59  ;;  %v16125_v3 = vor.u32 %v17993_v33, %v16122_v62 }
 0x93f   : > { %9982 = vmatmul.bf16.gmra.mxu1 %v16101_v41 }
 0x940   : > { %v21922_v55 = vadd.f32 %v9232_v21, %v21630_v36  ;;  %10061 = vmatmul.bf16.gmra.mxu2 %v16105_v23 }
 0x941   : > { %10140 = vmatmul.bf16.gmra.mxu3 %v16109_v5 }
 0x943   : > { %v9155_v22 = vpop.f32.mrf.mxu2  ;;  %v8999_v31 = vpop.f32.mrf.mxu0 }
 0x944   : > { %v9234_v36 = vpop.f32.mrf.mxu3  ;;  %v9156_v46 = vadd.f32 %v9155_v22, %v9077_v57  ;;  %v9078_v53 = vpop.f32.mrf.mxu1  ;;  %v16128_v22 = vld [vmem:[%s18446_s28 + $0x180] sm:$0xf] }
 0x945   : > { %v9079_v49 = vadd.f32 %v9078_v53, %v8999_v31  ;;  %v17996_v31 = vld [vmem:[%s18446_s28 + $0x184] sm:$0xf]  ;;  %v16136_v53 = vld [vmem:[%s18446_s28 + $0x188] sm:$0xf] }
 0x946   : > { %v9235_v51 = vadd.f32 %v9234_v36, %v9156_v46  ;;  %v17998_v36 = vld [vmem:[%s18446_s28 + $0x18c] sm:$0xf0] }
 0x947   : > { %v16129_v28 = vor.u32 %v17998_v36, %v16128_v22  ;;  %v18003_v22 = vld [vmem:[%s18446_s28 + $0x1b4] sm:$0xf0]  ;;  %v18001_v36 = vld [vmem:[%s18446_s28 + $0x1ac] sm:$0xf] }
 0x948   : > { %v21935_v30 = vadd.f32 %v9235_v51, %v21643_v40  ;;  %v17997_v51 = vld [vmem:[%s18446_s28 + $0x18c] sm:$0xf] }
 0x949   : > { %v16141_v62 = vor.u32 %v17997_v51, %v16138_v56 }
 0x94b   : > { %v9157_v32 = vpop.f32.mrf.mxu2  ;;  %v9002_v26 = vpop.f32.mrf.mxu0 }
 0x94c   : > { %v9236_v42 = vpop.f32.mrf.mxu3  ;;  %v9158_v40 = vadd.f32 %v9157_v32, %v9079_v49  ;;  %v9081_v44 = vpop.f32.mrf.mxu1  ;;  %v17999_v49 = vld [vmem:[%s18446_s28 + $0x194] sm:$0xf0] }
 0x94d   : > { %v9082_v41 = vadd.f32 %v9081_v44, %v9002_v26  ;;  %v16137_v33 = vor.u32 %v17999_v49, %v16136_v53 }
 0x94e   : > { %v9237_v15 = vadd.f32 %v9236_v42, %v9158_v40  ;;  %9908 = vmatmul.bf16.gmra.mxu0 %v16113_v10  ;;  %v18130_v10 = vld [vmem:[%s22621_s1 + $0xb90] sm:$0xff] }
 0x94f   : > { %9987 = vmatmul.bf16.gmra.mxu1 %v16117_v60  ;;  %v18138_v60 = vld [vmem:[%s22621_s1 + $0xbd0] sm:$0xff]  ;;  %10970 = vmatpush.bf16.msrb.mxu2 %v18130_v10 }
 0x950   : > { %v21948_v37 = vadd.f32 %v9237_v15, %v21656_v2  ;;  %10066 = vmatmul.bf16.gmra.mxu2 %v16121_v58  ;;  %v16130_v2 = vld [vmem:[%s18446_s28 + $0x190] sm:$0xf0]  ;;  %11049 = vmatpush.bf16.msrb.mxu3 %v18138_v60 }
 0x951   : > { %10145 = vmatmul.bf16.gmra.mxu3 %v16125_v3  ;;  %v16133_v59 = vor.u32 %v17996_v31, %v16130_v2  ;;  %v18114_v40 = vld [vmem:[%s22621_s1 + $0xb10] sm:$0xff]  ;;  %v16154_v31 = vld [vmem:[%s18446_s28 + $0x1b8] sm:$0xf0] }
 0x952   : > { %10812 = vmatpush.bf16.msrb.mxu0 %v18114_v40  ;;  %v16160_v40 = vld [vmem:[%s18446_s28 + $0x1c0] sm:$0xf] }
 0x953   : > { %v9160_v38 = vpop.f32.mrf.mxu2  ;;  %v9004_v57 = vpop.f32.mrf.mxu0 }
 0x954   : > { %v9239_v23 = vpop.f32.mrf.mxu3  ;;  %v9161_v5 = vadd.f32 %v9160_v38, %v9082_v41  ;;  %v9083_v21 = vpop.f32.mrf.mxu1 }
 0x955   : > { %v9084_v29 = vadd.f32 %v9083_v21, %v9004_v57  ;;  %v18000_v21 = vld [vmem:[%s18446_s28 + $0x1a4] sm:$0xf] }
 0x956   : > { %v9240_v39 = vadd.f32 %v9239_v23, %v9161_v5  ;;  %v16144_v23 = vld [vmem:[%s18446_s28 + $0x1a0] sm:$0xf]  ;;  %v18002_v5 = vld [vmem:[%s18446_s28 + $0x1ac] sm:$0xf0] }
 0x957   : > { %v16145_v49 = vor.u32 %v18002_v5, %v16144_v23  ;;  %v16170_v23 = vld [vmem:[%s18446_s28 + $0x1d8] sm:$0xf0] }
 0x958   : > { %v21953_v46 = vadd.f32 %v9240_v39, %v21661_v20  ;;  %v16152_v39 = vld [vmem:[%s18446_s28 + $0x1a8] sm:$0xf] }
 0x95b   : > { %v9162_v43 = vpop.f32.mrf.mxu2  ;;  %v9007_v50 = vpop.f32.mrf.mxu0 }
 0x95c   : > { %v9241_v34 = vpop.f32.mrf.mxu3  ;;  %v9163_v35 = vadd.f32 %v9162_v43, %v9084_v29  ;;  %v9086_v47 = vpop.f32.mrf.mxu1  ;;  %v16146_v29 = vld [vmem:[%s18446_s28 + $0x1b0] sm:$0xf0] }
 0x95d   : > { %v9087_v32 = vadd.f32 %v9086_v47, %v9007_v50  ;;  %v16149_v51 = vor.u32 %v18000_v21, %v16146_v29 }
 0x95e   : > { %v9242_v42 = vadd.f32 %v9241_v34, %v9163_v35  ;;  %9913 = vmatmul.bf16.gmra.mxu0 %v16129_v28  ;;  %v16153_v28 = vor.u32 %v18003_v22, %v16152_v39 }
 0x95f   : > { %9992 = vmatmul.bf16.gmra.mxu1 %v16133_v59  ;;  %v16157_v59 = vor.u32 %v18001_v36, %v16154_v31 }
 0x960   : > { %v21962_v20 = vadd.f32 %v9242_v42, %v21670_v17  ;;  %10071 = vmatmul.bf16.gmra.mxu2 %v16137_v33  ;;  %v18122_v17 = vld [vmem:[%s22621_s1 + $0xb50] sm:$0xff] }
 0x961   : > { %10150 = vmatmul.bf16.gmra.mxu3 %v16141_v62  ;;  %10891 = vmatpush.bf16.msrb.mxu1 %v18122_v17  ;;  %v18006_v17 = vld [vmem:[%s18446_s28 + $0x1cc] sm:$0xf0] }
 0x962   : > { %v16161_v29 = vor.u32 %v18006_v17, %v16160_v40  ;;  %v18011_v40 = vld [vmem:[%s18446_s28 + $0x1f4] sm:$0xf0]  ;;  %v18009_v17 = vld [vmem:[%s18446_s28 + $0x1ec] sm:$0xf] }
 0x963   : > { %v9165_v26 = vpop.f32.mrf.mxu2  ;;  %v9009_v3 = vpop.f32.mrf.mxu0 }
 0x964   : > { %v9244_v44 = vpop.f32.mrf.mxu3  ;;  %v9166_v58 = vadd.f32 %v9165_v26, %v9087_v32  ;;  %v9088_v41 = vpop.f32.mrf.mxu1  ;;  %v18004_v26 = vld [vmem:[%s18446_s28 + $0x1c4] sm:$0xf] }
 0x965   : > { %v9089_v15 = vadd.f32 %v9088_v41, %v9009_v3  ;;  %v18129_v3 = vld [vmem:[%s22621_s1 + $0xb88] sm:$0xff] }
 0x966   : > { %v9245_v38 = vadd.f32 %v9244_v44, %v9166_v58  ;;  %v16162_v44 = vld [vmem:[%s18446_s28 + $0x1d0] sm:$0xf0]  ;;  %v18137_v41 = vld [vmem:[%s22621_s1 + $0xbc8] sm:$0xff]  ;;  %10971 = vmatpush.bf16.msrb.mxu2 %v18129_v3 }
 0x967   : > { %11050 = vmatpush.bf16.msrb.mxu3 %v18137_v41  ;;  %v16165_v39 = vor.u32 %v18004_v26, %v16162_v44  ;;  %v16186_v26 = vld [vmem:[%s18446_s28 + $0x1f8] sm:$0xf0] }
 0x968   : > { %v21979_v57 = vadd.f32 %v9245_v38, %v21687_v61  ;;  %v18005_v38 = vld [vmem:[%s18446_s28 + $0x1cc] sm:$0xf] }
 0x96b   : > { %v9167_v2 = vpop.f32.mrf.mxu2  ;;  %v9879_v43 = vpop.f32.mrf.mxu0 }
 0x96c   : > { %v9246_v53 = vpop.f32.mrf.mxu3  ;;  %v9168_v56 = vadd.f32 %v9167_v2, %v9089_v15  ;;  %v9958_v34 = vpop.f32.mrf.mxu1  ;;  %v18007_v15 = vld [vmem:[%s18446_s28 + $0x1d4] sm:$0xf0]  ;;  %v16173_v2 = vor.u32 %v18005_v38, %v16170_v23 }
 0x96d   : > { %v9959_v35 = vadd.f32 %v9958_v34, %v9879_v43  ;;  %v18121_v43 = vld [vmem:[%s22621_s1 + $0xb48] sm:$0xff] }
 0x96e   : > { %v9247_v61 = vadd.f32 %v9246_v53, %v9168_v56  ;;  %9918 = vmatmul.bf16.gmra.mxu0 %v16145_v49  ;;  %v18113_v56 = vld [vmem:[%s22621_s1 + $0xb08] sm:$0xff]  ;;  %10892 = vmatpush.bf16.msrb.mxu1 %v18121_v43  ;;  %v18014_v43 = vld [vmem:[%s18446_s28 + $0x20c] sm:$0xf0] }
 0x96f   : > { %9997 = vmatmul.bf16.gmra.mxu1 %v16149_v51  ;;  %10813 = vmatpush.bf16.msrb.mxu0 %v18113_v56  ;;  %v16192_v56 = vld [vmem:[%s18446_s28 + $0x200] sm:$0xf] }
 0x970   : > { %v21988_v50 = vadd.f32 %v9247_v61, %v21696_v48  ;;  %10076 = vmatmul.bf16.gmra.mxu2 %v16153_v28  ;;  %v16168_v48 = vld [vmem:[%s18446_s28 + $0x1c8] sm:$0xf] }
 0x971   : > { %10155 = vmatmul.bf16.gmra.mxu3 %v16157_v59  ;;  %v16169_v31 = vor.u32 %v18007_v15, %v16168_v48 }
 0x973   : > { %v10037_v47 = vpop.f32.mrf.mxu2  ;;  %v9881_v32 = vpop.f32.mrf.mxu0 }
 0x974   : > { %v10116_v33 = vpop.f32.mrf.mxu3  ;;  %v10038_v62 = vadd.f32 %v10037_v47, %v9959_v35  ;;  %v9960_v42 = vpop.f32.mrf.mxu1 }
 0x975   : > { %v9961_v10 = vadd.f32 %v9960_v42, %v9881_v32  ;;  %v18008_v42 = vld [vmem:[%s18446_s28 + $0x1e4] sm:$0xf] }
 0x976   : > { %v10117_v60 = vadd.f32 %v10116_v33, %v10038_v62  ;;  %v16176_v33 = vld [vmem:[%s18446_s28 + $0x1e0] sm:$0xf]  ;;  %v18010_v62 = vld [vmem:[%s18446_s28 + $0x1ec] sm:$0xf0] }
 0x977   : > { %v16177_v3 = vor.u32 %v18010_v62, %v16176_v33  ;;  %v18013_v33 = vld [vmem:[%s18446_s28 + $0x20c] sm:$0xf]  ;;  %v16202_v62 = vld [vmem:[%s18446_s28 + $0x218] sm:$0xf0] }
 0x978   : > { %v21995_v58 = vadd.f32 %v10117_v60, %v21703_v27  ;;  %v16184_v60 = vld [vmem:[%s18446_s28 + $0x1e8] sm:$0xf] }
 0x97b   : > { %v10039_v5 = vpop.f32.mrf.mxu2  ;;  %v9884_v22 = vpop.f32.mrf.mxu0 }
 0x97c   : > { %v10118_v21 = vpop.f32.mrf.mxu3  ;;  %v10040_v27 = vadd.f32 %v10039_v5, %v9961_v10  ;;  %v9963_v36 = vpop.f32.mrf.mxu1  ;;  %v16178_v10 = vld [vmem:[%s18446_s28 + $0x1f0] sm:$0xf0]  ;;  %v16185_v5 = vor.u32 %v18011_v40, %v16184_v60  ;;  %v16193_v60 = vor.u32 %v18014_v43, %v16192_v56  ;;  %v18019_v56 = vld [vmem:[%s18446_s28 + $0x234] sm:$0xf0]  ;;  %v18017_v43 = vld [vmem:[%s18446_s28 + $0x22c] sm:$0xf] }
 0x97d   : > { %v9964_v53 = vadd.f32 %v9963_v36, %v9884_v22  ;;  %v16181_v41 = vor.u32 %v18008_v42, %v16178_v10  ;;  %v18120_v42 = vld [vmem:[%s22621_s1 + $0xb40] sm:$0xff] }
 0x97e   : > { %v10119_v49 = vadd.f32 %v10118_v21, %v10040_v27  ;;  %9923 = vmatmul.bf16.gmra.mxu0 %v16161_v29  ;;  %v16189_v21 = vor.u32 %v18009_v17, %v16186_v26  ;;  %10893 = vmatpush.bf16.msrb.mxu1 %v18120_v42 }
 0x97f   : > { %10002 = vmatmul.bf16.gmra.mxu1 %v16165_v39 }
 0x980   : > { %v22008_v51 = vadd.f32 %v10119_v49, %v21716_v24  ;;  %10081 = vmatmul.bf16.gmra.mxu2 %v16169_v31 }
 0x981   : > { %10160 = vmatmul.bf16.gmra.mxu3 %v16173_v2 }
 0x983   : > { %v10042_v24 = vpop.f32.mrf.mxu2  ;;  %v9886_v59 = vpop.f32.mrf.mxu0 }
 0x984   : > { %v10121_v34 = vpop.f32.mrf.mxu3  ;;  %v10043_v28 = vadd.f32 %v10042_v24, %v9964_v53  ;;  %v9965_v35 = vpop.f32.mrf.mxu1  ;;  %v18012_v24 = vld [vmem:[%s18446_s28 + $0x204] sm:$0xf] }
 0x985   : > { %v9966_v61 = vadd.f32 %v9965_v35, %v9886_v59  ;;  %v18015_v59 = vld [vmem:[%s18446_s28 + $0x214] sm:$0xf0]  ;;  %v18128_v35 = vld [vmem:[%s22621_s1 + $0xb80] sm:$0xff] }
 0x986   : > { %v10122_v47 = vadd.f32 %v10121_v34, %v10043_v28  ;;  %v16194_v34 = vld [vmem:[%s18446_s28 + $0x210] sm:$0xf0]  ;;  %v16200_v28 = vld [vmem:[%s18446_s28 + $0x208] sm:$0xf]  ;;  %10972 = vmatpush.bf16.msrb.mxu2 %v18128_v35 }
 0x987   : > { %v16197_v40 = vor.u32 %v18012_v24, %v16194_v34  ;;  %v16218_v24 = vld [vmem:[%s18446_s28 + $0x238] sm:$0xf0] }
 0x988   : > { %v22019_v32 = vadd.f32 %v10122_v47, %v21727_v13  ;;  %v18112_v47 = vld [vmem:[%s22621_s1 + $0xb00] sm:$0xff]  ;;  %v16221_v42 = vor.u32 %v18017_v43, %v16218_v24 }
 0x989   : > { %10814 = vmatpush.bf16.msrb.mxu0 %v18112_v47 }
 0x98b   : > { %v10044_v44 = vpop.f32.mrf.mxu2  ;;  %v9889_v38 = vpop.f32.mrf.mxu0 }
 0x98c   : > { %v10123_v48 = vpop.f32.mrf.mxu3  ;;  %v10045_v15 = vadd.f32 %v10044_v44, %v9966_v61  ;;  %v9968_v23 = vpop.f32.mrf.mxu1  ;;  %v18136_v61 = vld [vmem:[%s22621_s1 + $0xbc0] sm:$0xff] }
 0x98d   : > { %v9969_v29 = vadd.f32 %v9968_v23, %v9889_v38  ;;  %11051 = vmatpush.bf16.msrb.mxu3 %v18136_v61 }
 0x98e   : > { %v10124_v13 = vadd.f32 %v10123_v48, %v10045_v15  ;;  %9928 = vmatmul.bf16.gmra.mxu0 %v16177_v3  ;;  %v16201_v48 = vor.u32 %v18015_v59, %v16200_v28  ;;  %v16205_v3 = vor.u32 %v18013_v33, %v16202_v62 }
 0x98f   : > { %10007 = vmatmul.bf16.gmra.mxu1 %v16181_v41 }
 0x990   : > { %v22028_v39 = vadd.f32 %v10124_v13, %v21736_v16  ;;  %10086 = vmatmul.bf16.gmra.mxu2 %v16185_v5 }
 0x991   : > { %10165 = vmatmul.bf16.gmra.mxu3 %v16189_v21 }
 0x993   : > { %v10047_v27 = vpop.f32.mrf.mxu2  ;;  %v9891_v31 = vpop.f32.mrf.mxu0 }
 0x994   : > { %v10126_v22 = vpop.f32.mrf.mxu3  ;;  %v10048_v36 = vadd.f32 %v10047_v27, %v9969_v29  ;;  %v9970_v2 = vpop.f32.mrf.mxu1 }
 0x995   : > { %v9971_v53 = vadd.f32 %v9970_v2, %v9891_v31  ;;  %v18018_v31 = vld [vmem:[%s18446_s28 + $0x22c] sm:$0xf0] }
 0x996   : > { %v10127_v49 = vadd.f32 %v10126_v22, %v10048_v36  ;;  %v16208_v36 = vld [vmem:[%s18446_s28 + $0x220] sm:$0xf] }
 0x997   : > { %v16209_v59 = vor.u32 %v18018_v31, %v16208_v36  ;;  %v18023_v36 = vld [vmem:[%s18446_s28 + $0x254] sm:$0xf0]  ;;  %v18021_v31 = vld [vmem:[%s18446_s28 + $0x24c] sm:$0xf] }
 0x998   : > { %v22037_v16 = vadd.f32 %v10127_v49, %v21745_v54  ;;  %v16216_v49 = vld [vmem:[%s18446_s28 + $0x228] sm:$0xf] }
 0x999   : > { %v16217_v62 = vor.u32 %v18019_v56, %v16216_v49 }
 0x99b   : > { %v10049_v54 = vpop.f32.mrf.mxu2  ;;  %v9894_v26 = vpop.f32.mrf.mxu0 }
 0x99c   : > { %v10128_v10 = vpop.f32.mrf.mxu3  ;;  %v10050_v17 = vadd.f32 %v10049_v54, %v9971_v53  ;;  %v9973_v44 = vpop.f32.mrf.mxu1  ;;  %v18016_v53 = vld [vmem:[%s18446_s28 + $0x224] sm:$0xf] }
 0x99d   : > { %v9974_v41 = vadd.f32 %v9973_v44, %v9894_v26 }
 0x99e   : > { %v10129_v15 = vadd.f32 %v10128_v10, %v10050_v17  ;;  %9933 = vmatmul.bf16.gmra.mxu0 %v16193_v60  ;;  %v18223_v60 = vld [vmem:[%s22621_s1 + $0xcb8] sm:$0xff] }
 0x99f   : > { %10012 = vmatmul.bf16.gmra.mxu1 %v16197_v40  ;;  %v18231_v40 = vld [vmem:[%s22621_s1 + $0xcf8] sm:$0xff]  ;;  %11902 = vmatpush.bf16.msra.mxu2 %v18223_v60 }
 0x9a0   : > { %v22054_v38 = vadd.f32 %v10129_v15, %v21762_v7  ;;  %10091 = vmatmul.bf16.gmra.mxu2 %v16201_v48  ;;  %v16210_v7 = vld [vmem:[%s18446_s28 + $0x230] sm:$0xf0]  ;;  %11981 = vmatpush.bf16.msra.mxu3 %v18231_v40  ;;  %v16224_v15 = vld [vmem:[%s18446_s28 + $0x240] sm:$0xf] }
 0x9a1   : > { %10170 = vmatmul.bf16.gmra.mxu3 %v16205_v3  ;;  %v16213_v35 = vor.u32 %v18016_v53, %v16210_v7  ;;  %v16234_v53 = vld [vmem:[%s18446_s28 + $0x258] sm:$0xf0] }
 0x9a3   : > { %v10052_v23 = vpop.f32.mrf.mxu2  ;;  %v9896_v29 = vpop.f32.mrf.mxu0 }
 0x9a4   : > { %v10131_v5 = vpop.f32.mrf.mxu3  ;;  %v10053_v21 = vadd.f32 %v10052_v23, %v9974_v41  ;;  %v9975_v13 = vpop.f32.mrf.mxu1  ;;  %v18022_v23 = vld [vmem:[%s18446_s28 + $0x24c] sm:$0xf0] }
 0x9a5   : > { %v9976_v27 = vadd.f32 %v9975_v13, %v9896_v29  ;;  %v16232_v13 = vld [vmem:[%s18446_s28 + $0x248] sm:$0xf]  ;;  %v16225_v56 = vor.u32 %v18022_v23, %v16224_v15  ;;  %v16442_v15 = vld [vmem:[%s18446_s28 + $0xc8] sm:$0xf0] }
 0x9a6   : > { %v10132_v22 = vadd.f32 %v10131_v5, %v10053_v21  ;;  %v18020_v5 = vld [vmem:[%s18446_s28 + $0x244] sm:$0xf]  ;;  %v16226_v21 = vld [vmem:[%s18446_s28 + $0x250] sm:$0xf0] }
 0x9a7   : > { %v16229_v43 = vor.u32 %v18020_v5, %v16226_v21 }
 0x9a8   : > { %v22059_v2 = vadd.f32 %v10132_v22, %v21767_v18  ;;  %v18215_v22 = vld [vmem:[%s22621_s1 + $0xc78] sm:$0xff] }
 0x9a9   : > { %11823 = vmatpush.bf16.msra.mxu1 %v18215_v22 }
 0x9ab   : > { %v10054_v34 = vpop.f32.mrf.mxu2  ;;  %v9899_v47 = vpop.f32.mrf.mxu0 }
 0x9ac   : > { %v10133_v28 = vpop.f32.mrf.mxu3  ;;  %v10055_v61 = vadd.f32 %v10054_v34, %v9976_v27  ;;  %v9978_v33 = vpop.f32.mrf.mxu1  ;;  %v18207_v27 = vld [vmem:[%s22621_s1 + $0xc38] sm:$0xff] }
 0x9ad   : > { %v9979_v54 = vadd.f32 %v9978_v33, %v9899_v47  ;;  %11744 = vmatpush.bf16.msra.mxu0 %v18207_v27 }
 0x9ae   : > { %v10134_v10 = vadd.f32 %v10133_v28, %v10055_v61  ;;  %9938 = vmatmul.bf16.gmra.mxu0 %v16209_v59  ;;  %v16233_v28 = vor.u32 %v18023_v36, %v16232_v13  ;;  %v16237_v59 = vor.u32 %v18021_v31, %v16234_v53 }
 0x9af   : > { %10017 = vmatmul.bf16.gmra.mxu1 %v16213_v35 }
 0x9b0   : > { %v22068_v18 = vadd.f32 %v10134_v10, %v21776_v12  ;;  %10096 = vmatmul.bf16.gmra.mxu2 %v16217_v62 }
 0x9b1   : > { %10175 = vmatmul.bf16.gmra.mxu3 %v16221_v42 }
 0x9b3   : > { %v10057_v17 = vpop.f32.mrf.mxu2  ;;  %v9901_v44 = vpop.f32.mrf.mxu0 }
 0x9b4   : > { %v10136_v12 = vpop.f32.mrf.mxu3  ;;  %v10058_v26 = vadd.f32 %v10057_v17, %v9979_v54  ;;  %v9980_v48 = vpop.f32.mrf.mxu1  ;;  %v16432_v17 = vld [vmem:[%s18446_s28 + $0xb0] sm:$0xf] }
 0x9b5   : > { %v9981_v3 = vadd.f32 %v9980_v48, %v9901_v44  ;;  %v18056_v44 = vld [vmem:[%s18446_s28 + $0xb4] sm:$0xf]  ;;  %v16440_v48 = vld [vmem:[%s18446_s28 + $0xb8] sm:$0xf] }
 0x9b6   : > { %v10137_v41 = vadd.f32 %v10136_v12, %v10058_v26  ;;  %v18058_v12 = vld [vmem:[%s18446_s28 + $0xbc] sm:$0xf0] }
 0x9b7   : > { %v16433_v21 = vor.u32 %v18058_v12, %v16432_v17  ;;  %v18063_v17 = vld [vmem:[%s18446_s28 + $0xe4] sm:$0xf0]  ;;  %v18061_v12 = vld [vmem:[%s18446_s28 + $0xdc] sm:$0xf] }
 0x9b8   : > { %v22081_v29 = vadd.f32 %v10137_v41, %v21789_v14  ;;  %v18057_v41 = vld [vmem:[%s18446_s28 + $0xbc] sm:$0xf] }
 0x9b9   : > { %v16445_v53 = vor.u32 %v18057_v41, %v16442_v15 }
 0x9bb   : > { %v10059_v7 = vpop.f32.mrf.mxu2  ;;  %v9904_v24 = vpop.f32.mrf.mxu0 }
 0x9bc   : > { %v10138_v49 = vpop.f32.mrf.mxu3  ;;  %v10060_v14 = vadd.f32 %v10059_v7, %v9981_v3  ;;  %v9983_v34 = vpop.f32.mrf.mxu1  ;;  %v18059_v3 = vld [vmem:[%s18446_s28 + $0xc4] sm:$0xf0] }
 0x9bd   : > { %v9984_v35 = vadd.f32 %v9983_v34, %v9904_v24  ;;  %v16441_v31 = vor.u32 %v18059_v3, %v16440_v48 }
 0x9be   : > { %v10139_v61 = vadd.f32 %v10138_v49, %v10060_v14  ;;  %9943 = vmatmul.bf16.gmra.mxu0 %v16225_v56  ;;  %v18222_v56 = vld [vmem:[%s22621_s1 + $0xcb0] sm:$0xff] }
 0x9bf   : > { %10022 = vmatmul.bf16.gmra.mxu1 %v16229_v43  ;;  %v18230_v43 = vld [vmem:[%s22621_s1 + $0xcf0] sm:$0xff]  ;;  %11903 = vmatpush.bf16.msra.mxu2 %v18222_v56 }
 0x9c0   : > { %v22094_v47 = vadd.f32 %v10139_v61, %v21802_v1  ;;  %10101 = vmatmul.bf16.gmra.mxu2 %v16233_v28  ;;  %v16434_v1 = vld [vmem:[%s18446_s28 + $0xc0] sm:$0xf0]  ;;  %v18206_v14 = vld [vmem:[%s22621_s1 + $0xc30] sm:$0xff]  ;;  %11982 = vmatpush.bf16.msra.mxu3 %v18230_v43 }
 0x9c1   : > { %10180 = vmatmul.bf16.gmra.mxu3 %v16237_v59  ;;  %v16437_v13 = vor.u32 %v18056_v44, %v16434_v1  ;;  %11745 = vmatpush.bf16.msra.mxu0 %v18206_v14  ;;  %v16458_v44 = vld [vmem:[%s18446_s28 + $0xe8] sm:$0xf0]  ;;  %v16464_v14 = vld [vmem:[%s18446_s28 + $0xf0] sm:$0xf] }
 0x9c3   : > { %v10062_v33 = vpop.f32.mrf.mxu2  ;;  %v9906_v54 = vpop.f32.mrf.mxu0 }
 0x9c4   : > { %v10141_v62 = vpop.f32.mrf.mxu3  ;;  %v10063_v42 = vadd.f32 %v10062_v33, %v9984_v35  ;;  %v9985_v10 = vpop.f32.mrf.mxu1 }
 0x9c5   : > { %v9986_v60 = vadd.f32 %v9985_v10, %v9906_v54  ;;  %v18060_v10 = vld [vmem:[%s18446_s28 + $0xd4] sm:$0xf] }
 0x9c6   : > { %v10142_v40 = vadd.f32 %v10141_v62, %v10063_v42  ;;  %v16448_v62 = vld [vmem:[%s18446_s28 + $0xd0] sm:$0xf]  ;;  %v18062_v42 = vld [vmem:[%s18446_s28 + $0xdc] sm:$0xf0] }
 0x9c7   : > { %v16449_v3 = vor.u32 %v18062_v42, %v16448_v62  ;;  %v16474_v62 = vld [vmem:[%s18446_s28 + $0x108] sm:$0xf0] }
 0x9c8   : > { %v22099_v26 = vadd.f32 %v10142_v40, %v21807_v4  ;;  %v16456_v40 = vld [vmem:[%s18446_s28 + $0xd8] sm:$0xf] }
 0x9cb   : > { %v10064_v23 = vpop.f32.mrf.mxu2  ;;  %v9909_v22 = vpop.f32.mrf.mxu0 }
 0x9cc   : > { %v10143_v5 = vpop.f32.mrf.mxu3  ;;  %v10065_v27 = vadd.f32 %v10064_v23, %v9986_v60  ;;  %v9988_v36 = vpop.f32.mrf.mxu1  ;;  %v16450_v60 = vld [vmem:[%s18446_s28 + $0xe0] sm:$0xf0] }
 0x9cd   : > { %v9989_v7 = vadd.f32 %v9988_v36, %v9909_v22  ;;  %v16453_v41 = vor.u32 %v18060_v10, %v16450_v60 }
 0x9ce   : > { %v10144_v49 = vadd.f32 %v10143_v5, %v10065_v27  ;;  %10815 = vmatmul.bf16.vlgmr.msrb.gmra.mxu0 %v16433_v21  ;;  %v16457_v21 = vor.u32 %v18063_v17, %v16456_v40 }
 0x9cf   : > { %10894 = vmatmul.bf16.vlgmr.msrb.gmra.mxu1 %v16437_v13  ;;  %v16461_v13 = vor.u32 %v18061_v12, %v16458_v44 }
 0x9d0   : > { %v22108_v4 = vadd.f32 %v10144_v49, %v21816_v63  ;;  %10973 = vmatmul.bf16.vlgmr.msrb.gmra.mxu2 %v16441_v31  ;;  %v18214_v63 = vld [vmem:[%s22621_s1 + $0xc70] sm:$0xff] }
 0x9d1   : > { %11052 = vmatmul.bf16.vlgmr.msrb.gmra.mxu3 %v16445_v53  ;;  %11824 = vmatpush.bf16.msra.mxu1 %v18214_v63  ;;  %v18066_v63 = vld [vmem:[%s18446_s28 + $0xfc] sm:$0xf0] }
 0x9d2   : > { %v16465_v60 = vor.u32 %v18066_v63, %v16464_v14  ;;  %v18071_v14 = vld [vmem:[%s18446_s28 + $0x124] sm:$0xf0]  ;;  %v18069_v63 = vld [vmem:[%s18446_s28 + $0x11c] sm:$0xf] }
 0x9d3   : > { %v10067_v24 = vpop.f32.mrf.mxu2  ;;  %v9911_v59 = vpop.f32.mrf.mxu0 }
 0x9d4   : > { %v10146_v34 = vpop.f32.mrf.mxu3  ;;  %v10068_v28 = vadd.f32 %v10067_v24, %v9989_v7  ;;  %v9990_v35 = vpop.f32.mrf.mxu1  ;;  %v18064_v24 = vld [vmem:[%s18446_s28 + $0xf4] sm:$0xf] }
 0x9d5   : > { %v9991_v61 = vadd.f32 %v9990_v35, %v9911_v59  ;;  %v18221_v59 = vld [vmem:[%s22621_s1 + $0xca8] sm:$0xff] }
 0x9d6   : > { %v10147_v33 = vadd.f32 %v10146_v34, %v10068_v28  ;;  %v16466_v34 = vld [vmem:[%s18446_s28 + $0x100] sm:$0xf0]  ;;  %v18229_v35 = vld [vmem:[%s22621_s1 + $0xce8] sm:$0xff]  ;;  %11904 = vmatpush.bf16.msra.mxu2 %v18221_v59 }
 0x9d7   : > { %11983 = vmatpush.bf16.msra.mxu3 %v18229_v35  ;;  %v16469_v40 = vor.u32 %v18064_v24, %v16466_v34  ;;  %v16490_v24 = vld [vmem:[%s18446_s28 + $0x128] sm:$0xf0] }
 0x9d8   : > { %v22125_v54 = vadd.f32 %v10147_v33, %v21833_v25  ;;  %v18065_v33 = vld [vmem:[%s18446_s28 + $0xfc] sm:$0xf] }
 0x9db   : > { %v10069_v1 = vpop.f32.mrf.mxu2  ;;  %v9914_v23 = vpop.f32.mrf.mxu0 }
 0x9dc   : > { %v10148_v48 = vpop.f32.mrf.mxu3  ;;  %v10070_v15 = vadd.f32 %v10069_v1, %v9991_v61  ;;  %v9993_v5 = vpop.f32.mrf.mxu1  ;;  %v18067_v61 = vld [vmem:[%s18446_s28 + $0x104] sm:$0xf0]  ;;  %v16477_v1 = vor.u32 %v18065_v33, %v16474_v62 }
 0x9dd   : > { %v9994_v27 = vadd.f32 %v9993_v5, %v9914_v23  ;;  %v18213_v23 = vld [vmem:[%s22621_s1 + $0xc68] sm:$0xff] }
 0x9de   : > { %v10149_v25 = vadd.f32 %v10148_v48, %v10070_v15  ;;  %10820 = vmatmul.bf16.gmra.mxu0 %v16449_v3  ;;  %v18205_v15 = vld [vmem:[%s22621_s1 + $0xc28] sm:$0xff]  ;;  %11825 = vmatpush.bf16.msra.mxu1 %v18213_v23  ;;  %v18074_v23 = vld [vmem:[%s18446_s28 + $0x13c] sm:$0xf0] }
 0x9df   : > { %10899 = vmatmul.bf16.gmra.mxu1 %v16453_v41  ;;  %11746 = vmatpush.bf16.msra.mxu0 %v18205_v15  ;;  %v16496_v15 = vld [vmem:[%s18446_s28 + $0x130] sm:$0xf] }
 0x9e0   : > { %v22134_v22 = vadd.f32 %v10149_v25, %v21842_v52  ;;  %10978 = vmatmul.bf16.gmra.mxu2 %v16457_v21  ;;  %v16472_v52 = vld [vmem:[%s18446_s28 + $0xf8] sm:$0xf] }
 0x9e1   : > { %11057 = vmatmul.bf16.gmra.mxu3 %v16461_v13  ;;  %v16473_v44 = vor.u32 %v18067_v61, %v16472_v52 }
 0x9e3   : > { %v10072_v36 = vpop.f32.mrf.mxu2  ;;  %v9916_v7 = vpop.f32.mrf.mxu0 }
 0x9e4   : > { %v10151_v31 = vpop.f32.mrf.mxu3  ;;  %v10073_v53 = vadd.f32 %v10072_v36, %v9994_v27  ;;  %v9995_v49 = vpop.f32.mrf.mxu1 }
 0x9e5   : > { %v9996_v56 = vadd.f32 %v9995_v49, %v9916_v7  ;;  %v18068_v49 = vld [vmem:[%s18446_s28 + $0x114] sm:$0xf] }
 0x9e6   : > { %v10152_v43 = vadd.f32 %v10151_v31, %v10073_v53  ;;  %v16480_v31 = vld [vmem:[%s18446_s28 + $0x110] sm:$0xf]  ;;  %v18070_v53 = vld [vmem:[%s18446_s28 + $0x11c] sm:$0xf0] }
 0x9e7   : > { %v16481_v59 = vor.u32 %v18070_v53, %v16480_v31  ;;  %v18073_v31 = vld [vmem:[%s18446_s28 + $0x13c] sm:$0xf]  ;;  %v16506_v53 = vld [vmem:[%s18446_s28 + $0x148] sm:$0xf0] }
 0x9e8   : > { %v22141_v28 = vadd.f32 %v10152_v43, %v21849_v9  ;;  %v16488_v43 = vld [vmem:[%s18446_s28 + $0x118] sm:$0xf] }
 0x9eb   : > { %v10074_v42 = vpop.f32.mrf.mxu2  ;;  %v9919_v17 = vpop.f32.mrf.mxu0 }
 0x9ec   : > { %v10153_v10 = vpop.f32.mrf.mxu3  ;;  %v10075_v9 = vadd.f32 %v10074_v42, %v9996_v56  ;;  %v9998_v12 = vpop.f32.mrf.mxu1  ;;  %v16482_v56 = vld [vmem:[%s18446_s28 + $0x120] sm:$0xf0]  ;;  %v16489_v42 = vor.u32 %v18071_v14, %v16488_v43  ;;  %v16497_v43 = vor.u32 %v18074_v23, %v16496_v15  ;;  %v18079_v15 = vld [vmem:[%s18446_s28 + $0x164] sm:$0xf0]  ;;  %v18077_v23 = vld [vmem:[%s18446_s28 + $0x15c] sm:$0xf] }
 0x9ed   : > { %v9999_v48 = vadd.f32 %v9998_v12, %v9919_v17  ;;  %v16485_v35 = vor.u32 %v18068_v49, %v16482_v56  ;;  %v18212_v49 = vld [vmem:[%s22621_s1 + $0xc60] sm:$0xff] }
 0x9ee   : > { %v10154_v3 = vadd.f32 %v10153_v10, %v10075_v9  ;;  %10825 = vmatmul.bf16.gmra.mxu0 %v16465_v60  ;;  %v16493_v10 = vor.u32 %v18069_v63, %v16490_v24  ;;  %11826 = vmatpush.bf16.msra.mxu1 %v18212_v49 }
 0x9ef   : > { %10904 = vmatmul.bf16.gmra.mxu1 %v16469_v40 }
 0x9f0   : > { %v22154_v41 = vadd.f32 %v10154_v3, %v21862_v45  ;;  %10983 = vmatmul.bf16.gmra.mxu2 %v16473_v44 }
 0x9f1   : > { %11062 = vmatmul.bf16.gmra.mxu3 %v16477_v1 }
 0x9f3   : > { %v10077_v45 = vpop.f32.mrf.mxu2  ;;  %v9921_v13 = vpop.f32.mrf.mxu0 }
 0x9f4   : > { %v10156_v5 = vpop.f32.mrf.mxu3  ;;  %v10078_v21 = vadd.f32 %v10077_v45, %v9999_v48  ;;  %v10000_v27 = vpop.f32.mrf.mxu1  ;;  %v18072_v45 = vld [vmem:[%s18446_s28 + $0x134] sm:$0xf] }
 0x9f5   : > { %v10001_v25 = vadd.f32 %v10000_v27, %v9921_v13  ;;  %v18075_v13 = vld [vmem:[%s18446_s28 + $0x144] sm:$0xf0]  ;;  %v18220_v27 = vld [vmem:[%s22621_s1 + $0xca0] sm:$0xff] }
 0x9f6   : > { %v10157_v36 = vadd.f32 %v10156_v5, %v10078_v21  ;;  %v16498_v5 = vld [vmem:[%s18446_s28 + $0x140] sm:$0xf0]  ;;  %v16504_v21 = vld [vmem:[%s18446_s28 + $0x138] sm:$0xf]  ;;  %11905 = vmatpush.bf16.msra.mxu2 %v18220_v27 }
 0x9f7   : > { %v16501_v14 = vor.u32 %v18072_v45, %v16498_v5  ;;  %v16522_v45 = vld [vmem:[%s18446_s28 + $0x168] sm:$0xf0] }
 0x9f8   : > { %v22165_v7 = vadd.f32 %v10157_v36, %v21873_v0  ;;  %v18204_v36 = vld [vmem:[%s22621_s1 + $0xc20] sm:$0xff]  ;;  %v16525_v49 = vor.u32 %v18077_v23, %v16522_v45 }
 0x9f9   : > { %11747 = vmatpush.bf16.msra.mxu0 %v18204_v36 }
 0x9fb   : > { %v10079_v34 = vpop.f32.mrf.mxu2  ;;  %v9924_v33 = vpop.f32.mrf.mxu0 }
 0x9fc   : > { %v10158_v52 = vpop.f32.mrf.mxu3  ;;  %v10080_v61 = vadd.f32 %v10079_v34, %v10001_v25  ;;  %v10003_v62 = vpop.f32.mrf.mxu1  ;;  %v18228_v25 = vld [vmem:[%s22621_s1 + $0xce0] sm:$0xff] }
 0x9fd   : > { %v10004_v60 = vadd.f32 %v10003_v62, %v9924_v33  ;;  %11984 = vmatpush.bf16.msra.mxu3 %v18228_v25 }
 0x9fe   : > { %v10159_v0 = vadd.f32 %v10158_v52, %v10080_v61  ;;  %10830 = vmatmul.bf16.gmra.mxu0 %v16481_v59  ;;  %v16505_v52 = vor.u32 %v18075_v13, %v16504_v21  ;;  %v16509_v59 = vor.u32 %v18073_v31, %v16506_v53 }
 0x9ff   : > { %10909 = vmatmul.bf16.gmra.mxu1 %v16485_v35 }
 0xa00   : > { %v22174_v40 = vadd.f32 %v10159_v0, %v21882_v6  ;;  %10988 = vmatmul.bf16.gmra.mxu2 %v16489_v42 }
 0xa01   : > { %11067 = vmatmul.bf16.gmra.mxu3 %v16493_v10 }
 0xa03   : > { %v10082_v9 = vpop.f32.mrf.mxu2  ;;  %v9926_v44 = vpop.f32.mrf.mxu0 }
 0xa04   : > { %v10161_v17 = vpop.f32.mrf.mxu3  ;;  %v10083_v12 = vadd.f32 %v10082_v9, %v10004_v60  ;;  %v10005_v1 = vpop.f32.mrf.mxu1 }
 0xa05   : > { %v10006_v48 = vadd.f32 %v10005_v1, %v9926_v44  ;;  %v18078_v44 = vld [vmem:[%s18446_s28 + $0x15c] sm:$0xf0] }
 0xa06   : > { %v10162_v3 = vadd.f32 %v10161_v17, %v10083_v12  ;;  %v16512_v12 = vld [vmem:[%s18446_s28 + $0x150] sm:$0xf] }
 0xa07   : > { %v16513_v13 = vor.u32 %v18078_v44, %v16512_v12  ;;  %v18083_v12 = vld [vmem:[%s18446_s28 + $0x184] sm:$0xf0]  ;;  %v18081_v44 = vld [vmem:[%s18446_s28 + $0x17c] sm:$0xf] }
 0xa08   : > { %v22183_v6 = vadd.f32 %v10162_v3, %v21891_v11  ;;  %v16520_v3 = vld [vmem:[%s18446_s28 + $0x158] sm:$0xf] }
 0xa09   : > { %v16521_v53 = vor.u32 %v18079_v15, %v16520_v3 }
 0xa0b   : > { %v10084_v11 = vpop.f32.mrf.mxu2  ;;  %v9929_v24 = vpop.f32.mrf.mxu0 }
 0xa0c   : > { %v10163_v56 = vpop.f32.mrf.mxu3  ;;  %v10085_v63 = vadd.f32 %v10084_v11, %v10006_v48  ;;  %v10008_v34 = vpop.f32.mrf.mxu1  ;;  %v18076_v48 = vld [vmem:[%s18446_s28 + $0x154] sm:$0xf] }
 0xa0d   : > { %v10009_v35 = vadd.f32 %v10008_v34, %v9929_v24 }
 0xa0e   : > { %v10164_v61 = vadd.f32 %v10163_v56, %v10085_v63  ;;  %10835 = vmatmul.bf16.gmra.mxu0 %v16497_v43  ;;  %v18219_v43 = vld [vmem:[%s22621_s1 + $0xc98] sm:$0xff] }
 0xa0f   : > { %10914 = vmatmul.bf16.gmra.mxu1 %v16501_v14  ;;  %v18227_v14 = vld [vmem:[%s22621_s1 + $0xcd8] sm:$0xff]  ;;  %11906 = vmatpush.bf16.msra.mxu2 %v18219_v43 }
 0xa10   : > { %v22200_v33 = vadd.f32 %v10164_v61, %v21908_v19  ;;  %10993 = vmatmul.bf16.gmra.mxu2 %v16505_v52  ;;  %v16514_v19 = vld [vmem:[%s18446_s28 + $0x160] sm:$0xf0]  ;;  %11985 = vmatpush.bf16.msra.mxu3 %v18227_v14  ;;  %v16528_v61 = vld [vmem:[%s18446_s28 + $0x170] sm:$0xf] }
 0xa11   : > { %11072 = vmatmul.bf16.gmra.mxu3 %v16509_v59  ;;  %v16517_v27 = vor.u32 %v18076_v48, %v16514_v19  ;;  %v16538_v48 = vld [vmem:[%s18446_s28 + $0x188] sm:$0xf0] }
 0xa13   : > { %v10087_v62 = vpop.f32.mrf.mxu2  ;;  %v9931_v60 = vpop.f32.mrf.mxu0 }
 0xa14   : > { %v10166_v42 = vpop.f32.mrf.mxu3  ;;  %v10088_v10 = vadd.f32 %v10087_v62, %v10009_v35  ;;  %v10010_v0 = vpop.f32.mrf.mxu1  ;;  %v18082_v62 = vld [vmem:[%s18446_s28 + $0x17c] sm:$0xf0] }
 0xa15   : > { %v10011_v9 = vadd.f32 %v10010_v0, %v9931_v60  ;;  %v16536_v0 = vld [vmem:[%s18446_s28 + $0x178] sm:$0xf]  ;;  %v16529_v15 = vor.u32 %v18082_v62, %v16528_v61  ;;  %v16554_v61 = vld [vmem:[%s18446_s28 + $0x1a8] sm:$0xf0] }
 0xa16   : > { %v10167_v17 = vadd.f32 %v10166_v42, %v10088_v10  ;;  %v18080_v42 = vld [vmem:[%s18446_s28 + $0x174] sm:$0xf]  ;;  %v16530_v10 = vld [vmem:[%s18446_s28 + $0x180] sm:$0xf0] }
 0xa17   : > { %v16533_v23 = vor.u32 %v18080_v42, %v16530_v10 }
 0xa18   : > { %v22205_v1 = vadd.f32 %v10167_v17, %v21913_v8  ;;  %v18211_v17 = vld [vmem:[%s22621_s1 + $0xc58] sm:$0xff] }
 0xa19   : > { %11827 = vmatpush.bf16.msra.mxu1 %v18211_v17 }
 0xa1b   : > { %v10089_v5 = vpop.f32.mrf.mxu2  ;;  %v9934_v36 = vpop.f32.mrf.mxu0 }
 0xa1c   : > { %v10168_v21 = vpop.f32.mrf.mxu3  ;;  %v10090_v25 = vadd.f32 %v10089_v5, %v10011_v9  ;;  %v10013_v31 = vpop.f32.mrf.mxu1  ;;  %v18203_v9 = vld [vmem:[%s22621_s1 + $0xc18] sm:$0xff] }
 0xa1d   : > { %v10014_v11 = vadd.f32 %v10013_v31, %v9934_v36  ;;  %11748 = vmatpush.bf16.msra.mxu0 %v18203_v9 }
 0xa1e   : > { %v10169_v56 = vadd.f32 %v10168_v21, %v10090_v25  ;;  %10840 = vmatmul.bf16.gmra.mxu0 %v16513_v13  ;;  %v16537_v21 = vor.u32 %v18083_v12, %v16536_v0  ;;  %v16541_v13 = vor.u32 %v18081_v44, %v16538_v48 }
 0xa1f   : > { %10919 = vmatmul.bf16.gmra.mxu1 %v16517_v27 }
 0xa20   : > { %v22214_v8 = vadd.f32 %v10169_v56, %v21922_v55  ;;  %10998 = vmatmul.bf16.gmra.mxu2 %v16521_v53 }
 0xa21   : > { %11077 = vmatmul.bf16.gmra.mxu3 %v16525_v49 }
 0xa23   : > { %v10092_v63 = vpop.f32.mrf.mxu2  ;;  %v9936_v34 = vpop.f32.mrf.mxu0 }
 0xa24   : > { %v10171_v55 = vpop.f32.mrf.mxu3  ;;  %v10093_v24 = vadd.f32 %v10092_v63, %v10014_v11  ;;  %v10015_v52 = vpop.f32.mrf.mxu1  ;;  %v16544_v63 = vld [vmem:[%s18446_s28 + $0x190] sm:$0xf] }
 0xa25   : > { %v10016_v59 = vadd.f32 %v10015_v52, %v9936_v34  ;;  %v18084_v34 = vld [vmem:[%s18446_s28 + $0x194] sm:$0xf]  ;;  %v16552_v52 = vld [vmem:[%s18446_s28 + $0x198] sm:$0xf] }
 0xa26   : > { %v10172_v35 = vadd.f32 %v10171_v55, %v10093_v24  ;;  %v18086_v55 = vld [vmem:[%s18446_s28 + $0x19c] sm:$0xf0] }
 0xa27   : > { %v16545_v10 = vor.u32 %v18086_v55, %v16544_v63  ;;  %v18091_v63 = vld [vmem:[%s18446_s28 + $0x1c4] sm:$0xf0]  ;;  %v18089_v55 = vld [vmem:[%s18446_s28 + $0x1bc] sm:$0xf] }
 0xa28   : > { %v22227_v60 = vadd.f32 %v10172_v35, %v21935_v30  ;;  %v18085_v35 = vld [vmem:[%s18446_s28 + $0x19c] sm:$0xf] }
 0xa29   : > { %v16557_v48 = vor.u32 %v18085_v35, %v16554_v61 }
 0xa2b   : > { %v10094_v19 = vpop.f32.mrf.mxu2  ;;  %v9939_v45 = vpop.f32.mrf.mxu0 }
 0xa2c   : > { %v10173_v3 = vpop.f32.mrf.mxu3  ;;  %v10095_v30 = vadd.f32 %v10094_v19, %v10016_v59  ;;  %v10018_v5 = vpop.f32.mrf.mxu1  ;;  %v18087_v59 = vld [vmem:[%s18446_s28 + $0x1a4] sm:$0xf0] }
 0xa2d   : > { %v10019_v27 = vadd.f32 %v10018_v5, %v9939_v45  ;;  %v16553_v44 = vor.u32 %v18087_v59, %v16552_v52 }
 0xa2e   : > { %v10174_v25 = vadd.f32 %v10173_v3, %v10095_v30  ;;  %10845 = vmatmul.bf16.gmra.mxu0 %v16529_v15  ;;  %v18218_v15 = vld [vmem:[%s22621_s1 + $0xc90] sm:$0xff] }
 0xa2f   : > { %10924 = vmatmul.bf16.gmra.mxu1 %v16533_v23  ;;  %v18226_v23 = vld [vmem:[%s22621_s1 + $0xcd0] sm:$0xff]  ;;  %11907 = vmatpush.bf16.msra.mxu2 %v18218_v15 }
 0xa30   : > { %v22240_v36 = vadd.f32 %v10174_v25, %v21948_v37  ;;  %11003 = vmatmul.bf16.gmra.mxu2 %v16537_v21  ;;  %v16546_v37 = vld [vmem:[%s18446_s28 + $0x1a0] sm:$0xf0]  ;;  %v18202_v30 = vld [vmem:[%s22621_s1 + $0xc10] sm:$0xff]  ;;  %11986 = vmatpush.bf16.msra.mxu3 %v18226_v23 }
 0xa31   : > { %11082 = vmatmul.bf16.gmra.mxu3 %v16541_v13  ;;  %v16549_v0 = vor.u32 %v18084_v34, %v16546_v37  ;;  %11749 = vmatpush.bf16.msra.mxu0 %v18202_v30  ;;  %v16570_v34 = vld [vmem:[%s18446_s28 + $0x1c8] sm:$0xf0]  ;;  %v16576_v30 = vld [vmem:[%s18446_s28 + $0x1d0] sm:$0xf] }
 0xa33   : > { %v10097_v31 = vpop.f32.mrf.mxu2  ;;  %v9941_v11 = vpop.f32.mrf.mxu0 }
 0xa34   : > { %v10176_v53 = vpop.f32.mrf.mxu3  ;;  %v10098_v49 = vadd.f32 %v10097_v31, %v10019_v27  ;;  %v10020_v56 = vpop.f32.mrf.mxu1 }
 0xa35   : > { %v10021_v43 = vadd.f32 %v10020_v56, %v9941_v11  ;;  %v18088_v56 = vld [vmem:[%s18446_s28 + $0x1b4] sm:$0xf] }
 0xa36   : > { %v10177_v14 = vadd.f32 %v10176_v53, %v10098_v49  ;;  %v16560_v53 = vld [vmem:[%s18446_s28 + $0x1b0] sm:$0xf]  ;;  %v18090_v49 = vld [vmem:[%s18446_s28 + $0x1bc] sm:$0xf0] }
 0xa37   : > { %v16561_v59 = vor.u32 %v18090_v49, %v16560_v53  ;;  %v16586_v53 = vld [vmem:[%s18446_s28 + $0x1e8] sm:$0xf0] }
 0xa38   : > { %v22245_v24 = vadd.f32 %v10177_v14, %v21953_v46  ;;  %v16568_v14 = vld [vmem:[%s18446_s28 + $0x1b8] sm:$0xf] }
 0xa3b   : > { %v10099_v62 = vpop.f32.mrf.mxu2  ;;  %v9944_v17 = vpop.f32.mrf.mxu0 }
 0xa3c   : > { %v10178_v42 = vpop.f32.mrf.mxu3  ;;  %v10100_v9 = vadd.f32 %v10099_v62, %v10021_v43  ;;  %v10023_v12 = vpop.f32.mrf.mxu1  ;;  %v16562_v43 = vld [vmem:[%s18446_s28 + $0x1c0] sm:$0xf0] }
 0xa3d   : > { %v10024_v19 = vadd.f32 %v10023_v12, %v9944_v17  ;;  %v16565_v35 = vor.u32 %v18088_v56, %v16562_v43 }
 0xa3e   : > { %v10179_v3 = vadd.f32 %v10178_v42, %v10100_v9  ;;  %10850 = vmatmul.bf16.gmra.mxu0 %v16545_v10  ;;  %v16569_v10 = vor.u32 %v18091_v63, %v16568_v14 }
 0xa3f   : > { %10929 = vmatmul.bf16.gmra.mxu1 %v16549_v0  ;;  %v16573_v0 = vor.u32 %v18089_v55, %v16570_v34 }
 0xa40   : > { %v22254_v46 = vadd.f32 %v10179_v3, %v21962_v20  ;;  %11008 = vmatmul.bf16.gmra.mxu2 %v16553_v44  ;;  %v18210_v20 = vld [vmem:[%s22621_s1 + $0xc50] sm:$0xff] }
 0xa41   : > { %11087 = vmatmul.bf16.gmra.mxu3 %v16557_v48  ;;  %11828 = vmatpush.bf16.msra.mxu1 %v18210_v20  ;;  %v18094_v20 = vld [vmem:[%s18446_s28 + $0x1dc] sm:$0xf0] }
 0xa42   : > { %v16577_v43 = vor.u32 %v18094_v20, %v16576_v30  ;;  %v18099_v30 = vld [vmem:[%s18446_s28 + $0x204] sm:$0xf0]  ;;  %v18097_v20 = vld [vmem:[%s18446_s28 + $0x1fc] sm:$0xf] }
 0xa43   : > { %v10102_v45 = vpop.f32.mrf.mxu2  ;;  %v9946_v13 = vpop.f32.mrf.mxu0 }
 0xa44   : > { %v10181_v5 = vpop.f32.mrf.mxu3  ;;  %v10103_v21 = vadd.f32 %v10102_v45, %v10024_v19  ;;  %v10025_v27 = vpop.f32.mrf.mxu1  ;;  %v18092_v45 = vld [vmem:[%s18446_s28 + $0x1d4] sm:$0xf] }
 0xa45   : > { %v10026_v25 = vadd.f32 %v10025_v27, %v9946_v13  ;;  %v18217_v13 = vld [vmem:[%s22621_s1 + $0xc88] sm:$0xff] }
 0xa46   : > { %v10182_v31 = vadd.f32 %v10181_v5, %v10103_v21  ;;  %v16578_v5 = vld [vmem:[%s18446_s28 + $0x1e0] sm:$0xf0]  ;;  %v18225_v27 = vld [vmem:[%s22621_s1 + $0xcc8] sm:$0xff]  ;;  %11908 = vmatpush.bf16.msra.mxu2 %v18217_v13 }
 0xa47   : > { %11987 = vmatpush.bf16.msra.mxu3 %v18225_v27  ;;  %v16581_v14 = vor.u32 %v18092_v45, %v16578_v5  ;;  %v16602_v45 = vld [vmem:[%s18446_s28 + $0x208] sm:$0xf0] }
 0xa48   : > { %v22271_v11 = vadd.f32 %v10182_v31, %v21979_v57  ;;  %v18093_v31 = vld [vmem:[%s18446_s28 + $0x1dc] sm:$0xf] }
 0xa4b   : > { %v10104_v37 = vpop.f32.mrf.mxu2  ;;  %v10816_v62 = vpop.f32.mrf.mxu0 }
 0xa4c   : > { %v10183_v52 = vpop.f32.mrf.mxu3  ;;  %v10105_v61 = vadd.f32 %v10104_v37, %v10026_v25  ;;  %v10895_v42 = vpop.f32.mrf.mxu1  ;;  %v18095_v25 = vld [vmem:[%s18446_s28 + $0x1e4] sm:$0xf0]  ;;  %v16589_v37 = vor.u32 %v18093_v31, %v16586_v53 }
 0xa4d   : > { %v10896_v9 = vadd.f32 %v10895_v42, %v10816_v62  ;;  %v18209_v62 = vld [vmem:[%s22621_s1 + $0xc48] sm:$0xff] }
 0xa4e   : > { %v10184_v57 = vadd.f32 %v10183_v52, %v10105_v61  ;;  %10855 = vmatmul.bf16.gmra.mxu0 %v16561_v59  ;;  %v18201_v61 = vld [vmem:[%s22621_s1 + $0xc08] sm:$0xff]  ;;  %11829 = vmatpush.bf16.msra.mxu1 %v18209_v62  ;;  %v18102_v62 = vld [vmem:[%s18446_s28 + $0x21c] sm:$0xf0] }
 0xa4f   : > { %10934 = vmatmul.bf16.gmra.mxu1 %v16565_v35  ;;  %11750 = vmatpush.bf16.msra.mxu0 %v18201_v61  ;;  %v16608_v61 = vld [vmem:[%s18446_s28 + $0x210] sm:$0xf] }
 0xa50   : > { %v22280_v17 = vadd.f32 %v10184_v57, %v21988_v50  ;;  %11013 = vmatmul.bf16.gmra.mxu2 %v16569_v10  ;;  %v16584_v50 = vld [vmem:[%s18446_s28 + $0x1d8] sm:$0xf] }
 0xa51   : > { %11092 = vmatmul.bf16.gmra.mxu3 %v16573_v0  ;;  %v16585_v34 = vor.u32 %v18095_v25, %v16584_v50 }
 0xa53   : > { %v10974_v12 = vpop.f32.mrf.mxu2  ;;  %v10818_v19 = vpop.f32.mrf.mxu0 }
 0xa54   : > { %v11053_v44 = vpop.f32.mrf.mxu3  ;;  %v10975_v48 = vadd.f32 %v10974_v12, %v10896_v9  ;;  %v10897_v3 = vpop.f32.mrf.mxu1 }
 0xa55   : > { %v10898_v15 = vadd.f32 %v10897_v3, %v10818_v19  ;;  %v18096_v3 = vld [vmem:[%s18446_s28 + $0x1f4] sm:$0xf] }
 0xa56   : > { %v11054_v23 = vadd.f32 %v11053_v44, %v10975_v48  ;;  %v16592_v44 = vld [vmem:[%s18446_s28 + $0x1f0] sm:$0xf]  ;;  %v18098_v48 = vld [vmem:[%s18446_s28 + $0x1fc] sm:$0xf0] }
 0xa57   : > { %v16593_v13 = vor.u32 %v18098_v48, %v16592_v44  ;;  %v18101_v44 = vld [vmem:[%s18446_s28 + $0x21c] sm:$0xf]  ;;  %v16618_v48 = vld [vmem:[%s18446_s28 + $0x228] sm:$0xf0] }
 0xa58   : > { %v22287_v21 = vadd.f32 %v11054_v23, %v21995_v58  ;;  %v16600_v23 = vld [vmem:[%s18446_s28 + $0x1f8] sm:$0xf] }
 0xa5b   : > { %v10976_v49 = vpop.f32.mrf.mxu2  ;;  %v10821_v63 = vpop.f32.mrf.mxu0 }
 0xa5c   : > { %v11055_v56 = vpop.f32.mrf.mxu3  ;;  %v10977_v58 = vadd.f32 %v10976_v49, %v10898_v15  ;;  %v10900_v55 = vpop.f32.mrf.mxu1  ;;  %v16594_v15 = vld [vmem:[%s18446_s28 + $0x200] sm:$0xf0]  ;;  %v16601_v49 = vor.u32 %v18099_v30, %v16600_v23  ;;  %v16609_v23 = vor.u32 %v18102_v62, %v16608_v61  ;;  %v18107_v61 = vld [vmem:[%s18446_s28 + $0x244] sm:$0xf0]  ;;  %v18105_v62 = vld [vmem:[%s18446_s28 + $0x23c] sm:$0xf] }
 0xa5d   : > { %v10901_v52 = vadd.f32 %v10900_v55, %v10821_v63  ;;  %v16597_v27 = vor.u32 %v18096_v3, %v16594_v15  ;;  %v18208_v3 = vld [vmem:[%s22621_s1 + $0xc40] sm:$0xff] }
 0xa5e   : > { %v11056_v59 = vadd.f32 %v11055_v56, %v10977_v58  ;;  %10860 = vmatmul.bf16.gmra.mxu0 %v16577_v43  ;;  %v16605_v56 = vor.u32 %v18097_v20, %v16602_v45  ;;  %11830 = vmatpush.bf16.msra.mxu1 %v18208_v3 }
 0xa5f   : > { %10939 = vmatmul.bf16.gmra.mxu1 %v16581_v14 }
 0xa60   : > { %v22300_v35 = vadd.f32 %v11056_v59, %v22008_v51  ;;  %11018 = vmatmul.bf16.gmra.mxu2 %v16585_v34 }
 0xa61   : > { %11097 = vmatmul.bf16.gmra.mxu3 %v16589_v37 }
 0xa63   : > { %v10979_v51 = vpop.f32.mrf.mxu2  ;;  %v10823_v0 = vpop.f32.mrf.mxu0 }
 0xa64   : > { %v11058_v42 = vpop.f32.mrf.mxu3  ;;  %v10980_v10 = vadd.f32 %v10979_v51, %v10901_v52  ;;  %v10902_v9 = vpop.f32.mrf.mxu1  ;;  %v18100_v51 = vld [vmem:[%s18446_s28 + $0x214] sm:$0xf] }
 0xa65   : > { %v10903_v57 = vadd.f32 %v10902_v9, %v10823_v0  ;;  %v18103_v0 = vld [vmem:[%s18446_s28 + $0x224] sm:$0xf0]  ;;  %v18216_v9 = vld [vmem:[%s22621_s1 + $0xc80] sm:$0xff] }
 0xa66   : > { %v11059_v12 = vadd.f32 %v11058_v42, %v10980_v10  ;;  %v16610_v42 = vld [vmem:[%s18446_s28 + $0x220] sm:$0xf0]  ;;  %v16616_v10 = vld [vmem:[%s18446_s28 + $0x218] sm:$0xf]  ;;  %11909 = vmatpush.bf16.msra.mxu2 %v18216_v9 }
 0xa67   : > { %v16613_v30 = vor.u32 %v18100_v51, %v16610_v42  ;;  %v16634_v51 = vld [vmem:[%s18446_s28 + $0x248] sm:$0xf0] }
 0xa68   : > { %v22311_v19 = vadd.f32 %v11059_v12, %v22019_v32  ;;  %v18200_v12 = vld [vmem:[%s22621_s1 + $0xc00] sm:$0xff]  ;;  %v16637_v3 = vor.u32 %v18105_v62, %v16634_v51 }
 0xa69   : > { %11751 = vmatpush.bf16.msra.mxu0 %v18200_v12 }
 0xa6b   : > { %v10981_v5 = vpop.f32.mrf.mxu2  ;;  %v10826_v31 = vpop.f32.mrf.mxu0 }
 0xa6c   : > { %v11060_v50 = vpop.f32.mrf.mxu3  ;;  %v10982_v25 = vadd.f32 %v10981_v5, %v10903_v57  ;;  %v10905_v53 = vpop.f32.mrf.mxu1  ;;  %v18224_v57 = vld [vmem:[%s22621_s1 + $0xcc0] sm:$0xff] }
 0xa6d   : > { %v10906_v43 = vadd.f32 %v10905_v53, %v10826_v31  ;;  %11988 = vmatpush.bf16.msra.mxu3 %v18224_v57 }
 0xa6e   : > { %v11061_v32 = vadd.f32 %v11060_v50, %v10982_v25  ;;  %10865 = vmatmul.bf16.gmra.mxu0 %v16593_v13  ;;  %v16617_v50 = vor.u32 %v18103_v0, %v16616_v10  ;;  %v16621_v13 = vor.u32 %v18101_v44, %v16618_v48 }
 0xa6f   : > { %10944 = vmatmul.bf16.gmra.mxu1 %v16597_v27 }
 0xa70   : > { %v22320_v14 = vadd.f32 %v11061_v32, %v22028_v39  ;;  %11023 = vmatmul.bf16.gmra.mxu2 %v16601_v49 }
 0xa71   : > { %11102 = vmatmul.bf16.gmra.mxu3 %v16605_v56 }
 0xa73   : > { %v10984_v58 = vpop.f32.mrf.mxu2  ;;  %v10828_v34 = vpop.f32.mrf.mxu0 }
 0xa74   : > { %v11063_v63 = vpop.f32.mrf.mxu3  ;;  %v10985_v55 = vadd.f32 %v10984_v58, %v10906_v43  ;;  %v10907_v37 = vpop.f32.mrf.mxu1 }
 0xa75   : > { %v10908_v52 = vadd.f32 %v10907_v37, %v10828_v34  ;;  %v18106_v34 = vld [vmem:[%s18446_s28 + $0x23c] sm:$0xf0] }
 0xa76   : > { %v11064_v59 = vadd.f32 %v11063_v63, %v10985_v55  ;;  %v16624_v55 = vld [vmem:[%s18446_s28 + $0x230] sm:$0xf] }
 0xa77   : > { %v16625_v0 = vor.u32 %v18106_v34, %v16624_v55 }
 0xa78   : > { %v22329_v39 = vadd.f32 %v11064_v59, %v22037_v16  ;;  %v16632_v59 = vld [vmem:[%s18446_s28 + $0x238] sm:$0xf] }
 0xa79   : > { %v16633_v48 = vor.u32 %v18107_v61, %v16632_v59 }
 0xa7b   : > { %v10986_v16 = vpop.f32.mrf.mxu2  ;;  %v10831_v45 = vpop.f32.mrf.mxu0 }
 0xa7c   : > { %v11065_v15 = vpop.f32.mrf.mxu3  ;;  %v10987_v20 = vadd.f32 %v10986_v16, %v10908_v52  ;;  %v10910_v5 = vpop.f32.mrf.mxu1  ;;  %v18104_v52 = vld [vmem:[%s18446_s28 + $0x234] sm:$0xf] }
 0xa7d   : > { %v10911_v27 = vadd.f32 %v10910_v5, %v10831_v45 }
 0xa7e   : > { %v11066_v25 = vadd.f32 %v11065_v15, %v10987_v20  ;;  %10870 = vmatmul.bf16.gmra.mxu0 %v16609_v23 }
 0xa7f   : > { %10949 = vmatmul.bf16.gmra.mxu1 %v16613_v30 }
 0xa80   : > { %v22346_v31 = vadd.f32 %v11066_v25, %v22054_v38  ;;  %11028 = vmatmul.bf16.gmra.mxu2 %v16617_v50  ;;  %v16626_v38 = vld [vmem:[%s18446_s28 + $0x240] sm:$0xf0]  ;;  %v18110_v25 = vld [vmem:[%s18446_s28 + $0x25c] sm:$0xf0] }
 0xa81   : > { %11107 = vmatmul.bf16.gmra.mxu3 %v16621_v13  ;;  %v16629_v9 = vor.u32 %v18104_v52, %v16626_v38 }
 0xa83   : > { %v10989_v53 = vpop.f32.mrf.mxu2  ;;  %v10833_v43 = vpop.f32.mrf.mxu0 }
 0xa84   : > { %v11068_v49 = vpop.f32.mrf.mxu3  ;;  %v10990_v56 = vadd.f32 %v10989_v53, %v10911_v27  ;;  %v10912_v32 = vpop.f32.mrf.mxu1  ;;  %v16640_v27 = vld [vmem:[%s18446_s28 + $0x250] sm:$0xf] }
 0xa85   : > { %v10913_v58 = vadd.f32 %v10912_v32, %v10833_v43  ;;  %v18111_v43 = vld [vmem:[%s18446_s28 + $0x264] sm:$0xf0]  ;;  %v18109_v32 = vld [vmem:[%s18446_s28 + $0x25c] sm:$0xf]  ;;  %v16641_v34 = vor.u32 %v18110_v25, %v16640_v27 }
 0xa86   : > { %v11069_v63 = vadd.f32 %v11068_v49, %v10990_v56  ;;  %v18108_v49 = vld [vmem:[%s18446_s28 + $0x254] sm:$0xf]  ;;  %v16648_v56 = vld [vmem:[%s18446_s28 + $0x258] sm:$0xf] }
 0xa87   : > { %v16649_v62 = vor.u32 %v18111_v43, %v16648_v56 }
 0xa88   : > { %v22351_v37 = vadd.f32 %v11069_v63, %v22059_v2 }
 0xa8b   : > { %v10991_v42 = vpop.f32.mrf.mxu2  ;;  %v10836_v12 = vpop.f32.mrf.mxu0 }
 0xa8c   : > { %v11070_v10 = vpop.f32.mrf.mxu3  ;;  %v10992_v57 = vadd.f32 %v10991_v42, %v10913_v58  ;;  %v10915_v44 = vpop.f32.mrf.mxu1  ;;  %v16650_v58 = vld [vmem:[%s18446_s28 + $0x268] sm:$0xf0] }
 0xa8d   : > { %v10916_v16 = vadd.f32 %v10915_v44, %v10836_v12  ;;  %v16653_v51 = vor.u32 %v18109_v32, %v16650_v58 }
 0xa8e   : > { %v11071_v2 = vadd.f32 %v11070_v10, %v10992_v57  ;;  %10875 = vmatmul.bf16.gmra.mxu0 %v16625_v0 }
 0xa8f   : > { %10954 = vmatmul.bf16.gmra.mxu1 %v16629_v9 }
 0xa90   : > { %v22360_v15 = vadd.f32 %v11071_v2, %v22068_v18  ;;  %11033 = vmatmul.bf16.gmra.mxu2 %v16633_v48  ;;  %v16642_v18 = vld [vmem:[%s18446_s28 + $0x260] sm:$0xf0]  ;;  %v18146_v2 = vld [vmem:[%s18446_s28 + $0xcc] sm:$0xf0] }
 0xa91   : > { %11112 = vmatmul.bf16.gmra.mxu3 %v16637_v3  ;;  %v16645_v52 = vor.u32 %v18108_v49, %v16642_v18 }
 0xa93   : > { %v10994_v23 = vpop.f32.mrf.mxu2  ;;  %v10838_v45 = vpop.f32.mrf.mxu0 }
 0xa94   : > { %v11073_v30 = vpop.f32.mrf.mxu3  ;;  %v10995_v20 = vadd.f32 %v10994_v23, %v10916_v16  ;;  %v10917_v5 = vpop.f32.mrf.mxu1  ;;  %v16848_v16 = vld [vmem:[%s18446_s28 + $0xc0] sm:$0xf] }
 0xa95   : > { %v10918_v50 = vadd.f32 %v10917_v5, %v10838_v45  ;;  %v18147_v45 = vld [vmem:[%s18446_s28 + $0xd4] sm:$0xf0]  ;;  %v18145_v5 = vld [vmem:[%s18446_s28 + $0xcc] sm:$0xf]  ;;  %v16849_v25 = vor.u32 %v18146_v2, %v16848_v16 }
 0xa96   : > { %v11074_v13 = vadd.f32 %v11073_v30, %v10995_v20  ;;  %v18144_v30 = vld [vmem:[%s18446_s28 + $0xc4] sm:$0xf]  ;;  %v16856_v20 = vld [vmem:[%s18446_s28 + $0xc8] sm:$0xf] }
 0xa97   : > { %v16857_v32 = vor.u32 %v18147_v45, %v16856_v20 }
 0xa98   : > { %v22365_v53 = vadd.f32 %v11074_v13, %v22081_v29 }
 0xa9b   : > { %v10996_v63 = vpop.f32.mrf.mxu2  ;;  %v10841_v59 = vpop.f32.mrf.mxu0 }
 0xa9c   : > { %v11075_v55 = vpop.f32.mrf.mxu3  ;;  %v10997_v38 = vadd.f32 %v10996_v63, %v10918_v50  ;;  %v10920_v61 = vpop.f32.mrf.mxu1  ;;  %v16858_v50 = vld [vmem:[%s18446_s28 + $0xd8] sm:$0xf0] }
 0xa9d   : > { %v10921_v42 = vadd.f32 %v10920_v61, %v10841_v59  ;;  %v16861_v58 = vor.u32 %v18145_v5, %v16858_v50 }
 0xa9e   : > { %v11076_v29 = vadd.f32 %v11075_v55, %v10997_v38  ;;  %10880 = vmatmul.bf16.gmra.mxu0 %v16641_v34 }
 0xa9f   : > { %10959 = vmatmul.bf16.gmra.mxu1 %v16645_v52 }
 0xaa0   : > { %v22374_v10 = vadd.f32 %v11076_v29, %v22094_v47  ;;  %11038 = vmatmul.bf16.gmra.mxu2 %v16649_v62  ;;  %v16850_v47 = vld [vmem:[%s18446_s28 + $0xd0] sm:$0xf0]  ;;  %v18150_v29 = vld [vmem:[%s18446_s28 + $0xec] sm:$0xf0] }
 0xaa1   : > { %11117 = vmatmul.bf16.gmra.mxu3 %v16653_v51  ;;  %v16853_v49 = vor.u32 %v18144_v30, %v16850_v47 }
 0xaa3   : > { %v10999_v0 = vpop.f32.mrf.mxu2  ;;  %v10843_v12 = vpop.f32.mrf.mxu0 }
 0xaa4   : > { %v11078_v9 = vpop.f32.mrf.mxu3  ;;  %v11000_v57 = vadd.f32 %v10999_v0, %v10921_v42  ;;  %v10922_v44 = vpop.f32.mrf.mxu1  ;;  %v16864_v42 = vld [vmem:[%s18446_s28 + $0xe0] sm:$0xf] }
 0xaa5   : > { %v10923_v48 = vadd.f32 %v10922_v44, %v10843_v12  ;;  %v18151_v12 = vld [vmem:[%s18446_s28 + $0xf4] sm:$0xf0]  ;;  %v18149_v44 = vld [vmem:[%s18446_s28 + $0xec] sm:$0xf]  ;;  %v16865_v2 = vor.u32 %v18150_v29, %v16864_v42 }
 0xaa6   : > { %v11079_v3 = vadd.f32 %v11078_v9, %v11000_v57  ;;  %v18148_v9 = vld [vmem:[%s18446_s28 + $0xe4] sm:$0xf]  ;;  %v16872_v57 = vld [vmem:[%s18446_s28 + $0xe8] sm:$0xf] }
 0xaa7   : > { %v16873_v5 = vor.u32 %v18151_v12, %v16872_v57 }
 0xaa8   : > { %v22379_v23 = vadd.f32 %v11079_v3, %v22099_v26 }
 0xaab   : > { %v11001_v13 = vpop.f32.mrf.mxu2  ;;  %v10846_v56 = vpop.f32.mrf.mxu0 }
 0xaac   : > { %v11080_v27 = vpop.f32.mrf.mxu3  ;;  %v11002_v18 = vadd.f32 %v11001_v13, %v10923_v48  ;;  %v10925_v43 = vpop.f32.mrf.mxu1  ;;  %v16874_v48 = vld [vmem:[%s18446_s28 + $0xf8] sm:$0xf0] }
 0xaad   : > { %v10926_v63 = vadd.f32 %v10925_v43, %v10846_v56  ;;  %v16877_v50 = vor.u32 %v18149_v44, %v16874_v48 }
 0xaae   : > { %v11081_v26 = vadd.f32 %v11080_v27, %v11002_v18  ;;  %11752 = vmatmul.bf16.vlgmr.msra.gmra.mxu0 %v16849_v25 }
 0xaaf   : > { %11831 = vmatmul.bf16.vlgmr.msra.gmra.mxu1 %v16853_v49 }
 0xab0   : > { %v22388_v55 = vadd.f32 %v11081_v26, %v22108_v4  ;;  %11910 = vmatmul.bf16.vlgmr.msra.gmra.mxu2 %v16857_v32  ;;  %v16866_v4 = vld [vmem:[%s18446_s28 + $0xf0] sm:$0xf0]  ;;  %v18154_v26 = vld [vmem:[%s18446_s28 + $0x10c] sm:$0xf0] }
 0xab1   : > { %11989 = vmatmul.bf16.vlgmr.msra.gmra.mxu3 %v16861_v58  ;;  %v16869_v30 = vor.u32 %v18148_v9, %v16866_v4 }
 0xab3   : > { %v11004_v34 = vpop.f32.mrf.mxu2  ;;  %v10848_v59 = vpop.f32.mrf.mxu0 }
 0xab4   : > { %v11083_v52 = vpop.f32.mrf.mxu3  ;;  %v11005_v38 = vadd.f32 %v11004_v34, %v10926_v63  ;;  %v10927_v61 = vpop.f32.mrf.mxu1  ;;  %v16880_v63 = vld [vmem:[%s18446_s28 + $0x100] sm:$0xf] }
 0xab5   : > { %v10928_v62 = vadd.f32 %v10927_v61, %v10848_v59  ;;  %v18155_v59 = vld [vmem:[%s18446_s28 + $0x114] sm:$0xf0]  ;;  %v18153_v61 = vld [vmem:[%s18446_s28 + $0x10c] sm:$0xf]  ;;  %v16881_v29 = vor.u32 %v18154_v26, %v16880_v63 }
 0xab6   : > { %v11084_v51 = vadd.f32 %v11083_v52, %v11005_v38  ;;  %v18152_v52 = vld [vmem:[%s18446_s28 + $0x104] sm:$0xf]  ;;  %v16888_v38 = vld [vmem:[%s18446_s28 + $0x108] sm:$0xf] }
 0xab7   : > { %v16889_v44 = vor.u32 %v18155_v59, %v16888_v38 }
 0xab8   : > { %v22393_v0 = vadd.f32 %v11084_v51, %v22125_v54 }
 0xabb   : > { %v11006_v3 = vpop.f32.mrf.mxu2  ;;  %v10851_v20 = vpop.f32.mrf.mxu0 }
 0xabc   : > { %v11085_v16 = vpop.f32.mrf.mxu3  ;;  %v11007_v47 = vadd.f32 %v11006_v3, %v10928_v62  ;;  %v10930_v45 = vpop.f32.mrf.mxu1  ;;  %v16890_v62 = vld [vmem:[%s18446_s28 + $0x118] sm:$0xf0] }
 0xabd   : > { %v10931_v13 = vadd.f32 %v10930_v45, %v10851_v20  ;;  %v16893_v48 = vor.u32 %v18153_v61, %v16890_v62 }
 0xabe   : > { %v11086_v54 = vadd.f32 %v11085_v16, %v11007_v47  ;;  %11757 = vmatmul.bf16.gmra.mxu0 %v16865_v2 }
 0xabf   : > { %11836 = vmatmul.bf16.gmra.mxu1 %v16869_v30 }
 0xac0   : > { %v22402_v27 = vadd.f32 %v11086_v54, %v22134_v22  ;;  %11915 = vmatmul.bf16.gmra.mxu2 %v16873_v5  ;;  %v16882_v22 = vld [vmem:[%s18446_s28 + $0x110] sm:$0xf0]  ;;  %v18158_v54 = vld [vmem:[%s18446_s28 + $0x12c] sm:$0xf0] }
 0xac1   : > { %11994 = vmatmul.bf16.gmra.mxu3 %v16877_v50  ;;  %v16885_v9 = vor.u32 %v18152_v52, %v16882_v22 }
 0xac3   : > { %v11009_v25 = vpop.f32.mrf.mxu2  ;;  %v10853_v56 = vpop.f32.mrf.mxu0 }
 0xac4   : > { %v11088_v49 = vpop.f32.mrf.mxu3  ;;  %v11010_v18 = vadd.f32 %v11009_v25, %v10931_v13  ;;  %v10932_v43 = vpop.f32.mrf.mxu1  ;;  %v16896_v13 = vld [vmem:[%s18446_s28 + $0x120] sm:$0xf] }
 0xac5   : > { %v10933_v32 = vadd.f32 %v10932_v43, %v10853_v56  ;;  %v18159_v56 = vld [vmem:[%s18446_s28 + $0x134] sm:$0xf0]  ;;  %v18157_v43 = vld [vmem:[%s18446_s28 + $0x12c] sm:$0xf]  ;;  %v16897_v26 = vor.u32 %v18158_v54, %v16896_v13 }
 0xac6   : > { %v11089_v58 = vadd.f32 %v11088_v49, %v11010_v18  ;;  %v18156_v49 = vld [vmem:[%s18446_s28 + $0x124] sm:$0xf]  ;;  %v16904_v18 = vld [vmem:[%s18446_s28 + $0x128] sm:$0xf] }
 0xac7   : > { %v16905_v61 = vor.u32 %v18159_v56, %v16904_v18 }
 0xac8   : > { %v22407_v34 = vadd.f32 %v11089_v58, %v22141_v28 }
 0xacb   : > { %v11011_v51 = vpop.f32.mrf.mxu2  ;;  %v10856_v57 = vpop.f32.mrf.mxu0 }
 0xacc   : > { %v11090_v42 = vpop.f32.mrf.mxu3  ;;  %v11012_v4 = vadd.f32 %v11011_v51, %v10933_v32  ;;  %v10935_v12 = vpop.f32.mrf.mxu1  ;;  %v16906_v32 = vld [vmem:[%s18446_s28 + $0x138] sm:$0xf0] }
 0xacd   : > { %v10936_v3 = vadd.f32 %v10935_v12, %v10856_v57  ;;  %v16909_v62 = vor.u32 %v18157_v43, %v16906_v32 }
 0xace   : > { %v11091_v28 = vadd.f32 %v11090_v42, %v11012_v4  ;;  %11762 = vmatmul.bf16.gmra.mxu0 %v16881_v29 }
 0xacf   : > { %11841 = vmatmul.bf16.gmra.mxu1 %v16885_v9 }
 0xad0   : > { %v22416_v16 = vadd.f32 %v11091_v28, %v22154_v41  ;;  %11920 = vmatmul.bf16.gmra.mxu2 %v16889_v44  ;;  %v16898_v41 = vld [vmem:[%s18446_s28 + $0x130] sm:$0xf0]  ;;  %v18162_v28 = vld [vmem:[%s18446_s28 + $0x14c] sm:$0xf0] }
 0xad1   : > { %11999 = vmatmul.bf16.gmra.mxu3 %v16893_v48  ;;  %v16901_v52 = vor.u32 %v18156_v49, %v16898_v41 }
 0xad3   : > { %v11014_v2 = vpop.f32.mrf.mxu2  ;;  %v10858_v20 = vpop.f32.mrf.mxu0 }
 0xad4   : > { %v11093_v30 = vpop.f32.mrf.mxu3  ;;  %v11015_v47 = vadd.f32 %v11014_v2, %v10936_v3  ;;  %v10937_v45 = vpop.f32.mrf.mxu1  ;;  %v16912_v3 = vld [vmem:[%s18446_s28 + $0x140] sm:$0xf] }
 0xad5   : > { %v10938_v5 = vadd.f32 %v10937_v45, %v10858_v20  ;;  %v18163_v20 = vld [vmem:[%s18446_s28 + $0x154] sm:$0xf0]  ;;  %v18161_v45 = vld [vmem:[%s18446_s28 + $0x14c] sm:$0xf]  ;;  %v16913_v54 = vor.u32 %v18162_v28, %v16912_v3 }
 0xad6   : > { %v11094_v50 = vadd.f32 %v11093_v30, %v11015_v47  ;;  %v18160_v30 = vld [vmem:[%s18446_s28 + $0x144] sm:$0xf]  ;;  %v16920_v47 = vld [vmem:[%s18446_s28 + $0x148] sm:$0xf] }
 0xad7   : > { %v16921_v43 = vor.u32 %v18163_v20, %v16920_v47 }
 0xad8   : > { %v22421_v25 = vadd.f32 %v11094_v50, %v22165_v7 }
 0xadb   : > { %v11016_v58 = vpop.f32.mrf.mxu2  ;;  %v10861_v38 = vpop.f32.mrf.mxu0 }
 0xadc   : > { %v11095_v63 = vpop.f32.mrf.mxu3  ;;  %v11017_v22 = vadd.f32 %v11016_v58, %v10938_v5  ;;  %v10940_v59 = vpop.f32.mrf.mxu1  ;;  %v16922_v5 = vld [vmem:[%s18446_s28 + $0x158] sm:$0xf0] }
 0xadd   : > { %v10941_v51 = vadd.f32 %v10940_v59, %v10861_v38  ;;  %v16925_v32 = vor.u32 %v18161_v45, %v16922_v5 }
 0xade   : > { %v11096_v7 = vadd.f32 %v11095_v63, %v11017_v22  ;;  %11767 = vmatmul.bf16.gmra.mxu0 %v16897_v26 }
 0xadf   : > { %11846 = vmatmul.bf16.gmra.mxu1 %v16901_v52 }
 0xae0   : > { %v22430_v42 = vadd.f32 %v11096_v7, %v22174_v40  ;;  %11925 = vmatmul.bf16.gmra.mxu2 %v16905_v61  ;;  %v16914_v40 = vld [vmem:[%s18446_s28 + $0x150] sm:$0xf0]  ;;  %v18166_v7 = vld [vmem:[%s18446_s28 + $0x16c] sm:$0xf0] }
 0xae1   : > { %12004 = vmatmul.bf16.gmra.mxu3 %v16909_v62  ;;  %v16917_v49 = vor.u32 %v18160_v30, %v16914_v40 }
 0xae3   : > { %v11019_v29 = vpop.f32.mrf.mxu2  ;;  %v10863_v57 = vpop.f32.mrf.mxu0 }
 0xae4   : > { %v11098_v9 = vpop.f32.mrf.mxu3  ;;  %v11020_v4 = vadd.f32 %v11019_v29, %v10941_v51  ;;  %v10942_v12 = vpop.f32.mrf.mxu1  ;;  %v16928_v51 = vld [vmem:[%s18446_s28 + $0x160] sm:$0xf] }
 0xae5   : > { %v10943_v44 = vadd.f32 %v10942_v12, %v10863_v57  ;;  %v18167_v57 = vld [vmem:[%s18446_s28 + $0x174] sm:$0xf0]  ;;  %v18165_v12 = vld [vmem:[%s18446_s28 + $0x16c] sm:$0xf]  ;;  %v16929_v28 = vor.u32 %v18166_v7, %v16928_v51 }
 0xae6   : > { %v11099_v48 = vadd.f32 %v11098_v9, %v11020_v4  ;;  %v18164_v9 = vld [vmem:[%s18446_s28 + $0x164] sm:$0xf]  ;;  %v16936_v4 = vld [vmem:[%s18446_s28 + $0x168] sm:$0xf] }
 0xae7   : > { %v16937_v45 = vor.u32 %v18167_v57, %v16936_v4 }
 0xae8   : > { %v22435_v2 = vadd.f32 %v11099_v48, %v22183_v6 }
 0xaeb   : > { %v11021_v50 = vpop.f32.mrf.mxu2  ;;  %v10866_v18 = vpop.f32.mrf.mxu0 }
 0xaec   : > { %v11100_v13 = vpop.f32.mrf.mxu3  ;;  %v11022_v41 = vadd.f32 %v11021_v50, %v10943_v44  ;;  %v10945_v56 = vpop.f32.mrf.mxu1  ;;  %v16938_v44 = vld [vmem:[%s18446_s28 + $0x178] sm:$0xf0] }
 0xaed   : > { %v10946_v58 = vadd.f32 %v10945_v56, %v10866_v18  ;;  %v16941_v5 = vor.u32 %v18165_v12, %v16938_v44 }
 0xaee   : > { %v11101_v6 = vadd.f32 %v11100_v13, %v11022_v41  ;;  %11772 = vmatmul.bf16.gmra.mxu0 %v16913_v54 }
 0xaef   : > { %11851 = vmatmul.bf16.gmra.mxu1 %v16917_v49 }
 0xaf0   : > { %v22444_v63 = vadd.f32 %v11101_v6, %v22200_v33  ;;  %11930 = vmatmul.bf16.gmra.mxu2 %v16921_v43  ;;  %v16930_v33 = vld [vmem:[%s18446_s28 + $0x170] sm:$0xf0]  ;;  %v18170_v6 = vld [vmem:[%s18446_s28 + $0x18c] sm:$0xf0] }
 0xaf1   : > { %12009 = vmatmul.bf16.gmra.mxu3 %v16925_v32  ;;  %v16933_v30 = vor.u32 %v18164_v9, %v16930_v33 }
 0xaf3   : > { %v11024_v26 = vpop.f32.mrf.mxu2  ;;  %v10868_v38 = vpop.f32.mrf.mxu0 }
 0xaf4   : > { %v11103_v52 = vpop.f32.mrf.mxu3  ;;  %v11025_v22 = vadd.f32 %v11024_v26, %v10946_v58  ;;  %v10947_v59 = vpop.f32.mrf.mxu1  ;;  %v16944_v58 = vld [vmem:[%s18446_s28 + $0x180] sm:$0xf] }
 0xaf5   : > { %v10948_v61 = vadd.f32 %v10947_v59, %v10868_v38  ;;  %v18171_v38 = vld [vmem:[%s18446_s28 + $0x194] sm:$0xf0]  ;;  %v18169_v59 = vld [vmem:[%s18446_s28 + $0x18c] sm:$0xf]  ;;  %v16945_v7 = vor.u32 %v18170_v6, %v16944_v58 }
 0xaf6   : > { %v11104_v62 = vadd.f32 %v11103_v52, %v11025_v22  ;;  %v18168_v52 = vld [vmem:[%s18446_s28 + $0x184] sm:$0xf]  ;;  %v16952_v22 = vld [vmem:[%s18446_s28 + $0x188] sm:$0xf] }
 0xaf7   : > { %v16953_v12 = vor.u32 %v18171_v38, %v16952_v22 }
 0xaf8   : > { %v22449_v29 = vadd.f32 %v11104_v62, %v22205_v1 }
 0xafb   : > { %v11026_v48 = vpop.f32.mrf.mxu2  ;;  %v10871_v47 = vpop.f32.mrf.mxu0 }
 0xafc   : > { %v11105_v3 = vpop.f32.mrf.mxu3  ;;  %v11027_v40 = vadd.f32 %v11026_v48, %v10948_v61  ;;  %v10950_v20 = vpop.f32.mrf.mxu1  ;;  %v16954_v61 = vld [vmem:[%s18446_s28 + $0x198] sm:$0xf0] }
 0xafd   : > { %v10951_v50 = vadd.f32 %v10950_v20, %v10871_v47  ;;  %v16957_v44 = vor.u32 %v18169_v59, %v16954_v61 }
 0xafe   : > { %v11106_v1 = vadd.f32 %v11105_v3, %v11027_v40  ;;  %11777 = vmatmul.bf16.gmra.mxu0 %v16929_v28 }
 0xaff   : > { %11856 = vmatmul.bf16.gmra.mxu1 %v16933_v30 }
 0xb00   : > { %v22458_v13 = vadd.f32 %v11106_v1, %v22214_v8  ;;  %11935 = vmatmul.bf16.gmra.mxu2 %v16937_v45  ;;  %v16946_v8 = vld [vmem:[%s18446_s28 + $0x190] sm:$0xf0]  ;;  %v18174_v1 = vld [vmem:[%s18446_s28 + $0x1ac] sm:$0xf0] }
 0xb01   : > { %12014 = vmatmul.bf16.gmra.mxu3 %v16941_v5  ;;  %v16949_v9 = vor.u32 %v18168_v52, %v16946_v8 }
 0xb03   : > { %v11029_v54 = vpop.f32.mrf.mxu2  ;;  %v10873_v18 = vpop.f32.mrf.mxu0 }
 0xb04   : > { %v11108_v49 = vpop.f32.mrf.mxu3  ;;  %v11030_v41 = vadd.f32 %v11029_v54, %v10951_v50  ;;  %v10952_v56 = vpop.f32.mrf.mxu1  ;;  %v16960_v50 = vld [vmem:[%s18446_s28 + $0x1a0] sm:$0xf] }
 0xb05   : > { %v10953_v43 = vadd.f32 %v10952_v56, %v10873_v18  ;;  %v18175_v18 = vld [vmem:[%s18446_s28 + $0x1b4] sm:$0xf0]  ;;  %v18173_v56 = vld [vmem:[%s18446_s28 + $0x1ac] sm:$0xf]  ;;  %v16961_v6 = vor.u32 %v18174_v1, %v16960_v50 }
 0xb06   : > { %v11109_v32 = vadd.f32 %v11108_v49, %v11030_v41  ;;  %v18172_v49 = vld [vmem:[%s18446_s28 + $0x1a4] sm:$0xf]  ;;  %v16968_v41 = vld [vmem:[%s18446_s28 + $0x1a8] sm:$0xf] }
 0xb07   : > { %v16969_v59 = vor.u32 %v18175_v18, %v16968_v41 }
 0xb08   : > { %v22463_v26 = vadd.f32 %v11109_v32, %v22227_v60 }
 0xb0b   : > { %v11031_v62 = vpop.f32.mrf.mxu2  ;;  %v10876_v4 = vpop.f32.mrf.mxu0 }
 0xb0c   : > { %v11110_v51 = vpop.f32.mrf.mxu3  ;;  %v11032_v33 = vadd.f32 %v11031_v62, %v10953_v43  ;;  %v10955_v57 = vpop.f32.mrf.mxu1  ;;  %v16970_v43 = vld [vmem:[%s18446_s28 + $0x1b8] sm:$0xf0] }
 0xb0d   : > { %v10956_v48 = vadd.f32 %v10955_v57, %v10876_v4  ;;  %v16973_v61 = vor.u32 %v18173_v56, %v16970_v43 }
 0xb0e   : > { %v11111_v60 = vadd.f32 %v11110_v51, %v11032_v33  ;;  %11782 = vmatmul.bf16.gmra.mxu0 %v16945_v7 }
 0xb0f   : > { %11861 = vmatmul.bf16.gmra.mxu1 %v16949_v9 }
 0xb10   : > { %v22472_v3 = vadd.f32 %v11111_v60, %v22240_v36  ;;  %11940 = vmatmul.bf16.gmra.mxu2 %v16953_v12  ;;  %v16962_v36 = vld [vmem:[%s18446_s28 + $0x1b0] sm:$0xf0]  ;;  %v18178_v60 = vld [vmem:[%s18446_s28 + $0x1cc] sm:$0xf0] }
 0xb11   : > { %12019 = vmatmul.bf16.gmra.mxu3 %v16957_v44  ;;  %v16965_v52 = vor.u32 %v18172_v49, %v16962_v36 }
 0xb13   : > { %v11034_v28 = vpop.f32.mrf.mxu2  ;;  %v10878_v47 = vpop.f32.mrf.mxu0 }
 0xb14   : > { %v11113_v30 = vpop.f32.mrf.mxu3  ;;  %v11035_v40 = vadd.f32 %v11034_v28, %v10956_v48  ;;  %v10957_v20 = vpop.f32.mrf.mxu1  ;;  %v16976_v48 = vld [vmem:[%s18446_s28 + $0x1c0] sm:$0xf] }
 0xb15   : > { %v10958_v45 = vadd.f32 %v10957_v20, %v10878_v47  ;;  %v18179_v47 = vld [vmem:[%s18446_s28 + $0x1d4] sm:$0xf0]  ;;  %v18177_v20 = vld [vmem:[%s18446_s28 + $0x1cc] sm:$0xf]  ;;  %v16977_v1 = vor.u32 %v18178_v60, %v16976_v48 }
 0xb16   : > { %v11114_v5 = vadd.f32 %v11113_v30, %v11035_v40  ;;  %v18176_v30 = vld [vmem:[%s18446_s28 + $0x1c4] sm:$0xf]  ;;  %v16984_v40 = vld [vmem:[%s18446_s28 + $0x1c8] sm:$0xf] }
 0xb17   : > { %v16985_v56 = vor.u32 %v18179_v47, %v16984_v40 }
 0xb18   : > { %v22477_v54 = vadd.f32 %v11114_v5, %v22245_v24 }
 0xb1b   : > { %v11036_v32 = vpop.f32.mrf.mxu2  ;;  %v10881_v22 = vpop.f32.mrf.mxu0 }
 0xb1c   : > { %v11115_v58 = vpop.f32.mrf.mxu3  ;;  %v11037_v8 = vadd.f32 %v11036_v32, %v10958_v45  ;;  %v10960_v38 = vpop.f32.mrf.mxu1  ;;  %v16986_v45 = vld [vmem:[%s18446_s28 + $0x1d8] sm:$0xf0] }
 0xb1d   : > { %v10961_v62 = vadd.f32 %v10960_v38, %v10881_v22  ;;  %v16989_v43 = vor.u32 %v18177_v20, %v16986_v45 }
 0xb1e   : > { %v11116_v24 = vadd.f32 %v11115_v58, %v11037_v8  ;;  %11787 = vmatmul.bf16.gmra.mxu0 %v16961_v6 }
 0xb1f   : > { %11866 = vmatmul.bf16.gmra.mxu1 %v16965_v52 }
 0xb20   : > { %v22486_v51 = vadd.f32 %v11116_v24, %v22254_v46  ;;  %11945 = vmatmul.bf16.gmra.mxu2 %v16969_v59  ;;  %v16978_v46 = vld [vmem:[%s18446_s28 + $0x1d0] sm:$0xf0]  ;;  %v18180_v24 = vld [vmem:[%s18446_s28 + $0x1e4] sm:$0xf] }
 0xb21   : > { %12024 = vmatmul.bf16.gmra.mxu3 %v16973_v61  ;;  %v16981_v49 = vor.u32 %v18176_v30, %v16978_v46  ;;  %v18182_v61 = vld [vmem:[%s18446_s28 + $0x1ec] sm:$0xf0] }
 0xb23   : > { %v11039_v7 = vpop.f32.mrf.mxu2  ;;  %v10883_v4 = vpop.f32.mrf.mxu0 }
 0xb24   : > { %v11118_v9 = vpop.f32.mrf.mxu3  ;;  %v11040_v33 = vadd.f32 %v11039_v7, %v10961_v62  ;;  %v10962_v57 = vpop.f32.mrf.mxu1  ;;  %v16994_v7 = vld [vmem:[%s18446_s28 + $0x1f0] sm:$0xf0] }
 0xb25   : > { %v10963_v12 = vadd.f32 %v10962_v57, %v10883_v4  ;;  %v18181_v4 = vld [vmem:[%s18446_s28 + $0x1ec] sm:$0xf]  ;;  %v17002_v57 = vld [vmem:[%s18446_s28 + $0x1f8] sm:$0xf0]  ;;  %v16997_v46 = vor.u32 %v18180_v24, %v16994_v7 }
 0xb26   : > { %v11119_v44 = vadd.f32 %v11118_v9, %v11040_v33  ;;  %v17000_v9 = vld [vmem:[%s18446_s28 + $0x1e8] sm:$0xf]  ;;  %v18183_v33 = vld [vmem:[%s18446_s28 + $0x1f4] sm:$0xf0] }
 0xb27   : > { %v17001_v45 = vor.u32 %v18183_v33, %v17000_v9 }
 0xb28   : > { %v22491_v28 = vadd.f32 %v11119_v44, %v22271_v11 }
 0xb2b   : > { %v11041_v5 = vpop.f32.mrf.mxu2  ;;  %v11753_v41 = vpop.f32.mrf.mxu0 }
 0xb2c   : > { %v11120_v50 = vpop.f32.mrf.mxu3  ;;  %v11042_v36 = vadd.f32 %v11041_v5, %v10963_v12  ;;  %v11832_v18 = vpop.f32.mrf.mxu1  ;;  %v17005_v5 = vor.u32 %v18181_v4, %v17002_v57 }
 0xb2d   : > { %v11833_v58 = vadd.f32 %v11832_v18, %v11753_v41 }
 0xb2e   : > { %v11121_v32 = vadd.f32 %v11120_v50, %v11042_v36  ;;  %11792 = vmatmul.bf16.gmra.mxu0 %v16977_v1 }
 0xb2f   : > { %11871 = vmatmul.bf16.gmra.mxu1 %v16981_v49 }
 0xb30   : > { %v22501_v11 = vadd.f32 %v11121_v32, %v22280_v17  ;;  %11950 = vmatmul.bf16.gmra.mxu2 %v16985_v56  ;;  %v16992_v17 = vld [vmem:[%s18446_s28 + $0x1e0] sm:$0xf] }
 0xb31   : > { %12029 = vmatmul.bf16.gmra.mxu3 %v16989_v43  ;;  %v16993_v30 = vor.u32 %v18182_v61, %v16992_v17  ;;  %v18187_v17 = vld [vmem:[%s18446_s28 + $0x214] sm:$0xf0]  ;;  %v18185_v61 = vld [vmem:[%s18446_s28 + $0x20c] sm:$0xf] }
 0xb33   : > { %v11911_v6 = vpop.f32.mrf.mxu2  ;;  %v11755_v22 = vpop.f32.mrf.mxu0 }
 0xb34   : > { %v11990_v52 = vpop.f32.mrf.mxu3  ;;  %v11912_v8 = vadd.f32 %v11911_v6, %v11833_v58  ;;  %v11834_v38 = vpop.f32.mrf.mxu1 }
 0xb35   : > { %v11835_v44 = vadd.f32 %v11834_v38, %v11755_v22  ;;  %v18184_v22 = vld [vmem:[%s18446_s28 + $0x204] sm:$0xf]  ;;  %v17010_v38 = vld [vmem:[%s18446_s28 + $0x210] sm:$0xf0] }
 0xb36   : > { %v11991_v59 = vadd.f32 %v11990_v52, %v11912_v8  ;;  %v18186_v52 = vld [vmem:[%s18446_s28 + $0x20c] sm:$0xf0]  ;;  %v17013_v57 = vor.u32 %v18184_v22, %v17010_v38 }
 0xb38   : > { %v12060_v62 = vadd.f32 %v11991_v59, %v22287_v21  ;;  %v17016_v59 = vld [vmem:[%s18446_s28 + $0x208] sm:$0xf] }
 0xb3a   : > { %vm12088_vm0 = vcmp.gt.f32.partialorder %v12060_v62, 0.0  ;;  %v12116_v12 = vmul.f32 399.0, %v12060_v62 }
 0xb3b   : > { %v11913_v48 = vpop.f32.mrf.mxu2  ;;  %v11758_v47 = vpop.f32.mrf.mxu0 }
 0xb3c   : > { %v11992_v60 = vpop.f32.mrf.mxu3  ;;  %v12144_v21 = vsel %vm12088_vm0, %v12060_v62, %v12116_v12  ;;  %v11914_v40 = vadd.f32 %v11913_v48, %v11835_v44  ;;  %v11837_v20 = vpop.f32.mrf.mxu1  ;;  %v17018_v62 = vld [vmem:[%s18446_s28 + $0x218] sm:$0xf0] }
 0xb3d   : > { %12172 = vst [vmem:[%s22516_s16] sm:$0xff] %v12144_v21  ;;  %v11838_v49 = vadd.f32 %v11837_v20, %v11758_v47 }
 0xb3e   : > { %v11993_v50 = vadd.f32 %v11992_v60, %v11914_v40  ;;  %11797 = vmatmul.bf16.gmra.mxu0 %v16993_v30  ;;  %v17017_v30 = vor.u32 %v18187_v17, %v17016_v59 }
 0xb3f   : > { %11876 = vmatmul.bf16.gmra.mxu1 %v16997_v46 }
 0xb40   : > { %v12061_v1 = vadd.f32 %v11993_v50, %v22300_v35  ;;  %11955 = vmatmul.bf16.gmra.mxu2 %v17001_v45  ;;  %v17008_v35 = vld [vmem:[%s18446_s28 + $0x200] sm:$0xf] }
 0xb41   : > { %12034 = vmatmul.bf16.gmra.mxu3 %v17005_v5  ;;  %v17009_v4 = vor.u32 %v18186_v52, %v17008_v35  ;;  %v17034_v35 = vld [vmem:[%s18446_s28 + $0x238] sm:$0xf0] }
 0xb42   : > { %vm12089_vm1 = vcmp.gt.f32.partialorder %v12061_v1, 0.0  ;;  %v12117_v36 = vmul.f32 399.0, %v12061_v1 }
 0xb43   : > { %v11916_v41 = vpop.f32.mrf.mxu2  ;;  %v11760_v32 = vpop.f32.mrf.mxu0 }
 0xb44   : > { %v11995_v18 = vpop.f32.mrf.mxu3  ;;  %v12145_v56 = vsel %vm12089_vm1, %v12061_v1, %v12117_v36  ;;  %v11917_v43 = vadd.f32 %v11916_v41, %v11838_v49  ;;  %v11839_v58 = vpop.f32.mrf.mxu1  ;;  %v18190_v41 = vld [vmem:[%s18446_s28 + $0x22c] sm:$0xf0] }
 0xb45   : > { %12173 = vst [vmem:[%s22516_s16 + $0x8] sm:$0xff] %v12145_v56  ;;  %v11840_v7 = vadd.f32 %v11839_v58, %v11760_v32  ;;  %v18188_v56 = vld [vmem:[%s18446_s28 + $0x224] sm:$0xf]  ;;  %v17032_v32 = vld [vmem:[%s18446_s28 + $0x228] sm:$0xf] }
 0xb46   : > { %v11996_v6 = vadd.f32 %v11995_v18, %v11917_v43  ;;  %v17026_v43 = vld [vmem:[%s18446_s28 + $0x230] sm:$0xf0]  ;;  %v18191_v58 = vld [vmem:[%s18446_s28 + $0x234] sm:$0xf0] }
 0xb47   : > { %v17029_v17 = vor.u32 %v18188_v56, %v17026_v43 }
 0xb48   : > { %v12062_v8 = vadd.f32 %v11996_v6, %v22311_v19  ;;  %v17021_v19 = vor.u32 %v18185_v61, %v17018_v62  ;;  %v18189_v6 = vld [vmem:[%s18446_s28 + $0x22c] sm:$0xf] }
 0xb4a   : > { %vm12090_vm2 = vcmp.gt.f32.partialorder %v12062_v8, 0.0  ;;  %v12118_v24 = vmul.f32 399.0, %v12062_v8 }
 0xb4b   : > { %v11918_v9 = vpop.f32.mrf.mxu2  ;;  %v11763_v48 = vpop.f32.mrf.mxu0 }
 0xb4c   : > { %v11997_v33 = vpop.f32.mrf.mxu3  ;;  %v12146_v12 = vsel %vm12090_vm2, %v12062_v8, %v12118_v24  ;;  %v11919_v44 = vadd.f32 %v11918_v9, %v11840_v7  ;;  %v11842_v60 = vpop.f32.mrf.mxu1  ;;  %v17033_v9 = vor.u32 %v18191_v58, %v17032_v32 }
 0xb4d   : > { %12174 = vst [vmem:[%s22516_s16 + $0x10] sm:$0xff] %v12146_v12  ;;  %v11843_v40 = vadd.f32 %v11842_v60, %v11763_v48 }
 0xb4e   : > { %v11998_v46 = vadd.f32 %v11997_v33, %v11919_v44  ;;  %11802 = vmatmul.bf16.gmra.mxu0 %v17009_v4 }
 0xb4f   : > { %11881 = vmatmul.bf16.gmra.mxu1 %v17013_v57 }
 0xb50   : > { %v12063_v21 = vadd.f32 %v11998_v46, %v22320_v14  ;;  %11960 = vmatmul.bf16.gmra.mxu2 %v17017_v30  ;;  %v17024_v14 = vld [vmem:[%s18446_s28 + $0x220] sm:$0xf] }
 0xb51   : > { %12039 = vmatmul.bf16.gmra.mxu3 %v17021_v19  ;;  %v17025_v59 = vor.u32 %v18190_v41, %v17024_v14 }
 0xb52   : > { %vm12091_vm3 = vcmp.gt.f32.partialorder %v12063_v21, 0.0  ;;  %v12119_v47 = vmul.f32 399.0, %v12063_v21 }
 0xb53   : > { %v11921_v20 = vpop.f32.mrf.mxu2  ;;  %v11765_v1 = vpop.f32.mrf.mxu0 }
 0xb54   : > { %v12000_v45 = vpop.f32.mrf.mxu3  ;;  %v12147_v5 = vsel %vm12091_vm3, %v12063_v21, %v12119_v47  ;;  %v11922_v50 = vadd.f32 %v11921_v20, %v11843_v40  ;;  %v11844_v49 = vpop.f32.mrf.mxu1  ;;  %v18194_v40 = vld [vmem:[%s18446_s28 + $0x24c] sm:$0xf0]  ;;  %v18192_v20 = vld [vmem:[%s18446_s28 + $0x244] sm:$0xf] }
 0xb55   : > { %12175 = vst [vmem:[%s22516_s16 + $0x18] sm:$0xff] %v12147_v5  ;;  %v11845_v8 = vadd.f32 %v11844_v49, %v11765_v1  ;;  %v17048_v5 = vld [vmem:[%s18446_s28 + $0x248] sm:$0xf]  ;;  %v18193_v1 = vld [vmem:[%s18446_s28 + $0x24c] sm:$0xf] }
 0xb56   : > { %v12001_v36 = vadd.f32 %v12000_v45, %v11922_v50  ;;  %v17042_v45 = vld [vmem:[%s18446_s28 + $0x250] sm:$0xf0]  ;;  %v18195_v50 = vld [vmem:[%s18446_s28 + $0x254] sm:$0xf0]  ;;  %v17050_v49 = vld [vmem:[%s18446_s28 + $0x258] sm:$0xf0] }
 0xb57   : > { %v17045_v43 = vor.u32 %v18192_v20, %v17042_v45 }
 0xb58   : > { %v12064_v18 = vadd.f32 %v12001_v36, %v22329_v39  ;;  %v17037_v39 = vor.u32 %v18189_v6, %v17034_v35 }
 0xb5a   : > { %vm12092_vm4 = vcmp.gt.f32.partialorder %v12064_v18, 0.0  ;;  %v12120_v52 = vmul.f32 399.0, %v12064_v18 }
 0xb5b   : > { %v11923_v22 = vpop.f32.mrf.mxu2  ;;  %v11768_v24 = vpop.f32.mrf.mxu0 }
 0xb5c   : > { %v12002_v38 = vpop.f32.mrf.mxu3  ;;  %v12148_v61 = vsel %vm12092_vm4, %v12064_v18, %v12120_v52  ;;  %v11924_v62 = vadd.f32 %v11923_v22, %v11845_v8  ;;  %v11847_v7 = vpop.f32.mrf.mxu1  ;;  %v17049_v52 = vor.u32 %v18195_v50, %v17048_v5 }
 0xb5d   : > { %12176 = vst [vmem:[%s22516_s16 + $0x20] sm:$0xff] %v12148_v61  ;;  %v11848_v57 = vadd.f32 %v11847_v7, %v11768_v24 }
 0xb5e   : > { %v12003_v33 = vadd.f32 %v12002_v38, %v11924_v62  ;;  %11807 = vmatmul.bf16.gmra.mxu0 %v17025_v59 }
 0xb5f   : > { %11886 = vmatmul.bf16.gmra.mxu1 %v17029_v17 }
 0xb60   : > { %v12065_v4 = vadd.f32 %v12003_v33, %v22346_v31  ;;  %11965 = vmatmul.bf16.gmra.mxu2 %v17033_v9  ;;  %v17040_v31 = vld [vmem:[%s18446_s28 + $0x240] sm:$0xf]  ;;  %v18198_v33 = vld [vmem:[%s18446_s28 + $0x26c] sm:$0xf0] }
 0xb61   : > { %12044 = vmatmul.bf16.gmra.mxu3 %v17037_v39  ;;  %v17041_v56 = vor.u32 %v18194_v40, %v17040_v31 }
 0xb62   : > { %vm12093_vm5 = vcmp.gt.f32.partialorder %v12065_v4, 0.0  ;;  %v12121_v12 = vmul.f32 399.0, %v12065_v4 }
 0xb63   : > { %v11926_v44 = vpop.f32.mrf.mxu2  ;;  %v11770_v19 = vpop.f32.mrf.mxu0 }
 0xb64   : > { %v12005_v48 = vpop.f32.mrf.mxu3  ;;  %v12149_v60 = vsel %vm12093_vm5, %v12065_v4, %v12121_v12  ;;  %v11927_v30 = vadd.f32 %v11926_v44, %v11848_v57  ;;  %v11849_v46 = vpop.f32.mrf.mxu1  ;;  %v18196_v57 = vld [vmem:[%s18446_s28 + $0x264] sm:$0xf]  ;;  %v17058_v12 = vld [vmem:[%s18446_s28 + $0x270] sm:$0xf0]  ;;  %v17064_v44 = vld [vmem:[%s18446_s28 + $0x268] sm:$0xf] }
 0xb65   : > { %12177 = vst [vmem:[%s22516_s16 + $0x28] sm:$0xff] %v12149_v60  ;;  %v11850_v14 = vadd.f32 %v11849_v46, %v11770_v19  ;;  %v18197_v60 = vld [vmem:[%s18446_s28 + $0x26c] sm:$0xf] }
 0xb66   : > { %v12006_v21 = vadd.f32 %v12005_v48, %v11927_v30  ;;  %v18199_v48 = vld [vmem:[%s18446_s28 + $0x274] sm:$0xf0]  ;;  %v17066_v30 = vld [vmem:[%s18446_s28 + $0x278] sm:$0xf0] }
 0xb68   : > { %v12066_v47 = vadd.f32 %v12006_v21, %v22351_v37  ;;  %v17053_v37 = vor.u32 %v18193_v1, %v17050_v49  ;;  %v17065_v1 = vor.u32 %v18199_v48, %v17064_v44 }
 0xb6a   : > { %vm12094_vm6 = vcmp.gt.f32.partialorder %v12066_v47, 0.0  ;;  %v12122_v36 = vmul.f32 399.0, %v12066_v47 }
 0xb6b   : > { %v11928_v41 = vpop.f32.mrf.mxu2  ;;  %v11773_v6 = vpop.f32.mrf.mxu0 }
 0xb6c   : > { %v12007_v18 = vpop.f32.mrf.mxu3  ;;  %v12150_v32 = vsel %vm12094_vm6, %v12066_v47, %v12122_v36  ;;  %v11929_v58 = vadd.f32 %v11928_v41, %v11850_v14  ;;  %v11852_v35 = vpop.f32.mrf.mxu1  ;;  %v17061_v47 = vor.u32 %v18196_v57, %v17058_v12 }
 0xb6d   : > { %12178 = vst [vmem:[%s22516_s16 + $0x30] sm:$0xff] %v12150_v32  ;;  %v11853_v38 = vadd.f32 %v11852_v35, %v11773_v6 }
 0xb6e   : > { %v12008_v8 = vadd.f32 %v12007_v18, %v11929_v58  ;;  %11812 = vmatmul.bf16.gmra.mxu0 %v17041_v56 }
 0xb6f   : > { %11891 = vmatmul.bf16.gmra.mxu1 %v17045_v43 }
 0xb70   : > { %v12067_v22 = vadd.f32 %v12008_v8, %v22360_v15  ;;  %11970 = vmatmul.bf16.gmra.mxu2 %v17049_v52  ;;  %v17056_v15 = vld [vmem:[%s18446_s28 + $0x260] sm:$0xf] }
 0xb71   : > { %12049 = vmatmul.bf16.gmra.mxu3 %v17053_v37  ;;  %v17057_v40 = vor.u32 %v18198_v33, %v17056_v15 }
 0xb72   : > { %vm12095_vm7 = vcmp.gt.f32.partialorder %v12067_v22, 0.0  ;;  %v12123_v59 = vmul.f32 399.0, %v12067_v22 }
 0xb73   : > { %v11931_v17 = vpop.f32.mrf.mxu2  ;;  %v11775_v7 = vpop.f32.mrf.mxu0 }
 0xb74   : > { %v12010_v61 = vpop.f32.mrf.mxu3  ;;  %v12151_v62 = vsel %vm12095_vm7, %v12067_v22, %v12123_v59  ;;  %v11932_v24 = vadd.f32 %v11931_v17, %v11853_v38  ;;  %v11854_v9 = vpop.f32.mrf.mxu1 }
 0xb75   : > { %12179 = vst [vmem:[%s22516_s16 + $0x38] sm:$0xff] %v12151_v62  ;;  %v11855_v46 = vadd.f32 %v11854_v9, %v11775_v7 }
 0xb76   : > { %v12011_v39 = vadd.f32 %v12010_v61, %v11932_v24 }
 0xb78   : > { %v12068_v4 = vadd.f32 %v12011_v39, %v22365_v53  ;;  %v17069_v53 = vor.u32 %v18197_v60, %v17066_v30 }
 0xb7a   : > { %vm12096_vm8 = vcmp.gt.f32.partialorder %v12068_v4, 0.0  ;;  %v12124_v19 = vmul.f32 399.0, %v12068_v4 }
 0xb7b   : > { %v11933_v21 = vpop.f32.mrf.mxu2  ;;  %v11778_v5 = vpop.f32.mrf.mxu0 }
 0xb7c   : > { %v12012_v31 = vpop.f32.mrf.mxu3  ;;  %v12152_v20 = vsel %vm12096_vm8, %v12068_v4, %v12124_v19  ;;  %v11934_v45 = vadd.f32 %v11933_v21, %v11855_v46  ;;  %v11857_v50 = vpop.f32.mrf.mxu1 }
 0xb7d   : > { %12180 = vst [vmem:[%s22516_s16 + $0x40] sm:$0xff] %v12152_v20  ;;  %v11858_v14 = vadd.f32 %v11857_v50, %v11778_v5 }
 0xb7e   : > { %v12013_v49 = vadd.f32 %v12012_v31, %v11934_v45  ;;  %11817 = vmatmul.bf16.gmra.mxu0 %v17057_v40 }
 0xb7f   : > { %11896 = vmatmul.bf16.gmra.mxu1 %v17061_v47 }
 0xb80   : > { %v12069_v36 = vadd.f32 %v12013_v49, %v22374_v10  ;;  %11975 = vmatmul.bf16.gmra.mxu2 %v17065_v1 }
 0xb81   : > { %12054 = vmatmul.bf16.gmra.mxu3 %v17069_v53 }
 0xb82   : > { %vm12097_vm9 = vcmp.gt.f32.partialorder %v12069_v36, 0.0  ;;  %v12125_v41 = vmul.f32 399.0, %v12069_v36 }
 0xb83   : > { %v11936_v18 = vpop.f32.mrf.mxu2  ;;  %v11780_v58 = vpop.f32.mrf.mxu0 }
 0xb84   : > { %v12015_v56 = vpop.f32.mrf.mxu3  ;;  %v12153_v43 = vsel %vm12097_vm9, %v12069_v36, %v12125_v41  ;;  %v11937_v32 = vadd.f32 %v11936_v18, %v11858_v14  ;;  %v11859_v6 = vpop.f32.mrf.mxu1 }
 0xb85   : > { %12181 = vst [vmem:[%s22516_s16 + $0x48] sm:$0xff] %v12153_v43  ;;  %v11860_v8 = vadd.f32 %v11859_v6, %v11780_v58 }
 0xb86   : > { %v12016_v35 = vadd.f32 %v12015_v56, %v11937_v32 }
 0xb88   : > { %v12070_v52 = vadd.f32 %v12016_v35, %v22379_v23 }
 0xb8a   : > { %vm12098_vm10 = vcmp.gt.f32.partialorder %v12070_v52, 0.0  ;;  %v12126_v37 = vmul.f32 399.0, %v12070_v52 }
 0xb8b   : > { %v11938_v10 = vpop.f32.mrf.mxu2  ;;  %v11783_v17 = vpop.f32.mrf.mxu0 }
 0xb8c   : > { %v12017_v22 = vpop.f32.mrf.mxu3  ;;  %v12154_v38 = vsel %vm12098_vm10, %v12070_v52, %v12126_v37  ;;  %v11939_v59 = vadd.f32 %v11938_v10, %v11860_v8  ;;  %v11862_v61 = vpop.f32.mrf.mxu1 }
 0xb8d   : > { %12182 = vst [vmem:[%s22516_s16 + $0x50] sm:$0xff] %v12154_v38  ;;  %v11863_v7 = vadd.f32 %v11862_v61, %v11783_v17 }
 0xb8e   : > { %v12018_v62 = vadd.f32 %v12017_v22, %v11939_v59 }
 0xb90   : > { %v12071_v24 = vadd.f32 %v12018_v62, %v22388_v55 }
 0xb92   : > { %vm12099_vm11 = vcmp.gt.f32.partialorder %v12071_v24, 0.0  ;;  %v12127_v9 = vmul.f32 399.0, %v12071_v24 }
 0xb93   : > { %v11941_v39 = vpop.f32.mrf.mxu2  ;;  %v11785_v4 = vpop.f32.mrf.mxu0 }
 0xb94   : > { %v12020_v15 = vpop.f32.mrf.mxu3  ;;  %v12155_v23 = vsel %vm12099_vm11, %v12071_v24, %v12127_v9  ;;  %v11942_v33 = vadd.f32 %v11941_v39, %v11863_v7  ;;  %v11864_v57 = vpop.f32.mrf.mxu1 }
 0xb95   : > { %12183 = vst [vmem:[%s22516_s16 + $0x58] sm:$0xff] %v12155_v23  ;;  %v11865_v60 = vadd.f32 %v11864_v57, %v11785_v4 }
 0xb96   : > { %v12021_v12 = vadd.f32 %v12020_v15, %v11942_v33 }
 0xb98   : > { %v12072_v44 = vadd.f32 %v12021_v12, %v22393_v0 }
 0xb9a   : > { %vm12100_vm12 = vcmp.gt.f32.partialorder %v12072_v44, 0.0  ;;  %v12128_v48 = vmul.f32 399.0, %v12072_v44 }
 0xb9b   : > { %v11943_v30 = vpop.f32.mrf.mxu2  ;;  %v11788_v21 = vpop.f32.mrf.mxu0 }
 0xb9c   : > { %v12022_v19 = vpop.f32.mrf.mxu3  ;;  %v12156_v55 = vsel %vm12100_vm12, %v12072_v44, %v12128_v48  ;;  %v11944_v46 = vadd.f32 %v11943_v30, %v11865_v60  ;;  %v11867_v31 = vpop.f32.mrf.mxu1 }
 0xb9d   : > { %12184 = vst [vmem:[%s22516_s16 + $0x60] sm:$0xff] %v12156_v55  ;;  %v11868_v20 = vadd.f32 %v11867_v31, %v11788_v21 }
 0xb9e   : > { %v12023_v40 = vadd.f32 %v12022_v19, %v11944_v46 }
 0xba0   : > { %v12073_v47 = vadd.f32 %v12023_v40, %v22402_v27 }
 0xba2   : > { %vm12101_vm13 = vcmp.gt.f32.partialorder %v12073_v47, 0.0  ;;  %v12129_v45 = vmul.f32 399.0, %v12073_v47 }
 0xba3   : > { %v11946_v5 = vpop.f32.mrf.mxu2  ;;  %v11790_v53 = vpop.f32.mrf.mxu0 }
 0xba4   : > { %v12025_v50 = vpop.f32.mrf.mxu3  ;;  %v12157_v0 = vsel %vm12101_vm13, %v12073_v47, %v12129_v45  ;;  %v11947_v1 = vadd.f32 %v11946_v5, %v11868_v20  ;;  %v11869_v49 = vpop.f32.mrf.mxu1 }
 0xba5   : > { %12185 = vst [vmem:[%s22516_s16 + $0x68] sm:$0xff] %v12157_v0  ;;  %v11870_v18 = vadd.f32 %v11869_v49, %v11790_v53 }
 0xba6   : > { %v12026_v36 = vadd.f32 %v12025_v50, %v11947_v1 }
 0xba8   : > { %v12074_v14 = vadd.f32 %v12026_v36, %v22407_v34 }
 0xbaa   : > { %vm12102_vm14 = vcmp.gt.f32.partialorder %v12074_v14, 0.0  ;;  %v12130_v41 = vmul.f32 399.0, %v12074_v14 }
 0xbab   : > { %v11948_v56 = vpop.f32.mrf.mxu2  ;;  %v11793_v58 = vpop.f32.mrf.mxu0 }
 0xbac   : > { %v12027_v43 = vpop.f32.mrf.mxu3  ;;  %v12158_v27 = vsel %vm12102_vm14, %v12074_v14, %v12130_v41  ;;  %v11949_v32 = vadd.f32 %v11948_v56, %v11870_v18  ;;  %v11872_v6 = vpop.f32.mrf.mxu1 }
 0xbad   : > { %12186 = vst [vmem:[%s22516_s16 + $0x70] sm:$0xff] %v12158_v27  ;;  %v11873_v37 = vadd.f32 %v11872_v6, %v11793_v58 }
 0xbae   : > { %v12028_v35 = vadd.f32 %v12027_v43, %v11949_v32 }
 0xbb0   : > { %v12075_v52 = vadd.f32 %v12028_v35, %v22416_v16 }
 0xbb2   : > { %vm12103_vm15 = vcmp.gt.f32.partialorder %v12075_v52, 0.0  ;;  %v12131_v8 = vmul.f32 399.0, %v12075_v52 }
 0xbb3   : > { %v11951_v10 = vpop.f32.mrf.mxu2  ;;  %v11795_v59 = vpop.f32.mrf.mxu0 }
 0xbb4   : > { %v12030_v22 = vpop.f32.mrf.mxu3  ;;  %v12159_v34 = vsel %vm12103_vm15, %v12075_v52, %v12131_v8  ;;  %v11952_v38 = vadd.f32 %v11951_v10, %v11873_v37  ;;  %v11874_v17 = vpop.f32.mrf.mxu1 }
 0xbb5   : > { %12187 = vst [vmem:[%s22516_s16 + $0x78] sm:$0xff] %v12159_v34  ;;  %v11875_v7 = vadd.f32 %v11874_v17, %v11795_v59 }
 0xbb6   : > { %v12031_v61 = vadd.f32 %v12030_v22, %v11952_v38 }
 0xbb8   : > { %v12076_v62 = vadd.f32 %v12031_v61, %v22421_v25 }
 0xbba   : > { %vm12104_vm0 = vcmp.gt.f32.partialorder %v12076_v62, 0.0  ;;  %v12132_v24 = vmul.f32 399.0, %v12076_v62 }
 0xbbb   : > { %v11953_v9 = vpop.f32.mrf.mxu2  ;;  %v11798_v23 = vpop.f32.mrf.mxu0 }
 0xbbc   : > { %v12032_v39 = vpop.f32.mrf.mxu3  ;;  %v12160_v16 = vsel %vm12104_vm0, %v12076_v62, %v12132_v24  ;;  %v11954_v15 = vadd.f32 %v11953_v9, %v11875_v7  ;;  %v11877_v33 = vpop.f32.mrf.mxu1 }
 0xbbd   : > { %12188 = vst [vmem:[%s22516_s16 + $0x80] sm:$0xff] %v12160_v16  ;;  %v11878_v12 = vadd.f32 %v11877_v33, %v11798_v23 }
 0xbbe   : > { %v12033_v4 = vadd.f32 %v12032_v39, %v11954_v15 }
 0xbc0   : > { %v12077_v57 = vadd.f32 %v12033_v4, %v22430_v42 }
 0xbc2   : > { %vm12105_vm1 = vcmp.gt.f32.partialorder %v12077_v57, 0.0  ;;  %v12133_v44 = vmul.f32 399.0, %v12077_v57 }
 0xbc3   : > { %v11956_v48 = vpop.f32.mrf.mxu2  ;;  %v11800_v19 = vpop.f32.mrf.mxu0 }
 0xbc4   : > { %v12035_v60 = vpop.f32.mrf.mxu3  ;;  %v12161_v25 = vsel %vm12105_vm1, %v12077_v57, %v12133_v44  ;;  %v11957_v30 = vadd.f32 %v11956_v48, %v11878_v12  ;;  %v11879_v55 = vpop.f32.mrf.mxu1 }
 0xbc5   : > { %12189 = vst [vmem:[%s22516_s16 + $0x88] sm:$0xff] %v12161_v25  ;;  %v11880_v40 = vadd.f32 %v11879_v55, %v11800_v19 }
 0xbc6   : > { %v12036_v46 = vadd.f32 %v12035_v60, %v11957_v30 }
 0xbc8   : > { %v12078_v21 = vadd.f32 %v12036_v46, %v22435_v2 }
 0xbca   : > { %vm12106_vm2 = vcmp.gt.f32.partialorder %v12078_v21, 0.0  ;;  %v12134_v31 = vmul.f32 399.0, %v12078_v21 }
 0xbcb   : > { %v11958_v47 = vpop.f32.mrf.mxu2  ;;  %v11803_v5 = vpop.f32.mrf.mxu0 }
 0xbcc   : > { %v12037_v20 = vpop.f32.mrf.mxu3  ;;  %v12162_v42 = vsel %vm12106_vm2, %v12078_v21, %v12134_v31  ;;  %v11959_v45 = vadd.f32 %v11958_v47, %v11880_v40  ;;  %v11882_v50 = vpop.f32.mrf.mxu1 }
 0xbcd   : > { %12190 = vst [vmem:[%s22516_s16 + $0x90] sm:$0xff] %v12162_v42  ;;  %v11883_v53 = vadd.f32 %v11882_v50, %v11803_v5 }
 0xbce   : > { %v12038_v0 = vadd.f32 %v12037_v20, %v11959_v45 }
 0xbd0   : > { %v12079_v1 = vadd.f32 %v12038_v0, %v22444_v63 }
 0xbd2   : > { %vm12107_vm3 = vcmp.gt.f32.partialorder %v12079_v1, 0.0  ;;  %v12135_v49 = vmul.f32 399.0, %v12079_v1 }
 0xbd3   : > { %v11961_v36 = vpop.f32.mrf.mxu2  ;;  %v11805_v18 = vpop.f32.mrf.mxu0 }
 0xbd4   : > { %v12040_v14 = vpop.f32.mrf.mxu3  ;;  %v12163_v2 = vsel %vm12107_vm3, %v12079_v1, %v12135_v49  ;;  %v11962_v41 = vadd.f32 %v11961_v36, %v11883_v53  ;;  %v11884_v56 = vpop.f32.mrf.mxu1 }
 0xbd5   : > { %12191 = vst [vmem:[%s22516_s16 + $0x98] sm:$0xff] %v12163_v2  ;;  %v11885_v58 = vadd.f32 %v11884_v56, %v11805_v18 }
 0xbd6   : > { %v12041_v43 = vadd.f32 %v12040_v14, %v11962_v41 }
 0xbd8   : > { %v12080_v27 = vadd.f32 %v12041_v43, %v22449_v29 }
 0xbda   : > { %vm12108_vm4 = vcmp.gt.f32.partialorder %v12080_v27, 0.0  ;;  %v12136_v32 = vmul.f32 399.0, %v12080_v27 }
 0xbdb   : > { %v11963_v6 = vpop.f32.mrf.mxu2  ;;  %v11808_v37 = vpop.f32.mrf.mxu0 }
 0xbdc   : > { %v12042_v35 = vpop.f32.mrf.mxu3  ;;  %v12164_v63 = vsel %vm12108_vm4, %v12080_v27, %v12136_v32  ;;  %v11964_v52 = vadd.f32 %v11963_v6, %v11885_v58  ;;  %v11887_v8 = vpop.f32.mrf.mxu1 }
 0xbdd   : > { %12192 = vst [vmem:[%s22516_s16 + $0xa0] sm:$0xff] %v12164_v63  ;;  %v11888_v34 = vadd.f32 %v11887_v8, %v11808_v37 }
 0xbde   : > { %v12043_v10 = vadd.f32 %v12042_v35, %v11964_v52 }
 0xbe0   : > { %v12081_v22 = vadd.f32 %v12043_v10, %v22458_v13 }
 0xbe2   : > { %vm12109_vm5 = vcmp.gt.f32.partialorder %v12081_v22, 0.0  ;;  %v12137_v38 = vmul.f32 399.0, %v12081_v22 }
 0xbe3   : > { %v11966_v59 = vpop.f32.mrf.mxu2  ;;  %v11810_v62 = vpop.f32.mrf.mxu0 }
 0xbe4   : > { %v12045_v17 = vpop.f32.mrf.mxu3  ;;  %v12165_v29 = vsel %vm12109_vm5, %v12081_v22, %v12137_v38  ;;  %v11967_v61 = vadd.f32 %v11966_v59, %v11888_v34  ;;  %v11889_v24 = vpop.f32.mrf.mxu1 }
 0xbe5   : > { %12193 = vst [vmem:[%s22516_s16 + $0xa8] sm:$0xff] %v12165_v29  ;;  %v11890_v16 = vadd.f32 %v11889_v24, %v11810_v62 }
 0xbe6   : > { %v12046_v7 = vadd.f32 %v12045_v17, %v11967_v61 }
 0xbe8   : > { %v12082_v9 = vadd.f32 %v12046_v7, %v22463_v26 }
 0xbea   : > { %vm12110_vm6 = vcmp.gt.f32.partialorder %v12082_v9, 0.0  ;;  %v12138_v39 = vmul.f32 399.0, %v12082_v9 }
 0xbeb   : > { %v11968_v15 = vpop.f32.mrf.mxu2  ;;  %v11813_v4 = vpop.f32.mrf.mxu0 }
 0xbec   : > { %v12047_v23 = vpop.f32.mrf.mxu3  ;;  %v12166_v13 = vsel %vm12110_vm6, %v12082_v9, %v12138_v39  ;;  %v11969_v33 = vadd.f32 %v11968_v15, %v11890_v16  ;;  %v11892_v57 = vpop.f32.mrf.mxu1 }
 0xbed   : > { %12194 = vst [vmem:[%s22516_s16 + $0xb0] sm:$0xff] %v12166_v13  ;;  %v11893_v48 = vadd.f32 %v11892_v57, %v11813_v4 }
 0xbee   : > { %v12048_v12 = vadd.f32 %v12047_v23, %v11969_v33 }
 0xbf0   : > { %v12083_v44 = vadd.f32 %v12048_v12, %v22472_v3 }
 0xbf2   : > { %vm12111_vm7 = vcmp.gt.f32.partialorder %v12083_v44, 0.0  ;;  %v12139_v60 = vmul.f32 399.0, %v12083_v44 }
 0xbf3   : > { %v11971_v25 = vpop.f32.mrf.mxu2  ;;  %v11815_v55 = vpop.f32.mrf.mxu0 }
 0xbf4   : > { %v12050_v26 = vpop.f32.mrf.mxu3  ;;  %v12167_v30 = vsel %vm12111_vm7, %v12083_v44, %v12139_v60  ;;  %v11972_v19 = vadd.f32 %v11971_v25, %v11893_v48  ;;  %v11894_v46 = vpop.f32.mrf.mxu1 }
 0xbf5   : > { %12195 = vst [vmem:[%s22516_s16 + $0xb8] sm:$0xff] %v12167_v30  ;;  %v11895_v47 = vadd.f32 %v11894_v46, %v11815_v55 }
 0xbf6   : > { %v12051_v21 = vadd.f32 %v12050_v26, %v11972_v19 }
 0xbf8   : > { %v12084_v31 = vadd.f32 %v12051_v21, %v22477_v54 }
 0xbfa   : > { %vm12112_vm8 = vcmp.gt.f32.partialorder %v12084_v31, 0.0  ;;  %v12140_v40 = vmul.f32 399.0, %v12084_v31 }
 0xbfb   : > { %v11973_v20 = vpop.f32.mrf.mxu2  ;;  %v11818_v5 = vpop.f32.mrf.mxu0 }
 0xbfc   : > { %v12052_v3 = vpop.f32.mrf.mxu3  ;;  %v12168_v42 = vsel %vm12112_vm8, %v12084_v31, %v12140_v40  ;;  %v11974_v45 = vadd.f32 %v11973_v20, %v11895_v47  ;;  %v11897_v50 = vpop.f32.mrf.mxu1 }
 0xbfd   : > { %12196 = vst [vmem:[%s22516_s16 + $0xc0] sm:$0xff] %v12168_v42  ;;  %v11898_v53 = vadd.f32 %v11897_v50, %v11818_v5 }
 0xbfe   : > { %v12053_v0 = vadd.f32 %v12052_v3, %v11974_v45 }
 0xc00   : > { %v12085_v1 = vadd.f32 %v12053_v0, %v22486_v51 }
 0xc02   : > { %vm12113_vm9 = vcmp.gt.f32.partialorder %v12085_v1, 0.0  ;;  %v12141_v49 = vmul.f32 399.0, %v12085_v1 }
 0xc03   : > { %v11976_v36 = vpop.f32.mrf.mxu2  ;;  %v11820_v18 = vpop.f32.mrf.mxu0 }
 0xc04   : > { %v12055_v54 = vpop.f32.mrf.mxu3  ;;  %v12169_v14 = vsel %vm12113_vm9, %v12085_v1, %v12141_v49  ;;  %v11977_v2 = vadd.f32 %v11976_v36, %v11898_v53  ;;  %v11899_v56 = vpop.f32.mrf.mxu1 }
 0xc05   : > { %12197 = vst [vmem:[%s22516_s16 + $0xc8] sm:$0xff] %v12169_v14  ;;  %v11900_v32 = vadd.f32 %v11899_v56, %v11820_v18 }
 0xc06   : > { %v12056_v41 = vadd.f32 %v12055_v54, %v11977_v2 }
 0xc08   : > { %v12086_v43 = vadd.f32 %v12056_v41, %v22491_v28 }
 0xc0a   : > { %vm12114_vm10 = vcmp.gt.f32.partialorder %v12086_v43, 0.0  ;;  %v12142_v27 = vmul.f32 399.0, %v12086_v43 }
 0xc0b   : > { %v11978_v58 = vpop.f32.mrf.mxu2 }
 0xc0c   : > { %v12170_v51 = vsel %vm12114_vm10, %v12086_v43, %v12142_v27  ;;  %v11979_v6 = vadd.f32 %v11978_v58, %v11900_v32  ;;  %v12057_v35 = vpop.f32.mrf.mxu3 }
 0xc0d   : > { %12198 = vst [vmem:[%s22516_s16 + $0xd0] sm:$0xff] %v12170_v51 }
 0xc0e   : > { %v12058_v63 = vadd.f32 %v12057_v35, %v11979_v6 }
 0xc10   : > { %v12087_v52 = vadd.f32 %v12058_v63, %v22501_v11 }
 0xc12   : > { %vm12115_vm11 = vcmp.gt.f32.partialorder %v12087_v52, 0.0  ;;  %v12143_v37 = vmul.f32 399.0, %v12087_v52 }
 0xc14   : > { %v12171_v8 = vsel %vm12115_vm11, %v12087_v52, %v12143_v37 }
 0xc15   : > { %12199 = vst [vmem:[%s22516_s16 + $0xd8] sm:$0xff] %v12171_v8 }
 0xc16 PF: > { %s12_s13 = sadd.s32 1, %s18314_s13   ;;  %s22913_s9 = smov %s18306_s11 }
 0xc17   : > { %p9_p7 = scmp.ge.s32.totalorder %s12_s13, 10   ;;  %s22914_s10 = smov %s18310_s12 }
 0xc18   : > { %s22915_s11 = smov %s22918_s14  ;;  %s22916_s12 = smov %s22922_s15 }
 0xc19   :  { %11 = sbr.rel (!%p9_p7) target bundleno = 3 (0x3), region = 70 }

</bundles_post_ra>
